<compile_context>
chip_gen: v7x
topology: tpu7x:2x2x1
jax: 0.10.0
libtpu: 0.0.40
codegen_flags: <defaults>
</compile_context>

<pallas_src>
import functools
import math

import jax
import jax.numpy as jnp
from jax import lax
from jax.experimental import pallas as pl
from jax.experimental.pallas import tpu as pltpu
from jax.scipy.linalg import solve_triangular

_DIAG_BIG = 1e30          # finite "infinity" to exclude self / already-picked entries
_VMEM_LIMIT = 32 * 1024 * 1024


# ---------------------------------------------------------------------------
# Fused per-layer kernel:
#   sqdist -> in-kernel top-k -> affinity -> normalize -> alpha-mix -> GCN
# ---------------------------------------------------------------------------

def _fused_block_layer_kernel(z_ref, adj_ref, x_ref, w_ref, out_ref, adj_out_ref,
                              *, alpha, k_neighbor, act, sym_w):
    n = adj_ref.shape[0]

    # ---- pairwise squared distances (MXU Gram trick, no tile transpose) ----
    z = z_ref[...]                                            # (N, d) norm_cov
    g = lax.dot_general(z, z, (((1,), (1,)), ((), ())),
                        preferred_element_type=jnp.float32)   # Z Z^T, (N, N)
    sq = jnp.sum(z * z, axis=1, keepdims=True)                # (N, 1)
    row = lax.broadcasted_iota(jnp.int32, (n, n), 0)
    col = lax.broadcasted_iota(jnp.int32, (n, n), 1)
    d2 = jnp.maximum(sq + sq.T - 2.0 * g, 0.0)
    d2 = jnp.where(row == col, _DIAG_BIG, d2)                 # exclude self

    # ---- in-kernel top-k (k is tiny -> static unroll; no HBM intermediates) --
    d2m = d2
    sel = jnp.zeros((n, n), jnp.float32)                      # selection mask
    sum_sqrt = jnp.float32(0.0)                               # sum of kNN distances
    for _ in range(k_neighbor):
        row_min = jnp.min(d2m, axis=1, keepdims=True)                       # (N, 1)
        is_min = d2m == row_min
        first = jnp.min(jnp.where(is_min, col, n), axis=1, keepdims=True)   # lowest index
        onehot = (col == first).astype(jnp.float32)                         # (N, N)
        sel = sel + onehot
        # sqrt only on selected entries (masked BIG entries multiply by 0)
        sum_sqrt = sum_sqrt + jnp.sum(onehot * jnp.sqrt(d2m))
        d2m = jnp.where(onehot > 0.0, _DIAG_BIG, d2m)

    sigma = sum_sqrt / (n * k_neighbor) + 1e-12               # mean kNN distance
    kvals = jnp.exp(-d2 / (2.0 * sigma * sigma))              # diag underflows to 0
    m = sel * kvals                                           # kNN affinity matrix

    # ---- symmetrize + D^{-1/2} M D^{-1/2} + alpha * adj ----
    m = 0.5 * (m + m.T)
    deg_r = jnp.sum(m, axis=1, keepdims=True)                 # (N, 1)
    deg_c = jnp.sum(m, axis=0, keepdims=True)                 # (1, N) == deg_r^T (sym)
    dinv_r = jnp.where(deg_r > 0.0, lax.rsqrt(jnp.maximum(deg_r, 1e-30)), 0.0)
    dinv_c = jnp.where(deg_c > 0.0, lax.rsqrt(jnp.maximum(deg_c, 1e-30)), 0.0)
    new_adj = alpha * adj_ref[...] + dinv_r * m * dinv_c

    # ---- GCN: act(new_adj @ (x @ W)); x@W stays in VMEM ----
    w = w_ref[...]
    if sym_w:                       # Block.weight2 symmetrization, fused in
        w = 0.5 * (w + w.T)
    xw = jnp.dot(x_ref[...], w, preferred_element_type=jnp.float32)
    r = jnp.dot(new_adj, xw, preferred_element_type=jnp.float32)
    if act == "tanh":
        r = jnp.tanh(r)

    out_ref[...] = r
    adj_out_ref[...] = new_adj


def pallas_block_layer(z, adj, x, w, *, alpha, k_neighbor, act, sym_w):
    n = adj.shape[0]
    d = z.shape[1]
    f_in = x.shape[1]
    f_out = w.shape[1]
    assert k_neighbor < n, "k_neighbor must be < number of nodes"
    kernel = functools.partial(_fused_block_layer_kernel, alpha=float(alpha),
                               k_neighbor=int(k_neighbor), act=act, sym_w=sym_w)
    return pl.pallas_call(
        kernel,
        out_shape=(jax.ShapeDtypeStruct((n, f_out), jnp.float32),
                   jax.ShapeDtypeStruct((n, n), jnp.float32)),
        grid=(1,),
        in_specs=[
            pl.BlockSpec((n, d), lambda i: (0, 0)),
            pl.BlockSpec((n, n), lambda i: (0, 0)),
            pl.BlockSpec((n, f_in), lambda i: (0, 0)),
            pl.BlockSpec((f_in, f_out), lambda i: (0, 0)),
        ],
        out_specs=(pl.BlockSpec((n, f_out), lambda i: (0, 0)),
                   pl.BlockSpec((n, n), lambda i: (0, 0))),
        compiler_params=pltpu.CompilerParams(
            dimension_semantics=("arbitrary",),
            vmem_limit_bytes=_VMEM_LIMIT),
    )(z.astype(jnp.float32), adj.astype(jnp.float32),
      x.astype(jnp.float32), w.astype(jnp.float32))


# ---------------------------------------------------------------------------
# Decoder kernel: tanh(x@W0+b0) @ W1 + b1, hidden kept in VMEM, single grid step
# ---------------------------------------------------------------------------

def _decoder_kernel(x_ref, w0_ref, b0_ref, w1_ref, b1_ref, o_ref):
    h = jnp.tanh(jnp.dot(x_ref[...], w0_ref[...],
                         preferred_element_type=jnp.float32) + b0_ref[...])
    o_ref[...] = jnp.dot(h, w1_ref[...],
                         preferred_element_type=jnp.float32) + b1_ref[...]


def pallas_decoder(x, w0, b0, w1, b1):
    n, h_in = x.shape
    h_mid = w0.shape[1]
    out_dim = w1.shape[1]
    b0 = b0.reshape(1, h_mid).astype(jnp.float32)
    b1 = b1.reshape(1, out_dim).astype(jnp.float32)
    return pl.pallas_call(
        _decoder_kernel,
        out_shape=jax.ShapeDtypeStruct((n, out_dim), jnp.float32),
        grid=(1,),   # single step: megacore split is pure overhead at this size
        in_specs=[
            pl.BlockSpec((n, h_in), lambda i: (0, 0)),
            pl.BlockSpec((h_in, h_mid), lambda i: (0, 0)),
            pl.BlockSpec((1, h_mid), lambda i: (0, 0)),
            pl.BlockSpec((h_mid, out_dim), lambda i: (0, 0)),
            pl.BlockSpec((1, out_dim), lambda i: (0, 0)),
        ],
        out_specs=pl.BlockSpec((n, out_dim), lambda i: (0, 0)),
        compiler_params=pltpu.CompilerParams(
            dimension_semantics=("arbitrary",),
            vmem_limit_bytes=_VMEM_LIMIT),
    )(x.astype(jnp.float32), w0.astype(jnp.float32), b0,
      w1.astype(jnp.float32), b1)


# ---------------------------------------------------------------------------
# GraphSTAR forward (glue in plain JAX, hot paths fused in Pallas)
# ---------------------------------------------------------------------------

def get_norm_cov(H, beta):
    """norm_cov = H @ inv(chol(beta*I + H^T H)).T  -- tiny dense linalg in XLA."""
    d = H.shape[1]
    sym = beta * jnp.eye(d, dtype=jnp.float32) + H.T @ H
    # TODO(synk): cholesky / triangular solve have no Pallas equivalent; these
    # are tiny (d x d) ops and fuse fine under XLA next to the gram matmul.
    L = jnp.linalg.cholesky(sym)
    return solve_triangular(L, H.T, lower=True).T


def block_forward(x, adj, W1, W2, alpha, beta, k_neighbor, is_end):
    z1 = get_norm_cov(x, beta)
    out, _ = pallas_block_layer(z1, adj, x, W1, alpha=alpha,
                                k_neighbor=k_neighbor, act="tanh", sym_w=False)

    z2 = get_norm_cov(out, beta)
    out2, new_adj2 = pallas_block_layer(z2, adj, out, W2, alpha=alpha,
                                        k_neighbor=k_neighbor,
                                        act=None if is_end else "tanh",
                                        sym_w=True)
    if is_end:
        return out2, new_adj2
    return out2


def graphstar_forward(params, x, adj, *, alpha, beta, k_neighbor):
    # Encoder: single Block (mid_feature_dims=[] -> block_num == 1, is_end=True)
    emb, new_adj = block_forward(x, adj, params["W1"], params["W2"],
                                 alpha, beta, k_neighbor, is_end=True)
    # Decoder: Linear(hidden, 512) + Tanh, Linear(512, input_dim) -- one kernel
    recon = pallas_decoder(emb, params["dec_W0"], params["dec_b0"],
                           params["dec_W1"], params["dec_b1"])
    return recon, emb, new_adj


# ---------------------------------------------------------------------------
# Deterministic parameter init (mirrors the PyTorch __init__ shapes)
# ---------------------------------------------------------------------------

def xavier_uniform(key, fan_in, fan_out):
    a = math.sqrt(6.0 / (fan_in + fan_out))
    return jax.random.uniform(key, (fan_in, fan_out), jnp.float32, -a, a)


def torch_linear_init(key, fan_in, fan_out):
    kW, kb = jax.random.split(key)
    bound = 1.0 / math.sqrt(fan_in)
    W = jax.random.uniform(kW, (fan_in, fan_out), jnp.float32, -bound, bound)
    b = jax.random.uniform(kb, (fan_out,), jnp.float32, -bound, bound)
    return W, b


if __name__ == "__main__":
    N, input_dim, hidden_dim = 64, 32, 16
    k_neighbor, alpha, beta = 4, 0.5, 1.0   # k_neighbor_list=[4], alpha_list=[0.5], beta_list=[1.0]

    key = jax.random.PRNGKey(0)
    kx, kadj, kw1, kw2, kd0, kd1 = jax.random.split(key, 6)

    x = jax.random.normal(kx, (N, input_dim), jnp.float32)
    r = jax.random.uniform(kadj, (N, N))
    A = jnp.where(r < 0.1, 1.0, 0.0)
    A = jnp.maximum(A, A.T) + jnp.eye(N)
    adj = (A / jnp.sum(A, axis=1, keepdims=True)).astype(jnp.float32)

    params = {
        "W1": xavier_uniform(kw1, input_dim, hidden_dim),   # Block.weight1
        "W2": xavier_uniform(kw2, hidden_dim, hidden_dim),  # Block.weight2
    }
    # Decoder with mid_feature_dims=[512] (GraphSTAR default when encoder mids are [])
    params["dec_W0"], params["dec_b0"] = torch_linear_init(kd0, hidden_dim, 512)
    params["dec_W1"], params["dec_b1"] = torch_linear_init(kd1, 512, input_dim)

    fwd = jax.jit(functools.partial(graphstar_forward, alpha=alpha, beta=beta,
                                    k_neighbor=k_neighbor))
    recon, emb, new_adj = fwd(params, x, adj)
    jax.block_until_ready((recon, emb, new_adj))

    assert recon.shape == (N, input_dim)
    assert emb.shape == (N, hidden_dim)
    assert new_adj.shape == (N, N)
    assert bool(jnp.all(jnp.isfinite(recon))) and bool(jnp.all(jnp.isfinite(emb)))
    assert bool(jnp.all(jnp.isfinite(new_adj)))
    print("KERNEL_OK")
</pallas_src>

<mosaic_0001>
module attributes {stable_mosaic.version = 11 : i64} {
  func.func @_fused_block_layer_kernel(%arg0: i32, %arg1: memref<64x32xf32, #tpu.memory_space<vmem>>, %arg2: memref<64x64xf32, #tpu.memory_space<vmem>>, %arg3: memref<64x32xf32, #tpu.memory_space<vmem>>, %arg4: memref<32x16xf32, #tpu.memory_space<vmem>>, %arg5: memref<64x16xf32, #tpu.memory_space<vmem>>, %arg6: memref<64x64xf32, #tpu.memory_space<vmem>>) attributes {dimension_semantics = [#tpu.dimension_semantics<arbitrary>], iteration_bounds = array<i64: 1>, scalar_prefetch = 0 : i64, scratch_operands = 0 : i64, tpu.core_type = #tpu.core_type<tc>, window_params = [{pipeline_mode = #tpu.pipeline_mode<synchronous>, transform_indices = @transform_0, window_bounds = array<i64: 64, 32>}, {pipeline_mode = #tpu.pipeline_mode<synchronous>, transform_indices = @transform_1, window_bounds = array<i64: 64, 64>}, {pipeline_mode = #tpu.pipeline_mode<synchronous>, transform_indices = @transform_2, window_bounds = array<i64: 64, 32>}, {pipeline_mode = #tpu.pipeline_mode<synchronous>, transform_indices = @transform_3, window_bounds = array<i64: 32, 16>}, {pipeline_mode = #tpu.pipeline_mode<synchronous>, transform_indices = @transform_4, window_bounds = array<i64: 64, 16>}, {pipeline_mode = #tpu.pipeline_mode<synchronous>, transform_indices = @transform_5, window_bounds = array<i64: 64, 64>}]} {
    %c0 = arith.constant 0 : index
    %c0_0 = arith.constant 0 : index
    %0 = vector.load %arg1[%c0, %c0_0] : memref<64x32xf32, #tpu.memory_space<vmem>>, vector<64x32xf32>
    %cst = arith.constant dense<0.000000e+00> : vector<64x64xf32>
    %1 = tpu.matmul %0, %0, %cst {dimension_numbers = #tpu.dot_dimension_numbers<[1], [1], [0], [0], [0, 0, 1, 0], [], []>} : vector<64x32xf32>, vector<64x32xf32>, vector<64x64xf32> -> vector<64x64xf32>
    %2 = arith.mulf %0, %0 : vector<64x32xf32>
    %cst_1 = arith.constant dense<0.000000e+00> : vector<64xf32>
    %3 = vector.multi_reduction <add>, %2, %cst_1 [1] : vector<64x32xf32> to vector<64xf32>
    %4 = vector.shape_cast %3 : vector<64xf32> to vector<64x1xf32>
    %5 = tpu.iota {dimensions = array<i32: 0>} : vector<64x64xi32>
    %6 = tpu.iota {dimensions = array<i32: 1>} : vector<64x64xi32>
    %7 = tpu.transpose %4, [1, 0] : vector<64x1xf32> -> vector<1x64xf32>
    %8 = vector.broadcast %4 : vector<64x1xf32> to vector<64x64xf32>
    %9 = vector.broadcast %7 : vector<1x64xf32> to vector<64x64xf32>
    %10 = arith.addf %8, %9 : vector<64x64xf32>
    %cst_2 = arith.constant 2.000000e+00 : f32
    %11 = vector.broadcast %cst_2 : f32 to vector<64x64xf32>
    %12 = arith.mulf %11, %1 : vector<64x64xf32>
    %13 = arith.subf %10, %12 : vector<64x64xf32>
    %cst_3 = arith.constant 0.000000e+00 : f32
    %14 = vector.broadcast %cst_3 : f32 to vector<64x64xf32>
    %15 = arith.maximumf %13, %14 : vector<64x64xf32>
    %16 = arith.cmpi eq, %5, %6 : vector<64x64xi32>
    %cst_4 = arith.constant 1.000000e+30 : f32
    %17 = vector.broadcast %cst_4 : f32 to vector<64x64xf32>
    %18 = arith.select %16, %17, %15 : vector<64x64xi1>, vector<64x64xf32>
    %cst_5 = arith.constant 0.000000e+00 : f32
    %19 = vector.broadcast %cst_5 : f32 to vector<64x64xf32>
    %cst_6 = arith.constant dense<0x7F800000> : vector<64xf32>
    %20 = vector.multi_reduction <minimumf>, %18, %cst_6 [1] : vector<64x64xf32> to vector<64xf32>
    %21 = vector.shape_cast %20 : vector<64xf32> to vector<64x1xf32>
    %22 = vector.broadcast %21 : vector<64x1xf32> to vector<64x64xf32>
    %23 = arith.cmpf oeq, %18, %22 : vector<64x64xf32>
    %c64_i32 = arith.constant 64 : i32
    %24 = vector.broadcast %c64_i32 : i32 to vector<64x64xi32>
    %25 = arith.select %23, %6, %24 : vector<64x64xi1>, vector<64x64xi32>
    %cst_7 = arith.constant dense<2147483647> : vector<64xi32>
    %26 = vector.multi_reduction <minsi>, %25, %cst_7 [1] : vector<64x64xi32> to vector<64xi32>
    %27 = vector.shape_cast %26 : vector<64xi32> to vector<64x1xi32>
    %28 = vector.broadcast %27 : vector<64x1xi32> to vector<64x64xi32>
    %29 = arith.cmpi eq, %6, %28 : vector<64x64xi32>
    %30 = arith.extui %29 : vector<64x64xi1> to vector<64x64xi32>
    %31 = arith.sitofp %30 : vector<64x64xi32> to vector<64x64xf32>
    %32 = arith.addf %19, %31 : vector<64x64xf32>
    %33 = math.sqrt %18 : vector<64x64xf32>
    %34 = arith.mulf %31, %33 : vector<64x64xf32>
    %35 = vector.shape_cast %34 : vector<64x64xf32> to vector<1x64x64xf32>
    %cst_8 = arith.constant dense<0.000000e+00> : vector<1xf32>
    %36 = vector.multi_reduction <add>, %35, %cst_8 [1, 2] : vector<1x64x64xf32> to vector<1xf32>
    %37 = vector.shape_cast %36 : vector<1xf32> to vector<1x1x1xf32>
    %38 = vector.extract %37[0, 0, 0] : f32 from vector<1x1x1xf32>
    %cst_9 = arith.constant 0.000000e+00 : f32
    %39 = arith.addf %cst_9, %38 : f32
    %cst_10 = arith.constant 0.000000e+00 : f32
    %40 = vector.broadcast %cst_10 : f32 to vector<64x64xf32>
    %41 = arith.cmpf ogt, %31, %40 : vector<64x64xf32>
    %cst_11 = arith.constant 1.000000e+30 : f32
    %42 = vector.broadcast %cst_11 : f32 to vector<64x64xf32>
    %43 = arith.select %41, %42, %18 : vector<64x64xi1>, vector<64x64xf32>
    %cst_12 = arith.constant dense<0x7F800000> : vector<64xf32>
    %44 = vector.multi_reduction <minimumf>, %43, %cst_12 [1] : vector<64x64xf32> to vector<64xf32>
    %45 = vector.shape_cast %44 : vector<64xf32> to vector<64x1xf32>
    %46 = vector.broadcast %45 : vector<64x1xf32> to vector<64x64xf32>
    %47 = arith.cmpf oeq, %43, %46 : vector<64x64xf32>
    %c64_i32_13 = arith.constant 64 : i32
    %48 = vector.broadcast %c64_i32_13 : i32 to vector<64x64xi32>
    %49 = arith.select %47, %6, %48 : vector<64x64xi1>, vector<64x64xi32>
    %cst_14 = arith.constant dense<2147483647> : vector<64xi32>
    %50 = vector.multi_reduction <minsi>, %49, %cst_14 [1] : vector<64x64xi32> to vector<64xi32>
    %51 = vector.shape_cast %50 : vector<64xi32> to vector<64x1xi32>
    %52 = vector.broadcast %51 : vector<64x1xi32> to vector<64x64xi32>
    %53 = arith.cmpi eq, %6, %52 : vector<64x64xi32>
    %54 = arith.extui %53 : vector<64x64xi1> to vector<64x64xi32>
    %55 = arith.sitofp %54 : vector<64x64xi32> to vector<64x64xf32>
    %56 = arith.addf %32, %55 : vector<64x64xf32>
    %57 = math.sqrt %43 : vector<64x64xf32>
    %58 = arith.mulf %55, %57 : vector<64x64xf32>
    %59 = vector.shape_cast %58 : vector<64x64xf32> to vector<1x64x64xf32>
    %cst_15 = arith.constant dense<0.000000e+00> : vector<1xf32>
    %60 = vector.multi_reduction <add>, %59, %cst_15 [1, 2] : vector<1x64x64xf32> to vector<1xf32>
    %61 = vector.shape_cast %60 : vector<1xf32> to vector<1x1x1xf32>
    %62 = vector.extract %61[0, 0, 0] : f32 from vector<1x1x1xf32>
    %63 = arith.addf %39, %62 : f32
    %cst_16 = arith.constant 0.000000e+00 : f32
    %64 = vector.broadcast %cst_16 : f32 to vector<64x64xf32>
    %65 = arith.cmpf ogt, %55, %64 : vector<64x64xf32>
    %cst_17 = arith.constant 1.000000e+30 : f32
    %66 = vector.broadcast %cst_17 : f32 to vector<64x64xf32>
    %67 = arith.select %65, %66, %43 : vector<64x64xi1>, vector<64x64xf32>
    %cst_18 = arith.constant dense<0x7F800000> : vector<64xf32>
    %68 = vector.multi_reduction <minimumf>, %67, %cst_18 [1] : vector<64x64xf32> to vector<64xf32>
    %69 = vector.shape_cast %68 : vector<64xf32> to vector<64x1xf32>
    %70 = vector.broadcast %69 : vector<64x1xf32> to vector<64x64xf32>
    %71 = arith.cmpf oeq, %67, %70 : vector<64x64xf32>
    %c64_i32_19 = arith.constant 64 : i32
    %72 = vector.broadcast %c64_i32_19 : i32 to vector<64x64xi32>
    %73 = arith.select %71, %6, %72 : vector<64x64xi1>, vector<64x64xi32>
    %cst_20 = arith.constant dense<2147483647> : vector<64xi32>
    %74 = vector.multi_reduction <minsi>, %73, %cst_20 [1] : vector<64x64xi32> to vector<64xi32>
    %75 = vector.shape_cast %74 : vector<64xi32> to vector<64x1xi32>
    %76 = vector.broadcast %75 : vector<64x1xi32> to vector<64x64xi32>
    %77 = arith.cmpi eq, %6, %76 : vector<64x64xi32>
    %78 = arith.extui %77 : vector<64x64xi1> to vector<64x64xi32>
    %79 = arith.sitofp %78 : vector<64x64xi32> to vector<64x64xf32>
    %80 = arith.addf %56, %79 : vector<64x64xf32>
    %81 = math.sqrt %67 : vector<64x64xf32>
    %82 = arith.mulf %79, %81 : vector<64x64xf32>
    %83 = vector.shape_cast %82 : vector<64x64xf32> to vector<1x64x64xf32>
    %cst_21 = arith.constant dense<0.000000e+00> : vector<1xf32>
    %84 = vector.multi_reduction <add>, %83, %cst_21 [1, 2] : vector<1x64x64xf32> to vector<1xf32>
    %85 = vector.shape_cast %84 : vector<1xf32> to vector<1x1x1xf32>
    %86 = vector.extract %85[0, 0, 0] : f32 from vector<1x1x1xf32>
    %87 = arith.addf %63, %86 : f32
    %cst_22 = arith.constant 0.000000e+00 : f32
    %88 = vector.broadcast %cst_22 : f32 to vector<64x64xf32>
    %89 = arith.cmpf ogt, %79, %88 : vector<64x64xf32>
    %cst_23 = arith.constant 1.000000e+30 : f32
    %90 = vector.broadcast %cst_23 : f32 to vector<64x64xf32>
    %91 = arith.select %89, %90, %67 : vector<64x64xi1>, vector<64x64xf32>
    %cst_24 = arith.constant dense<0x7F800000> : vector<64xf32>
    %92 = vector.multi_reduction <minimumf>, %91, %cst_24 [1] : vector<64x64xf32> to vector<64xf32>
    %93 = vector.shape_cast %92 : vector<64xf32> to vector<64x1xf32>
    %94 = vector.broadcast %93 : vector<64x1xf32> to vector<64x64xf32>
    %95 = arith.cmpf oeq, %91, %94 : vector<64x64xf32>
    %c64_i32_25 = arith.constant 64 : i32
    %96 = vector.broadcast %c64_i32_25 : i32 to vector<64x64xi32>
    %97 = arith.select %95, %6, %96 : vector<64x64xi1>, vector<64x64xi32>
    %cst_26 = arith.constant dense<2147483647> : vector<64xi32>
    %98 = vector.multi_reduction <minsi>, %97, %cst_26 [1] : vector<64x64xi32> to vector<64xi32>
    %99 = vector.shape_cast %98 : vector<64xi32> to vector<64x1xi32>
    %100 = vector.broadcast %99 : vector<64x1xi32> to vector<64x64xi32>
    %101 = arith.cmpi eq, %6, %100 : vector<64x64xi32>
    %102 = arith.extui %101 : vector<64x64xi1> to vector<64x64xi32>
    %103 = arith.sitofp %102 : vector<64x64xi32> to vector<64x64xf32>
    %104 = arith.addf %80, %103 : vector<64x64xf32>
    %105 = math.sqrt %91 : vector<64x64xf32>
    %106 = arith.mulf %103, %105 : vector<64x64xf32>
    %107 = vector.shape_cast %106 : vector<64x64xf32> to vector<1x64x64xf32>
    %cst_27 = arith.constant dense<0.000000e+00> : vector<1xf32>
    %108 = vector.multi_reduction <add>, %107, %cst_27 [1, 2] : vector<1x64x64xf32> to vector<1xf32>
    %109 = vector.shape_cast %108 : vector<1xf32> to vector<1x1x1xf32>
    %110 = vector.extract %109[0, 0, 0] : f32 from vector<1x1x1xf32>
    %111 = arith.addf %87, %110 : f32
    %cst_28 = arith.constant 2.560000e+02 : f32
    %112 = arith.divf %111, %cst_28 : f32
    %cst_29 = arith.constant 9.99999996E-13 : f32
    %113 = arith.addf %112, %cst_29 : f32
    %cst_30 = arith.constant 0.000000e+00 : f32
    %114 = vector.broadcast %cst_30 : f32 to vector<64x64xf32>
    %115 = arith.subf %114, %18 : vector<64x64xf32>
    %cst_31 = arith.constant 2.000000e+00 : f32
    %116 = arith.mulf %cst_31, %113 : f32
    %117 = arith.mulf %116, %113 : f32
    %118 = vector.broadcast %117 : f32 to vector<64x64xf32>
    %119 = arith.divf %115, %118 : vector<64x64xf32>
    %120 = math.exp %119 : vector<64x64xf32>
    %121 = arith.mulf %104, %120 : vector<64x64xf32>
    %122 = tpu.transpose %121, [1, 0] : vector<64x64xf32> -> vector<64x64xf32>
    %123 = arith.addf %121, %122 : vector<64x64xf32>
    %cst_32 = arith.constant 5.000000e-01 : f32
    %124 = vector.broadcast %cst_32 : f32 to vector<64x64xf32>
    %125 = arith.mulf %124, %123 : vector<64x64xf32>
    %cst_33 = arith.constant dense<0.000000e+00> : vector<64xf32>
    %126 = vector.multi_reduction <add>, %125, %cst_33 [1] : vector<64x64xf32> to vector<64xf32>
    %127 = vector.shape_cast %126 : vector<64xf32> to vector<64x1xf32>
    %cst_34 = arith.constant dense<0.000000e+00> : vector<64xf32>
    %128 = vector.multi_reduction <add>, %125, %cst_34 [0] : vector<64x64xf32> to vector<64xf32>
    %129 = vector.shape_cast %128 : vector<64xf32> to vector<1x64xf32>
    %cst_35 = arith.constant 0.000000e+00 : f32
    %130 = vector.broadcast %cst_35 : f32 to vector<64x1xf32>
    %131 = arith.cmpf ogt, %127, %130 : vector<64x1xf32>
    %cst_36 = arith.constant 1.000000e-30 : f32
    %132 = vector.broadcast %cst_36 : f32 to vector<64x1xf32>
    %133 = arith.maximumf %127, %132 : vector<64x1xf32>
    %134 = math.rsqrt %133 : vector<64x1xf32>
    %cst_37 = arith.constant 0.000000e+00 : f32
    %135 = vector.broadcast %cst_37 : f32 to vector<64x1xf32>
    %136 = arith.select %131, %134, %135 : vector<64x1xi1>, vector<64x1xf32>
    %cst_38 = arith.constant 0.000000e+00 : f32
    %137 = vector.broadcast %cst_38 : f32 to vector<1x64xf32>
    %138 = arith.cmpf ogt, %129, %137 : vector<1x64xf32>
    %cst_39 = arith.constant 1.000000e-30 : f32
    %139 = vector.broadcast %cst_39 : f32 to vector<1x64xf32>
    %140 = arith.maximumf %129, %139 : vector<1x64xf32>
    %141 = math.rsqrt %140 : vector<1x64xf32>
    %cst_40 = arith.constant 0.000000e+00 : f32
    %142 = vector.broadcast %cst_40 : f32 to vector<1x64xf32>
    %143 = arith.select %138, %141, %142 : vector<1x64xi1>, vector<1x64xf32>
    %c0_41 = arith.constant 0 : index
    %c0_42 = arith.constant 0 : index
    %144 = vector.load %arg2[%c0_41, %c0_42] : memref<64x64xf32, #tpu.memory_space<vmem>>, vector<64x64xf32>
    %cst_43 = arith.constant 5.000000e-01 : f32
    %145 = vector.broadcast %cst_43 : f32 to vector<64x64xf32>
    %146 = arith.mulf %145, %144 : vector<64x64xf32>
    %147 = vector.broadcast %136 : vector<64x1xf32> to vector<64x64xf32>
    %148 = arith.mulf %147, %125 : vector<64x64xf32>
    %149 = vector.broadcast %143 : vector<1x64xf32> to vector<64x64xf32>
    %150 = arith.mulf %148, %149 : vector<64x64xf32>
    %151 = arith.addf %146, %150 : vector<64x64xf32>
    %c0_44 = arith.constant 0 : index
    %c0_45 = arith.constant 0 : index
    %152 = vector.load %arg4[%c0_44, %c0_45] : memref<32x16xf32, #tpu.memory_space<vmem>>, vector<32x16xf32>
    %c0_46 = arith.constant 0 : index
    %c0_47 = arith.constant 0 : index
    %153 = vector.load %arg3[%c0_46, %c0_47] : memref<64x32xf32, #tpu.memory_space<vmem>>, vector<64x32xf32>
    %cst_48 = arith.constant dense<0.000000e+00> : vector<64x16xf32>
    %154 = tpu.matmul %153, %152, %cst_48 {dimension_numbers = #tpu.dot_dimension_numbers<[1], [0], [0], [1], [0, 0, 1, 1], [], []>} : vector<64x32xf32>, vector<32x16xf32>, vector<64x16xf32> -> vector<64x16xf32>
    %cst_49 = arith.constant dense<0.000000e+00> : vector<64x16xf32>
    %155 = tpu.matmul %151, %154, %cst_49 {dimension_numbers = #tpu.dot_dimension_numbers<[1], [0], [0], [1], [0, 0, 1, 1], [], []>} : vector<64x64xf32>, vector<64x16xf32>, vector<64x16xf32> -> vector<64x16xf32>
    %156 = math.tanh %155 : vector<64x16xf32>
    %c0_50 = arith.constant 0 : index
    %c0_51 = arith.constant 0 : index
    %157 = vector.load %arg5[%c0_50, %c0_51] : memref<64x16xf32, #tpu.memory_space<vmem>>, vector<64x16xf32>
    tpu.vector_store %arg5[%c0_50, %c0_51], %156 {strides = array<i32>} : memref<64x16xf32, #tpu.memory_space<vmem>>, vector<64x16xf32>,
    %c0_52 = arith.constant 0 : index
    %c0_53 = arith.constant 0 : index
    %158 = vector.load %arg6[%c0_52, %c0_53] : memref<64x64xf32, #tpu.memory_space<vmem>>, vector<64x64xf32>
    tpu.vector_store %arg6[%c0_52, %c0_53], %151 {strides = array<i32>} : memref<64x64xf32, #tpu.memory_space<vmem>>, vector<64x64xf32>,
    return
  }
  func.func @transform_0(%arg0: i32) -> (i32, i32) {
    %c0_i32 = arith.constant 0 : i32
    %c0_i32_0 = arith.constant 0 : i32
    %c0_i32_1 = arith.constant 0 : i32
    return %c0_i32, %c0_i32_0 : i32, i32
  }
  func.func @transform_1(%arg0: i32) -> (i32, i32) {
    %c0_i32 = arith.constant 0 : i32
    %c0_i32_0 = arith.constant 0 : i32
    %c0_i32_1 = arith.constant 0 : i32
    return %c0_i32, %c0_i32_0 : i32, i32
  }
  func.func @transform_2(%arg0: i32) -> (i32, i32) {
    %c0_i32 = arith.constant 0 : i32
    %c0_i32_0 = arith.constant 0 : i32
    %c0_i32_1 = arith.constant 0 : i32
    return %c0_i32, %c0_i32_0 : i32, i32
  }
  func.func @transform_3(%arg0: i32) -> (i32, i32) {
    %c0_i32 = arith.constant 0 : i32
    %c0_i32_0 = arith.constant 0 : i32
    %c0_i32_1 = arith.constant 0 : i32
    return %c0_i32, %c0_i32_0 : i32, i32
  }
  func.func @transform_4(%arg0: i32) -> (i32, i32) {
    %c0_i32 = arith.constant 0 : i32
    %c0_i32_0 = arith.constant 0 : i32
    %c0_i32_1 = arith.constant 0 : i32
    return %c0_i32, %c0_i32_0 : i32, i32
  }
  func.func @transform_5(%arg0: i32) -> (i32, i32) {
    %c0_i32 = arith.constant 0 : i32
    %c0_i32_0 = arith.constant 0 : i32
    %c0_i32_1 = arith.constant 0 : i32
    return %c0_i32, %c0_i32_0 : i32, i32
  }
}

module attributes {stable_mosaic.version = 11 : i64} {
  func.func @_fused_block_layer_kernel(%arg0: i32, %arg1: memref<64x16xf32, #tpu.memory_space<vmem>>, %arg2: memref<64x64xf32, #tpu.memory_space<vmem>>, %arg3: memref<64x16xf32, #tpu.memory_space<vmem>>, %arg4: memref<16x16xf32, #tpu.memory_space<vmem>>, %arg5: memref<64x16xf32, #tpu.memory_space<vmem>>, %arg6: memref<64x64xf32, #tpu.memory_space<vmem>>) attributes {dimension_semantics = [#tpu.dimension_semantics<arbitrary>], iteration_bounds = array<i64: 1>, scalar_prefetch = 0 : i64, scratch_operands = 0 : i64, tpu.core_type = #tpu.core_type<tc>, window_params = [{pipeline_mode = #tpu.pipeline_mode<synchronous>, transform_indices = @transform_0, window_bounds = array<i64: 64, 16>}, {pipeline_mode = #tpu.pipeline_mode<synchronous>, transform_indices = @transform_1, window_bounds = array<i64: 64, 64>}, {pipeline_mode = #tpu.pipeline_mode<synchronous>, transform_indices = @transform_2, window_bounds = array<i64: 64, 16>}, {pipeline_mode = #tpu.pipeline_mode<synchronous>, transform_indices = @transform_3, window_bounds = array<i64: 16, 16>}, {pipeline_mode = #tpu.pipeline_mode<synchronous>, transform_indices = @transform_4, window_bounds = array<i64: 64, 16>}, {pipeline_mode = #tpu.pipeline_mode<synchronous>, transform_indices = @transform_5, window_bounds = array<i64: 64, 64>}]} {
    %c0 = arith.constant 0 : index
    %c0_0 = arith.constant 0 : index
    %0 = vector.load %arg1[%c0, %c0_0] : memref<64x16xf32, #tpu.memory_space<vmem>>, vector<64x16xf32>
    %cst = arith.constant dense<0.000000e+00> : vector<64x64xf32>
    %1 = tpu.matmul %0, %0, %cst {dimension_numbers = #tpu.dot_dimension_numbers<[1], [1], [0], [0], [0, 0, 1, 0], [], []>} : vector<64x16xf32>, vector<64x16xf32>, vector<64x64xf32> -> vector<64x64xf32>
    %2 = arith.mulf %0, %0 : vector<64x16xf32>
    %cst_1 = arith.constant dense<0.000000e+00> : vector<64xf32>
    %3 = vector.multi_reduction <add>, %2, %cst_1 [1] : vector<64x16xf32> to vector<64xf32>
    %4 = vector.shape_cast %3 : vector<64xf32> to vector<64x1xf32>
    %5 = tpu.iota {dimensions = array<i32: 0>} : vector<64x64xi32>
    %6 = tpu.iota {dimensions = array<i32: 1>} : vector<64x64xi32>
    %7 = tpu.transpose %4, [1, 0] : vector<64x1xf32> -> vector<1x64xf32>
    %8 = vector.broadcast %4 : vector<64x1xf32> to vector<64x64xf32>
    %9 = vector.broadcast %7 : vector<1x64xf32> to vector<64x64xf32>
    %10 = arith.addf %8, %9 : vector<64x64xf32>
    %cst_2 = arith.constant 2.000000e+00 : f32
    %11 = vector.broadcast %cst_2 : f32 to vector<64x64xf32>
    %12 = arith.mulf %11, %1 : vector<64x64xf32>
    %13 = arith.subf %10, %12 : vector<64x64xf32>
    %cst_3 = arith.constant 0.000000e+00 : f32
    %14 = vector.broadcast %cst_3 : f32 to vector<64x64xf32>
    %15 = arith.maximumf %13, %14 : vector<64x64xf32>
    %16 = arith.cmpi eq, %5, %6 : vector<64x64xi32>
    %cst_4 = arith.constant 1.000000e+30 : f32
    %17 = vector.broadcast %cst_4 : f32 to vector<64x64xf32>
    %18 = arith.select %16, %17, %15 : vector<64x64xi1>, vector<64x64xf32>
    %cst_5 = arith.constant 0.000000e+00 : f32
    %19 = vector.broadcast %cst_5 : f32 to vector<64x64xf32>
    %cst_6 = arith.constant dense<0x7F800000> : vector<64xf32>
    %20 = vector.multi_reduction <minimumf>, %18, %cst_6 [1] : vector<64x64xf32> to vector<64xf32>
    %21 = vector.shape_cast %20 : vector<64xf32> to vector<64x1xf32>
    %22 = vector.broadcast %21 : vector<64x1xf32> to vector<64x64xf32>
    %23 = arith.cmpf oeq, %18, %22 : vector<64x64xf32>
    %c64_i32 = arith.constant 64 : i32
    %24 = vector.broadcast %c64_i32 : i32 to vector<64x64xi32>
    %25 = arith.select %23, %6, %24 : vector<64x64xi1>, vector<64x64xi32>
    %cst_7 = arith.constant dense<2147483647> : vector<64xi32>
    %26 = vector.multi_reduction <minsi>, %25, %cst_7 [1] : vector<64x64xi32> to vector<64xi32>
    %27 = vector.shape_cast %26 : vector<64xi32> to vector<64x1xi32>
    %28 = vector.broadcast %27 : vector<64x1xi32> to vector<64x64xi32>
    %29 = arith.cmpi eq, %6, %28 : vector<64x64xi32>
    %30 = arith.extui %29 : vector<64x64xi1> to vector<64x64xi32>
    %31 = arith.sitofp %30 : vector<64x64xi32> to vector<64x64xf32>
    %32 = arith.addf %19, %31 : vector<64x64xf32>
    %33 = math.sqrt %18 : vector<64x64xf32>
    %34 = arith.mulf %31, %33 : vector<64x64xf32>
    %35 = vector.shape_cast %34 : vector<64x64xf32> to vector<1x64x64xf32>
    %cst_8 = arith.constant dense<0.000000e+00> : vector<1xf32>
    %36 = vector.multi_reduction <add>, %35, %cst_8 [1, 2] : vector<1x64x64xf32> to vector<1xf32>
    %37 = vector.shape_cast %36 : vector<1xf32> to vector<1x1x1xf32>
    %38 = vector.extract %37[0, 0, 0] : f32 from vector<1x1x1xf32>
    %cst_9 = arith.constant 0.000000e+00 : f32
    %39 = arith.addf %cst_9, %38 : f32
    %cst_10 = arith.constant 0.000000e+00 : f32
    %40 = vector.broadcast %cst_10 : f32 to vector<64x64xf32>
    %41 = arith.cmpf ogt, %31, %40 : vector<64x64xf32>
    %cst_11 = arith.constant 1.000000e+30 : f32
    %42 = vector.broadcast %cst_11 : f32 to vector<64x64xf32>
    %43 = arith.select %41, %42, %18 : vector<64x64xi1>, vector<64x64xf32>
    %cst_12 = arith.constant dense<0x7F800000> : vector<64xf32>
    %44 = vector.multi_reduction <minimumf>, %43, %cst_12 [1] : vector<64x64xf32> to vector<64xf32>
    %45 = vector.shape_cast %44 : vector<64xf32> to vector<64x1xf32>
    %46 = vector.broadcast %45 : vector<64x1xf32> to vector<64x64xf32>
    %47 = arith.cmpf oeq, %43, %46 : vector<64x64xf32>
    %c64_i32_13 = arith.constant 64 : i32
    %48 = vector.broadcast %c64_i32_13 : i32 to vector<64x64xi32>
    %49 = arith.select %47, %6, %48 : vector<64x64xi1>, vector<64x64xi32>
    %cst_14 = arith.constant dense<2147483647> : vector<64xi32>
    %50 = vector.multi_reduction <minsi>, %49, %cst_14 [1] : vector<64x64xi32> to vector<64xi32>
    %51 = vector.shape_cast %50 : vector<64xi32> to vector<64x1xi32>
    %52 = vector.broadcast %51 : vector<64x1xi32> to vector<64x64xi32>
    %53 = arith.cmpi eq, %6, %52 : vector<64x64xi32>
    %54 = arith.extui %53 : vector<64x64xi1> to vector<64x64xi32>
    %55 = arith.sitofp %54 : vector<64x64xi32> to vector<64x64xf32>
    %56 = arith.addf %32, %55 : vector<64x64xf32>
    %57 = math.sqrt %43 : vector<64x64xf32>
    %58 = arith.mulf %55, %57 : vector<64x64xf32>
    %59 = vector.shape_cast %58 : vector<64x64xf32> to vector<1x64x64xf32>
    %cst_15 = arith.constant dense<0.000000e+00> : vector<1xf32>
    %60 = vector.multi_reduction <add>, %59, %cst_15 [1, 2] : vector<1x64x64xf32> to vector<1xf32>
    %61 = vector.shape_cast %60 : vector<1xf32> to vector<1x1x1xf32>
    %62 = vector.extract %61[0, 0, 0] : f32 from vector<1x1x1xf32>
    %63 = arith.addf %39, %62 : f32
    %cst_16 = arith.constant 0.000000e+00 : f32
    %64 = vector.broadcast %cst_16 : f32 to vector<64x64xf32>
    %65 = arith.cmpf ogt, %55, %64 : vector<64x64xf32>
    %cst_17 = arith.constant 1.000000e+30 : f32
    %66 = vector.broadcast %cst_17 : f32 to vector<64x64xf32>
    %67 = arith.select %65, %66, %43 : vector<64x64xi1>, vector<64x64xf32>
    %cst_18 = arith.constant dense<0x7F800000> : vector<64xf32>
    %68 = vector.multi_reduction <minimumf>, %67, %cst_18 [1] : vector<64x64xf32> to vector<64xf32>
    %69 = vector.shape_cast %68 : vector<64xf32> to vector<64x1xf32>
    %70 = vector.broadcast %69 : vector<64x1xf32> to vector<64x64xf32>
    %71 = arith.cmpf oeq, %67, %70 : vector<64x64xf32>
    %c64_i32_19 = arith.constant 64 : i32
    %72 = vector.broadcast %c64_i32_19 : i32 to vector<64x64xi32>
    %73 = arith.select %71, %6, %72 : vector<64x64xi1>, vector<64x64xi32>
    %cst_20 = arith.constant dense<2147483647> : vector<64xi32>
    %74 = vector.multi_reduction <minsi>, %73, %cst_20 [1] : vector<64x64xi32> to vector<64xi32>
    %75 = vector.shape_cast %74 : vector<64xi32> to vector<64x1xi32>
    %76 = vector.broadcast %75 : vector<64x1xi32> to vector<64x64xi32>
    %77 = arith.cmpi eq, %6, %76 : vector<64x64xi32>
    %78 = arith.extui %77 : vector<64x64xi1> to vector<64x64xi32>
    %79 = arith.sitofp %78 : vector<64x64xi32> to vector<64x64xf32>
    %80 = arith.addf %56, %79 : vector<64x64xf32>
    %81 = math.sqrt %67 : vector<64x64xf32>
    %82 = arith.mulf %79, %81 : vector<64x64xf32>
    %83 = vector.shape_cast %82 : vector<64x64xf32> to vector<1x64x64xf32>
    %cst_21 = arith.constant dense<0.000000e+00> : vector<1xf32>
    %84 = vector.multi_reduction <add>, %83, %cst_21 [1, 2] : vector<1x64x64xf32> to vector<1xf32>
    %85 = vector.shape_cast %84 : vector<1xf32> to vector<1x1x1xf32>
    %86 = vector.extract %85[0, 0, 0] : f32 from vector<1x1x1xf32>
    %87 = arith.addf %63, %86 : f32
    %cst_22 = arith.constant 0.000000e+00 : f32
    %88 = vector.broadcast %cst_22 : f32 to vector<64x64xf32>
    %89 = arith.cmpf ogt, %79, %88 : vector<64x64xf32>
    %cst_23 = arith.constant 1.000000e+30 : f32
    %90 = vector.broadcast %cst_23 : f32 to vector<64x64xf32>
    %91 = arith.select %89, %90, %67 : vector<64x64xi1>, vector<64x64xf32>
    %cst_24 = arith.constant dense<0x7F800000> : vector<64xf32>
    %92 = vector.multi_reduction <minimumf>, %91, %cst_24 [1] : vector<64x64xf32> to vector<64xf32>
    %93 = vector.shape_cast %92 : vector<64xf32> to vector<64x1xf32>
    %94 = vector.broadcast %93 : vector<64x1xf32> to vector<64x64xf32>
    %95 = arith.cmpf oeq, %91, %94 : vector<64x64xf32>
    %c64_i32_25 = arith.constant 64 : i32
    %96 = vector.broadcast %c64_i32_25 : i32 to vector<64x64xi32>
    %97 = arith.select %95, %6, %96 : vector<64x64xi1>, vector<64x64xi32>
    %cst_26 = arith.constant dense<2147483647> : vector<64xi32>
    %98 = vector.multi_reduction <minsi>, %97, %cst_26 [1] : vector<64x64xi32> to vector<64xi32>
    %99 = vector.shape_cast %98 : vector<64xi32> to vector<64x1xi32>
    %100 = vector.broadcast %99 : vector<64x1xi32> to vector<64x64xi32>
    %101 = arith.cmpi eq, %6, %100 : vector<64x64xi32>
    %102 = arith.extui %101 : vector<64x64xi1> to vector<64x64xi32>
    %103 = arith.sitofp %102 : vector<64x64xi32> to vector<64x64xf32>
    %104 = arith.addf %80, %103 : vector<64x64xf32>
    %105 = math.sqrt %91 : vector<64x64xf32>
    %106 = arith.mulf %103, %105 : vector<64x64xf32>
    %107 = vector.shape_cast %106 : vector<64x64xf32> to vector<1x64x64xf32>
    %cst_27 = arith.constant dense<0.000000e+00> : vector<1xf32>
    %108 = vector.multi_reduction <add>, %107, %cst_27 [1, 2] : vector<1x64x64xf32> to vector<1xf32>
    %109 = vector.shape_cast %108 : vector<1xf32> to vector<1x1x1xf32>
    %110 = vector.extract %109[0, 0, 0] : f32 from vector<1x1x1xf32>
    %111 = arith.addf %87, %110 : f32
    %cst_28 = arith.constant 2.560000e+02 : f32
    %112 = arith.divf %111, %cst_28 : f32
    %cst_29 = arith.constant 9.99999996E-13 : f32
    %113 = arith.addf %112, %cst_29 : f32
    %cst_30 = arith.constant 0.000000e+00 : f32
    %114 = vector.broadcast %cst_30 : f32 to vector<64x64xf32>
    %115 = arith.subf %114, %18 : vector<64x64xf32>
    %cst_31 = arith.constant 2.000000e+00 : f32
    %116 = arith.mulf %cst_31, %113 : f32
    %117 = arith.mulf %116, %113 : f32
    %118 = vector.broadcast %117 : f32 to vector<64x64xf32>
    %119 = arith.divf %115, %118 : vector<64x64xf32>
    %120 = math.exp %119 : vector<64x64xf32>
    %121 = arith.mulf %104, %120 : vector<64x64xf32>
    %122 = tpu.transpose %121, [1, 0] : vector<64x64xf32> -> vector<64x64xf32>
    %123 = arith.addf %121, %122 : vector<64x64xf32>
    %cst_32 = arith.constant 5.000000e-01 : f32
    %124 = vector.broadcast %cst_32 : f32 to vector<64x64xf32>
    %125 = arith.mulf %124, %123 : vector<64x64xf32>
    %cst_33 = arith.constant dense<0.000000e+00> : vector<64xf32>
    %126 = vector.multi_reduction <add>, %125, %cst_33 [1] : vector<64x64xf32> to vector<64xf32>
    %127 = vector.shape_cast %126 : vector<64xf32> to vector<64x1xf32>
    %cst_34 = arith.constant dense<0.000000e+00> : vector<64xf32>
    %128 = vector.multi_reduction <add>, %125, %cst_34 [0] : vector<64x64xf32> to vector<64xf32>
    %129 = vector.shape_cast %128 : vector<64xf32> to vector<1x64xf32>
    %cst_35 = arith.constant 0.000000e+00 : f32
    %130 = vector.broadcast %cst_35 : f32 to vector<64x1xf32>
    %131 = arith.cmpf ogt, %127, %130 : vector<64x1xf32>
    %cst_36 = arith.constant 1.000000e-30 : f32
    %132 = vector.broadcast %cst_36 : f32 to vector<64x1xf32>
    %133 = arith.maximumf %127, %132 : vector<64x1xf32>
    %134 = math.rsqrt %133 : vector<64x1xf32>
    %cst_37 = arith.constant 0.000000e+00 : f32
    %135 = vector.broadcast %cst_37 : f32 to vector<64x1xf32>
    %136 = arith.select %131, %134, %135 : vector<64x1xi1>, vector<64x1xf32>
    %cst_38 = arith.constant 0.000000e+00 : f32
    %137 = vector.broadcast %cst_38 : f32 to vector<1x64xf32>
    %138 = arith.cmpf ogt, %129, %137 : vector<1x64xf32>
    %cst_39 = arith.constant 1.000000e-30 : f32
    %139 = vector.broadcast %cst_39 : f32 to vector<1x64xf32>
    %140 = arith.maximumf %129, %139 : vector<1x64xf32>
    %141 = math.rsqrt %140 : vector<1x64xf32>
    %cst_40 = arith.constant 0.000000e+00 : f32
    %142 = vector.broadcast %cst_40 : f32 to vector<1x64xf32>
    %143 = arith.select %138, %141, %142 : vector<1x64xi1>, vector<1x64xf32>
    %c0_41 = arith.constant 0 : index
    %c0_42 = arith.constant 0 : index
    %144 = vector.load %arg2[%c0_41, %c0_42] : memref<64x64xf32, #tpu.memory_space<vmem>>, vector<64x64xf32>
    %cst_43 = arith.constant 5.000000e-01 : f32
    %145 = vector.broadcast %cst_43 : f32 to vector<64x64xf32>
    %146 = arith.mulf %145, %144 : vector<64x64xf32>
    %147 = vector.broadcast %136 : vector<64x1xf32> to vector<64x64xf32>
    %148 = arith.mulf %147, %125 : vector<64x64xf32>
    %149 = vector.broadcast %143 : vector<1x64xf32> to vector<64x64xf32>
    %150 = arith.mulf %148, %149 : vector<64x64xf32>
    %151 = arith.addf %146, %150 : vector<64x64xf32>
    %c0_44 = arith.constant 0 : index
    %c0_45 = arith.constant 0 : index
    %152 = vector.load %arg4[%c0_44, %c0_45] : memref<16x16xf32, #tpu.memory_space<vmem>>, vector<16x16xf32>
    %153 = tpu.transpose %152, [1, 0] : vector<16x16xf32> -> vector<16x16xf32>
    %154 = arith.addf %152, %153 : vector<16x16xf32>
    %cst_46 = arith.constant 5.000000e-01 : f32
    %155 = vector.broadcast %cst_46 : f32 to vector<16x16xf32>
    %156 = arith.mulf %155, %154 : vector<16x16xf32>
    %c0_47 = arith.constant 0 : index
    %c0_48 = arith.constant 0 : index
    %157 = vector.load %arg3[%c0_47, %c0_48] : memref<64x16xf32, #tpu.memory_space<vmem>>, vector<64x16xf32>
    %cst_49 = arith.constant dense<0.000000e+00> : vector<64x16xf32>
    %158 = tpu.matmul %157, %156, %cst_49 {dimension_numbers = #tpu.dot_dimension_numbers<[1], [0], [0], [1], [0, 0, 1, 1], [], []>} : vector<64x16xf32>, vector<16x16xf32>, vector<64x16xf32> -> vector<64x16xf32>
    %cst_50 = arith.constant dense<0.000000e+00> : vector<64x16xf32>
    %159 = tpu.matmul %151, %158, %cst_50 {dimension_numbers = #tpu.dot_dimension_numbers<[1], [0], [0], [1], [0, 0, 1, 1], [], []>} : vector<64x64xf32>, vector<64x16xf32>, vector<64x16xf32> -> vector<64x16xf32>
    %c0_51 = arith.constant 0 : index
    %c0_52 = arith.constant 0 : index
    %160 = vector.load %arg5[%c0_51, %c0_52] : memref<64x16xf32, #tpu.memory_space<vmem>>, vector<64x16xf32>
    tpu.vector_store %arg5[%c0_51, %c0_52], %159 {strides = array<i32>} : memref<64x16xf32, #tpu.memory_space<vmem>>, vector<64x16xf32>,
    %c0_53 = arith.constant 0 : index
    %c0_54 = arith.constant 0 : index
    %161 = vector.load %arg6[%c0_53, %c0_54] : memref<64x64xf32, #tpu.memory_space<vmem>>, vector<64x64xf32>
    tpu.vector_store %arg6[%c0_53, %c0_54], %151 {strides = array<i32>} : memref<64x64xf32, #tpu.memory_space<vmem>>, vector<64x64xf32>,
    return
  }
  func.func @transform_0(%arg0: i32) -> (i32, i32) {
    %c0_i32 = arith.constant 0 : i32
    %c0_i32_0 = arith.constant 0 : i32
    %c0_i32_1 = arith.constant 0 : i32
    return %c0_i32, %c0_i32_0 : i32, i32
  }
  func.func @transform_1(%arg0: i32) -> (i32, i32) {
    %c0_i32 = arith.constant 0 : i32
    %c0_i32_0 = arith.constant 0 : i32
    %c0_i32_1 = arith.constant 0 : i32
    return %c0_i32, %c0_i32_0 : i32, i32
  }
  func.func @transform_2(%arg0: i32) -> (i32, i32) {
    %c0_i32 = arith.constant 0 : i32
    %c0_i32_0 = arith.constant 0 : i32
    %c0_i32_1 = arith.constant 0 : i32
    return %c0_i32, %c0_i32_0 : i32, i32
  }
  func.func @transform_3(%arg0: i32) -> (i32, i32) {
    %c0_i32 = arith.constant 0 : i32
    %c0_i32_0 = arith.constant 0 : i32
    %c0_i32_1 = arith.constant 0 : i32
    return %c0_i32, %c0_i32_0 : i32, i32
  }
  func.func @transform_4(%arg0: i32) -> (i32, i32) {
    %c0_i32 = arith.constant 0 : i32
    %c0_i32_0 = arith.constant 0 : i32
    %c0_i32_1 = arith.constant 0 : i32
    return %c0_i32, %c0_i32_0 : i32, i32
  }
  func.func @transform_5(%arg0: i32) -> (i32, i32) {
    %c0_i32 = arith.constant 0 : i32
    %c0_i32_0 = arith.constant 0 : i32
    %c0_i32_1 = arith.constant 0 : i32
    return %c0_i32, %c0_i32_0 : i32, i32
  }
}

module attributes {stable_mosaic.version = 11 : i64} {
  func.func @_decoder_kernel(%arg0: i32, %arg1: memref<64x16xf32, #tpu.memory_space<vmem>>, %arg2: memref<16x512xf32, #tpu.memory_space<vmem>>, %arg3: memref<1x512xf32, #tpu.memory_space<vmem>>, %arg4: memref<512x32xf32, #tpu.memory_space<vmem>>, %arg5: memref<1x32xf32, #tpu.memory_space<vmem>>, %arg6: memref<64x32xf32, #tpu.memory_space<vmem>>) attributes {dimension_semantics = [#tpu.dimension_semantics<arbitrary>], iteration_bounds = array<i64: 1>, scalar_prefetch = 0 : i64, scratch_operands = 0 : i64, tpu.core_type = #tpu.core_type<tc>, window_params = [{pipeline_mode = #tpu.pipeline_mode<synchronous>, transform_indices = @transform_0, window_bounds = array<i64: 64, 16>}, {pipeline_mode = #tpu.pipeline_mode<synchronous>, transform_indices = @transform_1, window_bounds = array<i64: 16, 512>}, {pipeline_mode = #tpu.pipeline_mode<synchronous>, transform_indices = @transform_2, window_bounds = array<i64: 1, 512>}, {pipeline_mode = #tpu.pipeline_mode<synchronous>, transform_indices = @transform_3, window_bounds = array<i64: 512, 32>}, {pipeline_mode = #tpu.pipeline_mode<synchronous>, transform_indices = @transform_4, window_bounds = array<i64: 1, 32>}, {pipeline_mode = #tpu.pipeline_mode<synchronous>, transform_indices = @transform_5, window_bounds = array<i64: 64, 32>}]} {
    %c0 = arith.constant 0 : index
    %c0_0 = arith.constant 0 : index
    %0 = vector.load %arg1[%c0, %c0_0] : memref<64x16xf32, #tpu.memory_space<vmem>>, vector<64x16xf32>
    %c0_1 = arith.constant 0 : index
    %c0_2 = arith.constant 0 : index
    %1 = vector.load %arg2[%c0_1, %c0_2] : memref<16x512xf32, #tpu.memory_space<vmem>>, vector<16x512xf32>
    %cst = arith.constant dense<0.000000e+00> : vector<64x512xf32>
    %2 = tpu.matmul %0, %1, %cst {dimension_numbers = #tpu.dot_dimension_numbers<[1], [0], [0], [1], [0, 0, 1, 1], [], []>} : vector<64x16xf32>, vector<16x512xf32>, vector<64x512xf32> -> vector<64x512xf32>
    %c0_3 = arith.constant 0 : index
    %c0_4 = arith.constant 0 : index
    %3 = vector.load %arg3[%c0_3, %c0_4] : memref<1x512xf32, #tpu.memory_space<vmem>>, vector<1x512xf32>
    %4 = vector.broadcast %3 : vector<1x512xf32> to vector<64x512xf32>
    %5 = arith.addf %2, %4 : vector<64x512xf32>
    %6 = math.tanh %5 : vector<64x512xf32>
    %c0_5 = arith.constant 0 : index
    %c0_6 = arith.constant 0 : index
    %7 = vector.load %arg4[%c0_5, %c0_6] : memref<512x32xf32, #tpu.memory_space<vmem>>, vector<512x32xf32>
    %cst_7 = arith.constant dense<0.000000e+00> : vector<64x32xf32>
    %8 = tpu.matmul %6, %7, %cst_7 {dimension_numbers = #tpu.dot_dimension_numbers<[1], [0], [0], [1], [0, 0, 1, 1], [], []>} : vector<64x512xf32>, vector<512x32xf32>, vector<64x32xf32> -> vector<64x32xf32>
    %c0_8 = arith.constant 0 : index
    %c0_9 = arith.constant 0 : index
    %9 = vector.load %arg5[%c0_8, %c0_9] : memref<1x32xf32, #tpu.memory_space<vmem>>, vector<1x32xf32>
    %10 = vector.broadcast %9 : vector<1x32xf32> to vector<64x32xf32>
    %11 = arith.addf %8, %10 : vector<64x32xf32>
    %c0_10 = arith.constant 0 : index
    %c0_11 = arith.constant 0 : index
    %12 = vector.load %arg6[%c0_10, %c0_11] : memref<64x32xf32, #tpu.memory_space<vmem>>, vector<64x32xf32>
    tpu.vector_store %arg6[%c0_10, %c0_11], %11 {strides = array<i32>} : memref<64x32xf32, #tpu.memory_space<vmem>>, vector<64x32xf32>,
    return
  }
  func.func @transform_0(%arg0: i32) -> (i32, i32) {
    %c0_i32 = arith.constant 0 : i32
    %c0_i32_0 = arith.constant 0 : i32
    %c0_i32_1 = arith.constant 0 : i32
    return %c0_i32, %c0_i32_0 : i32, i32
  }
  func.func @transform_1(%arg0: i32) -> (i32, i32) {
    %c0_i32 = arith.constant 0 : i32
    %c0_i32_0 = arith.constant 0 : i32
    %c0_i32_1 = arith.constant 0 : i32
    return %c0_i32, %c0_i32_0 : i32, i32
  }
  func.func @transform_2(%arg0: i32) -> (i32, i32) {
    %c0_i32 = arith.constant 0 : i32
    %c0_i32_0 = arith.constant 0 : i32
    %c0_i32_1 = arith.constant 0 : i32
    return %c0_i32, %c0_i32_0 : i32, i32
  }
  func.func @transform_3(%arg0: i32) -> (i32, i32) {
    %c0_i32 = arith.constant 0 : i32
    %c0_i32_0 = arith.constant 0 : i32
    %c0_i32_1 = arith.constant 0 : i32
    return %c0_i32, %c0_i32_0 : i32, i32
  }
  func.func @transform_4(%arg0: i32) -> (i32, i32) {
    %c0_i32 = arith.constant 0 : i32
    %c0_i32_0 = arith.constant 0 : i32
    %c0_i32_1 = arith.constant 0 : i32
    return %c0_i32, %c0_i32_0 : i32, i32
  }
  func.func @transform_5(%arg0: i32) -> (i32, i32) {
    %c0_i32 = arith.constant 0 : i32
    %c0_i32_0 = arith.constant 0 : i32
    %c0_i32_1 = arith.constant 0 : i32
    return %c0_i32, %c0_i32_0 : i32, i32
  }
}

</mosaic_0001>

<bundles_post_ra>
// kernel: custom-call.8
= control target key start
LH: loop header
LB: loop body
LE: loop exit
PB: predicated region body
PF: predicated region fallthrough
CT: control target
= control target key end

     0   :  { %v1561_v0 = vmov 0.0   ;;  %vm53_vm0 = vcmask 7168   ;;  %vm110_vm1 = vcmask 15368   ;;  %vm127_vm2 = vcmask 1047553   ;;  %s1900_s0 = inlined_call_operand.vmem [shape: f32[32,32], index: 0, kind: input, shape index: {}]   ;;  %s1901_s1 = inlined_call_operand.vmem [shape: f32[32,32], index: 1, kind: output, shape index: {}]  }
   0x1   :  { %46 = vst [vmem:[#allocation1] sm:$0xff] %v1561_v0  ;;  %v1575_v4 = vld [vmem:[%s1900_s0] sm:$0xff]  ;;  %v1581_v5 = vld [vmem:[%s1900_s0 + $0x8] sm:$0xff]  ;;  %v1601_v22 = vld [vmem:[%s1900_s0 + $0x10] sm:$0xff]  ;;  %vm171_vm4 = vcmask 23568   ;;  %vm188_vm5 = vcmask 1047554  }
   0x2   :  { %36 = vst [vmem:[#allocation0] sm:$0xff] %v1575_v4  ;;  %38 = vst [vmem:[#allocation0 + $0x8] sm:$0xff] %v1581_v5  ;;  %v1626_v46 = vld [vmem:[%s1900_s0 + $0x18] sm:$0xff]  ;;  %vm232_vm7 = vcmask 31768   ;;  %vm249_vm8 = vcmask 1047555   ;;  %vm293_vm10 = vcmask 39968  }
   0x3   :  { %40 = vst [vmem:[#allocation0 + $0x10] sm:$0xff] %v1601_v22  ;;  %vm128_vm3 = vmand %vm110_vm1, %vm127_vm2  ;;  %vm310_vm11 = vcmask 1047556   ;;  %vm354_vm13 = vcmask 48168   ;;  %vm371_vm14 = vcmask 1047557  }
   0x4   :  { %42 = vst [vmem:[#allocation0 + $0x18] sm:$0xff] %v1626_v46  ;;  %vm189_vm6 = vmand %vm171_vm4, %vm188_vm5 }
   0x5   :  { %vm250_vm9 = vmand %vm232_vm7, %vm249_vm8 }
   0x6   :  { %vm311_vm12 = vmand %vm293_vm10, %vm310_vm11 }
   0x7   :  { %vm372_vm15 = vmand %vm354_vm13, %vm371_vm14 }
   0x8   :  { %v54_v1 = vld [vmem:[#allocation1] ss:$0 sm:$0xff] }
   0x9   :  { %v56_v2 = vmul.f32 %v54_v1, %v54_v1  ;;  %v75_v3 = vmul.f32 0.0, %v54_v1  ;;  %v55_v6 = vld [vmem:[#allocation0] ss:$0 sm:$0xff]  ;;  %v114_v23 = vld [vmem:[#allocation0 + $0x1] ss:$0 sm:$0xff] }
   0xa   :  { %v175_v47 = vld [vmem:[#allocation0 + $0x2] ss:$0 sm:$0xff] }
   0xb   :  { %57 = vadd.xlane.f32.xlu0 %v56_v2  ;;  %76 = vadd.xlane.f32.xlu1 %v75_v3 }
   0xf   :  { %64 = vadd.xlane.f32.xlu0 %v75_v3 }
  0x98   :  { %v58_v7 = vpop.xlane.xlu0 %57  ;;  %v77_v13 = vpop.xlane.xlu1 %76 }
  0x99   :  { %v59_v8 = vsub.f32 %v55_v6, %v58_v7  ;;  %v78_v15 = vsub.f32 %v1581_v5, %v77_v13 }
  0x9b   :  { %1496 = vrsqrt.f32 %v59_v8 }
  0x9c   :  { %v65_v9 = vpop.xlane.xlu0 %64 }
  0x9d   :  { %v66_v10 = vsub.f32 %v1575_v4, %v65_v9 }
  0xa5   :  { %v1585_v11 = vpop.eup %1496 }
  0xa6   :  { %v67_v12 = vmul.f32 %v1585_v11, %v66_v10  ;;  %v79_v16 = vmul.f32 %v1585_v11, %v78_v15 }
  0xa8   :  { %v68_v14 = vsel %vm53_vm0, %v67_v12, 0.0  ;;  %v80_v17 = vsel %vm53_vm0, %v79_v16, 0.0 }
  0xa9   :  { %70 = vst [vmem:[#allocation1] sm:$0xff] %v68_v14 }
  0xb0   :  { %v1592_v18 = vld [vmem:[#allocation1 + $0x1] ss:$0 sm:$0xff] }
  0xb1   :  { %v122_v19 = vmul.f32 %v1592_v18, %v68_v14  ;;  %v115_v20 = vmul.f32 %v1592_v18, %v1592_v18  ;;  %v136_v21 = vmul.f32 %v1592_v18, %v80_v17 }
  0xb3   :  { %123 = vadd.xlane.f32.xlu0 %v122_v19  ;;  %116 = vadd.xlane.f32.xlu1 %v115_v20 }
  0xb7   :  { %137 = vadd.xlane.f32.xlu0 %v136_v21  ;;  %89 = vadd.xlane.f32.xlu1 %v75_v3 }
 0x140   :  { %v117_v24 = vpop.xlane.xlu1 %116  ;;  %v124_v26 = vpop.xlane.xlu0 %123 }
 0x141   :  { %v118_v25 = vsub.f32 %v114_v23, %v117_v24  ;;  %v125_v27 = vsub.f32 %v1575_v4, %v124_v26 }
 0x143   :  { %1498 = vrsqrt.f32 %v118_v25 }
 0x144   :  { %v90_v29 = vpop.xlane.xlu1 %89  ;;  %v138_v35 = vpop.xlane.xlu0 %137 }
 0x145   :  { %v91_v32 = vsub.f32 %v1601_v22, %v90_v29  ;;  %v139_v36 = vsub.f32 %v1581_v5, %v138_v35 }
 0x147   :  { %v92_v34 = vmul.f32 %v1585_v11, %v91_v32 }
 0x149   :  { %v93_v37 = vsel %vm53_vm0, %v92_v34, 0.0 }
 0x14a   :  { %v149_v43 = vmul.f32 %v1592_v18, %v93_v37 }
 0x14d   :  { %v1605_v28 = vpop.eup %1498 }
 0x14e   :  { %v126_v30 = vmul.f32 %v1605_v28, %v125_v27  ;;  %v140_v38 = vmul.f32 %v1605_v28, %v139_v36 }
 0x150   :  { %v129_v31 = vsel %vm128_vm3, %v126_v30, 0.0  ;;  %v141_v42 = vsel %vm110_vm1, %v140_v38, 0.0 }
 0x151   :  { %v130_v33 = vadd.f32 %v129_v31, %v68_v14  ;;  %v142_v44 = vadd.f32 %v141_v42, %v80_v17  ;;  %v236_v14 = vld [vmem:[#allocation0 + $0x3] ss:$0 sm:$0xff] }
 0x153   :  { %131 = vst [vmem:[#allocation1] sm:$0xff] %v130_v33 }
 0x15a   :  { %v1615_v39 = vld [vmem:[#allocation1 + $0x2] ss:$0 sm:$0xff] }
 0x15b   :  { %v183_v40 = vmul.f32 %v1615_v39, %v130_v33  ;;  %v176_v41 = vmul.f32 %v1615_v39, %v1615_v39  ;;  %v197_v45 = vmul.f32 %v1615_v39, %v142_v44 }
 0x15d   :  { %184 = vadd.xlane.f32.xlu0 %v183_v40  ;;  %177 = vadd.xlane.f32.xlu1 %v176_v41 }
 0x161   :  { %102 = vadd.xlane.f32.xlu1 %v75_v3  ;;  %150 = vadd.xlane.f32.xlu0 %v149_v43 }
 0x165   :  { %198 = vadd.xlane.f32.xlu1 %v197_v45 }
 0x1ea   :  { %v178_v48 = vpop.xlane.xlu1 %177  ;;  %v185_v50 = vpop.xlane.xlu0 %184 }
 0x1eb   :  { %v179_v49 = vsub.f32 %v175_v47, %v178_v48  ;;  %v186_v51 = vsub.f32 %v1575_v4, %v185_v50  ;;  %v297_v47 = vld [vmem:[#allocation0 + $0x4] ss:$0 sm:$0xff] }
 0x1ed   :  { %1500 = vrsqrt.f32 %v179_v49 }
 0x1ee   :  { %v151_v53 = vpop.xlane.xlu0 %150  ;;  %v103_v54 = vpop.xlane.xlu1 %102 }
 0x1ef   :  { %v152_v56 = vsub.f32 %v1601_v22, %v151_v53  ;;  %v104_v57 = vsub.f32 %v1626_v46, %v103_v54 }
 0x1f1   :  { %v153_v60 = vmul.f32 %v1605_v28, %v152_v56  ;;  %v105_v61 = vmul.f32 %v1585_v11, %v104_v57 }
 0x1f2   :  { %v199_v62 = vpop.xlane.xlu1 %198 }
 0x1f3   :  { %v154_v63 = vsel %vm110_vm1, %v153_v60, 0.0  ;;  %v106_v0 = vsel %vm53_vm0, %v105_v61, 0.0  ;;  %v200_v1 = vsub.f32 %v1581_v5, %v199_v62  ;;  %vm415_vm0 = vcmask 56368  }
 0x1f4   :  { %v155_v6 = vadd.f32 %v154_v63, %v93_v37  ;;  %v162_v11 = vmul.f32 %v1592_v18, %v106_v0 }
 0x1f6   :  { %v210_v10 = vmul.f32 %v1615_v39, %v155_v6 }
 0x1f7   :  { %v1630_v52 = vpop.eup %1500 }
 0x1f8   :  { %v187_v55 = vmul.f32 %v1630_v52, %v186_v51  ;;  %v201_v2 = vmul.f32 %v1630_v52, %v200_v1 }
 0x1fa   :  { %v190_v58 = vsel %vm189_vm6, %v187_v55, 0.0  ;;  %v202_v9 = vsel %vm171_vm4, %v201_v2, 0.0  ;;  %vm537_vm6 = vcmask 72768  }
 0x1fb   :  { %v191_v59 = vadd.f32 %v190_v58, %v130_v33  ;;  %v203_v12 = vadd.f32 %v202_v9, %v142_v44 }
 0x1fd   :  { %192 = vst [vmem:[#allocation1] sm:$0xff] %v191_v59 }
 0x204   :  { %v1643_v3 = vld [vmem:[#allocation1 + $0x3] ss:$0 sm:$0xff] }
 0x205   :  { %v244_v7 = vmul.f32 %v1643_v3, %v191_v59  ;;  %v237_v8 = vmul.f32 %v1643_v3, %v1643_v3  ;;  %v258_v13 = vmul.f32 %v1643_v3, %v203_v12 }
 0x207   :  { %245 = vadd.xlane.f32.xlu1 %v244_v7  ;;  %238 = vadd.xlane.f32.xlu0 %v237_v8 }
 0x20b   :  { %211 = vadd.xlane.f32.xlu1 %v210_v10  ;;  %163 = vadd.xlane.f32.xlu0 %v162_v11 }
 0x20f   :  { %259 = vadd.xlane.f32.xlu0 %v258_v13 }
 0x294   :  { %v239_v15 = vpop.xlane.xlu0 %238  ;;  %v246_v17 = vpop.xlane.xlu1 %245 }
 0x295   :  { %v240_v16 = vsub.f32 %v236_v14, %v239_v15  ;;  %v247_v19 = vsub.f32 %v1575_v4, %v246_v17  ;;  %v358_v15 = vld [vmem:[#allocation0 + $0x5] ss:$0 sm:$0xff] }
 0x297   :  { %1502 = vrsqrt.f32 %v240_v16 }
 0x298   :  { %v164_v18 = vpop.xlane.xlu0 %163  ;;  %v212_v21 = vpop.xlane.xlu1 %211 }
 0x299   :  { %v165_v25 = vsub.f32 %v1626_v46, %v164_v18  ;;  %v213_v26 = vsub.f32 %v1601_v22, %v212_v21 }
 0x29b   :  { %v166_v29 = vmul.f32 %v1605_v28, %v165_v25  ;;  %v214_v30 = vmul.f32 %v1630_v52, %v213_v26 }
 0x29c   :  { %v260_v31 = vpop.xlane.xlu0 %259 }
 0x29d   :  { %v167_v32 = vsel %vm110_vm1, %v166_v29, 0.0  ;;  %v215_v33 = vsel %vm171_vm4, %v214_v30, 0.0  ;;  %v261_v34 = vsub.f32 %v1581_v5, %v260_v31  ;;  %vm432_vm1 = vcmask 1047558  }
 0x29e   :  { %v168_v37 = vadd.f32 %v167_v32, %v106_v0  ;;  %v216_v38 = vadd.f32 %v215_v33, %v155_v6  ;;  %vm433_vm3 = vmand %vm415_vm0, %vm432_vm1 }
 0x2a0   :  { %v223_v42 = vmul.f32 %v1615_v39, %v168_v37  ;;  %v271_v43 = vmul.f32 %v1643_v3, %v216_v38 }
 0x2a1   :  { %v1653_v20 = vpop.eup %1502 }
 0x2a2   :  { %v248_v23 = vmul.f32 %v1653_v20, %v247_v19  ;;  %v262_v35 = vmul.f32 %v1653_v20, %v261_v34 }
 0x2a4   :  { %v251_v24 = vsel %vm250_vm9, %v248_v23, 0.0  ;;  %v263_v41 = vsel %vm232_vm7, %v262_v35, 0.0 }
 0x2a5   :  { %v252_v27 = vadd.f32 %v251_v24, %v191_v59  ;;  %v264_v44 = vadd.f32 %v263_v41, %v203_v12 }
 0x2a7   :  { %253 = vst [vmem:[#allocation1] sm:$0xff] %v252_v27 }
 0x2ae   :  { %v1666_v36 = vld [vmem:[#allocation1 + $0x4] ss:$0 sm:$0xff] }
 0x2af   :  { %v305_v40 = vmul.f32 %v1666_v36, %v252_v27  ;;  %v298_v28 = vmul.f32 %v1666_v36, %v1666_v36  ;;  %v319_v45 = vmul.f32 %v1666_v36, %v264_v44 }
 0x2b1   :  { %306 = vadd.xlane.f32.xlu0 %v305_v40  ;;  %299 = vadd.xlane.f32.xlu1 %v298_v28 }
 0x2b5   :  { %224 = vadd.xlane.f32.xlu1 %v223_v42  ;;  %272 = vadd.xlane.f32.xlu0 %v271_v43 }
 0x2b9   :  { %320 = vadd.xlane.f32.xlu1 %v319_v45 }
 0x33e   :  { %v300_v48 = vpop.xlane.xlu1 %299  ;;  %v307_v50 = vpop.xlane.xlu0 %306 }
 0x33f   :  { %v301_v49 = vsub.f32 %v297_v47, %v300_v48  ;;  %v308_v51 = vsub.f32 %v1575_v4, %v307_v50  ;;  %v419_v48 = vld [vmem:[#allocation0 + $0x6] ss:$0 sm:$0xff] }
 0x341   :  { %1504 = vrsqrt.f32 %v301_v49 }
 0x342   :  { %v273_v39 = vpop.xlane.xlu0 %272  ;;  %v225_v54 = vpop.xlane.xlu1 %224 }
 0x343   :  { %v274_v56 = vsub.f32 %v1601_v22, %v273_v39  ;;  %v226_v57 = vsub.f32 %v1626_v46, %v225_v54 }
 0x345   :  { %v275_v60 = vmul.f32 %v1653_v20, %v274_v56  ;;  %v227_v61 = vmul.f32 %v1630_v52, %v226_v57 }
 0x346   :  { %v321_v62 = vpop.xlane.xlu1 %320 }
 0x347   :  { %v276_v63 = vsel %vm232_vm7, %v275_v60, 0.0  ;;  %v228_v0 = vsel %vm171_vm4, %v227_v61, 0.0  ;;  %v322_v1 = vsub.f32 %v1581_v5, %v321_v62  ;;  %vm476_vm4 = vcmask 64568  }
 0x348   :  { %v277_v7 = vadd.f32 %v276_v63, %v216_v38  ;;  %v229_v8 = vadd.f32 %v228_v0, %v168_v37 }
 0x34a   :  { %v332_v11 = vmul.f32 %v1666_v36, %v277_v7  ;;  %v284_v12 = vmul.f32 %v1643_v3, %v229_v8 }
 0x34b   :  { %v1676_v53 = vpop.eup %1504 }
 0x34c   :  { %v309_v55 = vmul.f32 %v1676_v53, %v308_v51  ;;  %v323_v2 = vmul.f32 %v1676_v53, %v322_v1 }
 0x34e   :  { %v312_v58 = vsel %vm311_vm12, %v309_v55, 0.0  ;;  %v324_v52 = vsel %vm293_vm10, %v323_v2, 0.0 }
 0x34f   :  { %v313_v59 = vadd.f32 %v312_v58, %v252_v27  ;;  %v325_v13 = vadd.f32 %v324_v52, %v264_v44 }
 0x351   :  { %314 = vst [vmem:[#allocation1] sm:$0xff] %v313_v59 }
 0x358   :  { %v1689_v6 = vld [vmem:[#allocation1 + $0x5] ss:$0 sm:$0xff] }
 0x359   :  { %v366_v9 = vmul.f32 %v1689_v6, %v313_v59  ;;  %v359_v10 = vmul.f32 %v1689_v6, %v1689_v6  ;;  %v380_v14 = vmul.f32 %v1689_v6, %v325_v13 }
 0x35b   :  { %367 = vadd.xlane.f32.xlu1 %v366_v9  ;;  %360 = vadd.xlane.f32.xlu0 %v359_v10 }
 0x35f   :  { %333 = vadd.xlane.f32.xlu1 %v332_v11  ;;  %285 = vadd.xlane.f32.xlu0 %v284_v12 }
 0x363   :  { %381 = vadd.xlane.f32.xlu0 %v380_v14 }
 0x3e8   :  { %v361_v16 = vpop.xlane.xlu0 %360  ;;  %v368_v19 = vpop.xlane.xlu1 %367 }
 0x3e9   :  { %v362_v17 = vsub.f32 %v358_v15, %v361_v16  ;;  %v369_v18 = vsub.f32 %v1575_v4, %v368_v19 }
 0x3eb   :  { %1506 = vrsqrt.f32 %v362_v17 }
 0x3ec   :  { %v286_v3 = vpop.xlane.xlu0 %285  ;;  %v334_v23 = vpop.xlane.xlu1 %333 }
 0x3ed   :  { %v287_v26 = vsub.f32 %v1626_v46, %v286_v3  ;;  %v335_v27 = vsub.f32 %v1601_v22, %v334_v23 }
 0x3ef   :  { %v288_v30 = vmul.f32 %v1653_v20, %v287_v26  ;;  %v336_v31 = vmul.f32 %v1676_v53, %v335_v27 }
 0x3f0   :  { %v382_v32 = vpop.xlane.xlu0 %381 }
 0x3f1   :  { %v289_v33 = vsel %vm232_vm7, %v288_v30, 0.0  ;;  %v337_v34 = vsel %vm293_vm10, %v336_v31, 0.0  ;;  %v383_v35 = vsub.f32 %v1581_v5, %v382_v32  ;;  %vm586_vm7 = vcmask 80968  }
 0x3f2   :  { %v290_v40 = vadd.f32 %v289_v33, %v229_v8  ;;  %v338_v28 = vadd.f32 %v337_v34, %v277_v7  ;;  %vm606_vm9 = vmand %vm586_vm7, %vm127_vm2 }
 0x3f4   :  { %v345_v43 = vmul.f32 %v1666_v36, %v290_v40  ;;  %v393_v44 = vmul.f32 %v1689_v6, %v338_v28 }
 0x3f5   :  { %v1699_v21 = vpop.eup %1506 }
 0x3f6   :  { %v370_v24 = vmul.f32 %v1699_v21, %v369_v18  ;;  %v384_v37 = vmul.f32 %v1699_v21, %v383_v35  ;;  %v480_v18 = vld [vmem:[#allocation0 + $0x7] ss:$0 sm:$0xff] }
 0x3f8   :  { %v373_v25 = vsel %vm372_vm15, %v370_v24, 0.0  ;;  %v385_v20 = vsel %vm354_vm13, %v384_v37, 0.0 }
 0x3f9   :  { %v374_v29 = vadd.f32 %v373_v25, %v313_v59  ;;  %v386_v45 = vadd.f32 %v385_v20, %v325_v13 }
 0x3fb   :  { %375 = vst [vmem:[#allocation1] sm:$0xff] %v374_v29 }
 0x402   :  { %v417_v38 = vld [vmem:[#allocation1 + $0x6] ss:$0 sm:$0xff] }
 0x403   :  { %v427_v41 = vmul.f32 %v417_v38, %v374_v29  ;;  %v420_v42 = vmul.f32 %v417_v38, %v417_v38  ;;  %v441_v47 = vmul.f32 %v417_v38, %v386_v45 }
 0x405   :  { %428 = vadd.xlane.f32.xlu0 %v427_v41  ;;  %421 = vadd.xlane.f32.xlu1 %v420_v42 }
 0x409   :  { %346 = vadd.xlane.f32.xlu1 %v345_v43  ;;  %394 = vadd.xlane.f32.xlu0 %v393_v44 }
 0x40d   :  { %442 = vadd.xlane.f32.xlu1 %v441_v47 }
 0x492   :  { %v422_v49 = vpop.xlane.xlu1 %421  ;;  %v429_v54 = vpop.xlane.xlu0 %428 }
 0x493   :  { %v423_v50 = vsub.f32 %v419_v48, %v422_v49  ;;  %v430_v57 = vsub.f32 %v1575_v4, %v429_v54 }
 0x495   :  { %1508 = vrsqrt.f32 %v423_v50 }
 0x496   :  { %v347_v51 = vpop.xlane.xlu1 %346  ;;  %v395_v60 = vpop.xlane.xlu0 %394 }
 0x497   :  { %v348_v39 = vsub.f32 %v1626_v46, %v347_v51  ;;  %v396_v63 = vsub.f32 %v1601_v22, %v395_v60 }
 0x499   :  { %v349_v55 = vmul.f32 %v1676_v53, %v348_v39  ;;  %v397_v4 = vmul.f32 %v1699_v21, %v396_v63  ;;  %v541_v39 = vld [vmem:[#allocation0 + $0x8] ss:$0 sm:$0xff] }
 0x49a   :  { %v443_v61 = vpop.xlane.xlu1 %442 }
 0x49b   :  { %v350_v56 = vsel %vm293_vm10, %v349_v55, 0.0  ;;  %v444_v0 = vsub.f32 %v1581_v5, %v443_v61  ;;  %v398_v7 = vsel %vm354_vm13, %v397_v4, 0.0  ;;  %vm637_vm10 = vcmask 89168  }
 0x49c   :  { %v351_v36 = vadd.f32 %v350_v56, %v290_v40  ;;  %v399_v10 = vadd.f32 %v398_v7, %v338_v28  ;;  %vm657_vm12 = vmand %vm637_vm10, %vm188_vm5 }
 0x49e   :  { %v406_v58 = vmul.f32 %v1689_v6, %v351_v36  ;;  %v454_v12 = vmul.f32 %v417_v38, %v399_v10 }
 0x49f   :  { %v1509_v59 = vpop.eup %1508 }
 0x4a0   :  { %v431_v62 = vmul.f32 %v1509_v59, %v430_v57  ;;  %407 = vadd.xlane.f32.xlu1 %v406_v58  ;;  %v445_v2 = vmul.f32 %v1509_v59, %v444_v0 }
 0x4a2   :  { %v434_v53 = vsel %vm433_vm3, %v431_v62, 0.0  ;;  %v446_v6 = vsel %vm415_vm0, %v445_v2, 0.0 }
 0x4a3   :  { %v435_v1 = vadd.f32 %v434_v53, %v374_v29  ;;  %v447_v8 = vadd.f32 %v446_v6, %v386_v45 }
 0x4a5   :  { %436 = vst [vmem:[#allocation1] sm:$0xff] %v435_v1 }
 0x4ac   :  { %v478_v9 = vld [vmem:[#allocation1 + $0x7] ss:$0 sm:$0xff] }
 0x4ad   :  { %v481_v52 = vmul.f32 %v478_v9, %v478_v9  ;;  %v502_v11 = vmul.f32 %v478_v9, %v447_v8 }
 0x4af   :  { %482 = vadd.xlane.f32.xlu0 %v481_v52  ;;  %503 = vadd.xlane.f32.xlu1 %v502_v11 }
 0x4b3   :  { %455 = vadd.xlane.f32.xlu0 %v454_v12  ;;  %v590_v12 = vld [vmem:[#allocation0 + $0x9] ss:$0 sm:$0xff] }
 0x52d   :  { %v408_v13 = vpop.xlane.xlu1 %407 }
 0x52e   :  { %v409_v14 = vsub.f32 %v1626_v46, %v408_v13 }
 0x530   :  { %v410_v15 = vmul.f32 %v1699_v21, %v409_v14 }
 0x532   :  { %v411_v16 = vsel %vm354_vm13, %v410_v15, 0.0  ;;  %vm688_vm13 = vcmask 97368  }
 0x533   :  { %v412_v17 = vadd.f32 %v411_v16, %v351_v36  ;;  %vm708_vm15 = vmand %vm688_vm13, %vm249_vm8 }
 0x535   :  { %v467_v19 = vmul.f32 %v417_v38, %v412_v17 }
 0x537   :  { %468 = vadd.xlane.f32.xlu0 %v467_v19 }
 0x53c   :  { %v483_v3 = vpop.xlane.xlu0 %482  ;;  %v504_v27 = vpop.xlane.xlu1 %503 }
 0x53d   :  { %v484_v23 = vsub.f32 %v480_v18, %v483_v3  ;;  %v505_v31 = vsub.f32 %v1581_v5, %v504_v27 }
 0x53f   :  { %1510 = vrsqrt.f32 %v484_v23 }
 0x540   :  { %v456_v24 = vpop.xlane.xlu0 %455 }
 0x541   :  { %v457_v25 = vsub.f32 %v1601_v22, %v456_v24 }
 0x543   :  { %v458_v26 = vmul.f32 %v1509_v59, %v457_v25 }
 0x545   :  { %v459_v29 = vsel %vm415_vm0, %v458_v26, 0.0 }
 0x546   :  { %v460_v30 = vadd.f32 %v459_v29, %v399_v10 }
 0x548   :  { %v515_v21 = vmul.f32 %v478_v9, %v460_v30 }
 0x549   :  { %v1733_v32 = vpop.eup %1510 }
 0x54a   :  { %v506_v33 = vmul.f32 %v1733_v32, %v505_v31  ;;  %516 = vadd.xlane.f32.xlu1 %v515_v21 }
 0x54c   :  { %v507_v34 = vsel %vm476_vm4, %v506_v33, 0.0 }
 0x54d   :  { %v508_v35 = vadd.f32 %v507_v34, %v447_v8 }
 0x54f   :  { %510 = vst [vmem:[#allocation1 + $0x8] sm:$0xff] %v508_v35 }
 0x556   :  { %v539_v37 = vld [vmem:[#allocation1 + $0x8] ss:$0 sm:$0xff] }
 0x557   :  { %v551_v38 = vmul.f32 %v539_v37, %v508_v35  ;;  %v542_v40 = vmul.f32 %v539_v37, %v539_v37 }
 0x559   :  { %552 = vadd.xlane.f32.xlu1 %v551_v38  ;;  %543 = vadd.xlane.f32.xlu0 %v542_v40 }
 0x5c4   :  { %v469_v28 = vpop.xlane.xlu0 %468 }
 0x5c5   :  { %v470_v41 = vsub.f32 %v1626_v46, %v469_v28  ;;  %v641_v28 = vld [vmem:[#allocation0 + $0xa] ss:$0 sm:$0xff] }
 0x5c7   :  { %v471_v42 = vmul.f32 %v1509_v59, %v470_v41 }
 0x5c9   :  { %v472_v20 = vsel %vm415_vm0, %v471_v42, 0.0  ;;  %vm739_vm0 = vcmask 105568  }
 0x5ca   :  { %v473_v43 = vadd.f32 %v472_v20, %v412_v17  ;;  %vm759_vm3 = vmand %vm739_vm0, %vm310_vm11 }
 0x5cc   :  { %v528_v44 = vmul.f32 %v478_v9, %v473_v43 }
 0x5ce   :  { %529 = vadd.xlane.f32.xlu0 %v528_v44 }
 0x5d7   :  { %v517_v45 = vpop.xlane.xlu1 %516 }
 0x5d8   :  { %v518_v47 = vsub.f32 %v1601_v22, %v517_v45 }
 0x5da   :  { %v519_v48 = vmul.f32 %v1733_v32, %v518_v47 }
 0x5dc   :  { %v520_v49 = vsel %vm476_vm4, %v519_v48, 0.0 }
 0x5dd   :  { %v521_v50 = vadd.f32 %v520_v49, %v460_v30 }
 0x5df   :  { %v564_v51 = vmul.f32 %v539_v37, %v521_v50 }
 0x5e1   :  { %565 = vadd.xlane.f32.xlu1 %v564_v51 }
 0x5e6   :  { %v544_v54 = vpop.xlane.xlu0 %543  ;;  %v553_v56 = vpop.xlane.xlu1 %552 }
 0x5e7   :  { %v545_v55 = vsub.f32 %v541_v39, %v544_v54  ;;  %v554_v36 = vsub.f32 %v1581_v5, %v553_v56 }
 0x5e9   :  { %1512 = vrsqrt.f32 %v545_v55 }
 0x5f3   :  { %v1513_v57 = vpop.eup %1512 }
 0x5f4   :  { %v555_v58 = vmul.f32 %v1513_v57, %v554_v36 }
 0x5f6   :  { %v556_v59 = vsel %vm537_vm6, %v555_v58, 0.0 }
 0x5f7   :  { %v557_v60 = vadd.f32 %v556_v59, %v508_v35 }
 0x5f9   :  { %559 = vst [vmem:[#allocation1 + $0x8] sm:$0xff] %v557_v60 }
 0x600   :  { %v588_v61 = vld [vmem:[#allocation1 + $0x9] ss:$0 sm:$0xff] }
 0x601   :  { %v600_v62 = vmul.f32 %v588_v61, %v557_v60  ;;  %v591_v63 = vmul.f32 %v588_v61, %v588_v61 }
 0x603   :  { %601 = vadd.xlane.f32.xlu1 %v600_v62  ;;  %592 = vadd.xlane.f32.xlu0 %v591_v63 }
 0x65b   :  { %v530_v53 = vpop.xlane.xlu0 %529 }
 0x65c   :  { %v531_v0 = vsub.f32 %v1626_v46, %v530_v53  ;;  %v692_v53 = vld [vmem:[#allocation0 + $0xb] ss:$0 sm:$0xff] }
 0x65e   :  { %v532_v1 = vmul.f32 %v1733_v32, %v531_v0 }
 0x660   :  { %v533_v2 = vsel %vm476_vm4, %v532_v1, 0.0 }
 0x661   :  { %v534_v4 = vadd.f32 %v533_v2, %v473_v43 }
 0x663   :  { %v577_v6 = vmul.f32 %v539_v37, %v534_v4 }
 0x665   :  { %578 = vadd.xlane.f32.xlu0 %v577_v6 }
 0x66e   :  { %v566_v7 = vpop.xlane.xlu1 %565 }
 0x66f   :  { %v567_v8 = vsub.f32 %v1601_v22, %v566_v7 }
 0x671   :  { %v568_v9 = vmul.f32 %v1513_v57, %v567_v8 }
 0x673   :  { %v569_v10 = vsel %vm537_vm6, %v568_v9, 0.0 }
 0x674   :  { %v570_v52 = vadd.f32 %v569_v10, %v521_v50 }
 0x676   :  { %v615_v11 = vmul.f32 %v588_v61, %v570_v52 }
 0x678   :  { %616 = vadd.xlane.f32.xlu1 %v615_v11 }
 0x690   :  { %v593_v13 = vpop.xlane.xlu0 %592  ;;  %v602_v15 = vpop.xlane.xlu1 %601 }
 0x691   :  { %v594_v14 = vsub.f32 %v590_v12, %v593_v13  ;;  %v603_v16 = vsub.f32 %v1581_v5, %v602_v15 }
 0x693   :  { %1514 = vrsqrt.f32 %v594_v14 }
 0x69d   :  { %v1515_v17 = vpop.eup %1514 }
 0x69e   :  { %v604_v19 = vmul.f32 %v1515_v17, %v603_v16 }
 0x6a0   :  { %v607_v18 = vsel %vm606_vm9, %v604_v19, 0.0  ;;  %vm841_vm9 = vcmask 121968  }
 0x6a1   :  { %v608_v3 = vadd.f32 %v607_v18, %v557_v60 }
 0x6a3   :  { %610 = vst [vmem:[#allocation1 + $0x8] sm:$0xff] %v608_v3 }
 0x6aa   :  { %v639_v23 = vld [vmem:[#allocation1 + $0xa] ss:$0 sm:$0xff] }
 0x6ab   :  { %v651_v24 = vmul.f32 %v639_v23, %v608_v3  ;;  %v642_v25 = vmul.f32 %v639_v23, %v639_v23 }
 0x6ad   :  { %652 = vadd.xlane.f32.xlu1 %v651_v24  ;;  %643 = vadd.xlane.f32.xlu0 %v642_v25  ;;  %v743_v25 = vld [vmem:[#allocation0 + $0xc] ss:$0 sm:$0xff] }
 0x6f2   :  { %v579_v26 = vpop.xlane.xlu0 %578 }
 0x6f3   :  { %v580_v27 = vsub.f32 %v1626_v46, %v579_v26 }
 0x6f5   :  { %v581_v29 = vmul.f32 %v1513_v57, %v580_v27 }
 0x6f7   :  { %v582_v30 = vsel %vm537_vm6, %v581_v29, 0.0  ;;  %v1770_v29 = vld [vmem:[#allocation0 + $0x8] sm:$0xff]  ;;  %vm790_vm6 = vcmask 113768  }
 0x6f8   :  { %v583_v31 = vadd.f32 %v582_v30, %v534_v4 }
 0x6fa   :  { %v628_v21 = vmul.f32 %v588_v61, %v583_v31 }
 0x6fc   :  { %629 = vadd.xlane.f32.xlu0 %v628_v21 }
 0x705   :  { %v617_v33 = vpop.xlane.xlu1 %616 }
 0x706   :  { %v618_v34 = vsub.f32 %v1601_v22, %v617_v33 }
 0x708   :  { %v619_v35 = vmul.f32 %v1515_v17, %v618_v34 }
 0x70a   :  { %v620_v37 = vsel %vm586_vm7, %v619_v35, 0.0 }
 0x70b   :  { %v621_v38 = vadd.f32 %v620_v37, %v570_v52 }
 0x70d   :  { %v666_v40 = vmul.f32 %v639_v23, %v621_v38 }
 0x70f   :  { %667 = vadd.xlane.f32.xlu1 %v666_v40 }
 0x73a   :  { %v644_v41 = vpop.xlane.xlu0 %643  ;;  %v653_v20 = vpop.xlane.xlu1 %652 }
 0x73b   :  { %v645_v42 = vsub.f32 %v641_v28, %v644_v41  ;;  %v654_v43 = vsub.f32 %v1581_v5, %v653_v20 }
 0x73d   :  { %1516 = vrsqrt.f32 %v645_v42 }
 0x747   :  { %v1517_v44 = vpop.eup %1516 }
 0x748   :  { %v655_v45 = vmul.f32 %v1517_v44, %v654_v43 }
 0x74a   :  { %v658_v47 = vsel %vm657_vm12, %v655_v45, 0.0  ;;  %vm892_vm12 = vcmask 130168  }
 0x74b   :  { %v659_v48 = vadd.f32 %v658_v47, %v608_v3 }
 0x74d   :  { %661 = vst [vmem:[#allocation1 + $0x8] sm:$0xff] %v659_v48 }
 0x754   :  { %v690_v49 = vld [vmem:[#allocation1 + $0xb] ss:$0 sm:$0xff] }
 0x755   :  { %v702_v50 = vmul.f32 %v690_v49, %v659_v48  ;;  %v693_v51 = vmul.f32 %v690_v49, %v690_v49 }
 0x757   :  { %703 = vadd.xlane.f32.xlu1 %v702_v50  ;;  %694 = vadd.xlane.f32.xlu0 %v693_v51 }
 0x789   :  { %v630_v39 = vpop.xlane.xlu0 %629 }
 0x78a   :  { %v631_v54 = vsub.f32 %v1626_v46, %v630_v39  ;;  %v794_v39 = vld [vmem:[#allocation0 + $0xd] ss:$0 sm:$0xff] }
 0x78c   :  { %v632_v55 = vmul.f32 %v1515_v17, %v631_v54 }
 0x78e   :  { %v633_v56 = vsel %vm586_vm7, %v632_v55, 0.0  ;;  %vm810_vm7 = vmand %vm790_vm6, %vm371_vm14 }
 0x78f   :  { %v634_v36 = vadd.f32 %v633_v56, %v583_v31 }
 0x791   :  { %v679_v57 = vmul.f32 %v639_v23, %v634_v36 }
 0x793   :  { %680 = vadd.xlane.f32.xlu0 %v679_v57 }
 0x79c   :  { %v668_v58 = vpop.xlane.xlu1 %667 }
 0x79d   :  { %v669_v59 = vsub.f32 %v1601_v22, %v668_v58 }
 0x79f   :  { %v670_v60 = vmul.f32 %v1517_v44, %v669_v59 }
 0x7a1   :  { %v671_v61 = vsel %vm637_vm10, %v670_v60, 0.0  ;;  %v1784_v60 = vld [vmem:[#allocation0 + $0x18] sm:$0xff] }
 0x7a2   :  { %v672_v62 = vadd.f32 %v671_v61, %v621_v38 }
 0x7a4   :  { %v717_v63 = vmul.f32 %v690_v49, %v672_v62 }
 0x7a6   :  { %718 = vadd.xlane.f32.xlu1 %v717_v63 }
 0x7e4   :  { %v695_v0 = vpop.xlane.xlu0 %694  ;;  %v704_v2 = vpop.xlane.xlu1 %703 }
 0x7e5   :  { %v696_v1 = vsub.f32 %v692_v53, %v695_v0  ;;  %v705_v4 = vsub.f32 %v1581_v5, %v704_v2 }
 0x7e7   :  { %1518 = vrsqrt.f32 %v696_v1 }
 0x7f1   :  { %v1519_v6 = vpop.eup %1518 }
 0x7f2   :  { %v706_v7 = vmul.f32 %v1519_v6, %v705_v4 }
 0x7f4   :  { %v709_v8 = vsel %vm708_vm15, %v706_v7, 0.0  ;;  %vm979_vm15 = vcmask 146568  }
 0x7f5   :  { %v710_v9 = vadd.f32 %v709_v8, %v659_v48 }
 0x7f7   :  { %712 = vst [vmem:[#allocation1 + $0x8] sm:$0xff] %v710_v9 }
 0x7fe   :  { %v741_v10 = vld [vmem:[#allocation1 + $0xc] ss:$0 sm:$0xff] }
 0x7ff   :  { %v753_v52 = vmul.f32 %v741_v10, %v710_v9  ;;  %v744_v11 = vmul.f32 %v741_v10, %v741_v10 }
 0x801   :  { %754 = vadd.xlane.f32.xlu1 %v753_v52  ;;  %745 = vadd.xlane.f32.xlu0 %v744_v11 }
 0x820   :  { %v681_v12 = vpop.xlane.xlu0 %680 }
 0x821   :  { %v682_v13 = vsub.f32 %v1626_v46, %v681_v12  ;;  %v845_v12 = vld [vmem:[#allocation0 + $0xe] ss:$0 sm:$0xff] }
 0x823   :  { %v683_v14 = vmul.f32 %v1517_v44, %v682_v13  ;;  %v1777_v44 = vld [vmem:[#allocation0 + $0x10] sm:$0xff] }
 0x825   :  { %v684_v15 = vsel %vm637_vm10, %v683_v14, 0.0  ;;  %vm861_vm10 = vmand %vm841_vm9, %vm432_vm1 }
 0x826   :  { %v685_v5 = vadd.f32 %v684_v15, %v634_v36 }
 0x828   :  { %v730_v16 = vmul.f32 %v690_v49, %v685_v5 }
 0x82a   :  { %731 = vadd.xlane.f32.xlu0 %v730_v16 }
 0x833   :  { %v719_v17 = vpop.xlane.xlu1 %718 }
 0x834   :  { %v720_v19 = vsub.f32 %v1601_v22, %v719_v17 }
 0x836   :  { %v721_v18 = vmul.f32 %v1519_v6, %v720_v19 }
 0x838   :  { %v722_v3 = vsel %vm688_vm13, %v721_v18, 0.0 }
 0x839   :  { %v723_v23 = vadd.f32 %v722_v3, %v672_v62 }
 0x83b   :  { %v768_v24 = vmul.f32 %v741_v10, %v723_v23 }
 0x83d   :  { %769 = vadd.xlane.f32.xlu1 %v768_v24 }
 0x88e   :  { %v746_v26 = vpop.xlane.xlu0 %745  ;;  %v755_v30 = vpop.xlane.xlu1 %754 }
 0x88f   :  { %v747_v27 = vsub.f32 %v743_v25, %v746_v26  ;;  %v756_v31 = vsub.f32 %v1770_v29, %v755_v30 }
 0x891   :  { %1520 = vrsqrt.f32 %v747_v27 }
 0x89b   :  { %v1521_v21 = vpop.eup %1520 }
 0x89c   :  { %v757_v22 = vmul.f32 %v1521_v21, %v756_v31 }
 0x89e   :  { %v760_v33 = vsel %vm759_vm3, %v757_v22, 0.0  ;;  %vm1017_vm3 = vcmask 154768  }
 0x89f   :  { %v761_v34 = vadd.f32 %v760_v33, %v710_v9 }
 0x8a1   :  { %763 = vst [vmem:[#allocation1 + $0x8] sm:$0xff] %v761_v34 }
 0x8a8   :  { %v792_v35 = vld [vmem:[#allocation1 + $0xd] ss:$0 sm:$0xff] }
 0x8a9   :  { %v804_v37 = vmul.f32 %v792_v35, %v761_v34  ;;  %v795_v38 = vmul.f32 %v792_v35, %v792_v35 }
 0x8ab   :  { %805 = vadd.xlane.f32.xlu1 %v804_v37  ;;  %796 = vadd.xlane.f32.xlu0 %v795_v38 }
 0x8b7   :  { %v732_v40 = vpop.xlane.xlu0 %731 }
 0x8b8   :  { %v733_v28 = vsub.f32 %v1626_v46, %v732_v40 }
 0x8ba   :  { %v734_v41 = vmul.f32 %v1519_v6, %v733_v28 }
 0x8bc   :  { %v735_v42 = vsel %vm688_vm13, %v734_v41, 0.0  ;;  %vm943_vm13 = vcmask 138368  }
 0x8bd   :  { %v736_v20 = vadd.f32 %v735_v42, %v685_v5 }
 0x8bf   :  { %v781_v43 = vmul.f32 %v741_v10, %v736_v20 }
 0x8c1   :  { %782 = vadd.xlane.f32.xlu0 %v781_v43 }
 0x8ca   :  { %v770_v45 = vpop.xlane.xlu1 %769 }
 0x8cb   :  { %v771_v47 = vsub.f32 %v1777_v44, %v770_v45 }
 0x8cd   :  { %v772_v48 = vmul.f32 %v1521_v21, %v771_v47 }
 0x8cf   :  { %v773_v49 = vsel %vm739_vm0, %v772_v48, 0.0 }
 0x8d0   :  { %v774_v50 = vadd.f32 %v773_v49, %v723_v23 }
 0x8d2   :  { %v819_v51 = vmul.f32 %v792_v35, %v774_v50 }
 0x8d4   :  { %820 = vadd.xlane.f32.xlu1 %v819_v51 }
 0x938   :  { %v797_v54 = vpop.xlane.xlu0 %796  ;;  %v806_v55 = vpop.xlane.xlu1 %805 }
 0x939   :  { %v798_v46 = vsub.f32 %v794_v39, %v797_v54  ;;  %v807_v56 = vsub.f32 %v1770_v29, %v806_v55 }
 0x93b   :  { %1522 = vrsqrt.f32 %v798_v46 }
 0x945   :  { %v1523_v36 = vpop.eup %1522 }
 0x946   :  { %v808_v57 = vmul.f32 %v1523_v36, %v807_v56 }
 0x948   :  { %v811_v58 = vsel %vm810_vm7, %v808_v57, 0.0  ;;  %vm1055_vm7 = vcmask 162968  }
 0x949   :  { %v812_v59 = vadd.f32 %v811_v58, %v761_v34 }
 0x94b   :  { %814 = vst [vmem:[#allocation1 + $0x8] sm:$0xff] %v812_v59 }
 0x94e   :  { %v783_v61 = vpop.xlane.xlu0 %782 }
 0x94f   :  { %v784_v62 = vsub.f32 %v1784_v60, %v783_v61 }
 0x951   :  { %v785_v63 = vmul.f32 %v1521_v21, %v784_v62  ;;  %v947_v62 = vld [vmem:[#allocation0 + $0x10] ss:$0 sm:$0xff] }
 0x952   :  { %v843_v53 = vld [vmem:[#allocation1 + $0xe] ss:$0 sm:$0xff] }
 0x953   :  { %v855_v0 = vmul.f32 %v843_v53, %v812_v59  ;;  %v846_v1 = vmul.f32 %v843_v53, %v843_v53  ;;  %v786_v2 = vsel %vm739_vm0, %v785_v63, 0.0  ;;  %vm999_vm0 = vmand %vm979_vm15, %vm127_vm2 }
 0x954   :  { %v787_v4 = vadd.f32 %v786_v2, %v736_v20  ;;  %v896_v20 = vld [vmem:[#allocation0 + $0xf] ss:$0 sm:$0xff] }
 0x955   :  { %856 = vadd.xlane.f32.xlu1 %v855_v0  ;;  %847 = vadd.xlane.f32.xlu0 %v846_v1 }
 0x956   :  { %v832_v6 = vmul.f32 %v792_v35, %v787_v4 }
 0x959   :  { %833 = vadd.xlane.f32.xlu0 %v832_v6 }
 0x961   :  { %v821_v7 = vpop.xlane.xlu1 %820 }
 0x962   :  { %v822_v8 = vsub.f32 %v1777_v44, %v821_v7 }
 0x964   :  { %v823_v9 = vmul.f32 %v1523_v36, %v822_v8 }
 0x966   :  { %v824_v10 = vsel %vm790_vm6, %v823_v9, 0.0 }
 0x967   :  { %v825_v52 = vadd.f32 %v824_v10, %v774_v50 }
 0x969   :  { %v870_v11 = vmul.f32 %v843_v53, %v825_v52 }
 0x96b   :  { %871 = vadd.xlane.f32.xlu1 %v870_v11 }
 0x9e2   :  { %v848_v13 = vpop.xlane.xlu0 %847  ;;  %v857_v17 = vpop.xlane.xlu1 %856 }
 0x9e3   :  { %v849_v14 = vsub.f32 %v845_v12, %v848_v13  ;;  %v858_v3 = vsub.f32 %v1770_v29, %v857_v17 }
 0x9e5   :  { %1524 = vrsqrt.f32 %v849_v14 }
 0x9e6   :  { %v834_v15 = vpop.xlane.xlu0 %833 }
 0x9e7   :  { %v835_v5 = vsub.f32 %v1784_v60, %v834_v15 }
 0x9e9   :  { %v836_v16 = vmul.f32 %v1523_v36, %v835_v5  ;;  %v983_v5 = vld [vmem:[#allocation0 + $0x11] ss:$0 sm:$0xff] }
 0x9eb   :  { %v837_v19 = vsel %vm790_vm6, %v836_v16, 0.0  ;;  %vm1037_vm6 = vmand %vm1017_vm3, %vm188_vm5 }
 0x9ec   :  { %v838_v18 = vadd.f32 %v837_v19, %v787_v4 }
 0x9ee   :  { %v883_v23 = vmul.f32 %v843_v53, %v838_v18 }
 0x9ef   :  { %v1525_v24 = vpop.eup %1524 }
 0x9f0   :  { %v859_v25 = vmul.f32 %v1525_v24, %v858_v3  ;;  %884 = vadd.xlane.f32.xlu1 %v883_v23 }
 0x9f2   :  { %v862_v26 = vsel %vm861_vm10, %v859_v25, 0.0  ;;  %vm1093_vm10 = vcmask 171168  }
 0x9f3   :  { %v1795_v27 = vadd.f32 %v862_v26, %v812_v59 }
 0x9f5   :  { %865 = vst [vmem:[#allocation1 + $0x8] sm:$0xff] %v1795_v27 }
 0x9f8   :  { %v872_v30 = vpop.xlane.xlu1 %871 }
 0x9f9   :  { %v873_v31 = vsub.f32 %v1777_v44, %v872_v30 }
 0x9fb   :  { %v874_v21 = vmul.f32 %v1525_v24, %v873_v31 }
 0x9fc   :  { %v1799_v22 = vld [vmem:[#allocation1 + $0xf] ss:$0 sm:$0xff] }
 0x9fd   :  { %v897_v29 = vmul.f32 %v1799_v22, %v1799_v22  ;;  %v875_v33 = vsel %vm841_vm9, %v874_v21, 0.0 }
 0x9fe   :  { %v876_v34 = vadd.f32 %v875_v33, %v825_v52 }
 0x9ff   :  { %898 = vadd.xlane.f32.xlu0 %v897_v29 }
 0xa00   :  { %v921_v35 = vmul.f32 %v1799_v22, %v876_v34 }
 0xa03   :  { %922 = vadd.xlane.f32.xlu0 %v921_v35 }
 0xa7d   :  { %v885_v37 = vpop.xlane.xlu1 %884 }
 0xa7e   :  { %v886_v38 = vsub.f32 %v1784_v60, %v885_v37 }
 0xa80   :  { %v887_v40 = vmul.f32 %v1525_v24, %v886_v38  ;;  %v1021_v38 = vld [vmem:[#allocation0 + $0x12] ss:$0 sm:$0xff] }
 0xa82   :  { %v888_v28 = vsel %vm841_vm9, %v887_v40, 0.0  ;;  %vm1075_vm9 = vmand %vm1055_vm7, %vm249_vm8 }
 0xa83   :  { %v889_v41 = vadd.f32 %v888_v28, %v838_v18 }
 0xa85   :  { %v934_v42 = vmul.f32 %v1799_v22, %v889_v41 }
 0xa87   :  { %935 = vadd.xlane.f32.xlu1 %v934_v42 }
 0xa8c   :  { %v899_v43 = vpop.xlane.xlu0 %898 }
 0xa8d   :  { %v900_v45 = vsub.f32 %v896_v20, %v899_v43 }
 0xa8f   :  { %1526 = vrsqrt.f32 %v900_v45 }
 0xa90   :  { %v923_v47 = vpop.xlane.xlu0 %922 }
 0xa91   :  { %v924_v48 = vsub.f32 %v1777_v44, %v923_v47 }
 0xa99   :  { %v1809_v49 = vpop.eup %1526 }
 0xa9a   :  { %v925_v50 = vmul.f32 %v1809_v49, %v924_v48 }
 0xa9c   :  { %v926_v51 = vsel %vm892_vm12, %v925_v50, 0.0 }
 0xa9d   :  { %v927_v39 = vadd.f32 %v926_v51, %v876_v34 }
 0xa9f   :  { %929 = vst [vmem:[#allocation1 + $0x10] sm:$0xff] %v927_v39 }
 0xaa6   :  { %v945_v54 = vld [vmem:[#allocation1 + $0x10] ss:$0 sm:$0xff] }
 0xaa7   :  { %v948_v46 = vmul.f32 %v945_v54, %v945_v54  ;;  %v957_v55 = vmul.f32 %v945_v54, %v927_v39 }
 0xaa9   :  { %949 = vadd.xlane.f32.xlu0 %v948_v46  ;;  %958 = vadd.xlane.f32.xlu1 %v957_v55 }
 0xb14   :  { %v936_v56 = vpop.xlane.xlu1 %935 }
 0xb15   :  { %v937_v36 = vsub.f32 %v1784_v60, %v936_v56 }
 0xb17   :  { %v938_v57 = vmul.f32 %v1809_v49, %v937_v36 }
 0xb19   :  { %v939_v58 = vsel %vm892_vm12, %v938_v57, 0.0  ;;  %v1059_v57 = vld [vmem:[#allocation0 + $0x13] ss:$0 sm:$0xff] }
 0xb1a   :  { %v940_v59 = vadd.f32 %v939_v58, %v889_v41 }
 0xb1c   :  { %v970_v61 = vmul.f32 %v945_v54, %v940_v59 }
 0xb1e   :  { %971 = vadd.xlane.f32.xlu0 %v970_v61 }
 0xb36   :  { %v950_v63 = vpop.xlane.xlu0 %949  ;;  %v959_v0 = vpop.xlane.xlu1 %958 }
 0xb37   :  { %v951_v53 = vsub.f32 %v947_v62, %v950_v63  ;;  %v960_v1 = vsub.f32 %v1777_v44, %v959_v0 }
 0xb39   :  { %1528 = vrsqrt.f32 %v951_v53 }
 0xb43   :  { %v1529_v2 = vpop.eup %1528 }
 0xb44   :  { %v961_v4 = vmul.f32 %v1529_v2, %v960_v1 }
 0xb46   :  { %v962_v6 = vsel %vm943_vm13, %v961_v4, 0.0 }
 0xb47   :  { %v963_v7 = vadd.f32 %v962_v6, %v927_v39 }
 0xb49   :  { %965 = vst [vmem:[#allocation1 + $0x10] sm:$0xff] %v963_v7 }
 0xb50   :  { %v981_v8 = vld [vmem:[#allocation1 + $0x11] ss:$0 sm:$0xff] }
 0xb51   :  { %v993_v9 = vmul.f32 %v981_v8, %v963_v7  ;;  %v984_v10 = vmul.f32 %v981_v8, %v981_v8 }
 0xb53   :  { %994 = vadd.xlane.f32.xlu0 %v993_v9  ;;  %985 = vadd.xlane.f32.xlu1 %v984_v10 }
 0xbab   :  { %v972_v52 = vpop.xlane.xlu0 %971 }
 0xbac   :  { %v973_v11 = vsub.f32 %v1784_v60, %v972_v52 }
 0xbae   :  { %v974_v12 = vmul.f32 %v1529_v2, %v973_v11 }
 0xbb0   :  { %v975_v13 = vsel %vm943_vm13, %v974_v12, 0.0  ;;  %v1097_v12 = vld [vmem:[#allocation0 + $0x14] ss:$0 sm:$0xff]  ;;  %vm1113_vm13 = vmand %vm1093_vm10, %vm310_vm11 }
 0xbb1   :  { %v976_v14 = vadd.f32 %v975_v13, %v940_v59 }
 0xbb3   :  { %v1008_v15 = vmul.f32 %v981_v8, %v976_v14 }
 0xbb5   :  { %1009 = vadd.xlane.f32.xlu1 %v1008_v15 }
 0xbe0   :  { %v986_v16 = vpop.xlane.xlu1 %985  ;;  %v995_v19 = vpop.xlane.xlu0 %994 }
 0xbe1   :  { %v987_v17 = vsub.f32 %v983_v5, %v986_v16  ;;  %v996_v18 = vsub.f32 %v1777_v44, %v995_v19 }
 0xbe3   :  { %1530 = vrsqrt.f32 %v987_v17 }
 0xbed   :  { %v1531_v3 = vpop.eup %1530 }
 0xbee   :  { %v997_v23 = vmul.f32 %v1531_v3, %v996_v18 }
 0xbf0   :  { %v1000_v24 = vsel %vm999_vm0, %v997_v23, 0.0 }
 0xbf1   :  { %v1001_v25 = vadd.f32 %v1000_v24, %v963_v7 }
 0xbf3   :  { %1003 = vst [vmem:[#allocation1 + $0x10] sm:$0xff] %v1001_v25 }
 0xbfa   :  { %v1019_v26 = vld [vmem:[#allocation1 + $0x12] ss:$0 sm:$0xff] }
 0xbfb   :  { %v1031_v30 = vmul.f32 %v1019_v26, %v1001_v25  ;;  %v1022_v31 = vmul.f32 %v1019_v26, %v1019_v26 }
 0xbfd   :  { %1032 = vadd.xlane.f32.xlu1 %v1031_v30  ;;  %1023 = vadd.xlane.f32.xlu0 %v1022_v31 }
 0xc42   :  { %v1010_v21 = vpop.xlane.xlu1 %1009 }
 0xc43   :  { %v1011_v29 = vsub.f32 %v1784_v60, %v1010_v21 }
 0xc45   :  { %v1012_v33 = vmul.f32 %v1531_v3, %v1011_v29 }
 0xc47   :  { %v1013_v34 = vsel %vm979_vm15, %v1012_v33, 0.0  ;;  %v1135_v33 = vld [vmem:[#allocation0 + $0x15] ss:$0 sm:$0xff]  ;;  %vm1131_vm15 = vcmask 179368  }
 0xc48   :  { %v1014_v35 = vadd.f32 %v1013_v34, %v976_v14  ;;  %vm1151_vm0 = vmand %vm1131_vm15, %vm371_vm14 }
 0xc4a   :  { %v1046_v37 = vmul.f32 %v1019_v26, %v1014_v35 }
 0xc4c   :  { %1047 = vadd.xlane.f32.xlu0 %v1046_v37 }
 0xc8a   :  { %v1024_v40 = vpop.xlane.xlu0 %1023  ;;  %v1033_v41 = vpop.xlane.xlu1 %1032 }
 0xc8b   :  { %v1025_v28 = vsub.f32 %v1021_v38, %v1024_v40  ;;  %v1034_v42 = vsub.f32 %v1777_v44, %v1033_v41 }
 0xc8d   :  { %1532 = vrsqrt.f32 %v1025_v28 }
 0xc97   :  { %v1533_v20 = vpop.eup %1532 }
 0xc98   :  { %v1035_v43 = vmul.f32 %v1533_v20, %v1034_v42 }
 0xc9a   :  { %v1038_v45 = vsel %vm1037_vm6, %v1035_v43, 0.0 }
 0xc9b   :  { %v1039_v47 = vadd.f32 %v1038_v45, %v1001_v25 }
 0xc9d   :  { %1041 = vst [vmem:[#allocation1 + $0x10] sm:$0xff] %v1039_v47 }
 0xca4   :  { %v1057_v48 = vld [vmem:[#allocation1 + $0x13] ss:$0 sm:$0xff] }
 0xca5   :  { %v1069_v50 = vmul.f32 %v1057_v48, %v1039_v47  ;;  %v1060_v51 = vmul.f32 %v1057_v48, %v1057_v48 }
 0xca7   :  { %1070 = vadd.xlane.f32.xlu0 %v1069_v50  ;;  %1061 = vadd.xlane.f32.xlu1 %v1060_v51 }
 0xcd9   :  { %v1048_v39 = vpop.xlane.xlu0 %1047 }
 0xcda   :  { %v1049_v54 = vsub.f32 %v1784_v60, %v1048_v39 }
 0xcdc   :  { %v1050_v46 = vmul.f32 %v1533_v20, %v1049_v54 }
 0xcde   :  { %v1051_v55 = vsel %vm1017_vm3, %v1050_v46, 0.0  ;;  %v1173_v46 = vld [vmem:[#allocation0 + $0x16] ss:$0 sm:$0xff]  ;;  %vm1169_vm3 = vcmask 187568  }
 0xcdf   :  { %v1052_v56 = vadd.f32 %v1051_v55, %v1014_v35  ;;  %vm1189_vm6 = vmand %vm1169_vm3, %vm432_vm1 }
 0xce1   :  { %v1084_v36 = vmul.f32 %v1057_v48, %v1052_v56 }
 0xce3   :  { %1085 = vadd.xlane.f32.xlu1 %v1084_v36 }
 0xd34   :  { %v1062_v58 = vpop.xlane.xlu1 %1061  ;;  %v1071_v61 = vpop.xlane.xlu0 %1070 }
 0xd35   :  { %v1063_v59 = vsub.f32 %v1059_v57, %v1062_v58  ;;  %v1072_v62 = vsub.f32 %v1777_v44, %v1071_v61 }
 0xd37   :  { %1534 = vrsqrt.f32 %v1063_v59 }
 0xd41   :  { %v1535_v63 = vpop.eup %1534 }
 0xd42   :  { %v1073_v53 = vmul.f32 %v1535_v63, %v1072_v62 }
 0xd44   :  { %v1076_v0 = vsel %vm1075_vm9, %v1073_v53, 0.0  ;;  %vm1245_vm9 = vcmask 203968  }
 0xd45   :  { %v1077_v1 = vadd.f32 %v1076_v0, %v1039_v47 }
 0xd47   :  { %1079 = vst [vmem:[#allocation1 + $0x10] sm:$0xff] %v1077_v1 }
 0xd4e   :  { %v1095_v2 = vld [vmem:[#allocation1 + $0x14] ss:$0 sm:$0xff] }
 0xd4f   :  { %v1107_v4 = vmul.f32 %v1095_v2, %v1077_v1  ;;  %v1098_v6 = vmul.f32 %v1095_v2, %v1095_v2 }
 0xd51   :  { %1108 = vadd.xlane.f32.xlu1 %v1107_v4  ;;  %1099 = vadd.xlane.f32.xlu0 %v1098_v6 }
 0xd70   :  { %v1086_v7 = vpop.xlane.xlu1 %1085 }
 0xd71   :  { %v1087_v8 = vsub.f32 %v1784_v60, %v1086_v7 }
 0xd73   :  { %v1088_v9 = vmul.f32 %v1535_v63, %v1087_v8  ;;  %v1211_v8 = vld [vmem:[#allocation0 + $0x17] ss:$0 sm:$0xff] }
 0xd75   :  { %v1089_v10 = vsel %vm1055_vm7, %v1088_v9, 0.0  ;;  %vm1207_vm7 = vcmask 195768  }
 0xd76   :  { %v1090_v52 = vadd.f32 %v1089_v10, %v1052_v56 }
 0xd78   :  { %v1122_v11 = vmul.f32 %v1095_v2, %v1090_v52 }
 0xd7a   :  { %1123 = vadd.xlane.f32.xlu0 %v1122_v11 }
 0xdde   :  { %v1100_v13 = vpop.xlane.xlu0 %1099  ;;  %v1109_v15 = vpop.xlane.xlu1 %1108 }
 0xddf   :  { %v1101_v14 = vsub.f32 %v1097_v12, %v1100_v13  ;;  %v1110_v5 = vsub.f32 %v1777_v44, %v1109_v15 }
 0xde1   :  { %1536 = vrsqrt.f32 %v1101_v14 }
 0xdeb   :  { %v1537_v16 = vpop.eup %1536 }
 0xdec   :  { %v1111_v17 = vmul.f32 %v1537_v16, %v1110_v5 }
 0xdee   :  { %v1114_v19 = vsel %vm1113_vm13, %v1111_v17, 0.0 }
 0xdef   :  { %v1115_v18 = vadd.f32 %v1114_v19, %v1077_v1  ;;  %v1249_v19 = vld [vmem:[#allocation0 + $0x18] ss:$0 sm:$0xff] }
 0xdf1   :  { %1117 = vst [vmem:[#allocation1 + $0x10] sm:$0xff] %v1115_v18 }
 0xdf8   :  { %v1133_v3 = vld [vmem:[#allocation1 + $0x15] ss:$0 sm:$0xff] }
 0xdf9   :  { %v1145_v23 = vmul.f32 %v1133_v3, %v1115_v18  ;;  %v1136_v24 = vmul.f32 %v1133_v3, %v1133_v3 }
 0xdfb   :  { %1146 = vadd.xlane.f32.xlu0 %v1145_v23  ;;  %1137 = vadd.xlane.f32.xlu1 %v1136_v24 }
 0xe07   :  { %v1124_v25 = vpop.xlane.xlu0 %1123 }
 0xe08   :  { %v1125_v26 = vsub.f32 %v1784_v60, %v1124_v25 }
 0xe0a   :  { %v1126_v30 = vmul.f32 %v1537_v16, %v1125_v26 }
 0xe0c   :  { %v1127_v31 = vsel %vm1093_vm10, %v1126_v30, 0.0  ;;  %vm1268_vm10 = vcmask 212168  }
 0xe0d   :  { %v1128_v21 = vadd.f32 %v1127_v31, %v1090_v52  ;;  %vm1288_vm13 = vmand %vm1268_vm10, %vm127_vm2  ;;  %vm1393_vm10 = vcmask 253168  }
 0xe0f   :  { %v1160_v29 = vmul.f32 %v1133_v3, %v1128_v21 }
 0xe11   :  { %1161 = vadd.xlane.f32.xlu1 %v1160_v29 }
 0xe88   :  { %v1138_v34 = vpop.xlane.xlu1 %1137  ;;  %v1147_v37 = vpop.xlane.xlu0 %1146 }
 0xe89   :  { %v1139_v35 = vsub.f32 %v1135_v33, %v1138_v34  ;;  %v1148_v38 = vsub.f32 %v1777_v44, %v1147_v37  ;;  %v1272_v34 = vld [vmem:[#allocation0 + $0x19] ss:$0 sm:$0xff] }
 0xe8b   :  { %1538 = vrsqrt.f32 %v1139_v35 }
 0xe95   :  { %v1539_v40 = vpop.eup %1538 }
 0xe96   :  { %v1149_v28 = vmul.f32 %v1539_v40, %v1148_v38 }
 0xe98   :  { %v1152_v41 = vsel %vm1151_vm0, %v1149_v28, 0.0  ;;  %vm1318_vm0 = vcmask 228568  }
 0xe99   :  { %v1153_v42 = vadd.f32 %v1152_v41, %v1115_v18 }
 0xe9b   :  { %1155 = vst [vmem:[#allocation1 + $0x10] sm:$0xff] %v1153_v42 }
 0xe9e   :  { %v1162_v20 = vpop.xlane.xlu1 %1161 }
 0xe9f   :  { %v1163_v43 = vsub.f32 %v1784_v60, %v1162_v20 }
 0xea1   :  { %v1164_v45 = vmul.f32 %v1539_v40, %v1163_v43 }
 0xea2   :  { %v1171_v47 = vld [vmem:[#allocation1 + $0x16] ss:$0 sm:$0xff] }
 0xea3   :  { %v1183_v48 = vmul.f32 %v1171_v47, %v1153_v42  ;;  %v1174_v50 = vmul.f32 %v1171_v47, %v1171_v47  ;;  %v1165_v51 = vsel %vm1131_vm15, %v1164_v45, 0.0  ;;  %vm1293_vm15 = vcmask 220368  }
 0xea4   :  { %v1166_v39 = vadd.f32 %v1165_v51, %v1128_v21  ;;  %vm1313_vm2 = vmand %vm1293_vm15, %vm188_vm5 }
 0xea5   :  { %1184 = vadd.xlane.f32.xlu1 %v1183_v48  ;;  %1175 = vadd.xlane.f32.xlu0 %v1174_v50  ;;  %v1297_v48 = vld [vmem:[#allocation0 + $0x1a] ss:$0 sm:$0xff]  ;;  %vm1338_vm5 = vmand %vm1318_vm0, %vm249_vm8 }
 0xea6   :  { %v1198_v54 = vmul.f32 %v1171_v47, %v1166_v39 }
 0xea9   :  { %1199 = vadd.xlane.f32.xlu0 %v1198_v54 }
 0xf32   :  { %v1176_v55 = vpop.xlane.xlu0 %1175  ;;  %v1185_v36 = vpop.xlane.xlu1 %1184 }
 0xf33   :  { %v1177_v56 = vsub.f32 %v1173_v46, %v1176_v55  ;;  %v1186_v57 = vsub.f32 %v1777_v44, %v1185_v36 }
 0xf35   :  { %1540 = vrsqrt.f32 %v1177_v56 }
 0xf36   :  { %v1200_v59 = vpop.xlane.xlu0 %1199 }
 0xf37   :  { %v1201_v63 = vsub.f32 %v1784_v60, %v1200_v59 }
 0xf3f   :  { %v1541_v58 = vpop.eup %1540 }
 0xf40   :  { %v1187_v61 = vmul.f32 %v1541_v58, %v1186_v57  ;;  %v1202_v0 = vmul.f32 %v1541_v58, %v1201_v63 }
 0xf42   :  { %v1190_v62 = vsel %vm1189_vm6, %v1187_v61, 0.0  ;;  %v1203_v1 = vsel %vm1169_vm3, %v1202_v0, 0.0  ;;  %v1322_v61 = vld [vmem:[#allocation0 + $0x1b] ss:$0 sm:$0xff]  ;;  %vm1343_vm3 = vcmask 236768   ;;  %vm1368_vm6 = vcmask 244968  }
 0xf43   :  { %v1844_v53 = vadd.f32 %v1190_v62, %v1153_v42  ;;  %v1204_v2 = vadd.f32 %v1203_v1, %v1166_v39  ;;  %vm1363_vm8 = vmand %vm1343_vm3, %vm310_vm11 }
 0xf44   :  { %vm1388_vm11 = vmand %vm1368_vm6, %vm371_vm14  ;;  %vm493_vm14 = vcmask 1047559  }
 0xf45   :  { %1193 = vst [vmem:[#allocation1 + $0x10] sm:$0xff] %v1844_v53 }
 0xf4c   :  { %v1847_v4 = vld [vmem:[#allocation1 + $0x17] ss:$0 sm:$0xff] }
 0xf4d   :  { %v1212_v6 = vmul.f32 %v1847_v4, %v1847_v4  ;;  %v1236_v7 = vmul.f32 %v1847_v4, %v1204_v2 }
 0xf4f   :  { %1213 = vadd.xlane.f32.xlu1 %v1212_v6  ;;  %1237 = vadd.xlane.f32.xlu0 %v1236_v7 }
 0xfdc   :  { %v1214_v9 = vpop.xlane.xlu1 %1213  ;;  %v1238_v52 = vpop.xlane.xlu0 %1237 }
 0xfdd   :  { %v1215_v10 = vsub.f32 %v1211_v8, %v1214_v9  ;;  %v1239_v11 = vsub.f32 %v1784_v60, %v1238_v52 }
 0xfdf   :  { %1542 = vrsqrt.f32 %v1215_v10 }
 0xfe9   :  { %v1853_v12 = vpop.eup %1542 }
 0xfea   :  { %v1240_v13 = vmul.f32 %v1853_v12, %v1239_v11  ;;  %v1347_v11 = vld [vmem:[#allocation0 + $0x1c] ss:$0 sm:$0xff] }
 0xfec   :  { %v1241_v14 = vsel %vm1207_vm7, %v1240_v13, 0.0 }
 0xfed   :  { %v1242_v15 = vadd.f32 %v1241_v14, %v1204_v2 }
 0xfef   :  { %1244 = vst [vmem:[#allocation1 + $0x18] sm:$0xff] %v1242_v15 }
 0xff6   :  { %v1247_v5 = vld [vmem:[#allocation1 + $0x18] ss:$0 sm:$0xff] }
 0xff7   :  { %v1259_v16 = vmul.f32 %v1247_v5, %v1242_v15  ;;  %v1250_v17 = vmul.f32 %v1247_v5, %v1247_v5 }
 0xff9   :  { %1260 = vadd.xlane.f32.xlu0 %v1259_v16  ;;  %1251 = vadd.xlane.f32.xlu1 %v1250_v17 }
0x1086   :  { %v1252_v18 = vpop.xlane.xlu1 %1251  ;;  %v1261_v23 = vpop.xlane.xlu0 %1260 }
0x1087   :  { %v1253_v3 = vsub.f32 %v1249_v19, %v1252_v18  ;;  %v1262_v24 = vsub.f32 %v1784_v60, %v1261_v23 }
0x1089   :  { %1544 = vrsqrt.f32 %v1253_v3 }
0x1093   :  { %v1545_v25 = vpop.eup %1544 }
0x1094   :  { %v1263_v26 = vmul.f32 %v1545_v25, %v1262_v24  ;;  %v1372_v25 = vld [vmem:[#allocation0 + $0x1d] ss:$0 sm:$0xff] }
0x1096   :  { %v1264_v30 = vsel %vm1245_vm9, %v1263_v26, 0.0  ;;  %vm494_vm9 = vmand %vm476_vm4, %vm493_vm14 }
0x1097   :  { %v1265_v31 = vadd.f32 %v1264_v30, %v1242_v15  ;;  %vm1413_vm4 = vmand %vm1393_vm10, %vm432_vm1 }
0x1098   :  { %vm912_vm1 = vmand %vm892_vm12, %vm493_vm14 }
0x1099   :  { %1267 = vst [vmem:[#allocation1 + $0x18] sm:$0xff] %v1265_v31 }
0x10a0   :  { %v1270_v21 = vld [vmem:[#allocation1 + $0x19] ss:$0 sm:$0xff] }
0x10a1   :  { %v1282_v29 = vmul.f32 %v1270_v21, %v1265_v31  ;;  %v1273_v33 = vmul.f32 %v1270_v21, %v1270_v21 }
0x10a3   :  { %1283 = vadd.xlane.f32.xlu0 %v1282_v29  ;;  %1274 = vadd.xlane.f32.xlu1 %v1273_v33 }
0x1130   :  { %v1275_v35 = vpop.xlane.xlu1 %1274  ;;  %v1284_v38 = vpop.xlane.xlu0 %1283 }
0x1131   :  { %v1276_v37 = vsub.f32 %v1272_v34, %v1275_v35  ;;  %v1285_v40 = vsub.f32 %v1784_v60, %v1284_v38 }
0x1133   :  { %1546 = vrsqrt.f32 %v1276_v37 }
0x113d   :  { %v1547_v28 = vpop.eup %1546 }
0x113e   :  { %v1286_v41 = vmul.f32 %v1547_v28, %v1285_v40  ;;  %v487_v28 = vld [vmem:[#allocation1] sm:$0xff] }
0x1140   :  { %v1289_v42 = vsel %vm1288_vm13, %v1286_v41, 0.0  ;;  %v1560_v41 = vld [vmem:[#allocation1 + $0x7] ss:$0 sm:$0xff]  ;;  %vm1227_vm13 = vmand %vm1207_vm7, %vm493_vm14  ;;  %vm1418_vm7 = vcmask 261368  }
0x1141   :  { %v1290_v20 = vadd.f32 %v1289_v42, %v1265_v31  ;;  %v488_v42 = vmul.f32 %v1560_v41, %v487_v28  ;;  %vm1438_vm15 = vmand %vm1418_vm7, %vm493_vm14 }
0x1143   :  { %1292 = vst [vmem:[#allocation1 + $0x18] sm:$0xff] %v1290_v20 }
0x114a   :  { %v1295_v43 = vld [vmem:[#allocation1 + $0x1a] ss:$0 sm:$0xff] }
0x114b   :  { %v1307_v45 = vmul.f32 %v1295_v43, %v1290_v20  ;;  %v1298_v47 = vmul.f32 %v1295_v43, %v1295_v43  ;;  %v1397_v43 = vld [vmem:[#allocation0 + $0x1e] ss:$0 sm:$0xff] }
0x114d   :  { %1308 = vadd.xlane.f32.xlu0 %v1307_v45  ;;  %1299 = vadd.xlane.f32.xlu1 %v1298_v47 }
0x11da   :  { %v1300_v50 = vpop.xlane.xlu1 %1299  ;;  %v1309_v39 = vpop.xlane.xlu0 %1308 }
0x11db   :  { %v1301_v51 = vsub.f32 %v1297_v48, %v1300_v50  ;;  %v1310_v54 = vsub.f32 %v1784_v60, %v1309_v39  ;;  %v486_v50 = vld [vmem:[#allocation0] sm:$0xff] }
0x11dd   :  { %1548 = vrsqrt.f32 %v1301_v51 }
0x11e7   :  { %v1549_v46 = vpop.eup %1548 }
0x11e8   :  { %v1311_v55 = vmul.f32 %v1549_v46, %v1310_v54 }
0x11ea   :  { %v1314_v56 = vsel %vm1313_vm2, %v1311_v55, 0.0 }
0x11eb   :  { %v1315_v36 = vadd.f32 %v1314_v56, %v1290_v20  ;;  %v1221_v20 = vmul.f32 %v1847_v4, %v1844_v53 }
0x11ed   :  { %1317 = vst [vmem:[#allocation1 + $0x18] sm:$0xff] %v1315_v36 }
0x11f4   :  { %v1320_v57 = vld [vmem:[#allocation1 + $0x1b] ss:$0 sm:$0xff] }
0x11f5   :  { %v1332_v58 = vmul.f32 %v1320_v57, %v1315_v36  ;;  %v1323_v59 = vmul.f32 %v1320_v57, %v1320_v57 }
0x11f7   :  { %1333 = vadd.xlane.f32.xlu0 %v1332_v58  ;;  %1324 = vadd.xlane.f32.xlu1 %v1323_v59 }
0x1284   :  { %v1325_v62 = vpop.xlane.xlu1 %1324  ;;  %v1334_v0 = vpop.xlane.xlu0 %1333 }
0x1285   :  { %v1326_v63 = vsub.f32 %v1322_v61, %v1325_v62  ;;  %v1335_v1 = vsub.f32 %v1784_v60, %v1334_v0  ;;  %v906_v0 = vmul.f32 %v1799_v22, %v1795_v27 }
0x1287   :  { %1550 = vrsqrt.f32 %v1326_v63 }
0x1291   :  { %v1551_v2 = vpop.eup %1550 }
0x1292   :  { %v1336_v6 = vmul.f32 %v1551_v2, %v1335_v1  ;;  %v1422_v2 = vld [vmem:[#allocation0 + $0x1f] ss:$0 sm:$0xff] }
0x1294   :  { %v1339_v7 = vsel %vm1338_vm5, %v1336_v6, 0.0 }
0x1295   :  { %v1340_v8 = vadd.f32 %v1339_v7, %v1315_v36  ;;  %v903_v7 = vld [vmem:[#allocation0 + $0x8] sm:$0xff] }
0x1297   :  { %1342 = vst [vmem:[#allocation1 + $0x18] sm:$0xff] %v1340_v8 }
0x129e   :  { %v1345_v9 = vld [vmem:[#allocation1 + $0x1c] ss:$0 sm:$0xff] }
0x129f   :  { %v1357_v10 = vmul.f32 %v1345_v9, %v1340_v8  ;;  %v1348_v52 = vmul.f32 %v1345_v9, %v1345_v9 }
0x12a1   :  { %1358 = vadd.xlane.f32.xlu0 %v1357_v10  ;;  %1349 = vadd.xlane.f32.xlu1 %v1348_v52 }
0x132e   :  { %v1350_v13 = vpop.xlane.xlu1 %1349  ;;  %v1359_v15 = vpop.xlane.xlu0 %1358 }
0x132f   :  { %v1351_v14 = vsub.f32 %v1347_v11, %v1350_v13  ;;  %v1360_v5 = vsub.f32 %v1784_v60, %v1359_v15 }
0x1331   :  { %1552 = vrsqrt.f32 %v1351_v14 }
0x133b   :  { %v1553_v16 = vpop.eup %1552 }
0x133c   :  { %v1361_v17 = vmul.f32 %v1553_v16, %v1360_v5 }
0x133e   :  { %v1364_v19 = vsel %vm1363_vm8, %v1361_v17, 0.0 }
0x133f   :  { %v1365_v18 = vadd.f32 %v1364_v19, %v1340_v8 }
0x1341   :  { %1367 = vst [vmem:[#allocation1 + $0x18] sm:$0xff] %v1365_v18 }
0x1348   :  { %v1370_v3 = vld [vmem:[#allocation1 + $0x1d] ss:$0 sm:$0xff] }
0x1349   :  { %v1382_v23 = vmul.f32 %v1370_v3, %v1365_v18  ;;  %v1373_v24 = vmul.f32 %v1370_v3, %v1370_v3 }
0x134b   :  { %1383 = vadd.xlane.f32.xlu0 %v1382_v23  ;;  %1374 = vadd.xlane.f32.xlu1 %v1373_v24 }
0x13d8   :  { %v1375_v26 = vpop.xlane.xlu1 %1374  ;;  %v1384_v31 = vpop.xlane.xlu0 %1383 }
0x13d9   :  { %v1376_v30 = vsub.f32 %v1372_v25, %v1375_v26  ;;  %v1385_v21 = vsub.f32 %v1784_v60, %v1384_v31 }
0x13db   :  { %1554 = vrsqrt.f32 %v1376_v30 }
0x13e5   :  { %v1555_v29 = vpop.eup %1554 }
0x13e6   :  { %v1386_v33 = vmul.f32 %v1555_v29, %v1385_v21 }
0x13e8   :  { %v1389_v34 = vsel %vm1388_vm11, %v1386_v33, 0.0 }
0x13e9   :  { %v1390_v35 = vadd.f32 %v1389_v34, %v1365_v18 }
0x13eb   :  { %1392 = vst [vmem:[#allocation1 + $0x18] sm:$0xff] %v1390_v35 }
0x13f2   :  { %v1395_v37 = vld [vmem:[#allocation1 + $0x1e] ss:$0 sm:$0xff] }
0x13f3   :  { %v1407_v38 = vmul.f32 %v1395_v37, %v1390_v35  ;;  %v1398_v40 = vmul.f32 %v1395_v37, %v1395_v37 }
0x13f5   :  { %1408 = vadd.xlane.f32.xlu0 %v1407_v38  ;;  %1399 = vadd.xlane.f32.xlu1 %v1398_v40 }
0x13f9   :  { %489 = vadd.xlane.f32.xlu0 %v488_v42 }
0x13fd   :  { %1222 = vadd.xlane.f32.xlu0 %v1221_v20 }
0x1482   :  { %v1409_v45 = vpop.xlane.xlu0 %1408  ;;  %v1400_v47 = vpop.xlane.xlu1 %1399 }
0x1483   :  { %v1401_v48 = vsub.f32 %v1397_v43, %v1400_v47  ;;  %v1410_v57 = vsub.f32 %v1784_v60, %v1409_v45 }
0x1485   :  { %1556 = vrsqrt.f32 %v1401_v48 }
0x1486   :  { %v490_v51 = vpop.xlane.xlu0 %489 }
0x1487   :  { %v491_v39 = vsub.f32 %v486_v50, %v490_v51 }
0x1489   :  { %v492_v54 = vmul.f32 %v1733_v32, %v491_v39 }
0x148a   :  { %v1223_v46 = vpop.xlane.xlu0 %1222 }
0x148b   :  { %v495_v55 = vsel %vm494_vm9, %v492_v54, 0.0  ;;  %v1224_v56 = vsub.f32 %v1777_v44, %v1223_v46 }
0x148c   :  { %v496_v4 = vadd.f32 %v495_v55, %v487_v28 }
0x148d   :  { %v1225_v36 = vmul.f32 %v1853_v12, %v1224_v56 }
0x148e   :  { %497 = vst [vmem:[#allocation1] sm:$0xff] %v496_v4  ;;  %1477 = vst [vmem:[%s1901_s1] sm:$0xff] %v496_v4 }
0x148f   :  { %v1557_v58 = vpop.eup %1556  ;;  %v1228_v32 = vsel %vm1227_vm13, %v1225_v36, 0.0 }
0x1490   :  { %v1411_v59 = vmul.f32 %v1557_v58, %v1410_v57  ;;  %v1229_v44 = vadd.f32 %v1228_v32, %v1844_v53 }
0x1492   :  { %v1414_v61 = vsel %vm1413_vm4, %v1411_v59, 0.0  ;;  %1231 = vst [vmem:[#allocation1 + $0x10] sm:$0xff] %v1229_v44  ;;  %1481 = vst [vmem:[%s1901_s1 + $0x10] sm:$0xff] %v1229_v44 }
0x1493   :  { %v1415_v12 = vadd.f32 %v1414_v61, %v1390_v35 }
0x1495   :  { %1417 = vst [vmem:[#allocation1 + $0x18] sm:$0xff] %v1415_v12 }
0x149c   :  { %v1420_v62 = vld [vmem:[#allocation1 + $0x1f] ss:$0 sm:$0xff] }
0x149d   :  { %v1423_v63 = vmul.f32 %v1420_v62, %v1420_v62  ;;  %v1432_v1 = vmul.f32 %v1420_v62, %v1415_v12 }
0x149f   :  { %1424 = vadd.xlane.f32.xlu1 %v1423_v63 }
0x14a3   :  { %907 = vadd.xlane.f32.xlu1 %v906_v0 }
0x14a7   :  { %1433 = vadd.xlane.f32.xlu1 %v1432_v1 }
0x152c   :  { %v1425_v6 = vpop.xlane.xlu1 %1424 }
0x152d   :  { %v1426_v53 = vsub.f32 %v1422_v2, %v1425_v6 }
0x152f   :  { %1558 = vrsqrt.f32 %v1426_v53 }
0x1530   :  { %v908_v8 = vpop.xlane.xlu1 %907 }
0x1531   :  { %v909_v9 = vsub.f32 %v903_v7, %v908_v8 }
0x1533   :  { %v910_v10 = vmul.f32 %v1809_v49, %v909_v9 }
0x1534   :  { %v1434_v11 = vpop.xlane.xlu1 %1433 }
0x1535   :  { %v913_v52 = vsel %vm912_vm1, %v910_v10, 0.0  ;;  %v1435_v22 = vsub.f32 %v1784_v60, %v1434_v11 }
0x1536   :  { %v914_v13 = vadd.f32 %v913_v52, %v1795_v27 }
0x1538   :  { %916 = vst [vmem:[#allocation1 + $0x8] sm:$0xff] %v914_v13  ;;  %1479 = vst [vmem:[%s1901_s1 + $0x8] sm:$0xff] %v914_v13 }
0x1539   :  { %v1559_v14 = vpop.eup %1558 }
0x153a   :  { %v1436_v15 = vmul.f32 %v1559_v14, %v1435_v22 }
0x153c   :  { %v1439_v5 = vsel %vm1438_vm15, %v1436_v15, 0.0 }
0x153d   :  { %v1440_v16 = vadd.f32 %v1439_v5, %v1415_v12 }
0x153f   :  { %1442 = vst [vmem:[#allocation1 + $0x18] sm:$0xff] %v1440_v16  ;;  %1483 = vst [vmem:[%s1901_s1 + $0x18] sm:$0xff] %v1440_v16 }

// kernel: custom-call.9
= control target key start
LH: loop header
LB: loop body
LE: loop exit
PB: predicated region body
PF: predicated region fallthrough
CT: control target
= control target key end

     0   :  { %v46_v0 = vlaneseq  ;;  %v730_v9 = vmov -1.0   ;;  %v731_v53 = vmov 0.0   ;;  %s884_s0 = inlined_call_operand.vmem [shape: f32[1,32,32], index: 0, kind: input, shape index: {}]   ;;  %s885_s1 = inlined_call_operand.vmem [shape: f32[1,32,32], index: 1, kind: output, shape index: {}]  }
   0x1   :  { %v35_v1 = vld [vmem:[%s884_s0] sm:$0xff]  ;;  %v37_v36 = vld [vmem:[%s884_s0 + $0x8] sm:$0xff] }
   0x2   :  { %v745_v2 = vand.u32 127, %v46_v0  ;;  %v747_v3 = vshrl.u32 %v46_v0, 7 }
   0x4   :  { %vm52_vm0 = vcmp.eq.s32.totalorder %v747_v3, %v745_v2  ;;  %vm48_vm1 = vcmp.lt.s32.totalorder %v745_v2, 32  ;;  %vm57_vm2 = vcmp.ge.s32.totalorder %v747_v3, %v745_v2  ;;  %vm119_vm4 = vcmp.eq.s32.totalorder %v745_v2, 0 }
   0x5   :  { %v54_v4 = vsel %vm52_vm0, %v35_v1, 0.0  ;;  %vm58_vm3 = vmand %vm57_vm2, %vm48_vm1  ;;  %vm116_vm5 = vcmp.eq.s32.totalorder %v745_v2, %v747_v3  ;;  %v120_v10 = vsel %vm119_vm4, 1.0, %v730_v9  ;;  %vm148_vm6 = vcmp.eq.s32.totalorder %v745_v2, 1 }
   0x6   :  { %55 = vadd.xlane.f32.xlu0 %v54_v4  ;;  %v59_v6 = vsel %vm58_vm3, %v35_v1, 0.0  ;;  %v121_v11 = vsel %vm116_vm5, %v120_v10, 0.0  ;;  %vm158_vm7 = vcmp.eq.s32.totalorder %v745_v2, 2  ;;  %vm168_vm8 = vcmp.eq.s32.totalorder %v745_v2, 3 }
   0x7   :  { %vm178_vm9 = vcmp.eq.s32.totalorder %v745_v2, 4  ;;  %v67_v31 = vadd.s32 8, %v747_v3  ;;  %vm188_vm11 = vcmp.eq.s32.totalorder %v745_v2, 5  ;;  %vm198_vm14 = vcmp.eq.s32.totalorder %v745_v2, 6 }
   0x8   :  { %vm208_vm0 = vcmp.eq.s32.totalorder %v745_v2, 7  ;;  %vm218_vm2 = vcmp.eq.s32.totalorder %v745_v2, 8  ;;  %vm232_vm3 = vcmp.eq.s32.totalorder %v745_v2, 9  ;;  %vm246_vm4 = vcmp.eq.s32.totalorder %v745_v2, 10 }
   0x9   :  { %vm68_vm10 = vcmp.eq.s32.totalorder %v67_v31, %v745_v2  ;;  %vm73_vm12 = vcmp.ge.s32.totalorder %v67_v31, %v745_v2  ;;  %vm127_vm15 = vcmp.eq.s32.totalorder %v745_v2, %v67_v31  ;;  %vm260_vm5 = vcmp.eq.s32.totalorder %v745_v2, 11 }
   0xa   :  { %v70_v37 = vsel %vm68_vm10, %v37_v36, 0.0  ;;  %vm74_vm13 = vmand %vm73_vm12, %vm48_vm1  ;;  %v128_v54 = vsel %vm127_vm15, -1.0, %v731_v53  ;;  %vm316_vm12 = vcmp.eq.s32.totalorder %v745_v2, 15  ;;  %vm348_vm15 = vcmp.eq.s32.totalorder %v745_v2, 17 }
   0xb   :  { %v75_v44 = vsel %vm74_vm13, %v37_v36, 0.0 }
  0x93   :  { %v751_v5 = vpop.xlane.xlu0 %55 }
  0x94   :  { %722 = vrcp.f32 %v751_v5 }
  0x9e   :  { %v759_v7 = vpop.eup %722 }
  0x9f   :  { %v61_v8 = vmul.f32 %v759_v7, %v59_v6 }
  0xa1   :  { %62 = vst [vmem:[#allocation2] sm:$0xff] %v61_v8 }
  0xa8   :  { %v144_v12 = vld [vmem:[#allocation2 + $0x1] ss:$0 sm:$0xff]  ;;  %v154_v15 = vld [vmem:[#allocation2 + $0x2] ss:$0 sm:$0xff]  ;;  %v164_v20 = vld [vmem:[#allocation2 + $0x3] ss:$0 sm:$0xff] }
  0xa9   :  { %v145_v13 = vxor.u32 2147483648, %v144_v12  ;;  %v155_v17 = vxor.u32 2147483648, %v154_v15  ;;  %v165_v22 = vxor.u32 2147483648, %v164_v20  ;;  %v174_v25 = vld [vmem:[#allocation2 + $0x4] ss:$0 sm:$0xff] }
  0xaa   :  { %v175_v27 = vxor.u32 2147483648, %v174_v25  ;;  %v184_v30 = vld [vmem:[#allocation2 + $0x5] ss:$0 sm:$0xff]  ;;  %v194_v38 = vld [vmem:[#allocation2 + $0x6] ss:$0 sm:$0xff] }
  0xab   :  { %v149_v14 = vmul.f32 %v145_v13, %v121_v11  ;;  %v185_v33 = vxor.u32 2147483648, %v184_v30  ;;  %v195_v40 = vxor.u32 2147483648, %v194_v38  ;;  %v204_v47 = vld [vmem:[#allocation2 + $0x7] ss:$0 sm:$0xff] }
  0xac   :  { %v205_v50 = vxor.u32 2147483648, %v204_v47  ;;  %v83_v47 = vadd.s32 16, %v747_v3 }
  0xad   :  { %150 = vadd.xlane.f32.xlu0 %v149_v14 }
  0xae   :  { %vm89_vm10 = vcmp.ge.s32.totalorder %v83_v47, %v745_v2  ;;  %vm134_vm13 = vcmp.eq.s32.totalorder %v745_v2, %v83_v47 }
 0x13a   :  { %v151_v16 = vpop.xlane.xlu0 %150 }
 0x13b   :  { %v152_v18 = vsel %vm148_vm6, %v151_v16, %v121_v11  ;;  %vm274_vm6 = vcmp.eq.s32.totalorder %v745_v2, 12 }
 0x13c   :  { %v159_v19 = vmul.f32 %v155_v17, %v152_v18 }
 0x13e   :  { %160 = vadd.xlane.f32.xlu1 %v159_v19 }
 0x1cb   :  { %v161_v21 = vpop.xlane.xlu1 %160 }
 0x1cc   :  { %v162_v23 = vsel %vm158_vm7, %v161_v21, %v152_v18  ;;  %vm288_vm7 = vcmp.eq.s32.totalorder %v745_v2, 13 }
 0x1cd   :  { %v169_v24 = vmul.f32 %v165_v22, %v162_v23 }
 0x1cf   :  { %170 = vadd.xlane.f32.xlu1 %v169_v24 }
 0x25c   :  { %v171_v26 = vpop.xlane.xlu1 %170 }
 0x25d   :  { %v172_v28 = vsel %vm168_vm8, %v171_v26, %v162_v23  ;;  %vm84_vm8 = vcmp.eq.s32.totalorder %v83_v47, %v745_v2 }
 0x25e   :  { %v179_v29 = vmul.f32 %v175_v27, %v172_v28 }
 0x260   :  { %180 = vadd.xlane.f32.xlu0 %v179_v29 }
 0x2ed   :  { %v181_v32 = vpop.xlane.xlu0 %180 }
 0x2ee   :  { %v182_v34 = vsel %vm178_vm9, %v181_v32, %v172_v28  ;;  %vm302_vm9 = vcmp.eq.s32.totalorder %v745_v2, 14 }
 0x2ef   :  { %v189_v35 = vmul.f32 %v185_v33, %v182_v34 }
 0x2f1   :  { %190 = vadd.xlane.f32.xlu1 %v189_v35 }
 0x2f5   :  { %71 = vadd.xlane.f32.xlu1 %v70_v37 }
 0x37e   :  { %v191_v39 = vpop.xlane.xlu1 %190 }
 0x37f   :  { %v192_v41 = vsel %vm188_vm11, %v191_v39, %v182_v34  ;;  %vm90_vm11 = vmand %vm89_vm10, %vm48_vm1  ;;  %vm474_vm10 = vcmp.eq.s32.totalorder %v745_v2, 24 }
 0x380   :  { %v199_v42 = vmul.f32 %v195_v40, %v192_v41 }
 0x382   :  { %200 = vadd.xlane.f32.xlu0 %v199_v42  ;;  %v775_v43 = vpop.xlane.xlu1 %71 }
 0x383   :  { %724 = vrcp.f32 %v775_v43 }
 0x38d   :  { %v781_v45 = vpop.eup %724 }
 0x38e   :  { %v77_v46 = vmul.f32 %v781_v45, %v75_v44 }
 0x390   :  { %78 = vst [vmem:[#allocation2 + $0x8] sm:$0xff] %v77_v46 }
 0x397   :  { %v214_v48 = vld [vmem:[#allocation2 + $0x8] ss:$0 sm:$0xff]  ;;  %v228_v59 = vld [vmem:[#allocation2 + $0x9] ss:$0 sm:$0xff]  ;;  %v242_v6 = vld [vmem:[#allocation2 + $0xa] ss:$0 sm:$0xff] }
 0x398   :  { %v215_v51 = vxor.u32 2147483648, %v214_v48  ;;  %v229_v62 = vxor.u32 2147483648, %v228_v59  ;;  %v243_v10 = vxor.u32 2147483648, %v242_v6  ;;  %v256_v15 = vld [vmem:[#allocation2 + $0xb] ss:$0 sm:$0xff] }
 0x399   :  { %v257_v18 = vxor.u32 2147483648, %v256_v15  ;;  %v270_v23 = vld [vmem:[#allocation2 + $0xc] ss:$0 sm:$0xff]  ;;  %v284_v31 = vld [vmem:[#allocation2 + $0xd] ss:$0 sm:$0xff] }
 0x39a   :  { %v223_v56 = vmul.f32 %v215_v51, %v128_v54  ;;  %v271_v26 = vxor.u32 2147483648, %v270_v23  ;;  %v285_v34 = vxor.u32 2147483648, %v284_v31  ;;  %v298_v39 = vld [vmem:[#allocation2 + $0xe] ss:$0 sm:$0xff] }
 0x39b   :  { %v299_v42 = vxor.u32 2147483648, %v298_v39 }
 0x40f   :  { %v201_v49 = vpop.xlane.xlu0 %200 }
 0x410   :  { %v202_v52 = vsel %vm198_vm14, %v201_v49, %v192_v41  ;;  %vm330_vm14 = vcmp.eq.s32.totalorder %v745_v2, 16 }
 0x411   :  { %v209_v55 = vmul.f32 %v205_v50, %v202_v52 }
 0x413   :  { %210 = vadd.xlane.f32.xlu0 %v209_v55  ;;  %v312_v55 = vld [vmem:[#allocation2 + $0xf] ss:$0 sm:$0xff] }
 0x417   :  { %224 = vadd.xlane.f32.xlu0 %v223_v56 }
 0x4a0   :  { %v211_v57 = vpop.xlane.xlu0 %210 }
 0x4a1   :  { %v212_v58 = vsel %vm208_vm0, %v211_v57, %v202_v52  ;;  %v313_v57 = vxor.u32 2147483648, %v312_v55  ;;  %vm366_vm0 = vcmp.eq.s32.totalorder %v745_v2, 18 }
 0x4a2   :  { %v219_v60 = vmul.f32 %v215_v51, %v212_v58  ;;  %v39_v51 = vld [vmem:[%s884_s0 + $0x10] sm:$0xff] }
 0x4a4   :  { %v225_v61 = vpop.xlane.xlu0 %224  ;;  %220 = vadd.xlane.f32.xlu1 %v219_v60 }
 0x4a5   :  { %v226_v63 = vsel %vm218_vm2, %v225_v61, %v128_v54  ;;  %v86_v54 = vsel %vm84_vm8, %v39_v51, 0.0 }
 0x4a6   :  { %v237_v0 = vmul.f32 %v229_v62, %v226_v63 }
 0x4a8   :  { %238 = vadd.xlane.f32.xlu0 %v237_v0 }
 0x531   :  { %v221_v1 = vpop.xlane.xlu1 %220 }
 0x532   :  { %v222_v4 = vsel %vm218_vm2, %v221_v1, %v212_v58  ;;  %vm384_vm2 = vcmp.eq.s32.totalorder %v745_v2, 19 }
 0x533   :  { %v233_v8 = vmul.f32 %v229_v62, %v222_v4 }
 0x535   :  { %v239_v9 = vpop.xlane.xlu0 %238  ;;  %234 = vadd.xlane.f32.xlu1 %v233_v8 }
 0x536   :  { %v240_v11 = vsel %vm232_vm3, %v239_v9, %v226_v63  ;;  %v91_v63 = vsel %vm90_vm11, %v39_v51, 0.0  ;;  %vm496_vm11 = vcmp.eq.s32.totalorder %v745_v2, 25 }
 0x537   :  { %v251_v12 = vmul.f32 %v243_v10, %v240_v11 }
 0x539   :  { %252 = vadd.xlane.f32.xlu0 %v251_v12 }
 0x5c2   :  { %v235_v13 = vpop.xlane.xlu1 %234 }
 0x5c3   :  { %v236_v14 = vsel %vm232_vm3, %v235_v13, %v222_v4  ;;  %vm402_vm3 = vcmp.eq.s32.totalorder %v745_v2, 20 }
 0x5c4   :  { %v247_v16 = vmul.f32 %v243_v10, %v236_v14 }
 0x5c6   :  { %v253_v17 = vpop.xlane.xlu0 %252  ;;  %248 = vadd.xlane.f32.xlu1 %v247_v16 }
 0x5c7   :  { %v254_v19 = vsel %vm246_vm4, %v253_v17, %v240_v11 }
 0x5c8   :  { %v265_v20 = vmul.f32 %v257_v18, %v254_v19 }
 0x5ca   :  { %266 = vadd.xlane.f32.xlu0 %v265_v20 }
 0x653   :  { %v249_v21 = vpop.xlane.xlu1 %248 }
 0x654   :  { %v250_v22 = vsel %vm246_vm4, %v249_v21, %v236_v14  ;;  %v135_v14 = vsel %vm134_vm13, -1.0, %v731_v53  ;;  %vm420_vm4 = vcmp.eq.s32.totalorder %v745_v2, 21  ;;  %vm540_vm13 = vcmp.eq.s32.totalorder %v745_v2, 27 }
 0x655   :  { %v261_v24 = vmul.f32 %v257_v18, %v250_v22 }
 0x657   :  { %v267_v25 = vpop.xlane.xlu0 %266  ;;  %262 = vadd.xlane.f32.xlu1 %v261_v24 }
 0x658   :  { %v268_v27 = vsel %vm260_vm5, %v267_v25, %v254_v19 }
 0x659   :  { %v279_v28 = vmul.f32 %v271_v26, %v268_v27 }
 0x65b   :  { %280 = vadd.xlane.f32.xlu0 %v279_v28 }
 0x6e4   :  { %v263_v29 = vpop.xlane.xlu1 %262 }
 0x6e5   :  { %v264_v30 = vsel %vm260_vm5, %v263_v29, %v250_v22 }
 0x6e6   :  { %v275_v32 = vmul.f32 %v271_v26, %v264_v30 }
 0x6e8   :  { %v281_v33 = vpop.xlane.xlu0 %280  ;;  %276 = vadd.xlane.f32.xlu1 %v275_v32 }
 0x6e9   :  { %v282_v35 = vsel %vm274_vm6, %v281_v33, %v268_v27 }
 0x6ea   :  { %v293_v36 = vmul.f32 %v285_v34, %v282_v35 }
 0x6ec   :  { %294 = vadd.xlane.f32.xlu0 %v293_v36 }
 0x775   :  { %v277_v37 = vpop.xlane.xlu1 %276 }
 0x776   :  { %v278_v38 = vsel %vm274_vm6, %v277_v37, %v264_v30  ;;  %vm438_vm6 = vcmp.eq.s32.totalorder %v745_v2, 22 }
 0x777   :  { %v289_v40 = vmul.f32 %v285_v34, %v278_v38 }
 0x779   :  { %v295_v41 = vpop.xlane.xlu0 %294  ;;  %290 = vadd.xlane.f32.xlu1 %v289_v40 }
 0x77a   :  { %v296_v44 = vsel %vm288_vm7, %v295_v41, %v282_v35 }
 0x77b   :  { %v307_v46 = vmul.f32 %v299_v42, %v296_v44 }
 0x77d   :  { %308 = vadd.xlane.f32.xlu0 %v307_v46 }
 0x806   :  { %v291_v48 = vpop.xlane.xlu1 %290 }
 0x807   :  { %v292_v49 = vsel %vm288_vm7, %v291_v48, %v278_v38 }
 0x808   :  { %v303_v50 = vmul.f32 %v299_v42, %v292_v49 }
 0x80a   :  { %v309_v52 = vpop.xlane.xlu0 %308  ;;  %304 = vadd.xlane.f32.xlu1 %v303_v50 }
 0x80b   :  { %v310_v56 = vsel %vm302_vm9, %v309_v52, %v296_v44 }
 0x80c   :  { %v321_v58 = vmul.f32 %v313_v57, %v310_v56 }
 0x80e   :  { %87 = vadd.xlane.f32.xlu1 %v86_v54 }
 0x812   :  { %322 = vadd.xlane.f32.xlu1 %v321_v58 }
 0x897   :  { %v305_v59 = vpop.xlane.xlu1 %304 }
 0x898   :  { %v306_v60 = vsel %vm302_vm9, %v305_v59, %v292_v49 }
 0x899   :  { %v317_v61 = vmul.f32 %v313_v57, %v306_v60 }
 0x89b   :  { %318 = vadd.xlane.f32.xlu0 %v317_v61  ;;  %v800_v62 = vpop.xlane.xlu1 %87 }
 0x89c   :  { %726 = vrcp.f32 %v800_v62 }
 0x89f   :  { %v323_v4 = vpop.xlane.xlu1 %322 }
 0x8a0   :  { %v324_v9 = vsel %vm316_vm12, %v323_v4, %v310_v56 }
 0x8a6   :  { %v806_v0 = vpop.eup %726 }
 0x8a7   :  { %v93_v1 = vmul.f32 %v806_v0, %v91_v63 }
 0x8a9   :  { %94 = vst [vmem:[#allocation2 + $0x10] sm:$0xff] %v93_v1 }
 0x8b0   :  { %v326_v6 = vld [vmem:[#allocation2 + $0x10] ss:$0 sm:$0xff]  ;;  %v344_v16 = vld [vmem:[#allocation2 + $0x11] ss:$0 sm:$0xff]  ;;  %v362_v27 = vld [vmem:[#allocation2 + $0x12] ss:$0 sm:$0xff] }
 0x8b1   :  { %v327_v8 = vxor.u32 2147483648, %v326_v6  ;;  %v345_v18 = vxor.u32 2147483648, %v344_v16  ;;  %v363_v29 = vxor.u32 2147483648, %v362_v27  ;;  %v380_v38 = vld [vmem:[#allocation2 + $0x13] ss:$0 sm:$0xff] }
 0x8b2   :  { %v381_v40 = vxor.u32 2147483648, %v380_v38  ;;  %v398_v51 = vld [vmem:[#allocation2 + $0x14] ss:$0 sm:$0xff]  ;;  %v416_v1 = vld [vmem:[#allocation2 + $0x15] ss:$0 sm:$0xff] }
 0x8b3   :  { %v335_v10 = vmul.f32 %v327_v8, %v324_v9  ;;  %v339_v15 = vmul.f32 %v327_v8, %v135_v14  ;;  %v399_v54 = vxor.u32 2147483648, %v398_v51  ;;  %v417_v6 = vxor.u32 2147483648, %v416_v1  ;;  %v434_v16 = vld [vmem:[#allocation2 + $0x16] ss:$0 sm:$0xff] }
 0x8b5   :  { %336 = vadd.xlane.f32.xlu1 %v335_v10 }
 0x928   :  { %v319_v11 = vpop.xlane.xlu0 %318 }
 0x929   :  { %v320_v12 = vsel %vm316_vm12, %v319_v11, %v306_v60  ;;  %vm518_vm12 = vcmp.eq.s32.totalorder %v745_v2, 26 }
 0x92a   :  { %v331_v13 = vmul.f32 %v327_v8, %v320_v12 }
 0x92c   :  { %332 = vadd.xlane.f32.xlu0 %v331_v13 }
 0x930   :  { %340 = vadd.xlane.f32.xlu0 %v339_v15 }
 0x942   :  { %v337_v17 = vpop.xlane.xlu1 %336 }
 0x943   :  { %v338_v19 = vsel %vm330_vm14, %v337_v17, %v324_v9  ;;  %v99_v17 = vadd.s32 24, %v747_v3 }
 0x944   :  { %v353_v20 = vmul.f32 %v345_v18, %v338_v19 }
 0x945   :  { %vm100_vm5 = vcmp.eq.s32.totalorder %v99_v17, %v745_v2  ;;  %vm105_vm7 = vcmp.ge.s32.totalorder %v99_v17, %v745_v2  ;;  %vm141_vm9 = vcmp.eq.s32.totalorder %v745_v2, %v99_v17 }
 0x946   :  { %354 = vadd.xlane.f32.xlu0 %v353_v20  ;;  %vm106_vm8 = vmand %vm105_vm7, %vm48_vm1  ;;  %vm456_vm1 = vcmp.eq.s32.totalorder %v745_v2, 23 }
 0x9b9   :  { %v333_v21 = vpop.xlane.xlu0 %332 }
 0x9ba   :  { %v334_v22 = vsel %vm330_vm14, %v333_v21, %v320_v12 }
 0x9bb   :  { %v349_v23 = vmul.f32 %v345_v18, %v334_v22 }
 0x9bd   :  { %v341_v24 = vpop.xlane.xlu0 %340  ;;  %350 = vadd.xlane.f32.xlu1 %v349_v23 }
 0x9be   :  { %v342_v25 = vsel %vm330_vm14, %v341_v24, %v135_v14  ;;  %vm562_vm14 = vcmp.eq.s32.totalorder %v745_v2, 28 }
 0x9bf   :  { %v357_v26 = vmul.f32 %v345_v18, %v342_v25 }
 0x9c1   :  { %358 = vadd.xlane.f32.xlu1 %v357_v26 }
 0x9d3   :  { %v355_v28 = vpop.xlane.xlu0 %354 }
 0x9d4   :  { %v356_v30 = vsel %vm348_vm15, %v355_v28, %v338_v19  ;;  %v435_v19 = vxor.u32 2147483648, %v434_v16 }
 0x9d5   :  { %v371_v31 = vmul.f32 %v363_v29, %v356_v30 }
 0x9d7   :  { %372 = vadd.xlane.f32.xlu1 %v371_v31 }
 0xa4a   :  { %v351_v32 = vpop.xlane.xlu1 %350 }
 0xa4b   :  { %v352_v33 = vsel %vm348_vm15, %v351_v32, %v334_v22  ;;  %v41_v22 = vld [vmem:[%s884_s0 + $0x18] sm:$0xff] }
 0xa4c   :  { %v367_v34 = vmul.f32 %v363_v29, %v352_v33  ;;  %v102_v23 = vsel %vm100_vm5, %v41_v22, 0.0  ;;  %vm647_vm5 = vweird.f32 %v751_v5 }
 0xa4e   :  { %368 = vadd.xlane.f32.xlu0 %v367_v34  ;;  %v359_v35 = vpop.xlane.xlu1 %358 }
 0xa4f   :  { %v360_v36 = vsel %vm348_vm15, %v359_v35, %v342_v25  ;;  %v107_v35 = vsel %vm106_vm8, %v41_v22, 0.0  ;;  %vm584_vm15 = vcmp.eq.s32.totalorder %v745_v2, 29 }
 0xa50   :  { %v375_v37 = vmul.f32 %v363_v29, %v360_v36  ;;  %v452_v29 = vld [vmem:[#allocation2 + $0x17] ss:$0 sm:$0xff] }
 0xa51   :  { %v453_v31 = vxor.u32 2147483648, %v452_v29 }
 0xa52   :  { %376 = vadd.xlane.f32.xlu0 %v375_v37 }
 0xa64   :  { %v373_v39 = vpop.xlane.xlu1 %372 }
 0xa65   :  { %v374_v41 = vsel %vm366_vm0, %v373_v39, %v356_v30 }
 0xa66   :  { %v389_v42 = vmul.f32 %v381_v40, %v374_v41 }
 0xa68   :  { %390 = vadd.xlane.f32.xlu0 %v389_v42 }
 0xadb   :  { %v369_v44 = vpop.xlane.xlu0 %368 }
 0xadc   :  { %v370_v46 = vsel %vm366_vm0, %v369_v44, %v352_v33 }
 0xadd   :  { %v385_v47 = vmul.f32 %v381_v40, %v370_v46 }
 0xadf   :  { %386 = vadd.xlane.f32.xlu1 %v385_v47  ;;  %v377_v48 = vpop.xlane.xlu0 %376 }
 0xae0   :  { %v378_v49 = vsel %vm366_vm0, %v377_v48, %v360_v36  ;;  %vm606_vm0 = vcmp.eq.s32.totalorder %v745_v2, 30 }
 0xae1   :  { %v393_v50 = vmul.f32 %v381_v40, %v378_v49 }
 0xae3   :  { %394 = vadd.xlane.f32.xlu1 %v393_v50  ;;  %v142_v50 = vsel %vm141_vm9, -1.0, %v731_v53 }
 0xaf5   :  { %v391_v52 = vpop.xlane.xlu0 %390 }
 0xaf6   :  { %v392_v55 = vsel %vm384_vm2, %v391_v52, %v374_v41 }
 0xaf7   :  { %v407_v56 = vmul.f32 %v399_v54, %v392_v55 }
 0xaf9   :  { %408 = vadd.xlane.f32.xlu1 %v407_v56 }
 0xb6c   :  { %v387_v57 = vpop.xlane.xlu1 %386 }
 0xb6d   :  { %v388_v58 = vsel %vm384_vm2, %v387_v57, %v370_v46 }
 0xb6e   :  { %v403_v59 = vmul.f32 %v399_v54, %v388_v58 }
 0xb70   :  { %404 = vadd.xlane.f32.xlu0 %v403_v59  ;;  %v395_v60 = vpop.xlane.xlu1 %394 }
 0xb71   :  { %v396_v61 = vsel %vm384_vm2, %v395_v60, %v378_v49  ;;  %vm628_vm2 = vcmp.eq.s32.totalorder %v745_v2, 31 }
 0xb72   :  { %v411_v63 = vmul.f32 %v399_v54, %v396_v61 }
 0xb74   :  { %412 = vadd.xlane.f32.xlu0 %v411_v63 }
 0xb86   :  { %v409_v4 = vpop.xlane.xlu1 %408 }
 0xb87   :  { %v410_v8 = vsel %vm402_vm3, %v409_v4, %v392_v55 }
 0xb88   :  { %v425_v9 = vmul.f32 %v417_v6, %v410_v8 }
 0xb8a   :  { %426 = vadd.xlane.f32.xlu0 %v425_v9 }
 0xbfd   :  { %v405_v10 = vpop.xlane.xlu0 %404 }
 0xbfe   :  { %v406_v11 = vsel %vm402_vm3, %v405_v10, %v388_v58 }
 0xbff   :  { %v421_v12 = vmul.f32 %v417_v6, %v406_v11 }
 0xc01   :  { %422 = vadd.xlane.f32.xlu1 %v421_v12  ;;  %v413_v13 = vpop.xlane.xlu0 %412 }
 0xc02   :  { %v414_v14 = vsel %vm402_vm3, %v413_v13, %v396_v61  ;;  %vm652_vm3 = vweird.f32 %v775_v43 }
 0xc03   :  { %v429_v15 = vmul.f32 %v417_v6, %v414_v14 }
 0xc05   :  { %430 = vadd.xlane.f32.xlu1 %v429_v15 }
 0xc17   :  { %v427_v18 = vpop.xlane.xlu0 %426 }
 0xc18   :  { %v428_v20 = vsel %vm420_vm4, %v427_v18, %v410_v8 }
 0xc19   :  { %v443_v21 = vmul.f32 %v435_v19, %v428_v20 }
 0xc1b   :  { %444 = vadd.xlane.f32.xlu1 %v443_v21 }
 0xc1f   :  { %103 = vadd.xlane.f32.xlu1 %v102_v23 }
 0xc8e   :  { %v423_v24 = vpop.xlane.xlu1 %422 }
 0xc8f   :  { %v424_v25 = vsel %vm420_vm4, %v423_v24, %v406_v11 }
 0xc90   :  { %v439_v3 = vmul.f32 %v435_v19, %v424_v25 }
 0xc92   :  { %440 = vadd.xlane.f32.xlu0 %v439_v3  ;;  %v431_v26 = vpop.xlane.xlu1 %430 }
 0xc93   :  { %v432_v27 = vsel %vm420_vm4, %v431_v26, %v414_v14 }
 0xc94   :  { %v447_v28 = vmul.f32 %v435_v19, %v432_v27 }
 0xc96   :  { %448 = vadd.xlane.f32.xlu0 %v447_v28 }
 0xca8   :  { %v445_v30 = vpop.xlane.xlu1 %444 }
 0xca9   :  { %v446_v32 = vsel %vm438_vm6, %v445_v30, %v428_v20 }
 0xcaa   :  { %v461_v33 = vmul.f32 %v453_v31, %v446_v32 }
 0xcac   :  { %462 = vadd.xlane.f32.xlu1 %v461_v33  ;;  %v832_v34 = vpop.xlane.xlu1 %103 }
 0xcad   :  { %728 = vrcp.f32 %v832_v34  ;;  %vm664_vm4 = vweird.f32 %v832_v34 }
 0xcb7   :  { %v838_v36 = vpop.eup %728 }
 0xcb8   :  { %v109_v37 = vmul.f32 %v838_v36, %v107_v35 }
 0xcba   :  { %110 = vst [vmem:[#allocation2 + $0x18] sm:$0xff] %v109_v37 }
 0xcc1   :  { %v470_v46 = vld [vmem:[#allocation2 + $0x18] ss:$0 sm:$0xff]  ;;  %v492_v60 = vld [vmem:[#allocation2 + $0x19] ss:$0 sm:$0xff]  ;;  %v514_v15 = vld [vmem:[#allocation2 + $0x1a] ss:$0 sm:$0xff] }
 0xcc2   :  { %v471_v47 = vxor.u32 2147483648, %v470_v46  ;;  %v493_v63 = vxor.u32 2147483648, %v492_v60  ;;  %v515_v17 = vxor.u32 2147483648, %v514_v15  ;;  %v536_v28 = vld [vmem:[#allocation2 + $0x1b] ss:$0 sm:$0xff] }
 0xcc3   :  { %v537_v30 = vxor.u32 2147483648, %v536_v28  ;;  %v558_v46 = vld [vmem:[#allocation2 + $0x1c] ss:$0 sm:$0xff] }
 0xcc4   :  { %v487_v52 = vmul.f32 %v471_v47, %v142_v50 }
 0xd1f   :  { %v441_v38 = vpop.xlane.xlu0 %440 }
 0xd20   :  { %v442_v39 = vsel %vm438_vm6, %v441_v38, %v424_v25 }
 0xd21   :  { %v457_v40 = vmul.f32 %v453_v31, %v442_v39 }
 0xd23   :  { %458 = vadd.xlane.f32.xlu0 %v457_v40  ;;  %v449_v41 = vpop.xlane.xlu0 %448 }
 0xd24   :  { %v450_v42 = vsel %vm438_vm6, %v449_v41, %v432_v27  ;;  %vm658_vm6 = vweird.f32 %v800_v62 }
 0xd25   :  { %v465_v44 = vmul.f32 %v453_v31, %v450_v42 }
 0xd27   :  { %466 = vadd.xlane.f32.xlu0 %v465_v44 }
 0xd39   :  { %v463_v48 = vpop.xlane.xlu1 %462 }
 0xd3a   :  { %v464_v49 = vsel %vm456_vm1, %v463_v48, %v446_v32  ;;  %v559_v48 = vxor.u32 2147483648, %v558_v46 }
 0xd3b   :  { %v479_v51 = vmul.f32 %v471_v47, %v464_v49 }
 0xd3d   :  { %480 = vadd.xlane.f32.xlu0 %v479_v51 }
 0xd41   :  { %488 = vadd.xlane.f32.xlu0 %v487_v52 }
 0xdb0   :  { %v459_v54 = vpop.xlane.xlu0 %458 }
 0xdb1   :  { %v460_v55 = vsel %vm456_vm1, %v459_v54, %v442_v39 }
 0xdb2   :  { %v475_v56 = vmul.f32 %v471_v47, %v460_v55 }
 0xdb4   :  { %v467_v57 = vpop.xlane.xlu0 %466  ;;  %476 = vadd.xlane.f32.xlu1 %v475_v56 }
 0xdb5   :  { %v468_v58 = vsel %vm456_vm1, %v467_v57, %v450_v42 }
 0xdb6   :  { %v483_v59 = vmul.f32 %v471_v47, %v468_v58 }
 0xdb8   :  { %484 = vadd.xlane.f32.xlu1 %v483_v59 }
 0xdca   :  { %v481_v61 = vpop.xlane.xlu0 %480 }
 0xdcb   :  { %v482_v1 = vsel %vm474_vm10, %v481_v61, %v464_v49  ;;  %v580_v61 = vld [vmem:[#allocation2 + $0x1d] ss:$0 sm:$0xff] }
 0xdcc   :  { %v501_v4 = vmul.f32 %v493_v63, %v482_v1 }
 0xdce   :  { %502 = vadd.xlane.f32.xlu0 %v501_v4  ;;  %v489_v53 = vpop.xlane.xlu0 %488 }
 0xdcf   :  { %v490_v6 = vsel %vm474_vm10, %v489_v53, %v142_v50 }
 0xdd0   :  { %v509_v8 = vmul.f32 %v493_v63, %v490_v6 }
 0xdd2   :  { %510 = vadd.xlane.f32.xlu0 %v509_v8 }
 0xe41   :  { %v477_v9 = vpop.xlane.xlu1 %476 }
 0xe42   :  { %v478_v10 = vsel %vm474_vm10, %v477_v9, %v460_v55 }
 0xe43   :  { %v497_v11 = vmul.f32 %v493_v63, %v478_v10 }
 0xe45   :  { %498 = vadd.xlane.f32.xlu1 %v497_v11  ;;  %v485_v12 = vpop.xlane.xlu1 %484 }
 0xe46   :  { %v486_v13 = vsel %vm474_vm10, %v485_v12, %v468_v58 }
 0xe47   :  { %v505_v14 = vmul.f32 %v493_v63, %v486_v13 }
 0xe49   :  { %506 = vadd.xlane.f32.xlu1 %v505_v14 }
 0xe5b   :  { %v503_v16 = vpop.xlane.xlu0 %502 }
 0xe5c   :  { %v504_v18 = vsel %vm496_vm11, %v503_v16, %v482_v1  ;;  %v581_v1 = vxor.u32 2147483648, %v580_v61  ;;  %v602_v16 = vld [vmem:[#allocation2 + $0x1e] ss:$0 sm:$0xff] }
 0xe5d   :  { %v523_v19 = vmul.f32 %v515_v17, %v504_v18 }
 0xe5f   :  { %524 = vadd.xlane.f32.xlu0 %v523_v19  ;;  %v511_v20 = vpop.xlane.xlu0 %510 }
 0xe60   :  { %v512_v21 = vsel %vm496_vm11, %v511_v20, %v490_v6 }
 0xe61   :  { %v531_v22 = vmul.f32 %v515_v17, %v512_v21 }
 0xe63   :  { %532 = vadd.xlane.f32.xlu0 %v531_v22 }
 0xed2   :  { %v499_v23 = vpop.xlane.xlu1 %498 }
 0xed3   :  { %v500_v24 = vsel %vm496_vm11, %v499_v23, %v478_v10 }
 0xed4   :  { %v519_v25 = vmul.f32 %v515_v17, %v500_v24 }
 0xed6   :  { %520 = vadd.xlane.f32.xlu1 %v519_v25  ;;  %v507_v3 = vpop.xlane.xlu1 %506 }
 0xed7   :  { %v508_v26 = vsel %vm496_vm11, %v507_v3, %v486_v13 }
 0xed8   :  { %v527_v27 = vmul.f32 %v515_v17, %v508_v26 }
 0xeda   :  { %528 = vadd.xlane.f32.xlu1 %v527_v27 }
 0xeec   :  { %v525_v29 = vpop.xlane.xlu0 %524 }
 0xeed   :  { %v526_v31 = vsel %vm518_vm12, %v525_v29, %v504_v18  ;;  %v603_v18 = vxor.u32 2147483648, %v602_v16  ;;  %v624_v29 = vld [vmem:[#allocation2 + $0x1f] ss:$0 sm:$0xff] }
 0xeee   :  { %v545_v32 = vmul.f32 %v537_v30, %v526_v31 }
 0xef0   :  { %546 = vadd.xlane.f32.xlu0 %v545_v32  ;;  %v533_v33 = vpop.xlane.xlu0 %532 }
 0xef1   :  { %v534_v35 = vsel %vm518_vm12, %v533_v33, %v512_v21 }
 0xef2   :  { %v553_v37 = vmul.f32 %v537_v30, %v534_v35 }
 0xef4   :  { %554 = vadd.xlane.f32.xlu0 %v553_v37 }
 0xf63   :  { %v521_v38 = vpop.xlane.xlu1 %520 }
 0xf64   :  { %v522_v39 = vsel %vm518_vm12, %v521_v38, %v500_v24 }
 0xf65   :  { %v541_v40 = vmul.f32 %v537_v30, %v522_v39 }
 0xf67   :  { %542 = vadd.xlane.f32.xlu1 %v541_v40  ;;  %v529_v41 = vpop.xlane.xlu1 %528 }
 0xf68   :  { %v530_v42 = vsel %vm518_vm12, %v529_v41, %v508_v26 }
 0xf69   :  { %v549_v44 = vmul.f32 %v537_v30, %v530_v42 }
 0xf6b   :  { %550 = vadd.xlane.f32.xlu1 %v549_v44 }
 0xf7d   :  { %v547_v47 = vpop.xlane.xlu0 %546 }
 0xf7e   :  { %v548_v49 = vsel %vm540_vm13, %v547_v47, %v526_v31  ;;  %v625_v31 = vxor.u32 2147483648, %v624_v29 }
 0xf7f   :  { %v567_v50 = vmul.f32 %v559_v48, %v548_v49 }
 0xf81   :  { %568 = vadd.xlane.f32.xlu0 %v567_v50  ;;  %v555_v51 = vpop.xlane.xlu0 %554 }
 0xf82   :  { %v556_v52 = vsel %vm540_vm13, %v555_v51, %v534_v35 }
 0xf83   :  { %v575_v54 = vmul.f32 %v559_v48, %v556_v52 }
 0xf85   :  { %576 = vadd.xlane.f32.xlu0 %v575_v54 }
 0xff4   :  { %v543_v55 = vpop.xlane.xlu1 %542 }
 0xff5   :  { %v544_v56 = vsel %vm540_vm13, %v543_v55, %v522_v39 }
 0xff6   :  { %v563_v57 = vmul.f32 %v559_v48, %v544_v56 }
 0xff8   :  { %564 = vadd.xlane.f32.xlu1 %v563_v57  ;;  %v551_v58 = vpop.xlane.xlu1 %550 }
 0xff9   :  { %v552_v59 = vsel %vm540_vm13, %v551_v58, %v530_v42 }
 0xffa   :  { %v571_v60 = vmul.f32 %v559_v48, %v552_v59 }
 0xffc   :  { %572 = vadd.xlane.f32.xlu1 %v571_v60 }
0x100e   :  { %v569_v63 = vpop.xlane.xlu0 %568 }
0x100f   :  { %v570_v4 = vsel %vm562_vm14, %v569_v63, %v548_v49 }
0x1010   :  { %v589_v53 = vmul.f32 %v581_v1, %v570_v4 }
0x1012   :  { %590 = vadd.xlane.f32.xlu0 %v589_v53  ;;  %v577_v6 = vpop.xlane.xlu0 %576 }
0x1013   :  { %v578_v8 = vsel %vm562_vm14, %v577_v6, %v556_v52 }
0x1014   :  { %v597_v9 = vmul.f32 %v581_v1, %v578_v8 }
0x1016   :  { %598 = vadd.xlane.f32.xlu0 %v597_v9 }
0x1085   :  { %v565_v10 = vpop.xlane.xlu1 %564 }
0x1086   :  { %v566_v11 = vsel %vm562_vm14, %v565_v10, %v544_v56 }
0x1087   :  { %v585_v12 = vmul.f32 %v581_v1, %v566_v11 }
0x1089   :  { %586 = vadd.xlane.f32.xlu1 %v585_v12  ;;  %v573_v13 = vpop.xlane.xlu1 %572 }
0x108a   :  { %v574_v14 = vsel %vm562_vm14, %v573_v13, %v552_v59 }
0x108b   :  { %v593_v15 = vmul.f32 %v581_v1, %v574_v14 }
0x108d   :  { %594 = vadd.xlane.f32.xlu1 %v593_v15 }
0x109f   :  { %v591_v17 = vpop.xlane.xlu0 %590 }
0x10a0   :  { %v592_v19 = vsel %vm584_vm15, %v591_v17, %v570_v4 }
0x10a1   :  { %v611_v20 = vmul.f32 %v603_v18, %v592_v19 }
0x10a3   :  { %612 = vadd.xlane.f32.xlu0 %v611_v20  ;;  %v599_v21 = vpop.xlane.xlu0 %598 }
0x10a4   :  { %v600_v22 = vsel %vm584_vm15, %v599_v21, %v578_v8 }
0x10a5   :  { %v619_v23 = vmul.f32 %v603_v18, %v600_v22 }
0x10a7   :  { %620 = vadd.xlane.f32.xlu0 %v619_v23 }
0x1116   :  { %v587_v24 = vpop.xlane.xlu1 %586 }
0x1117   :  { %v588_v25 = vsel %vm584_vm15, %v587_v24, %v566_v11 }
0x1118   :  { %v607_v3 = vmul.f32 %v603_v18, %v588_v25 }
0x111a   :  { %608 = vadd.xlane.f32.xlu1 %v607_v3  ;;  %v595_v26 = vpop.xlane.xlu1 %594 }
0x111b   :  { %v596_v27 = vsel %vm584_vm15, %v595_v26, %v574_v14 }
0x111c   :  { %v615_v28 = vmul.f32 %v603_v18, %v596_v27 }
0x111e   :  { %616 = vadd.xlane.f32.xlu1 %v615_v28 }
0x1130   :  { %v613_v30 = vpop.xlane.xlu0 %612 }
0x1131   :  { %v614_v32 = vsel %vm606_vm0, %v613_v30, %v592_v19 }
0x1132   :  { %v633_v33 = vmul.f32 %v625_v31, %v614_v32 }
0x1134   :  { %634 = vadd.xlane.f32.xlu0 %v633_v33  ;;  %v621_v35 = vpop.xlane.xlu0 %620 }
0x1135   :  { %v622_v37 = vsel %vm606_vm0, %v621_v35, %v600_v22 }
0x1136   :  { %v641_v38 = vmul.f32 %v625_v31, %v622_v37 }
0x1138   :  { %642 = vadd.xlane.f32.xlu0 %v641_v38 }
0x11a7   :  { %v609_v39 = vpop.xlane.xlu1 %608 }
0x11a8   :  { %v610_v40 = vsel %vm606_vm0, %v609_v39, %v588_v25 }
0x11a9   :  { %v629_v41 = vmul.f32 %v625_v31, %v610_v40 }
0x11ab   :  { %630 = vadd.xlane.f32.xlu1 %v629_v41  ;;  %v617_v42 = vpop.xlane.xlu1 %616 }
0x11ac   :  { %v618_v44 = vsel %vm606_vm0, %v617_v42, %v596_v27 }
0x11ad   :  { %v637_v46 = vmul.f32 %v625_v31, %v618_v44 }
0x11af   :  { %638 = vadd.xlane.f32.xlu1 %v637_v46 }
0x11c1   :  { %v635_v47 = vpop.xlane.xlu0 %634 }
0x11c2   :  { %v636_v48 = vsel %vm628_vm2, %v635_v47, %v614_v32 }
0x11c3   :  { %v651_v49 = vmul.f32 %v781_v45, %v636_v48 }
0x11c5   :  { %v653_v50 = vsel %vm652_vm3, %v636_v48, %v651_v49  ;;  %v643_v51 = vpop.xlane.xlu0 %642 }
0x11c6   :  { %704 = vst [vmem:[%s885_s1 + $0x8] sm:$0xff] %v653_v50  ;;  %v644_v52 = vsel %vm628_vm2, %v643_v51, %v622_v37 }
0x11c7   :  { %v663_v54 = vmul.f32 %v838_v36, %v644_v52 }
0x11c9   :  { %v665_v55 = vsel %vm664_vm4, %v644_v52, %v663_v54 }
0x11ca   :  { %708 = vst [vmem:[%s885_s1 + $0x18] sm:$0xff] %v665_v55 }
0x1238   :  { %v631_v45 = vpop.xlane.xlu1 %630 }
0x1239   :  { %v632_v43 = vsel %vm628_vm2, %v631_v45, %v610_v40 }
0x123a   :  { %v646_v56 = vmul.f32 %v759_v7, %v632_v43 }
0x123c   :  { %v648_v57 = vsel %vm647_vm5, %v632_v43, %v646_v56  ;;  %v639_v58 = vpop.xlane.xlu1 %638 }
0x123d   :  { %702 = vst [vmem:[%s885_s1] sm:$0xff] %v648_v57  ;;  %v640_v34 = vsel %vm628_vm2, %v639_v58, %v618_v44 }
0x123e   :  { %v657_v36 = vmul.f32 %v806_v0, %v640_v34 }
0x1240   :  { %v659_v59 = vsel %vm658_vm6, %v640_v34, %v657_v36 }
0x1241   :  { %706 = vst [vmem:[%s885_s1 + $0x10] sm:$0xff] %v659_v59 }

// kernel: custom-call.10
= control target key start
LH: loop header
LB: loop body
LE: loop exit
PB: predicated region body
PF: predicated region fallthrough
CT: control target
= control target key end

     0   :  { %v592_v0 = vmov 0.0   ;;  %vm41_vm0 = vcmask 7168   ;;  %vm72_vm1 = vcmask 15368   ;;  %vm89_vm2 = vcmask 1047553   ;;  %s676_s0 = inlined_call_operand.vmem [shape: f32[16,16], index: 0, kind: input, shape index: {}]   ;;  %s677_s1 = inlined_call_operand.vmem [shape: f32[16,16], index: 1, kind: output, shape index: {}]  }
   0x1   :  { %38 = vst [vmem:[#allocation1] sm:$0xff] %v592_v0  ;;  %v606_v4 = vld [vmem:[%s676_s0] sm:$0xff]  ;;  %v612_v5 = vld [vmem:[%s676_s0 + $0x8] sm:$0xff]  ;;  %vm90_vm3 = vmand %vm72_vm1, %vm89_vm2  ;;  %vm107_vm4 = vcmask 23568   ;;  %vm124_vm5 = vcmask 1047554   ;;  %vm142_vm7 = vcmask 31768  }
   0x2   :  { %32 = vst [vmem:[#allocation0] sm:$0xff] %v606_v4  ;;  %34 = vst [vmem:[#allocation0 + $0x8] sm:$0xff] %v612_v5  ;;  %vm159_vm8 = vcmask 1047555   ;;  %vm177_vm10 = vcmask 39968   ;;  %vm194_vm11 = vcmask 1047556   ;;  %vm212_vm13 = vcmask 48168  }
   0x3   :  { %vm125_vm6 = vmand %vm107_vm4, %vm124_vm5  ;;  %vm229_vm14 = vcmask 1047557  }
   0x4   :  { %vm160_vm9 = vmand %vm142_vm7, %vm159_vm8 }
   0x5   :  { %vm195_vm12 = vmand %vm177_vm10, %vm194_vm11 }
   0x6   :  { %vm230_vm15 = vmand %vm212_vm13, %vm229_vm14 }
   0x8   :  { %v42_v1 = vld [vmem:[#allocation1] ss:$0 sm:$0xff] }
   0x9   :  { %v44_v2 = vmul.f32 %v42_v1, %v42_v1  ;;  %v63_v3 = vmul.f32 0.0, %v42_v1  ;;  %v43_v6 = vld [vmem:[#allocation0] ss:$0 sm:$0xff]  ;;  %v76_v22 = vld [vmem:[#allocation0 + $0x1] ss:$0 sm:$0xff] }
   0xa   :  { %v111_v40 = vld [vmem:[#allocation0 + $0x2] ss:$0 sm:$0xff]  ;;  %v146_v58 = vld [vmem:[#allocation0 + $0x3] ss:$0 sm:$0xff] }
   0xb   :  { %45 = vadd.xlane.f32.xlu0 %v44_v2  ;;  %64 = vadd.xlane.f32.xlu1 %v63_v3 }
   0xf   :  { %52 = vadd.xlane.f32.xlu0 %v63_v3 }
  0x98   :  { %v46_v7 = vpop.xlane.xlu0 %45  ;;  %v65_v13 = vpop.xlane.xlu1 %64 }
  0x99   :  { %v47_v8 = vsub.f32 %v43_v6, %v46_v7  ;;  %v66_v15 = vsub.f32 %v612_v5, %v65_v13 }
  0x9b   :  { %560 = vrsqrt.f32 %v47_v8 }
  0x9c   :  { %v53_v9 = vpop.xlane.xlu0 %52 }
  0x9d   :  { %v54_v10 = vsub.f32 %v606_v4, %v53_v9 }
  0xa5   :  { %v561_v11 = vpop.eup %560 }
  0xa6   :  { %v55_v12 = vmul.f32 %v561_v11, %v54_v10  ;;  %v67_v16 = vmul.f32 %v561_v11, %v66_v15 }
  0xa8   :  { %v56_v14 = vsel %vm41_vm0, %v55_v12, 0.0  ;;  %v68_v17 = vsel %vm41_vm0, %v67_v16, 0.0  ;;  %vm247_vm0 = vcmask 56368  }
  0xa9   :  { %58 = vst [vmem:[#allocation1] sm:$0xff] %v56_v14 }
  0xb0   :  { %v74_v18 = vld [vmem:[#allocation1 + $0x1] ss:$0 sm:$0xff] }
  0xb1   :  { %v84_v19 = vmul.f32 %v74_v18, %v56_v14  ;;  %v77_v20 = vmul.f32 %v74_v18, %v74_v18  ;;  %v98_v21 = vmul.f32 %v74_v18, %v68_v17 }
  0xb3   :  { %85 = vadd.xlane.f32.xlu0 %v84_v19  ;;  %78 = vadd.xlane.f32.xlu1 %v77_v20 }
  0xb7   :  { %99 = vadd.xlane.f32.xlu1 %v98_v21 }
 0x140   :  { %v79_v23 = vpop.xlane.xlu1 %78  ;;  %v86_v25 = vpop.xlane.xlu0 %85 }
 0x141   :  { %v80_v24 = vsub.f32 %v76_v22, %v79_v23  ;;  %v87_v26 = vsub.f32 %v606_v4, %v86_v25 }
 0x143   :  { %562 = vrsqrt.f32 %v80_v24 }
 0x144   :  { %v100_v31 = vpop.xlane.xlu1 %99 }
 0x145   :  { %v101_v32 = vsub.f32 %v612_v5, %v100_v31 }
 0x14d   :  { %v563_v27 = vpop.eup %562 }
 0x14e   :  { %v88_v28 = vmul.f32 %v563_v27, %v87_v26  ;;  %v102_v33 = vmul.f32 %v563_v27, %v101_v32  ;;  %v216_v32 = vld [vmem:[#allocation0 + $0x5] ss:$0 sm:$0xff] }
 0x150   :  { %v91_v29 = vsel %vm90_vm3, %v88_v28, 0.0  ;;  %v103_v34 = vsel %vm72_vm1, %v102_v33, 0.0  ;;  %vm264_vm1 = vcmask 1047558  }
 0x151   :  { %v92_v30 = vadd.f32 %v91_v29, %v56_v14  ;;  %v104_v38 = vadd.f32 %v103_v34, %v68_v17  ;;  %v181_v14 = vld [vmem:[#allocation0 + $0x4] ss:$0 sm:$0xff]  ;;  %vm265_vm3 = vmand %vm247_vm0, %vm264_vm1 }
 0x153   :  { %93 = vst [vmem:[#allocation1] sm:$0xff] %v92_v30 }
 0x15a   :  { %v109_v35 = vld [vmem:[#allocation1 + $0x2] ss:$0 sm:$0xff] }
 0x15b   :  { %v119_v36 = vmul.f32 %v109_v35, %v92_v30  ;;  %v112_v37 = vmul.f32 %v109_v35, %v109_v35  ;;  %v133_v39 = vmul.f32 %v109_v35, %v104_v38 }
 0x15d   :  { %120 = vadd.xlane.f32.xlu1 %v119_v36  ;;  %113 = vadd.xlane.f32.xlu0 %v112_v37 }
 0x161   :  { %134 = vadd.xlane.f32.xlu0 %v133_v39 }
 0x1ea   :  { %v114_v41 = vpop.xlane.xlu0 %113  ;;  %v121_v43 = vpop.xlane.xlu1 %120 }
 0x1eb   :  { %v115_v42 = vsub.f32 %v111_v40, %v114_v41  ;;  %v122_v44 = vsub.f32 %v606_v4, %v121_v43 }
 0x1ed   :  { %564 = vrsqrt.f32 %v115_v42 }
 0x1ee   :  { %v135_v49 = vpop.xlane.xlu0 %134 }
 0x1ef   :  { %v136_v50 = vsub.f32 %v612_v5, %v135_v49 }
 0x1f7   :  { %v565_v45 = vpop.eup %564 }
 0x1f8   :  { %v123_v46 = vmul.f32 %v565_v45, %v122_v44  ;;  %v137_v51 = vmul.f32 %v565_v45, %v136_v50  ;;  %v251_v50 = vld [vmem:[#allocation0 + $0x6] ss:$0 sm:$0xff] }
 0x1fa   :  { %v126_v47 = vsel %vm125_vm6, %v123_v46, 0.0  ;;  %v138_v52 = vsel %vm107_vm4, %v137_v51, 0.0  ;;  %vm282_vm4 = vcmask 64568   ;;  %vm317_vm6 = vcmask 72768  }
 0x1fb   :  { %v127_v48 = vadd.f32 %v126_v47, %v92_v30  ;;  %v139_v56 = vadd.f32 %v138_v52, %v104_v38 }
 0x1fd   :  { %128 = vst [vmem:[#allocation1] sm:$0xff] %v127_v48 }
 0x204   :  { %v144_v53 = vld [vmem:[#allocation1 + $0x3] ss:$0 sm:$0xff] }
 0x205   :  { %v154_v54 = vmul.f32 %v144_v53, %v127_v48  ;;  %v147_v55 = vmul.f32 %v144_v53, %v144_v53  ;;  %v168_v57 = vmul.f32 %v144_v53, %v139_v56 }
 0x207   :  { %155 = vadd.xlane.f32.xlu0 %v154_v54  ;;  %148 = vadd.xlane.f32.xlu1 %v147_v55 }
 0x20b   :  { %169 = vadd.xlane.f32.xlu1 %v168_v57 }
 0x294   :  { %v149_v59 = vpop.xlane.xlu1 %148  ;;  %v156_v61 = vpop.xlane.xlu0 %155 }
 0x295   :  { %v150_v60 = vsub.f32 %v146_v58, %v149_v59  ;;  %v157_v62 = vsub.f32 %v606_v4, %v156_v61 }
 0x297   :  { %566 = vrsqrt.f32 %v150_v60 }
 0x298   :  { %v170_v3 = vpop.xlane.xlu1 %169 }
 0x299   :  { %v171_v6 = vsub.f32 %v612_v5, %v170_v3  ;;  %v286_v3 = vld [vmem:[#allocation0 + $0x7] ss:$0 sm:$0xff] }
 0x2a1   :  { %v567_v63 = vpop.eup %566 }
 0x2a2   :  { %v158_v0 = vmul.f32 %v567_v63, %v157_v62  ;;  %v172_v7 = vmul.f32 %v567_v63, %v171_v6 }
 0x2a4   :  { %v161_v1 = vsel %vm160_vm9, %v158_v0, 0.0  ;;  %v173_v8 = vsel %vm142_vm7, %v172_v7, 0.0  ;;  %vm340_vm7 = vcmask 80968  }
 0x2a5   :  { %v162_v2 = vadd.f32 %v161_v1, %v127_v48  ;;  %v174_v12 = vadd.f32 %v173_v8, %v139_v56  ;;  %vm360_vm9 = vmand %vm340_vm7, %vm89_vm2 }
 0x2a7   :  { %163 = vst [vmem:[#allocation1] sm:$0xff] %v162_v2 }
 0x2ae   :  { %v179_v9 = vld [vmem:[#allocation1 + $0x4] ss:$0 sm:$0xff] }
 0x2af   :  { %v189_v10 = vmul.f32 %v179_v9, %v162_v2  ;;  %v182_v11 = vmul.f32 %v179_v9, %v179_v9  ;;  %v203_v13 = vmul.f32 %v179_v9, %v174_v12 }
 0x2b1   :  { %190 = vadd.xlane.f32.xlu1 %v189_v10  ;;  %183 = vadd.xlane.f32.xlu0 %v182_v11 }
 0x2b5   :  { %204 = vadd.xlane.f32.xlu0 %v203_v13 }
 0x33e   :  { %v184_v15 = vpop.xlane.xlu0 %183  ;;  %v191_v17 = vpop.xlane.xlu1 %190 }
 0x33f   :  { %v185_v16 = vsub.f32 %v181_v14, %v184_v15  ;;  %v192_v18 = vsub.f32 %v606_v4, %v191_v17  ;;  %v321_v17 = vld [vmem:[#allocation0 + $0x8] ss:$0 sm:$0xff] }
 0x341   :  { %568 = vrsqrt.f32 %v185_v16 }
 0x342   :  { %v205_v23 = vpop.xlane.xlu0 %204 }
 0x343   :  { %v206_v24 = vsub.f32 %v612_v5, %v205_v23 }
 0x34b   :  { %v569_v19 = vpop.eup %568 }
 0x34c   :  { %v193_v20 = vmul.f32 %v569_v19, %v192_v18  ;;  %v207_v25 = vmul.f32 %v569_v19, %v206_v24 }
 0x34e   :  { %v196_v21 = vsel %vm195_vm12, %v193_v20, 0.0  ;;  %v208_v26 = vsel %vm177_vm10, %v207_v25, 0.0  ;;  %vm365_vm10 = vcmask 89168   ;;  %vm390_vm12 = vcmask 97368  }
 0x34f   :  { %v197_v22 = vadd.f32 %v196_v21, %v162_v2  ;;  %v209_v30 = vadd.f32 %v208_v26, %v174_v12  ;;  %vm385_vm2 = vmand %vm365_vm10, %vm124_vm5 }
 0x350   :  { %vm410_vm5 = vmand %vm390_vm12, %vm159_vm8 }
 0x351   :  { %198 = vst [vmem:[#allocation1] sm:$0xff] %v197_v22 }
 0x358   :  { %v214_v27 = vld [vmem:[#allocation1 + $0x5] ss:$0 sm:$0xff] }
 0x359   :  { %v224_v28 = vmul.f32 %v214_v27, %v197_v22  ;;  %v217_v29 = vmul.f32 %v214_v27, %v214_v27  ;;  %v238_v31 = vmul.f32 %v214_v27, %v209_v30 }
 0x35b   :  { %225 = vadd.xlane.f32.xlu0 %v224_v28  ;;  %218 = vadd.xlane.f32.xlu1 %v217_v29  ;;  %v344_v29 = vld [vmem:[#allocation0 + $0x9] ss:$0 sm:$0xff] }
 0x35f   :  { %239 = vadd.xlane.f32.xlu1 %v238_v31 }
 0x3e8   :  { %v219_v33 = vpop.xlane.xlu1 %218  ;;  %v226_v35 = vpop.xlane.xlu0 %225 }
 0x3e9   :  { %v220_v34 = vsub.f32 %v216_v32, %v219_v33  ;;  %v227_v36 = vsub.f32 %v606_v4, %v226_v35 }
 0x3eb   :  { %570 = vrsqrt.f32 %v220_v34 }
 0x3ec   :  { %v240_v41 = vpop.xlane.xlu1 %239 }
 0x3ed   :  { %v241_v42 = vsub.f32 %v612_v5, %v240_v41  ;;  %v369_v41 = vld [vmem:[#allocation0 + $0xa] ss:$0 sm:$0xff] }
 0x3f5   :  { %v571_v37 = vpop.eup %570 }
 0x3f6   :  { %v228_v38 = vmul.f32 %v571_v37, %v227_v36  ;;  %v242_v43 = vmul.f32 %v571_v37, %v241_v42 }
 0x3f8   :  { %v231_v39 = vsel %vm230_vm15, %v228_v38, 0.0  ;;  %v243_v44 = vsel %vm212_vm13, %v242_v43, 0.0  ;;  %vm415_vm13 = vcmask 105568   ;;  %vm440_vm15 = vcmask 113768  }
 0x3f9   :  { %v232_v40 = vadd.f32 %v231_v39, %v197_v22  ;;  %v244_v48 = vadd.f32 %v243_v44, %v209_v30  ;;  %vm435_vm8 = vmand %vm415_vm13, %vm194_vm11 }
 0x3fa   :  { %vm460_vm11 = vmand %vm440_vm15, %vm229_vm14 }
 0x3fb   :  { %233 = vst [vmem:[#allocation1] sm:$0xff] %v232_v40 }
 0x402   :  { %v249_v45 = vld [vmem:[#allocation1 + $0x6] ss:$0 sm:$0xff] }
 0x403   :  { %v259_v46 = vmul.f32 %v249_v45, %v232_v40  ;;  %v252_v47 = vmul.f32 %v249_v45, %v249_v45  ;;  %v273_v49 = vmul.f32 %v249_v45, %v244_v48 }
 0x405   :  { %260 = vadd.xlane.f32.xlu1 %v259_v46  ;;  %253 = vadd.xlane.f32.xlu0 %v252_v47 }
 0x409   :  { %274 = vadd.xlane.f32.xlu0 %v273_v49 }
 0x492   :  { %v254_v51 = vpop.xlane.xlu0 %253  ;;  %v261_v53 = vpop.xlane.xlu1 %260 }
 0x493   :  { %v255_v52 = vsub.f32 %v251_v50, %v254_v51  ;;  %v262_v54 = vsub.f32 %v606_v4, %v261_v53  ;;  %v394_v53 = vld [vmem:[#allocation0 + $0xb] ss:$0 sm:$0xff] }
 0x495   :  { %572 = vrsqrt.f32 %v255_v52 }
 0x496   :  { %v275_v56 = vpop.xlane.xlu0 %274 }
 0x497   :  { %v276_v59 = vsub.f32 %v612_v5, %v275_v56 }
 0x49f   :  { %v573_v55 = vpop.eup %572 }
 0x4a0   :  { %v263_v57 = vmul.f32 %v573_v55, %v262_v54  ;;  %v277_v61 = vmul.f32 %v573_v55, %v276_v59 }
 0x4a2   :  { %v266_v58 = vsel %vm265_vm3, %v263_v57, 0.0  ;;  %v278_v62 = vsel %vm247_vm0, %v277_v61, 0.0  ;;  %vm299_vm0 = vcmask 1047559   ;;  %vm465_vm3 = vcmask 121968  }
 0x4a3   :  { %v635_v60 = vadd.f32 %v266_v58, %v232_v40  ;;  %v279_v63 = vadd.f32 %v278_v62, %v244_v48  ;;  %vm300_vm14 = vmand %vm282_vm4, %vm299_vm0 }
 0x4a5   :  { %268 = vst [vmem:[#allocation1] sm:$0xff] %v635_v60 }
 0x4ac   :  { %v638_v0 = vld [vmem:[#allocation1 + $0x7] ss:$0 sm:$0xff] }
 0x4ad   :  { %v308_v1 = vmul.f32 %v638_v0, %v279_v63  ;;  %v287_v2 = vmul.f32 %v638_v0, %v638_v0 }
 0x4af   :  { %309 = vadd.xlane.f32.xlu0 %v308_v1  ;;  %288 = vadd.xlane.f32.xlu1 %v287_v2 }
 0x53c   :  { %v289_v6 = vpop.xlane.xlu1 %288  ;;  %v310_v8 = vpop.xlane.xlu0 %309 }
 0x53d   :  { %v290_v7 = vsub.f32 %v286_v3, %v289_v6  ;;  %v311_v9 = vsub.f32 %v612_v5, %v310_v8  ;;  %v419_v3 = vld [vmem:[#allocation0 + $0xc] ss:$0 sm:$0xff] }
 0x53f   :  { %574 = vrsqrt.f32 %v290_v7 }
 0x549   :  { %v644_v10 = vpop.eup %574 }
 0x54a   :  { %v312_v11 = vmul.f32 %v644_v10, %v311_v9 }
 0x54c   :  { %v313_v12 = vsel %vm282_vm4, %v312_v11, 0.0  ;;  %vm490_vm4 = vcmask 130168  }
 0x54d   :  { %v314_v13 = vadd.f32 %v313_v12, %v279_v63 }
 0x54f   :  { %316 = vst [vmem:[#allocation1 + $0x8] sm:$0xff] %v314_v13 }
 0x556   :  { %v319_v14 = vld [vmem:[#allocation1 + $0x8] ss:$0 sm:$0xff] }
 0x557   :  { %v331_v15 = vmul.f32 %v319_v14, %v314_v13  ;;  %v322_v16 = vmul.f32 %v319_v14, %v319_v14 }
 0x559   :  { %332 = vadd.xlane.f32.xlu0 %v331_v15  ;;  %323 = vadd.xlane.f32.xlu1 %v322_v16 }
 0x5e6   :  { %v324_v18 = vpop.xlane.xlu1 %323  ;;  %v333_v20 = vpop.xlane.xlu0 %332 }
 0x5e7   :  { %v325_v19 = vsub.f32 %v321_v17, %v324_v18  ;;  %v334_v21 = vsub.f32 %v612_v5, %v333_v20  ;;  %v444_v18 = vld [vmem:[#allocation0 + $0xd] ss:$0 sm:$0xff] }
 0x5e9   :  { %576 = vrsqrt.f32 %v325_v19 }
 0x5f3   :  { %v577_v22 = vpop.eup %576 }
 0x5f4   :  { %v335_v23 = vmul.f32 %v577_v22, %v334_v21 }
 0x5f6   :  { %v336_v24 = vsel %vm317_vm6, %v335_v23, 0.0  ;;  %vm485_vm6 = vmand %vm465_vm3, %vm264_vm1 }
 0x5f7   :  { %v337_v25 = vadd.f32 %v336_v24, %v314_v13  ;;  %vm510_vm1 = vmand %vm490_vm4, %vm299_vm0 }
 0x5f9   :  { %339 = vst [vmem:[#allocation1 + $0x8] sm:$0xff] %v337_v25 }
 0x600   :  { %v342_v26 = vld [vmem:[#allocation1 + $0x9] ss:$0 sm:$0xff] }
 0x601   :  { %v354_v27 = vmul.f32 %v342_v26, %v337_v25  ;;  %v345_v28 = vmul.f32 %v342_v26, %v342_v26 }
 0x603   :  { %355 = vadd.xlane.f32.xlu0 %v354_v27  ;;  %346 = vadd.xlane.f32.xlu1 %v345_v28 }
 0x690   :  { %v347_v30 = vpop.xlane.xlu1 %346  ;;  %v356_v32 = vpop.xlane.xlu0 %355 }
 0x691   :  { %v348_v31 = vsub.f32 %v344_v29, %v347_v30  ;;  %v357_v33 = vsub.f32 %v612_v5, %v356_v32  ;;  %v294_v30 = vmul.f32 %v638_v0, %v635_v60 }
 0x693   :  { %578 = vrsqrt.f32 %v348_v31  ;;  %v469_v31 = vld [vmem:[#allocation0 + $0xe] ss:$0 sm:$0xff] }
 0x69d   :  { %v579_v34 = vpop.eup %578 }
 0x69e   :  { %v358_v35 = vmul.f32 %v579_v34, %v357_v33 }
 0x6a0   :  { %v361_v36 = vsel %vm360_vm9, %v358_v35, 0.0 }
 0x6a1   :  { %v362_v37 = vadd.f32 %v361_v36, %v337_v25 }
 0x6a3   :  { %364 = vst [vmem:[#allocation1 + $0x8] sm:$0xff] %v362_v37 }
 0x6aa   :  { %v367_v38 = vld [vmem:[#allocation1 + $0xa] ss:$0 sm:$0xff] }
 0x6ab   :  { %v379_v39 = vmul.f32 %v367_v38, %v362_v37  ;;  %v370_v40 = vmul.f32 %v367_v38, %v367_v38 }
 0x6ad   :  { %380 = vadd.xlane.f32.xlu0 %v379_v39  ;;  %371 = vadd.xlane.f32.xlu1 %v370_v40 }
 0x73a   :  { %v372_v42 = vpop.xlane.xlu1 %371  ;;  %v381_v44 = vpop.xlane.xlu0 %380 }
 0x73b   :  { %v373_v43 = vsub.f32 %v369_v41, %v372_v42  ;;  %v382_v45 = vsub.f32 %v612_v5, %v381_v44 }
 0x73d   :  { %580 = vrsqrt.f32 %v373_v43 }
 0x747   :  { %v581_v46 = vpop.eup %580 }
 0x748   :  { %v383_v47 = vmul.f32 %v581_v46, %v382_v45 }
 0x74a   :  { %v386_v48 = vsel %vm385_vm2, %v383_v47, 0.0 }
 0x74b   :  { %v387_v49 = vadd.f32 %v386_v48, %v362_v37 }
 0x74d   :  { %389 = vst [vmem:[#allocation1 + $0x8] sm:$0xff] %v387_v49 }
 0x754   :  { %v392_v50 = vld [vmem:[#allocation1 + $0xb] ss:$0 sm:$0xff] }
 0x755   :  { %v404_v51 = vmul.f32 %v392_v50, %v387_v49  ;;  %v395_v52 = vmul.f32 %v392_v50, %v392_v50 }
 0x757   :  { %405 = vadd.xlane.f32.xlu0 %v404_v51  ;;  %396 = vadd.xlane.f32.xlu1 %v395_v52 }
 0x7e4   :  { %v397_v54 = vpop.xlane.xlu1 %396  ;;  %v406_v56 = vpop.xlane.xlu0 %405 }
 0x7e5   :  { %v398_v55 = vsub.f32 %v394_v53, %v397_v54  ;;  %v407_v57 = vsub.f32 %v612_v5, %v406_v56 }
 0x7e7   :  { %582 = vrsqrt.f32 %v398_v55 }
 0x7f1   :  { %v583_v58 = vpop.eup %582 }
 0x7f2   :  { %v408_v59 = vmul.f32 %v583_v58, %v407_v57 }
 0x7f4   :  { %v411_v61 = vsel %vm410_vm5, %v408_v59, 0.0 }
 0x7f5   :  { %v412_v62 = vadd.f32 %v411_v61, %v387_v49 }
 0x7f7   :  { %414 = vst [vmem:[#allocation1 + $0x8] sm:$0xff] %v412_v62 }
 0x7fe   :  { %v417_v63 = vld [vmem:[#allocation1 + $0xc] ss:$0 sm:$0xff] }
 0x7ff   :  { %v429_v1 = vmul.f32 %v417_v63, %v412_v62  ;;  %v420_v2 = vmul.f32 %v417_v63, %v417_v63 }
 0x801   :  { %430 = vadd.xlane.f32.xlu0 %v429_v1  ;;  %421 = vadd.xlane.f32.xlu1 %v420_v2 }
 0x88e   :  { %v422_v6 = vpop.xlane.xlu1 %421  ;;  %v431_v8 = vpop.xlane.xlu0 %430 }
 0x88f   :  { %v423_v7 = vsub.f32 %v419_v3, %v422_v6  ;;  %v432_v9 = vsub.f32 %v612_v5, %v431_v8 }
 0x891   :  { %584 = vrsqrt.f32 %v423_v7 }
 0x89b   :  { %v585_v11 = vpop.eup %584 }
 0x89c   :  { %v433_v12 = vmul.f32 %v585_v11, %v432_v9 }
 0x89e   :  { %v436_v13 = vsel %vm435_vm8, %v433_v12, 0.0 }
 0x89f   :  { %v437_v14 = vadd.f32 %v436_v13, %v412_v62 }
 0x8a1   :  { %439 = vst [vmem:[#allocation1 + $0x8] sm:$0xff] %v437_v14 }
 0x8a8   :  { %v442_v15 = vld [vmem:[#allocation1 + $0xd] ss:$0 sm:$0xff] }
 0x8a9   :  { %v454_v16 = vmul.f32 %v442_v15, %v437_v14  ;;  %v445_v17 = vmul.f32 %v442_v15, %v442_v15 }
 0x8ab   :  { %455 = vadd.xlane.f32.xlu0 %v454_v16  ;;  %446 = vadd.xlane.f32.xlu1 %v445_v17 }
 0x938   :  { %v447_v19 = vpop.xlane.xlu1 %446  ;;  %v456_v21 = vpop.xlane.xlu0 %455 }
 0x939   :  { %v448_v20 = vsub.f32 %v444_v18, %v447_v19  ;;  %v457_v22 = vsub.f32 %v612_v5, %v456_v21 }
 0x93b   :  { %586 = vrsqrt.f32 %v448_v20 }
 0x945   :  { %v587_v23 = vpop.eup %586 }
 0x946   :  { %v458_v24 = vmul.f32 %v587_v23, %v457_v22 }
 0x948   :  { %v461_v25 = vsel %vm460_vm11, %v458_v24, 0.0 }
 0x949   :  { %v462_v26 = vadd.f32 %v461_v25, %v437_v14 }
 0x94b   :  { %464 = vst [vmem:[#allocation1 + $0x8] sm:$0xff] %v462_v26 }
 0x952   :  { %v467_v27 = vld [vmem:[#allocation1 + $0xe] ss:$0 sm:$0xff] }
 0x953   :  { %v479_v28 = vmul.f32 %v467_v27, %v462_v26  ;;  %v470_v29 = vmul.f32 %v467_v27, %v467_v27 }
 0x955   :  { %480 = vadd.xlane.f32.xlu0 %v479_v28  ;;  %471 = vadd.xlane.f32.xlu1 %v470_v29 }
 0x959   :  { %295 = vadd.xlane.f32.xlu0 %v294_v30 }
 0x9e2   :  { %v481_v32 = vpop.xlane.xlu0 %480  ;;  %v472_v33 = vpop.xlane.xlu1 %471 }
 0x9e3   :  { %v473_v34 = vsub.f32 %v469_v31, %v472_v33  ;;  %v482_v0 = vsub.f32 %v612_v5, %v481_v32 }
 0x9e5   :  { %588 = vrsqrt.f32 %v473_v34 }
 0x9e6   :  { %v296_v35 = vpop.xlane.xlu0 %295 }
 0x9e7   :  { %v297_v36 = vsub.f32 %v606_v4, %v296_v35 }
 0x9e9   :  { %v298_v37 = vmul.f32 %v644_v10, %v297_v36 }
 0x9eb   :  { %v301_v38 = vsel %vm300_vm14, %v298_v37, 0.0 }
 0x9ec   :  { %v302_v39 = vadd.f32 %v301_v38, %v635_v60  ;;  %v494_v60 = vld [vmem:[#allocation0 + $0xf] ss:$0 sm:$0xff] }
 0x9ee   :  { %303 = vst [vmem:[#allocation1] sm:$0xff] %v302_v39  ;;  %545 = vst [vmem:[%s677_s1] sm:$0xff] %v302_v39 }
 0x9ef   :  { %v589_v40 = vpop.eup %588 }
 0x9f0   :  { %v483_v4 = vmul.f32 %v589_v40, %v482_v0 }
 0x9f2   :  { %v486_v41 = vsel %vm485_vm6, %v483_v4, 0.0 }
 0x9f3   :  { %v487_v42 = vadd.f32 %v486_v41, %v462_v26 }
 0x9f5   :  { %489 = vst [vmem:[#allocation1 + $0x8] sm:$0xff] %v487_v42 }
 0x9fc   :  { %v492_v43 = vld [vmem:[#allocation1 + $0xf] ss:$0 sm:$0xff] }
 0x9fd   :  { %v495_v10 = vmul.f32 %v492_v43, %v492_v43  ;;  %v504_v44 = vmul.f32 %v492_v43, %v487_v42 }
 0x9ff   :  { %496 = vadd.xlane.f32.xlu1 %v495_v10 }
 0xa03   :  { %505 = vadd.xlane.f32.xlu1 %v504_v44 }
 0xa8c   :  { %v497_v45 = vpop.xlane.xlu1 %496 }
 0xa8d   :  { %v498_v46 = vsub.f32 %v494_v60, %v497_v45 }
 0xa8f   :  { %590 = vrsqrt.f32 %v498_v46 }
 0xa90   :  { %v506_v47 = vpop.xlane.xlu1 %505 }
 0xa91   :  { %v507_v48 = vsub.f32 %v612_v5, %v506_v47 }
 0xa99   :  { %v591_v49 = vpop.eup %590 }
 0xa9a   :  { %v508_v50 = vmul.f32 %v591_v49, %v507_v48 }
 0xa9c   :  { %v511_v51 = vsel %vm510_vm1, %v508_v50, 0.0 }
 0xa9d   :  { %v512_v52 = vadd.f32 %v511_v51, %v487_v42 }
 0xa9f   :  { %514 = vst [vmem:[#allocation1 + $0x8] sm:$0xff] %v512_v52  ;;  %547 = vst [vmem:[%s677_s1 + $0x8] sm:$0xff] %v512_v52 }

// kernel: custom-call.11
= control target key start
LH: loop header
LB: loop body
LE: loop exit
PB: predicated region body
PF: predicated region fallthrough
CT: control target
= control target key end

     0   :  { %v38_v0 = vlaneseq  ;;  %v332_v9 = vmov -1.0   ;;  %v333_v53 = vmov 0.0   ;;  %s401_s0 = inlined_call_operand.vmem [shape: f32[1,16,16], index: 0, kind: input, shape index: {}]   ;;  %s402_s1 = inlined_call_operand.vmem [shape: f32[1,16,16], index: 1, kind: output, shape index: {}]  }
   0x1   :  { %v31_v1 = vld [vmem:[%s401_s0] sm:$0xff]  ;;  %v33_v36 = vld [vmem:[%s401_s0 + $0x8] sm:$0xff] }
   0x2   :  { %v347_v2 = vand.u32 127, %v38_v0  ;;  %v42_v3 = vshrl.u32 %v38_v0, 7 }
   0x4   :  { %vm44_vm0 = vcmp.eq.s32.totalorder %v42_v3, %v347_v2  ;;  %vm40_vm1 = vcmp.lt.s32.totalorder %v347_v2, 16  ;;  %vm49_vm2 = vcmp.ge.s32.totalorder %v42_v3, %v347_v2  ;;  %vm79_vm4 = vcmp.eq.s32.totalorder %v347_v2, 0 }
   0x5   :  { %v46_v4 = vsel %vm44_vm0, %v31_v1, 0.0  ;;  %vm50_vm3 = vmand %vm49_vm2, %vm40_vm1  ;;  %vm76_vm5 = vcmp.eq.s32.totalorder %v347_v2, %v42_v3  ;;  %v80_v10 = vsel %vm79_vm4, 1.0, %v332_v9  ;;  %vm94_vm6 = vcmp.eq.s32.totalorder %v347_v2, 1 }
   0x6   :  { %47 = vadd.xlane.f32.xlu0 %v46_v4  ;;  %v51_v6 = vsel %vm50_vm3, %v31_v1, 0.0  ;;  %v81_v11 = vsel %vm76_vm5, %v80_v10, 0.0  ;;  %vm104_vm7 = vcmp.eq.s32.totalorder %v347_v2, 2  ;;  %vm114_vm8 = vcmp.eq.s32.totalorder %v347_v2, 3 }
   0x7   :  { %vm124_vm9 = vcmp.eq.s32.totalorder %v347_v2, 4  ;;  %v59_v31 = vadd.s32 8, %v42_v3  ;;  %vm134_vm11 = vcmp.eq.s32.totalorder %v347_v2, 5  ;;  %vm144_vm14 = vcmp.eq.s32.totalorder %v347_v2, 6 }
   0x8   :  { %vm154_vm0 = vcmp.eq.s32.totalorder %v347_v2, 7  ;;  %vm178_vm2 = vcmp.eq.s32.totalorder %v347_v2, 9  ;;  %vm192_vm3 = vcmp.eq.s32.totalorder %v347_v2, 10  ;;  %vm206_vm4 = vcmp.eq.s32.totalorder %v347_v2, 11 }
   0x9   :  { %vm60_vm10 = vcmp.eq.s32.totalorder %v59_v31, %v347_v2  ;;  %vm65_vm12 = vcmp.ge.s32.totalorder %v59_v31, %v347_v2  ;;  %vm87_vm15 = vcmp.eq.s32.totalorder %v347_v2, %v59_v31  ;;  %vm220_vm5 = vcmp.eq.s32.totalorder %v347_v2, 12 }
   0xa   :  { %v62_v37 = vsel %vm60_vm10, %v33_v36, 0.0  ;;  %vm66_vm13 = vmand %vm65_vm12, %vm40_vm1  ;;  %v88_v54 = vsel %vm87_vm15, -1.0, %v333_v53  ;;  %vm164_vm1 = vcmp.eq.s32.totalorder %v347_v2, 8 }
   0xb   :  { %v67_v44 = vsel %vm66_vm13, %v33_v36, 0.0 }
  0x93   :  { %v350_v5 = vpop.xlane.xlu0 %47 }
  0x94   :  { %328 = vrcp.f32 %v350_v5  ;;  %vm273_vm10 = vweird.f32 %v350_v5 }
  0x9e   :  { %v357_v7 = vpop.eup %328 }
  0x9f   :  { %v53_v8 = vmul.f32 %v357_v7, %v51_v6 }
  0xa1   :  { %54 = vst [vmem:[#allocation2] sm:$0xff] %v53_v8 }
  0xa8   :  { %v90_v12 = vld [vmem:[#allocation2 + $0x1] ss:$0 sm:$0xff]  ;;  %v100_v15 = vld [vmem:[#allocation2 + $0x2] ss:$0 sm:$0xff]  ;;  %v110_v20 = vld [vmem:[#allocation2 + $0x3] ss:$0 sm:$0xff] }
  0xa9   :  { %v91_v13 = vxor.u32 2147483648, %v90_v12  ;;  %v101_v17 = vxor.u32 2147483648, %v100_v15  ;;  %v111_v22 = vxor.u32 2147483648, %v110_v20  ;;  %v120_v25 = vld [vmem:[#allocation2 + $0x4] ss:$0 sm:$0xff] }
  0xaa   :  { %v121_v27 = vxor.u32 2147483648, %v120_v25  ;;  %v130_v30 = vld [vmem:[#allocation2 + $0x5] ss:$0 sm:$0xff]  ;;  %v140_v38 = vld [vmem:[#allocation2 + $0x6] ss:$0 sm:$0xff] }
  0xab   :  { %v95_v14 = vmul.f32 %v91_v13, %v81_v11  ;;  %v131_v33 = vxor.u32 2147483648, %v130_v30  ;;  %v141_v40 = vxor.u32 2147483648, %v140_v38  ;;  %v150_v47 = vld [vmem:[#allocation2 + $0x7] ss:$0 sm:$0xff] }
  0xac   :  { %v151_v50 = vxor.u32 2147483648, %v150_v47 }
  0xad   :  { %96 = vadd.xlane.f32.xlu0 %v95_v14 }
 0x13a   :  { %v97_v16 = vpop.xlane.xlu0 %96 }
 0x13b   :  { %v98_v18 = vsel %vm94_vm6, %v97_v16, %v81_v11  ;;  %vm234_vm6 = vcmp.eq.s32.totalorder %v347_v2, 13 }
 0x13c   :  { %v105_v19 = vmul.f32 %v101_v17, %v98_v18 }
 0x13e   :  { %106 = vadd.xlane.f32.xlu1 %v105_v19 }
 0x1cb   :  { %v107_v21 = vpop.xlane.xlu1 %106 }
 0x1cc   :  { %v108_v23 = vsel %vm104_vm7, %v107_v21, %v98_v18  ;;  %vm248_vm7 = vcmp.eq.s32.totalorder %v347_v2, 14 }
 0x1cd   :  { %v115_v24 = vmul.f32 %v111_v22, %v108_v23 }
 0x1cf   :  { %116 = vadd.xlane.f32.xlu1 %v115_v24 }
 0x25c   :  { %v117_v26 = vpop.xlane.xlu1 %116 }
 0x25d   :  { %v118_v28 = vsel %vm114_vm8, %v117_v26, %v108_v23  ;;  %vm262_vm8 = vcmp.eq.s32.totalorder %v347_v2, 15 }
 0x25e   :  { %v125_v29 = vmul.f32 %v121_v27, %v118_v28 }
 0x260   :  { %126 = vadd.xlane.f32.xlu0 %v125_v29 }
 0x2ed   :  { %v127_v32 = vpop.xlane.xlu0 %126 }
 0x2ee   :  { %v128_v34 = vsel %vm124_vm9, %v127_v32, %v118_v28 }
 0x2ef   :  { %v135_v35 = vmul.f32 %v131_v33, %v128_v34 }
 0x2f1   :  { %136 = vadd.xlane.f32.xlu1 %v135_v35 }
 0x2f5   :  { %63 = vadd.xlane.f32.xlu1 %v62_v37 }
 0x37e   :  { %v137_v39 = vpop.xlane.xlu1 %136 }
 0x37f   :  { %v138_v41 = vsel %vm134_vm11, %v137_v39, %v128_v34 }
 0x380   :  { %v145_v42 = vmul.f32 %v141_v40, %v138_v41 }
 0x382   :  { %146 = vadd.xlane.f32.xlu0 %v145_v42  ;;  %v371_v43 = vpop.xlane.xlu1 %63 }
 0x383   :  { %330 = vrcp.f32 %v371_v43  ;;  %vm278_vm9 = vweird.f32 %v371_v43 }
 0x38d   :  { %v377_v45 = vpop.eup %330 }
 0x38e   :  { %v69_v46 = vmul.f32 %v377_v45, %v67_v44 }
 0x390   :  { %70 = vst [vmem:[#allocation2 + $0x8] sm:$0xff] %v69_v46 }
 0x397   :  { %v160_v48 = vld [vmem:[#allocation2 + $0x8] ss:$0 sm:$0xff]  ;;  %v174_v59 = vld [vmem:[#allocation2 + $0x9] ss:$0 sm:$0xff]  ;;  %v188_v4 = vld [vmem:[#allocation2 + $0xa] ss:$0 sm:$0xff] }
 0x398   :  { %v161_v51 = vxor.u32 2147483648, %v160_v48  ;;  %v175_v62 = vxor.u32 2147483648, %v174_v59  ;;  %v189_v9 = vxor.u32 2147483648, %v188_v4  ;;  %v202_v14 = vld [vmem:[#allocation2 + $0xb] ss:$0 sm:$0xff] }
 0x399   :  { %v203_v17 = vxor.u32 2147483648, %v202_v14  ;;  %v216_v22 = vld [vmem:[#allocation2 + $0xc] ss:$0 sm:$0xff]  ;;  %v230_v30 = vld [vmem:[#allocation2 + $0xd] ss:$0 sm:$0xff] }
 0x39a   :  { %v169_v56 = vmul.f32 %v161_v51, %v88_v54  ;;  %v217_v25 = vxor.u32 2147483648, %v216_v22  ;;  %v231_v33 = vxor.u32 2147483648, %v230_v30  ;;  %v244_v38 = vld [vmem:[#allocation2 + $0xe] ss:$0 sm:$0xff]  ;;  %v258_v48 = vld [vmem:[#allocation2 + $0xf] ss:$0 sm:$0xff] }
 0x40f   :  { %v147_v49 = vpop.xlane.xlu0 %146 }
 0x410   :  { %v148_v52 = vsel %vm144_vm14, %v147_v49, %v138_v41  ;;  %v245_v41 = vxor.u32 2147483648, %v244_v38 }
 0x411   :  { %v155_v55 = vmul.f32 %v151_v50, %v148_v52 }
 0x413   :  { %156 = vadd.xlane.f32.xlu0 %v155_v55 }
 0x417   :  { %170 = vadd.xlane.f32.xlu0 %v169_v56 }
 0x4a0   :  { %v157_v57 = vpop.xlane.xlu0 %156 }
 0x4a1   :  { %v158_v58 = vsel %vm154_vm0, %v157_v57, %v148_v52 }
 0x4a2   :  { %v165_v60 = vmul.f32 %v161_v51, %v158_v58  ;;  %v259_v51 = vxor.u32 2147483648, %v258_v48 }
 0x4a4   :  { %v171_v61 = vpop.xlane.xlu0 %170  ;;  %166 = vadd.xlane.f32.xlu1 %v165_v60 }
 0x4a5   :  { %v172_v63 = vsel %vm164_vm1, %v171_v61, %v88_v54 }
 0x4a6   :  { %v183_v0 = vmul.f32 %v175_v62, %v172_v63 }
 0x4a8   :  { %184 = vadd.xlane.f32.xlu0 %v183_v0 }
 0x531   :  { %v167_v1 = vpop.xlane.xlu1 %166 }
 0x532   :  { %v168_v3 = vsel %vm164_vm1, %v167_v1, %v158_v58 }
 0x533   :  { %v179_v6 = vmul.f32 %v175_v62, %v168_v3 }
 0x535   :  { %v185_v8 = vpop.xlane.xlu0 %184  ;;  %180 = vadd.xlane.f32.xlu1 %v179_v6 }
 0x536   :  { %v186_v10 = vsel %vm178_vm2, %v185_v8, %v172_v63 }
 0x537   :  { %v197_v11 = vmul.f32 %v189_v9, %v186_v10 }
 0x539   :  { %198 = vadd.xlane.f32.xlu0 %v197_v11 }
 0x5c2   :  { %v181_v12 = vpop.xlane.xlu1 %180 }
 0x5c3   :  { %v182_v13 = vsel %vm178_vm2, %v181_v12, %v168_v3 }
 0x5c4   :  { %v193_v15 = vmul.f32 %v189_v9, %v182_v13 }
 0x5c6   :  { %v199_v16 = vpop.xlane.xlu0 %198  ;;  %194 = vadd.xlane.f32.xlu1 %v193_v15 }
 0x5c7   :  { %v200_v18 = vsel %vm192_vm3, %v199_v16, %v186_v10 }
 0x5c8   :  { %v211_v19 = vmul.f32 %v203_v17, %v200_v18 }
 0x5ca   :  { %212 = vadd.xlane.f32.xlu0 %v211_v19 }
 0x653   :  { %v195_v20 = vpop.xlane.xlu1 %194 }
 0x654   :  { %v196_v21 = vsel %vm192_vm3, %v195_v20, %v182_v13 }
 0x655   :  { %v207_v23 = vmul.f32 %v203_v17, %v196_v21 }
 0x657   :  { %v213_v24 = vpop.xlane.xlu0 %212  ;;  %208 = vadd.xlane.f32.xlu1 %v207_v23 }
 0x658   :  { %v214_v26 = vsel %vm206_vm4, %v213_v24, %v200_v18 }
 0x659   :  { %v225_v27 = vmul.f32 %v217_v25, %v214_v26 }
 0x65b   :  { %226 = vadd.xlane.f32.xlu0 %v225_v27 }
 0x6e4   :  { %v209_v28 = vpop.xlane.xlu1 %208 }
 0x6e5   :  { %v210_v29 = vsel %vm206_vm4, %v209_v28, %v196_v21 }
 0x6e6   :  { %v221_v31 = vmul.f32 %v217_v25, %v210_v29 }
 0x6e8   :  { %v227_v32 = vpop.xlane.xlu0 %226  ;;  %222 = vadd.xlane.f32.xlu1 %v221_v31 }
 0x6e9   :  { %v228_v34 = vsel %vm220_vm5, %v227_v32, %v214_v26 }
 0x6ea   :  { %v239_v35 = vmul.f32 %v231_v33, %v228_v34 }
 0x6ec   :  { %240 = vadd.xlane.f32.xlu0 %v239_v35 }
 0x775   :  { %v223_v36 = vpop.xlane.xlu1 %222 }
 0x776   :  { %v224_v37 = vsel %vm220_vm5, %v223_v36, %v210_v29 }
 0x777   :  { %v235_v39 = vmul.f32 %v231_v33, %v224_v37 }
 0x779   :  { %v241_v40 = vpop.xlane.xlu0 %240  ;;  %236 = vadd.xlane.f32.xlu1 %v235_v39 }
 0x77a   :  { %v242_v42 = vsel %vm234_vm6, %v241_v40, %v228_v34 }
 0x77b   :  { %v253_v44 = vmul.f32 %v245_v41, %v242_v42 }
 0x77d   :  { %254 = vadd.xlane.f32.xlu0 %v253_v44 }
 0x806   :  { %v237_v46 = vpop.xlane.xlu1 %236 }
 0x807   :  { %v238_v47 = vsel %vm234_vm6, %v237_v46, %v224_v37 }
 0x808   :  { %v249_v49 = vmul.f32 %v245_v41, %v238_v47 }
 0x80a   :  { %v255_v50 = vpop.xlane.xlu0 %254  ;;  %250 = vadd.xlane.f32.xlu1 %v249_v49 }
 0x80b   :  { %v256_v52 = vsel %vm248_vm7, %v255_v50, %v242_v42 }
 0x80c   :  { %v267_v53 = vmul.f32 %v259_v51, %v256_v52 }
 0x80e   :  { %268 = vadd.xlane.f32.xlu0 %v267_v53 }
 0x897   :  { %v251_v54 = vpop.xlane.xlu1 %250 }
 0x898   :  { %v252_v55 = vsel %vm248_vm7, %v251_v54, %v238_v47 }
 0x899   :  { %v263_v56 = vmul.f32 %v259_v51, %v252_v55 }
 0x89b   :  { %v269_v57 = vpop.xlane.xlu0 %268  ;;  %264 = vadd.xlane.f32.xlu1 %v263_v56 }
 0x89c   :  { %v270_v58 = vsel %vm262_vm8, %v269_v57, %v256_v52 }
 0x89d   :  { %v277_v59 = vmul.f32 %v377_v45, %v270_v58 }
 0x89f   :  { %v279_v60 = vsel %vm278_vm9, %v270_v58, %v277_v59 }
 0x8a0   :  { %314 = vst [vmem:[%s402_s1 + $0x8] sm:$0xff] %v279_v60 }
 0x928   :  { %v265_v61 = vpop.xlane.xlu1 %264 }
 0x929   :  { %v266_v62 = vsel %vm262_vm8, %v265_v61, %v252_v55 }
 0x92a   :  { %v272_v63 = vmul.f32 %v357_v7, %v266_v62 }
 0x92c   :  { %v274_v2 = vsel %vm273_vm10, %v266_v62, %v272_v63 }
 0x92d   :  { %312 = vst [vmem:[%s402_s1] sm:$0xff] %v274_v2 }

// kernel: graphstar_forward.5
= control target key start
LH: loop header
LB: loop body
LE: loop exit
PB: predicated region body
PF: predicated region fallthrough
CT: control target
= control target key end

     0   :  { %v901_v3 = vmov 0.0   ;;  %vm58_vm0 = vcmask 130048   ;;  %vm622_vm1 = vcmask 261120   ;;  %s1292_s1 = inlined_call_operand.vmem [shape: f32[16,512], index: 1, kind: input, shape index: {}]   ;;  %s1293_s0 = inlined_call_operand.vmem [shape: f32[64,16], index: 0, kind: input, shape index: {}]   ;;  %s1294_s3 = inlined_call_operand.vmem [shape: f32[512,32], index: 3, kind: input, shape index: {}]   ;;  %s1295_s2 = inlined_call_operand.vmem [shape: f32[1,512], index: 2, kind: input, shape index: {}]   ;;  %s1296_s4 = inlined_call_operand.vmem [shape: f32[1,32], index: 4, kind: input, shape index: {}]   ;;  %s1297_s5 = inlined_call_operand.vmem [shape: f32[64,32], index: 5, kind: output, shape index: {}]  }
   0x1   :  { %v29_v0 = vld [vmem:[%s1292_s1 + $0x8] sm:$0xff]  ;;  %v31_v2 = vld [vmem:[%s1292_s1 + $0x18] sm:$0xff]  ;;  %147 = vmatprep.mubr.f32.mxu0 %v901_v3  ;;  %260 = vmatprep.mubr.f32.mxu1 %v901_v3  ;;  %v28_v6 = vld [vmem:[%s1292_s1] sm:$0xff] }
   0x2   :  { %v33_v1 = vld [vmem:[%s1292_s1 + $0x28] sm:$0xff]  ;;  %v35_v5 = vld [vmem:[%s1292_s1 + $0x38] sm:$0xff]  ;;  %v32_v7 = vld [vmem:[%s1292_s1 + $0x20] sm:$0xff] }
   0x3   :  { %v764_v4 = vpack.c.bf16 %v33_v1, %v29_v0  ;;  %v768_v8 = vpack.c.bf16 %v35_v5, %v31_v2  ;;  %v766_v9 = vpack.c.bf16 %v32_v7, %v28_v6  ;;  %v30_v10 = vld [vmem:[%s1292_s1 + $0x10] sm:$0xff]  ;;  %v20_v13 = vld [vmem:[%s1293_s0] sm:$0xff]  ;;  %v358_v15 = vld [vmem:[%s1294_s3 + $0x88] sm:$0xff] }
   0x4   :  { %v34_v11 = vld [vmem:[%s1292_s1 + $0x30] sm:$0xff]  ;;  %v357_v14 = vld [vmem:[%s1294_s3 + $0x80] sm:$0xff]  ;;  %v21_v16 = vld [vmem:[%s1293_s0 + $0x8] sm:$0xff] }
   0x5   :  { %765 = vmatprep.subr.bf16.mxu0 %v764_v4  ;;  %v770_v12 = vpack.c.bf16 %v34_v11, %v30_v10  ;;  %769 = vmatprep.subr.bf16.mxu1 %v768_v8  ;;  %v772_v17 = vpack.c.bf16 %v358_v15, %v357_v14  ;;  %v341_v18 = vld [vmem:[%s1294_s3] sm:$0xff]  ;;  %v342_v19 = vld [vmem:[%s1294_s3 + $0x8] sm:$0xff]  ;;  %v359_v27 = vld [vmem:[%s1294_s3 + $0x90] sm:$0xff] }
   0x6   :  { %767 = vmatpush1.bf16.msra.mxu0 %v766_v9  ;;  %v389_v20 = vld [vmem:[%s1294_s3 + $0x180] sm:$0xff]  ;;  %v774_v21 = vpack.c.bf16 %v342_v19, %v341_v18  ;;  %v390_v22 = vld [vmem:[%s1294_s3 + $0x188] sm:$0xff]  ;;  %v360_v28 = vld [vmem:[%s1294_s3 + $0x98] sm:$0xff] }
   0x7   :  { %771 = vmatpush1.bf16.msra.mxu1 %v770_v12  ;;  %v373_v23 = vld [vmem:[%s1294_s3 + $0x100] sm:$0xff]  ;;  %v374_v24 = vld [vmem:[%s1294_s3 + $0x108] sm:$0xff]  ;;  %v804_v25 = vpack.c.bf16 %v390_v22, %v389_v20  ;;  %v343_v29 = vld [vmem:[%s1294_s3 + $0x10] sm:$0xff]  ;;  %773 = vmatprep.subr.bf16.mxu0 %v772_v17  ;;  %v776_v30 = vpack.c.bf16 %v360_v28, %v359_v27 }
   0x8   :  { %v806_v26 = vpack.c.bf16 %v374_v24, %v373_v23  ;;  %v344_v31 = vld [vmem:[%s1294_s3 + $0x18] sm:$0xff]  ;;  %v391_v32 = vld [vmem:[%s1294_s3 + $0x190] sm:$0xff]  ;;  %v361_v39 = vld [vmem:[%s1294_s3 + $0xa0] sm:$0xff] }
   0x9   :  { %635 = vmatmul.mubr.msk.f32.vlgmr.msra.gmra.mrb[0].mxu0 %vm58_vm0, %v20_v13  ;;  %v392_v33 = vld [vmem:[%s1294_s3 + $0x198] sm:$0xff]  ;;  %v22_v34 = vld [vmem:[%s1293_s0 + $0x10] sm:$0xff]  ;;  %805 = vmatprep.subr.bf16.mxu1 %v804_v25  ;;  %v778_v35 = vpack.c.bf16 %v344_v31, %v343_v29  ;;  %v362_v41 = vld [vmem:[%s1294_s3 + $0xa8] sm:$0xff] }
   0xa   :  { %643 = vmatmul.mubr.msk.f32.vlgmr.msra.gmra.mrb[0].mxu1 %vm58_vm0, %v20_v13  ;;  %153 = vmatprep.mubr.f32.mxu0 %v901_v3  ;;  %v808_v36 = vpack.c.bf16 %v392_v33, %v391_v32  ;;  %v375_v37 = vld [vmem:[%s1294_s3 + $0x110] sm:$0xff]  ;;  %v376_v38 = vld [vmem:[%s1294_s3 + $0x118] sm:$0xff]  ;;  %v345_v42 = vld [vmem:[%s1294_s3 + $0x20] sm:$0xff]  ;;  %v780_v47 = vpack.c.bf16 %v362_v41, %v361_v39 }
   0xb   :  { %266 = vmatprep.mubr.f32.mxu1 %v901_v3  ;;  %775 = vmatpush3.bf16.msra.mxu0 %v774_v21  ;;  %v810_v40 = vpack.c.bf16 %v376_v38, %v375_v37  ;;  %v346_v43 = vld [vmem:[%s1294_s3 + $0x28] sm:$0xff]  ;;  %v393_v44 = vld [vmem:[%s1294_s3 + $0x1a0] sm:$0xff]  ;;  %v363_v51 = vld [vmem:[%s1294_s3 + $0xb0] sm:$0xff] }
   0xc   :  { %807 = vmatpush3.bf16.msra.mxu1 %v806_v26  ;;  %v394_v45 = vld [vmem:[%s1294_s3 + $0x1a8] sm:$0xff]  ;;  %v377_v46 = vld [vmem:[%s1294_s3 + $0x120] sm:$0xff]  ;;  %777 = vmatprep.subr.bf16.mxu0 %v776_v30  ;;  %v782_v49 = vpack.c.bf16 %v346_v43, %v345_v42  ;;  %v364_v52 = vld [vmem:[%s1294_s3 + $0xb8] sm:$0xff] }
   0xd   :  { %636 = vmatmul.mubr.msk.f32.gmra.mrb[2].mxu0 %vm58_vm0, %v21_v16  ;;  %v378_v48 = vld [vmem:[%s1294_s3 + $0x128] sm:$0xff]  ;;  %809 = vmatprep.subr.bf16.mxu1 %v808_v36  ;;  %v812_v50 = vpack.c.bf16 %v394_v45, %v393_v44  ;;  %v347_v53 = vld [vmem:[%s1294_s3 + $0x30] sm:$0xff]  ;;  %v348_v55 = vld [vmem:[%s1294_s3 + $0x38] sm:$0xff]  ;;  %v784_v61 = vpack.c.bf16 %v364_v52, %v363_v51 }
   0xe   :  { %644 = vmatmul.mubr.msk.f32.gmra.mrb[2].mxu1 %vm58_vm0, %v21_v16  ;;  %159 = vmatprep.mubr.f32.mxu0 %v901_v3  ;;  %v814_v54 = vpack.c.bf16 %v378_v48, %v377_v46  ;;  %v395_v56 = vld [vmem:[%s1294_s3 + $0x1b0] sm:$0xff]  ;;  %v396_v57 = vld [vmem:[%s1294_s3 + $0x1b8] sm:$0xff]  ;;  %v786_v62 = vpack.c.bf16 %v348_v55, %v347_v53  ;;  %v365_v0 = vld [vmem:[%s1294_s3 + $0xc0] sm:$0xff]  ;;  %v38_v53 = vlaneseq }
   0xf   :  { %272 = vmatprep.mubr.f32.mxu1 %v901_v3  ;;  %779 = vmatpush3.bf16.msra.mxu0 %v778_v35  ;;  %v23_v58 = vld [vmem:[%s1293_s0 + $0x18] sm:$0xff]  ;;  %v379_v59 = vld [vmem:[%s1294_s3 + $0x130] sm:$0xff]  ;;  %v816_v63 = vpack.c.bf16 %v396_v57, %v395_v56  ;;  %v366_v1 = vld [vmem:[%s1294_s3 + $0xc8] sm:$0xff] }
  0x10   :  { %811 = vmatpush3.bf16.msra.mxu1 %v810_v40  ;;  %v380_v60 = vld [vmem:[%s1294_s3 + $0x138] sm:$0xff]  ;;  %781 = vmatprep.subr.bf16.mxu0 %v780_v47  ;;  %v24_v4 = vld [vmem:[%s1293_s0 + $0x20] sm:$0xff]  ;;  %v788_v5 = vpack.c.bf16 %v366_v1, %v365_v0  ;;  %v25_v6 = vld [vmem:[%s1293_s0 + $0x28] sm:$0xff] }
  0x11   :  { %637 = vmatmul.mubr.msk.f32.gmra.mrb[4].mxu0 %vm58_vm0, %v22_v34  ;;  %813 = vmatprep.subr.bf16.mxu1 %v812_v50  ;;  %v818_v2 = vpack.c.bf16 %v380_v60, %v379_v59  ;;  %v26_v7 = vld [vmem:[%s1293_s0 + $0x30] sm:$0xff]  ;;  %v27_v8 = vld [vmem:[%s1293_s0 + $0x38] sm:$0xff]  ;;  %v397_v9 = vld [vmem:[%s1294_s3 + $0x1c0] sm:$0xff] }
  0x12   :  { %645 = vmatmul.mubr.msk.f32.gmra.mrb[4].mxu1 %vm58_vm0, %v22_v34  ;;  %165 = vmatprep.mubr.f32.mxu0 %v901_v3  ;;  %v398_v10 = vld [vmem:[%s1294_s3 + $0x1c8] sm:$0xff]  ;;  %v349_v11 = vld [vmem:[%s1294_s3 + $0x40] sm:$0xff]  ;;  %v367_v17 = vld [vmem:[%s1294_s3 + $0xd0] sm:$0xff] }
  0x13   :  { %278 = vmatprep.mubr.f32.mxu1 %v901_v3  ;;  %783 = vmatpush3.bf16.msra.mxu0 %v782_v49  ;;  %v820_v12 = vpack.c.bf16 %v398_v10, %v397_v9  ;;  %v381_v14 = vld [vmem:[%s1294_s3 + $0x140] sm:$0xff]  ;;  %v382_v15 = vld [vmem:[%s1294_s3 + $0x148] sm:$0xff]  ;;  %v368_v18 = vld [vmem:[%s1294_s3 + $0xd8] sm:$0xff] }
  0x14   :  { %815 = vmatpush3.bf16.msra.mxu1 %v814_v54  ;;  %785 = vmatprep.subr.bf16.mxu0 %v784_v61  ;;  %v822_v16 = vpack.c.bf16 %v382_v15, %v381_v14  ;;  %v399_v19 = vld [vmem:[%s1294_s3 + $0x1d0] sm:$0xff]  ;;  %v792_v20 = vpack.c.bf16 %v368_v18, %v367_v17  ;;  %v352_v22 = vld [vmem:[%s1294_s3 + $0x58] sm:$0xff]  ;;  %v369_v29 = vld [vmem:[%s1294_s3 + $0xe0] sm:$0xff]  ;;  %v39_v54 = vshrl.u32 %v38_v53, 7 }
  0x15   :  { %638 = vmatmul.mubr.msk.f32.gmra.mrb[6].mxu0 %vm58_vm0, %v23_v58  ;;  %817 = vmatprep.subr.bf16.mxu1 %v816_v63  ;;  %v351_v21 = vld [vmem:[%s1294_s3 + $0x50] sm:$0xff]  ;;  %v400_v23 = vld [vmem:[%s1294_s3 + $0x1d8] sm:$0xff]  ;;  %v370_v30 = vld [vmem:[%s1294_s3 + $0xe8] sm:$0xff] }
  0x16   :  { %646 = vmatmul.mubr.msk.f32.gmra.mrb[6].mxu1 %vm58_vm0, %v23_v58  ;;  %171 = vmatprep.mubr.f32.mxu0 %v901_v3  ;;  %v794_v24 = vpack.c.bf16 %v352_v22, %v351_v21  ;;  %v824_v25 = vpack.c.bf16 %v400_v23, %v399_v19  ;;  %v383_v26 = vld [vmem:[%s1294_s3 + $0x150] sm:$0xff]  ;;  %v384_v27 = vld [vmem:[%s1294_s3 + $0x158] sm:$0xff]  ;;  %v401_v31 = vld [vmem:[%s1294_s3 + $0x1e0] sm:$0xff]  ;;  %v796_v32 = vpack.c.bf16 %v370_v30, %v369_v29  ;;  %v40_v55 = vsub.s32 0, %v39_v54 }
  0x17   :  { %284 = vmatprep.mubr.f32.mxu1 %v901_v3  ;;  %787 = vmatpush3.bf16.msra.mxu0 %v786_v62  ;;  %v826_v28 = vpack.c.bf16 %v384_v27, %v383_v26  ;;  %v353_v33 = vld [vmem:[%s1294_s3 + $0x60] sm:$0xff]  ;;  %v354_v34 = vld [vmem:[%s1294_s3 + $0x68] sm:$0xff]  ;;  %v371_v41 = vld [vmem:[%s1294_s3 + $0xf0] sm:$0xff]  ;;  %v48_v57 = vsub.s32 2, %v39_v54  ;;  %v44_v58 = vsub.s32 1, %v39_v54  ;;  %v52_v59 = vsub.s32 3, %v39_v54 }
  0x18   :  { %819 = vmatpush3.bf16.msra.mxu1 %v818_v2  ;;  %789 = vmatprep.subr.bf16.mxu0 %v788_v5  ;;  %v402_v35 = vld [vmem:[%s1294_s3 + $0x1e8] sm:$0xff]  ;;  %v798_v36 = vpack.c.bf16 %v354_v34, %v353_v33  ;;  %v385_v38 = vld [vmem:[%s1294_s3 + $0x160] sm:$0xff]  ;;  %v372_v42 = vld [vmem:[%s1294_s3 + $0xf8] sm:$0xff] }
  0x19   :  { %639 = vmatmul.mubr.msk.f32.gmra.mrb[8].mxu0 %vm58_vm0, %v24_v4  ;;  %821 = vmatprep.subr.bf16.mxu1 %v820_v12  ;;  %v828_v37 = vpack.c.bf16 %v402_v35, %v401_v31  ;;  %v386_v39 = vld [vmem:[%s1294_s3 + $0x168] sm:$0xff]  ;;  %v403_v43 = vld [vmem:[%s1294_s3 + $0x1f0] sm:$0xff]  ;;  %v800_v44 = vpack.c.bf16 %v372_v42, %v371_v41  ;;  %v356_v46 = vld [vmem:[%s1294_s3 + $0x78] sm:$0xff] }
  0x1a   :  { %647 = vmatmul.mubr.msk.f32.gmra.mrb[8].mxu1 %vm58_vm0, %v24_v4  ;;  %177 = vmatprep.mubr.f32.mxu0 %v901_v3  ;;  %v830_v40 = vpack.c.bf16 %v386_v39, %v385_v38  ;;  %v355_v45 = vld [vmem:[%s1294_s3 + $0x70] sm:$0xff]  ;;  %v404_v47 = vld [vmem:[%s1294_s3 + $0x1f8] sm:$0xff]  ;;  %v36_v56 = vld [vmem:[%s1295_s2] sm:$0xf] }
  0x1b   :  { %290 = vmatprep.mubr.f32.mxu1 %v901_v3  ;;  %v802_v48 = vpack.c.bf16 %v356_v46, %v355_v45  ;;  %v832_v49 = vpack.c.bf16 %v404_v47, %v403_v43  ;;  %v387_v50 = vld [vmem:[%s1294_s3 + $0x170] sm:$0xff]  ;;  %v388_v51 = vld [vmem:[%s1294_s3 + $0x178] sm:$0xff]  ;;  %v1207_v60 = vrot.slane %v36_v56, %v40_v55  ;;  %v1209_v61 = vrot.slane %v36_v56, %v48_v57 }
  0x1c   :  { %823 = vmatpush3.bf16.msra.mxu1 %v822_v16  ;;  %v834_v52 = vpack.c.bf16 %v388_v51, %v387_v50  ;;  %v1211_v62 = vrot.slane %v36_v56, %v44_v58  ;;  %v1213_v63 = vrot.slane %v36_v56, %v52_v59 }
  0x1d   :  { %640 = vmatmul.mubr.msk.f32.gmra.mrb[10].mxu0 %vm58_vm0, %v25_v6  ;;  %825 = vmatprep.subr.bf16.mxu1 %v824_v25 }
  0x1e   :  { %648 = vmatmul.mubr.msk.f32.gmra.mrb[10].mxu1 %vm58_vm0, %v25_v6  ;;  %183 = vmatprep.mubr.f32.mxu0 %v901_v3 }
  0x1f   :  { %296 = vmatprep.mubr.f32.mxu1 %v901_v3 }
  0x20   :  { %827 = vmatpush3.bf16.msra.mxu1 %v826_v28 }
  0x21   :  { %641 = vmatmul.mubr.msk.f32.gmra.mrb[12].mxu0 %vm58_vm0, %v26_v7  ;;  %829 = vmatprep.subr.bf16.mxu1 %v828_v37 }
  0x22   :  { %649 = vmatmul.mubr.msk.f32.gmra.mrb[12].mxu1 %vm58_vm0, %v26_v7  ;;  %189 = vmatprep.mubr.f32.mxu0 %v901_v3 }
  0x23   :  { %302 = vmatprep.mubr.f32.mxu1 %v901_v3  ;;  %v350_v3 = vld [vmem:[%s1294_s3 + $0x48] sm:$0xff] }
  0x24   :  { %v790_v13 = vpack.c.bf16 %v350_v3, %v349_v11  ;;  %831 = vmatpush3.bf16.msra.mxu1 %v830_v40 }
  0x25   :  { %642 = vmatmul.mubr.msk.f32.gmra.mrb[14].mxu0 %vm58_vm0, %v27_v8  ;;  %833 = vmatprep.subr.bf16.mxu1 %v832_v49 }
  0x26   :  { %650 = vmatmul.mubr.msk.f32.gmra.mrb[14].mxu1 %vm58_vm0, %v27_v8  ;;  %791 = vmatpush3.bf16.msra.mxu0 %v790_v13 }
  0x27   :  { %793 = vmatprep.subr.bf16.mxu0 %v792_v20 }
  0x28   :  { %835 = vmatpush3.bf16.msra.mxu1 %v834_v52 }
  0x2a   :  { %795 = vmatpush3.bf16.msra.mxu0 %v794_v24 }
  0x2b   :  { %797 = vmatprep.subr.bf16.mxu0 %v796_v32 }
  0x2e   :  { %799 = vmatpush3.bf16.msra.mxu0 %v798_v36 }
  0x2f   :  { %801 = vmatprep.subr.bf16.mxu0 %v800_v44 }
  0x32   :  { %803 = vmatpush3.bf16.msra.mxu0 %v802_v48 }
  0xdc   :  { %v149_v0 = vpop.f32.mrb[0].mxu0 }
  0xdd   :  { %v150_v1 = vadd.f32 %v149_v0, %v1207_v60  ;;  %v262_v2 = vpop.f32.mrb[0].mxu1  ;;  %v151_v4 = vpop.f32.mrb[1].mxu0 }
  0xde   :  { %v263_v5 = vadd.f32 %v262_v2, %v1209_v61  ;;  %v152_v6 = vadd.f32 %v151_v4, %v1211_v62  ;;  %v264_v7 = vpop.f32.mrb[1].mxu1 }
  0xdf   :  { %837 = vtanh.f32 %v150_v1  ;;  %v265_v8 = vadd.f32 %v264_v7, %v1213_v63 }
  0xe0   :  { %839 = vtanh.f32 %v263_v5  ;;  %v155_v9 = vpop.f32.mrb[2].mxu0 }
  0xe1   :  { %841 = vtanh.f32 %v152_v6  ;;  %v156_v10 = vadd.f32 %v155_v9, %v1207_v60  ;;  %v268_v11 = vpop.f32.mrb[2].mxu1  ;;  %v157_v3 = vpop.f32.mrb[3].mxu0 }
  0xe2   :  { %843 = vtanh.f32 %v265_v8  ;;  %v269_v12 = vadd.f32 %v268_v11, %v1209_v61  ;;  %v158_v13 = vadd.f32 %v157_v3, %v1211_v62  ;;  %v270_v14 = vpop.f32.mrb[3].mxu1 }
  0xe3   :  { %845 = vtanh.f32 %v156_v10  ;;  %v271_v15 = vadd.f32 %v270_v14, %v1213_v63 }
  0xe4   :  { %847 = vtanh.f32 %v269_v12  ;;  %v161_v16 = vpop.f32.mrb[4].mxu0 }
  0xe5   :  { %849 = vtanh.f32 %v158_v13  ;;  %v162_v17 = vadd.f32 %v161_v16, %v1207_v60  ;;  %v274_v18 = vpop.f32.mrb[4].mxu1  ;;  %v163_v19 = vpop.f32.mrb[5].mxu0 }
  0xe6   :  { %851 = vtanh.f32 %v271_v15  ;;  %v275_v20 = vadd.f32 %v274_v18, %v1209_v61  ;;  %v164_v21 = vadd.f32 %v163_v19, %v1211_v62  ;;  %v276_v22 = vpop.f32.mrb[5].mxu1 }
  0xe7   :  { %853 = vtanh.f32 %v162_v17  ;;  %v277_v23 = vadd.f32 %v276_v22, %v1213_v63 }
  0xe8   :  { %855 = vtanh.f32 %v275_v20  ;;  %v167_v24 = vpop.f32.mrb[6].mxu0 }
  0xe9   :  { %v838_v25 = vpop.eup %837  ;;  %857 = vtanh.f32 %v164_v21  ;;  %v168_v26 = vadd.f32 %v167_v24, %v1207_v60  ;;  %v280_v27 = vpop.f32.mrb[6].mxu1 }
  0xea   :  { %v169_v28 = vpop.f32.mrb[7].mxu0  ;;  %v840_v29 = vpop.eup %839  ;;  %859 = vtanh.f32 %v277_v23  ;;  %v281_v30 = vadd.f32 %v280_v27, %v1209_v61 }
  0xeb   :  { %v170_v31 = vadd.f32 %v169_v28, %v1211_v62  ;;  %v282_v32 = vpop.f32.mrb[7].mxu1  ;;  %v842_v33 = vpop.eup %841  ;;  %861 = vtanh.f32 %v168_v26 }
  0xec   :  { %v283_v34 = vadd.f32 %v282_v32, %v1213_v63  ;;  %v844_v35 = vpop.eup %843  ;;  %863 = vtanh.f32 %v281_v30  ;;  %476 = vmatprep.mubr.f32.mxu0 %v842_v33  ;;  %v173_v36 = vpop.f32.mrb[8].mxu0 }
  0xed   :  { %v846_v37 = vpop.eup %845  ;;  %865 = vtanh.f32 %v170_v31  ;;  %581 = vmatprep.mubr.f32.mxu1 %v844_v35  ;;  %v174_v38 = vadd.f32 %v173_v36, %v1207_v60  ;;  %v286_v39 = vpop.f32.mrb[8].mxu1  ;;  %477 = vmatmul.mubr.f32.vlgmr.msra.gmra.mrb[16].mxu0 %v838_v25 }
  0xee   :  { %v175_v40 = vpop.f32.mrb[9].mxu0  ;;  %v848_v41 = vpop.eup %847  ;;  %867 = vtanh.f32 %v283_v34  ;;  %v287_v42 = vadd.f32 %v286_v39, %v1209_v61  ;;  %582 = vmatmul.mubr.f32.vlgmr.msra.gmra.mrb[16].mxu1 %v840_v29  ;;  %v1250_v34 = vld [vmem:[%s1296_s4] ss:$0 sm:$0xff] }
  0xef   :  { %v176_v43 = vadd.f32 %v175_v40, %v1211_v62  ;;  %v288_v44 = vpop.f32.mrb[9].mxu1  ;;  %v850_v45 = vpop.eup %849  ;;  %869 = vtanh.f32 %v174_v38 }
  0xf0   :  { %v289_v46 = vadd.f32 %v288_v44, %v1213_v63  ;;  %v852_v47 = vpop.eup %851  ;;  %871 = vtanh.f32 %v287_v42  ;;  %481 = vmatprep.mubr.f32.mxu0 %v850_v45  ;;  %v179_v48 = vpop.f32.mrb[10].mxu0 }
  0xf1   :  { %v854_v49 = vpop.eup %853  ;;  %873 = vtanh.f32 %v176_v43  ;;  %586 = vmatprep.mubr.f32.mxu1 %v852_v47  ;;  %v180_v50 = vadd.f32 %v179_v48, %v1207_v60  ;;  %v292_v51 = vpop.f32.mrb[10].mxu1  ;;  %482 = vmatmul.mubr.f32.gmra.mrb[18].mxu0 %v846_v37 }
  0xf2   :  { %v181_v52 = vpop.f32.mrb[11].mxu0  ;;  %v856_v53 = vpop.eup %855  ;;  %875 = vtanh.f32 %v289_v46  ;;  %v293_v54 = vadd.f32 %v292_v51, %v1209_v61  ;;  %587 = vmatmul.mubr.f32.gmra.mrb[18].mxu1 %v848_v41 }
  0xf3   :  { %v182_v55 = vadd.f32 %v181_v52, %v1211_v62  ;;  %v294_v56 = vpop.f32.mrb[11].mxu1  ;;  %v858_v57 = vpop.eup %857  ;;  %877 = vtanh.f32 %v180_v50 }
  0xf4   :  { %v295_v58 = vadd.f32 %v294_v56, %v1213_v63  ;;  %v860_v59 = vpop.eup %859  ;;  %879 = vtanh.f32 %v293_v54  ;;  %486 = vmatprep.mubr.f32.mxu0 %v858_v57  ;;  %v185_v0 = vpop.f32.mrb[12].mxu0 }
  0xf5   :  { %v862_v1 = vpop.eup %861  ;;  %881 = vtanh.f32 %v182_v55  ;;  %591 = vmatprep.mubr.f32.mxu1 %v860_v59  ;;  %v186_v2 = vadd.f32 %v185_v0, %v1207_v60  ;;  %v298_v4 = vpop.f32.mrb[12].mxu1  ;;  %487 = vmatmul.mubr.f32.gmra.mrb[20].mxu0 %v854_v49 }
  0xf6   :  { %v187_v5 = vpop.f32.mrb[13].mxu0  ;;  %v864_v6 = vpop.eup %863  ;;  %883 = vtanh.f32 %v295_v58  ;;  %v299_v7 = vadd.f32 %v298_v4, %v1209_v61  ;;  %592 = vmatmul.mubr.f32.gmra.mrb[20].mxu1 %v856_v53 }
  0xf7   :  { %v188_v8 = vadd.f32 %v187_v5, %v1211_v62  ;;  %v300_v9 = vpop.f32.mrb[13].mxu1  ;;  %v866_v10 = vpop.eup %865  ;;  %885 = vtanh.f32 %v186_v2 }
  0xf8   :  { %v301_v11 = vadd.f32 %v300_v9, %v1213_v63  ;;  %v868_v3 = vpop.eup %867  ;;  %887 = vtanh.f32 %v299_v7  ;;  %491 = vmatprep.mubr.f32.mxu0 %v866_v10  ;;  %v191_v12 = vpop.f32.mrb[14].mxu0 }
  0xf9   :  { %v870_v13 = vpop.eup %869  ;;  %889 = vtanh.f32 %v188_v8  ;;  %596 = vmatprep.mubr.f32.mxu1 %v868_v3  ;;  %v192_v14 = vadd.f32 %v191_v12, %v1207_v60  ;;  %v304_v15 = vpop.f32.mrb[14].mxu1  ;;  %492 = vmatmul.mubr.f32.gmra.mrb[22].mxu0 %v862_v1 }
  0xfa   :  { %v193_v16 = vpop.f32.mrb[15].mxu0  ;;  %v872_v17 = vpop.eup %871  ;;  %891 = vtanh.f32 %v301_v11  ;;  %v305_v18 = vadd.f32 %v304_v15, %v1209_v61  ;;  %597 = vmatmul.mubr.f32.gmra.mrb[22].mxu1 %v864_v6 }
  0xfb   :  { %v194_v19 = vadd.f32 %v193_v16, %v1211_v62  ;;  %v306_v20 = vpop.f32.mrb[15].mxu1  ;;  %v874_v21 = vpop.eup %873  ;;  %893 = vtanh.f32 %v192_v14 }
  0xfc   :  { %v307_v22 = vadd.f32 %v306_v20, %v1213_v63  ;;  %v876_v23 = vpop.eup %875  ;;  %895 = vtanh.f32 %v305_v18  ;;  %496 = vmatprep.mubr.f32.mxu0 %v874_v21 }
  0xfd   :  { %v878_v24 = vpop.eup %877  ;;  %897 = vtanh.f32 %v194_v19  ;;  %601 = vmatprep.mubr.f32.mxu1 %v876_v23  ;;  %497 = vmatmul.mubr.f32.gmra.mrb[24].mxu0 %v870_v13 }
  0xfe   :  { %v880_v60 = vpop.eup %879  ;;  %899 = vtanh.f32 %v307_v22  ;;  %602 = vmatmul.mubr.f32.gmra.mrb[24].mxu1 %v872_v17 }
  0xff   :  { %v882_v25 = vpop.eup %881 }
 0x100   :  { %v884_v61 = vpop.eup %883  ;;  %501 = vmatprep.mubr.f32.mxu0 %v882_v25 }
 0x101   :  { %v886_v26 = vpop.eup %885  ;;  %606 = vmatprep.mubr.f32.mxu1 %v884_v61  ;;  %502 = vmatmul.mubr.f32.gmra.mrb[26].mxu0 %v878_v24 }
 0x102   :  { %v888_v62 = vpop.eup %887  ;;  %607 = vmatmul.mubr.f32.gmra.mrb[26].mxu1 %v880_v60 }
 0x103   :  { %v890_v27 = vpop.eup %889 }
 0x104   :  { %v892_v63 = vpop.eup %891  ;;  %506 = vmatprep.mubr.f32.mxu0 %v890_v27 }
 0x105   :  { %v894_v28 = vpop.eup %893  ;;  %611 = vmatprep.mubr.f32.mxu1 %v892_v63  ;;  %507 = vmatmul.mubr.f32.gmra.mrb[28].mxu0 %v886_v26 }
 0x106   :  { %v896_v29 = vpop.eup %895  ;;  %612 = vmatmul.mubr.f32.gmra.mrb[28].mxu1 %v888_v62 }
 0x107   :  { %v898_v30 = vpop.eup %897 }
 0x108   :  { %v900_v31 = vpop.eup %899  ;;  %511 = vmatprep.mubr.f32.mxu0 %v898_v30 }
 0x109   :  { %616 = vmatprep.mubr.f32.mxu1 %v900_v31  ;;  %512 = vmatmul.mubr.f32.gmra.mrb[30].mxu0 %v894_v28 }
 0x10a   :  { %617 = vmatmul.mubr.f32.gmra.mrb[30].mxu1 %v896_v29 }
 0x1c0   :  { %v684_v32 = vpop.f32.mrb[16].mxu0 }
 0x1c1   :  { %v740_v33 = vpop.f32.mrb[16].mxu1  ;;  %v685_v35 = vpop.f32.mrb[17].mxu0 }
 0x1c2   :  { %v686_v36 = vadd.f32 %v685_v35, %v684_v32  ;;  %v741_v37 = vpop.f32.mrb[17].mxu1 }
 0x1c3   :  { %v742_v38 = vadd.f32 %v741_v37, %v740_v33 }
 0x1c4   :  { %v479_v39 = vadd.f32 %v686_v36, %v1250_v34  ;;  %v687_v40 = vpop.f32.mrb[18].mxu0 }
 0x1c5   :  { %v743_v41 = vpop.f32.mrb[18].mxu1  ;;  %v688_v42 = vpop.f32.mrb[19].mxu0 }
 0x1c6   :  { %v584_v43 = vadd.f32 %v742_v38, %v479_v39  ;;  %v689_v44 = vadd.f32 %v688_v42, %v687_v40  ;;  %v744_v45 = vpop.f32.mrb[19].mxu1 }
 0x1c7   :  { %v745_v46 = vadd.f32 %v744_v45, %v743_v41 }
 0x1c8   :  { %623 = vst.msk [vmem:[%s1297_s5] sm:$0xff] %vm622_vm1, %v584_v43  ;;  %v484_v47 = vadd.f32 %v689_v44, %v1250_v34  ;;  %v690_v48 = vpop.f32.mrb[20].mxu0 }
 0x1c9   :  { %v746_v49 = vpop.f32.mrb[20].mxu1  ;;  %v691_v50 = vpop.f32.mrb[21].mxu0 }
 0x1ca   :  { %v589_v51 = vadd.f32 %v745_v46, %v484_v47  ;;  %v692_v52 = vadd.f32 %v691_v50, %v690_v48  ;;  %v747_v53 = vpop.f32.mrb[21].mxu1 }
 0x1cb   :  { %v748_v54 = vadd.f32 %v747_v53, %v746_v49 }
 0x1cc   :  { %624 = vst.msk [vmem:[%s1297_s5 + $0x8] sm:$0xff] %vm622_vm1, %v589_v51  ;;  %v489_v55 = vadd.f32 %v692_v52, %v1250_v34  ;;  %v693_v56 = vpop.f32.mrb[22].mxu0 }
 0x1cd   :  { %v749_v57 = vpop.f32.mrb[22].mxu1  ;;  %v694_v58 = vpop.f32.mrb[23].mxu0 }
 0x1ce   :  { %v594_v59 = vadd.f32 %v748_v54, %v489_v55  ;;  %v695_v0 = vadd.f32 %v694_v58, %v693_v56  ;;  %v750_v1 = vpop.f32.mrb[23].mxu1 }
 0x1cf   :  { %v751_v2 = vadd.f32 %v750_v1, %v749_v57 }
 0x1d0   :  { %625 = vst.msk [vmem:[%s1297_s5 + $0x10] sm:$0xff] %vm622_vm1, %v594_v59  ;;  %v494_v4 = vadd.f32 %v695_v0, %v1250_v34  ;;  %v696_v5 = vpop.f32.mrb[24].mxu0 }
 0x1d1   :  { %v752_v6 = vpop.f32.mrb[24].mxu1  ;;  %v697_v7 = vpop.f32.mrb[25].mxu0 }
 0x1d2   :  { %v599_v8 = vadd.f32 %v751_v2, %v494_v4  ;;  %v698_v9 = vadd.f32 %v697_v7, %v696_v5  ;;  %v753_v10 = vpop.f32.mrb[25].mxu1 }
 0x1d3   :  { %v754_v11 = vadd.f32 %v753_v10, %v752_v6 }
 0x1d4   :  { %626 = vst.msk [vmem:[%s1297_s5 + $0x18] sm:$0xff] %vm622_vm1, %v599_v8  ;;  %v499_v3 = vadd.f32 %v698_v9, %v1250_v34  ;;  %v699_v12 = vpop.f32.mrb[26].mxu0 }
 0x1d5   :  { %v755_v13 = vpop.f32.mrb[26].mxu1  ;;  %v700_v14 = vpop.f32.mrb[27].mxu0 }
 0x1d6   :  { %v604_v15 = vadd.f32 %v754_v11, %v499_v3  ;;  %v701_v16 = vadd.f32 %v700_v14, %v699_v12  ;;  %v756_v17 = vpop.f32.mrb[27].mxu1 }
 0x1d7   :  { %v757_v18 = vadd.f32 %v756_v17, %v755_v13 }
 0x1d8   :  { %627 = vst.msk [vmem:[%s1297_s5 + $0x20] sm:$0xff] %vm622_vm1, %v604_v15  ;;  %v504_v19 = vadd.f32 %v701_v16, %v1250_v34  ;;  %v702_v20 = vpop.f32.mrb[28].mxu0 }
 0x1d9   :  { %v758_v21 = vpop.f32.mrb[28].mxu1  ;;  %v703_v22 = vpop.f32.mrb[29].mxu0 }
 0x1da   :  { %v609_v23 = vadd.f32 %v757_v18, %v504_v19  ;;  %v704_v24 = vadd.f32 %v703_v22, %v702_v20  ;;  %v759_v60 = vpop.f32.mrb[29].mxu1 }
 0x1db   :  { %v760_v25 = vadd.f32 %v759_v60, %v758_v21 }
 0x1dc   :  { %628 = vst.msk [vmem:[%s1297_s5 + $0x28] sm:$0xff] %vm622_vm1, %v609_v23  ;;  %v509_v61 = vadd.f32 %v704_v24, %v1250_v34  ;;  %v705_v26 = vpop.f32.mrb[30].mxu0 }
 0x1dd   :  { %v761_v62 = vpop.f32.mrb[30].mxu1  ;;  %v706_v27 = vpop.f32.mrb[31].mxu0 }
 0x1de   :  { %v614_v63 = vadd.f32 %v760_v25, %v509_v61  ;;  %v707_v28 = vadd.f32 %v706_v27, %v705_v26  ;;  %v762_v29 = vpop.f32.mrb[31].mxu1 }
 0x1df   :  { %v763_v30 = vadd.f32 %v762_v29, %v761_v62 }
 0x1e0   :  { %629 = vst.msk [vmem:[%s1297_s5 + $0x30] sm:$0xff] %vm622_vm1, %v614_v63  ;;  %v514_v31 = vadd.f32 %v707_v28, %v1250_v34 }
 0x1e2   :  { %v619_v32 = vadd.f32 %v763_v30, %v514_v31 }
 0x1e4   :  { %630 = vst.msk [vmem:[%s1297_s5 + $0x38] sm:$0xff] %vm622_vm1, %v619_v32 }

// kernel: graphstar_forward.3
= control target key start
LH: loop header
LB: loop body
LE: loop exit
PB: predicated region body
PF: predicated region fallthrough
CT: control target
= control target key end

     0   :  { %vm28_vm0 = vcmask 261120   ;;  %s3594_s0 = inlined_call_operand.vmem [shape: f32[64,32], index: 0, kind: input, shape index: {}]   ;;  %s3595_s1 = inlined_call_operand.vmem [shape: f32[64,64], index: 1, kind: input, shape index: {}]   ;;  %s3596_s2 = inlined_call_operand.vmem [shape: f32[64,32], index: 2, kind: input, shape index: {}]   ;;  %s3597_s3 = inlined_call_operand.vmem [shape: f32[32,16], index: 3, kind: input, shape index: {}]   ;;  %s3598_s4 = inlined_call_operand.vmem [shape: f32[64,16], index: 4, kind: output, shape index: {0}]   ;;  %s3599_s5 = inlined_call_operand.hbm [shape: f32[64,64], index: 5, kind: output, shape index: {1}]  }
   0x1   :  { %v20_v0 = vld [vmem:[%s3594_s0] sm:$0xff]  ;;  %v21_v1 = vld [vmem:[%s3594_s0 + $0x8] sm:$0xff]  ;;  %v22_v2 = vld [vmem:[%s3594_s0 + $0x10] sm:$0xff] }
   0x2   :  { %v158_v3 = vmul.f32 %v20_v0, %v20_v0  ;;  %v159_v4 = vmul.f32 %v21_v1, %v21_v1  ;;  %v160_v5 = vmul.f32 %v22_v2, %v22_v2  ;;  %v23_v6 = vld [vmem:[%s3594_s0 + $0x18] sm:$0xff]  ;;  %v2166_v7 = vpack.c.bf16 %v21_v1, %v20_v0  ;;  %vm2414_vm1 = vmpackc.low %vm28_vm0, %vm28_vm0  ;;  %2106 = vmatprep.mubr.msk.f32.mxu0 %vm28_vm0, %v20_v0  ;;  %v24_v11 = vld [vmem:[%s3594_s0 + $0x20] sm:$0xff] }
   0x3   :  { %v161_v9 = vmul.f32 %v23_v6, %v23_v6  ;;  %v2172_v10 = vpack.c.bf16 %v23_v6, %v22_v2  ;;  %v25_v12 = vld [vmem:[%s3594_s0 + $0x28] sm:$0xff] }
   0x4   :  { %v166_v13 = vsel %vm28_vm0, %v158_v3, 0.0  ;;  %v172_v14 = vsel %vm28_vm0, %v160_v5, 0.0  ;;  %2168 = vmatprep.subr.msk.bf16.mxu0 %vm2414_vm1, %v2166_v7 }
   0x5   :  { %11 = vsyncpa [#allocation3], 0  ;;  %167 = vadd.xlane.f32.xlu0 %v166_v13  ;;  %173 = vadd.xlane.f32.xlu1 %v172_v14  ;;  %v169_v15 = vsel %vm28_vm0, %v159_v4, 0.0  ;;  %v175_v16 = vsel %vm28_vm0, %v161_v9, 0.0  ;;  %v162_v17 = vmul.f32 %v24_v11, %v24_v11  ;;  %v163_v18 = vmul.f32 %v25_v12, %v25_v12  ;;  %v26_v19 = vld [vmem:[%s3594_s0 + $0x30] sm:$0xff]  ;;  %v27_v20 = vld [vmem:[%s3594_s0 + $0x38] sm:$0xff] }
   0x6   :  { %2171 = vmatpush3.bf16.xpose.msk.msra.mxu0 %vm2414_vm1, %v2166_v7  ;;  %v164_v23 = vmul.f32 %v26_v19, %v26_v19  ;;  %v165_v24 = vmul.f32 %v27_v20, %v27_v20  ;;  %v2178_v25 = vpack.c.bf16 %v25_v12, %v24_v11  ;;  %v2184_v28 = vpack.c.bf16 %v27_v20, %v26_v19 }
   0x7   :  { %2174 = vmatprep.subr.msk.bf16.mxu0 %vm2414_vm1, %v2172_v10  ;;  %v178_v21 = vsel %vm28_vm0, %v162_v17, 0.0  ;;  %v181_v22 = vsel %vm28_vm0, %v163_v18, 0.0  ;;  %v190_v45 = vlaneseq  ;;  %vm285_vm3 = vcmask 523264  }
   0x8   :  { %v184_v26 = vsel %vm28_vm0, %v164_v23, 0.0  ;;  %v187_v27 = vsel %vm28_vm0, %v165_v24, 0.0 }
   0x9   :  { %170 = vadd.xlane.f32.xlu0 %v169_v15  ;;  %176 = vadd.xlane.f32.xlu1 %v175_v16  ;;  %v2465_v46 = vshrl.u32 %v190_v45, 7  ;;  %v2468_v52 = vand.u32 127, %v190_v45 }
   0xb   :  { %v235_v47 = vsub.s32 0, %v2465_v46  ;;  %v192_v53 = vadd.s32 8, %v2465_v46  ;;  %vm269_vm4 = vcmp.eq.s32.totalorder %v2465_v46, %v2468_v52  ;;  %v193_v9 = vadd.s32 16, %v2465_v46 }
   0xc   :  { %v196_v16 = vadd.s32 40, %v2465_v46  ;;  %v195_v23 = vadd.s32 32, %v2465_v46 }
   0xd   :  { %179 = vadd.xlane.f32.xlu0 %v178_v21  ;;  %182 = vadd.xlane.f32.xlu1 %v181_v22  ;;  %vm270_vm2 = vcmp.eq.s32.totalorder %v192_v53, %v2468_v52  ;;  %vm271_vm6 = vcmp.eq.s32.totalorder %v193_v9, %v2468_v52 }
   0xe   :  { %2177 = vmatpush3.bf16.xpose.msk.msra.mxu0 %vm2414_vm1, %v2172_v10  ;;  %vm274_vm7 = vcmp.eq.s32.totalorder %v196_v16, %v2468_v52  ;;  %vm273_vm8 = vcmp.eq.s32.totalorder %v195_v23, %v2468_v52 }
   0xf   :  { %2180 = vmatprep.subr.msk.bf16.mxu0 %vm2414_vm1, %v2178_v25 }
  0x11   :  { %185 = vadd.xlane.f32.xlu0 %v184_v26  ;;  %188 = vadd.xlane.f32.xlu1 %v187_v27 }
  0x16   :  { %2183 = vmatpush3.bf16.xpose.msk.msra.mxu0 %vm2414_vm1, %v2178_v25 }
  0x17   :  { %2186 = vmatprep.subr.msk.bf16.mxu0 %vm2414_vm1, %v2184_v28 }
  0x1e   :  { %2189 = vmatpush3.bf16.xpose.msk.msra.mxu0 %vm2414_vm1, %v2184_v28 }
  0x25   :  { %2107 = vmatmul.mubr.msk.f32.vlgmr.msra.gmra.mrb[0].mxu0 %vm28_vm0, %v21_v1  ;;  %v194_v1 = vadd.s32 24, %v2465_v46 }
  0x26   :  { %2109 = vmatprep.mubr.msk.f32.mxu0 %vm28_vm0, %v22_v2 }
  0x27   :  { %vm272_vm5 = vcmp.eq.s32.totalorder %v194_v1, %v2468_v52 }
  0x29   :  { %2110 = vmatmul.mubr.msk.f32.gmra.mrb[2].mxu0 %vm28_vm0, %v23_v6 }
  0x2a   :  { %2112 = vmatprep.mubr.msk.f32.mxu0 %vm28_vm0, %v24_v11 }
  0x2d   :  { %2113 = vmatmul.mubr.msk.f32.gmra.mrb[4].mxu0 %vm28_vm0, %v25_v12 }
  0x2e   :  { %2115 = vmatprep.mubr.msk.f32.mxu0 %vm28_vm0, %v26_v19 }
  0x31   :  { %2116 = vmatmul.mubr.msk.f32.gmra.mrb[6].mxu0 %vm28_vm0, %v27_v20 }
  0x92   :  { %v168_v29 = vpop.xlane.xlu0 %167  ;;  %v174_v31 = vpop.xlane.xlu1 %173 }
  0x93   :  { %201 = vxpose.xlu0.b32.start [1/8] (short) (narrow) %v168_v29, 8 }
  0x96   :  { %v171_v30 = vpop.xlane.xlu0 %170  ;;  %v177_v32 = vpop.xlane.xlu1 %176 }
  0x97   :  { %202 = vxpose.xlu0.b32.cont [2/8] (short) (narrow) %v171_v30, 8 }
  0x9a   :  { %v180_v33 = vpop.xlane.xlu0 %179  ;;  %v183_v34 = vpop.xlane.xlu1 %182 }
  0x9b   :  { %203 = vxpose.xlu0.b32.cont [3/8] (short) (narrow) %v174_v31, 8 }
  0x9e   :  { %v186_v35 = vpop.xlane.xlu0 %185  ;;  %v2462_v36 = vpop.xlane.xlu1 %188 }
  0x9f   :  { %204 = vxpose.xlu0.b32.cont [4/8] (short) (narrow) %v177_v32, 8 }
  0xa3   :  { %205 = vxpose.xlu0.b32.cont [5/8] (short) (narrow) %v180_v33, 8 }
  0xa7   :  { %206 = vxpose.xlu0.b32.cont [6/8] (short) (narrow) %v183_v34, 8 }
  0xab   :  { %207 = vxpose.xlu0.b32.cont [7/8] (short) (narrow) %v186_v35, 8 }
  0xaf   :  { %208 = vxpose.xlu0.b32.end [8/8] (short) (narrow) %v2462_v36, 8 }
  0xf8   :  { %v2108_v37 = vpop.f32.mrb[0].mxu0 }
  0xf9   :  { %v119_v38 = vpop.f32.mrb[1].mxu0  ;;  %v246_v49 = vmul.f32 2.0, %v2108_v37 }
  0xfa   :  { %v245_v51 = vmul.f32 2.0, %v119_v38 }
  0xfc   :  { %v2111_v39 = vpop.f32.mrb[2].mxu0 }
  0xfd   :  { %v129_v40 = vpop.f32.mrb[3].mxu0  ;;  %v248_v55 = vmul.f32 2.0, %v2111_v39 }
  0xfe   :  { %v247_v61 = vmul.f32 2.0, %v129_v40 }
 0x100   :  { %v2114_v41 = vpop.f32.mrb[4].mxu0 }
 0x101   :  { %v139_v42 = vpop.f32.mrb[5].mxu0  ;;  %v250_v3 = vmul.f32 2.0, %v2114_v41 }
 0x102   :  { %v249_v10 = vmul.f32 2.0, %v139_v42 }
 0x104   :  { %v2117_v43 = vpop.f32.mrb[6].mxu0 }
 0x105   :  { %v149_v44 = vpop.f32.mrb[7].mxu0  ;;  %v252_v24 = vmul.f32 2.0, %v2117_v43 }
 0x106   :  { %v251_v17 = vmul.f32 2.0, %v149_v44 }
 0x113   :  { %v217_v48 = vpop.trf.xlu0 }
 0x114   :  { %v236_v50 = vrot.slane %v217_v48, %v235_v47 }
 0x116   :  { %v238_v54 = vadd.f32 %v236_v50, %v171_v30  ;;  %v237_v56 = vadd.f32 %v236_v50, %v168_v29  ;;  %v240_v57 = vadd.f32 %v236_v50, %v177_v32  ;;  %v239_v0 = vadd.f32 %v236_v50, %v174_v31 }
 0x117   :  { %v242_v8 = vadd.f32 %v236_v50, %v183_v34  ;;  %v241_v12 = vadd.f32 %v236_v50, %v180_v33  ;;  %v243_v20 = vadd.f32 %v236_v50, %v186_v35  ;;  %v244_v27 = vadd.f32 %v236_v50, %v2462_v36 }
 0x118   :  { %v254_v58 = vsub.f32 %v238_v54, %v246_v49  ;;  %v253_v59 = vsub.f32 %v237_v56, %v245_v51  ;;  %v256_v63 = vsub.f32 %v240_v57, %v248_v55  ;;  %v255_v7 = vsub.f32 %v239_v0, %v247_v61 }
 0x119   :  { %v258_v15 = vsub.f32 %v242_v8, %v250_v3  ;;  %v257_v19 = vsub.f32 %v241_v12, %v249_v10  ;;  %v259_v28 = vsub.f32 %v243_v20, %v251_v17  ;;  %v197_v30 = vadd.s32 48, %v2465_v46 }
 0x11a   :  { %v262_v60 = vmax.f32 %v254_v58, 0.0  ;;  %v261_v62 = vmax.f32 %v253_v59, 0.0  ;;  %v264_v6 = vmax.f32 %v256_v63, 0.0  ;;  %v263_v14 = vmax.f32 %v255_v7, 0.0 }
 0x11b   :  { %v266_v22 = vmax.f32 %v258_v15, 0.0  ;;  %v265_v26 = vmax.f32 %v257_v19, 0.0  ;;  %v260_v33 = vsub.f32 %v244_v27, %v252_v24  ;;  %v267_v34 = vmax.f32 %v259_v28, 0.0 }
 0x11c   :  { %v2475_v2 = vsel %vm270_vm2, 1e+30, %v262_v60  ;;  %v2479_v5 = vsel %vm269_vm4, 1e+30, %v261_v62  ;;  %v2485_v13 = vsel %vm272_vm5, 1e+30, %v264_v6  ;;  %vm275_vm9 = vcmp.eq.s32.totalorder %v197_v30, %v2468_v52 }
 0x11d   :  { %v289_v4 = vsel %vm285_vm3, %v2475_v2, inf  ;;  %3605 = vst [vmem:[#allocation5_spill] sm:$0xff] %v2479_v5  ;;  %v286_v11 = vsel %vm285_vm3, %v2479_v5, inf  ;;  %v295_v18 = vsel %vm285_vm3, %v2485_v13, inf  ;;  %v2491_v21 = vsel %vm271_vm6, 1e+30, %v263_v14 }
 0x11e   :  { %290 = vmin.xlane.f32.xlu1 %v289_v4  ;;  %v292_v25 = vsel %vm285_vm3, %v2491_v21, inf  ;;  %v2498_v29 = vsel %vm274_vm7, 1e+30, %v266_v22  ;;  %v2504_v32 = vsel %vm273_vm8, 1e+30, %v265_v26  ;;  %v198_v35 = vadd.s32 56, %v2465_v46 }
 0x11f   :  { %v301_v31 = vsel %vm285_vm3, %v2498_v29, inf  ;;  %v298_v36 = vsel %vm285_vm3, %v2504_v32, inf  ;;  %v268_v37 = vmax.f32 %v260_v33, 0.0  ;;  %v2510_v38 = vsel %vm275_vm9, 1e+30, %v267_v34 }
 0x120   :  { %vm276_vm10 = vcmp.eq.s32.totalorder %v198_v35, %v2468_v52  ;;  %v304_v39 = vsel %vm285_vm3, %v2510_v38, inf }
 0x121   :  { %v2515_v40 = vsel %vm276_vm10, 1e+30, %v268_v37 }
 0x122   :  { %287 = vmin.xlane.f32.xlu1 %v286_v11  ;;  %v307_v41 = vsel %vm285_vm3, %v2515_v40, inf }
 0x126   :  { %296 = vmin.xlane.f32.xlu1 %v295_v18 }
 0x12a   :  { %293 = vmin.xlane.f32.xlu1 %v292_v25 }
 0x12e   :  { %302 = vmin.xlane.f32.xlu1 %v301_v31 }
 0x132   :  { %299 = vmin.xlane.f32.xlu1 %v298_v36 }
 0x136   :  { %305 = vmin.xlane.f32.xlu1 %v304_v39 }
 0x13a   :  { %308 = vmin.xlane.f32.xlu1 %v307_v41 }
 0x1ab   :  { %v291_v42 = vpop.xlane.xlu1 %290 }
 0x1ac   :  { %vm311_vm11 = vcmp.eq.f32.partialorder %v2475_v2, %v291_v42 }
 0x1ad   :  { %v319_v43 = vsel %vm311_vm11, %v2468_v52, 64 }
 0x1ae   :  { %v341_v44 = vsel %vm285_vm3, %v319_v43, 2147483647 }
 0x1af   :  { %v288_v45 = vpop.xlane.xlu1 %287  ;;  %v343_v46 = vshra.s32 %v341_v44, 16  ;;  %v342_v23 = vand.u32 65535, %v341_v44 }
 0x1b0   :  { %vm310_vm12 = vcmp.eq.f32.partialorder %v2479_v5, %v288_v45 }
 0x1b1   :  { %v318_v47 = vsel %vm310_vm12, %v2468_v52, 64  ;;  %v345_v48 = vcvt.s32.f32 %v343_v46  ;;  %v344_v25 = vcvt.s32.f32 %v342_v23 }
 0x1b2   :  { %v326_v49 = vsel %vm285_vm3, %v318_v47, 2147483647 }
 0x1b3   :  { %v297_v50 = vpop.xlane.xlu1 %296  ;;  %346 = vmin.xlane.f32.xlu1 %v345_v48  ;;  %v328_v51 = vshra.s32 %v326_v49, 16  ;;  %v327_v26 = vand.u32 65535, %v326_v49 }
 0x1b4   :  { %vm313_vm13 = vcmp.eq.f32.partialorder %v2485_v13, %v297_v50 }
 0x1b5   :  { %v321_v53 = vsel %vm313_vm13, %v2468_v52, 64  ;;  %v330_v54 = vcvt.s32.f32 %v328_v51  ;;  %v329_v30 = vcvt.s32.f32 %v327_v26 }
 0x1b6   :  { %v371_v55 = vsel %vm285_vm3, %v321_v53, 2147483647 }
 0x1b7   :  { %v294_v56 = vpop.xlane.xlu1 %293  ;;  %331 = vmin.xlane.f32.xlu1 %v330_v54  ;;  %v373_v57 = vshra.s32 %v371_v55, 16  ;;  %v372_v31 = vand.u32 65535, %v371_v55 }
 0x1b8   :  { %vm312_vm14 = vcmp.eq.f32.partialorder %v2491_v21, %v294_v56 }
 0x1b9   :  { %v320_v58 = vsel %vm312_vm14, %v2468_v52, 64  ;;  %v375_v59 = vcvt.s32.f32 %v373_v57  ;;  %v374_v35 = vcvt.s32.f32 %v372_v31 }
 0x1ba   :  { %v356_v60 = vsel %vm285_vm3, %v320_v58, 2147483647 }
 0x1bb   :  { %v303_v61 = vpop.xlane.xlu1 %302  ;;  %376 = vmin.xlane.f32.xlu1 %v375_v59  ;;  %v358_v62 = vshra.s32 %v356_v60, 16  ;;  %v357_v36 = vand.u32 65535, %v356_v60 }
 0x1bc   :  { %vm315_vm15 = vcmp.eq.f32.partialorder %v2498_v29, %v303_v61 }
 0x1bd   :  { %v323_v63 = vsel %vm315_vm15, %v2468_v52, 64  ;;  %v360_v0 = vcvt.s32.f32 %v358_v62  ;;  %v359_v41 = vcvt.s32.f32 %v357_v36 }
 0x1be   :  { %v401_v1 = vsel %vm285_vm3, %v323_v63, 2147483647 }
 0x1bf   :  { %v300_v3 = vpop.xlane.xlu1 %299  ;;  %361 = vmin.xlane.f32.xlu1 %v360_v0  ;;  %v403_v4 = vshra.s32 %v401_v1, 16  ;;  %v402_v42 = vand.u32 65535, %v401_v1 }
 0x1c0   :  { %vm314_vm1 = vcmp.eq.f32.partialorder %v2504_v32, %v300_v3 }
 0x1c1   :  { %v322_v6 = vsel %vm314_vm1, %v2468_v52, 64  ;;  %v405_v7 = vcvt.s32.f32 %v403_v4  ;;  %v404_v45 = vcvt.s32.f32 %v402_v42 }
 0x1c2   :  { %v386_v8 = vsel %vm285_vm3, %v322_v6, 2147483647 }
 0x1c3   :  { %406 = vmin.xlane.f32.xlu1 %v405_v7  ;;  %v306_v9 = vpop.xlane.xlu1 %305  ;;  %v388_v10 = vshra.s32 %v386_v8, 16  ;;  %v387_v46 = vand.u32 65535, %v386_v8  ;;  %v3600_v8 = vmov 0.0  }
 0x1c4   :  { %vm316_vm2 = vcmp.eq.f32.partialorder %v2510_v38, %v306_v9 }
 0x1c5   :  { %v324_v11 = vsel %vm316_vm2, %v2468_v52, 64  ;;  %v390_v12 = vcvt.s32.f32 %v388_v10  ;;  %v389_v49 = vcvt.s32.f32 %v387_v46 }
 0x1c6   :  { %v416_v14 = vsel %vm285_vm3, %v324_v11, 2147483647 }
 0x1c7   :  { %391 = vmin.xlane.f32.xlu1 %v390_v12  ;;  %v309_v15 = vpop.xlane.xlu1 %308  ;;  %v418_v16 = vshra.s32 %v416_v14, 16  ;;  %v417_v50 = vand.u32 65535, %v416_v14 }
 0x1c8   :  { %vm317_vm4 = vcmp.eq.f32.partialorder %v2515_v40, %v309_v15 }
 0x1c9   :  { %v325_v17 = vsel %vm317_vm4, %v2468_v52, 64  ;;  %v420_v18 = vcvt.s32.f32 %v418_v16 }
 0x1ca   :  { %v431_v19 = vsel %vm285_vm3, %v325_v17, 2147483647 }
 0x1cb   :  { %421 = vmin.xlane.f32.xlu1 %v420_v18  ;;  %v433_v20 = vshra.s32 %v431_v19, 16  ;;  %v432_v55 = vand.u32 65535, %v431_v19 }
 0x1cd   :  { %v435_v22 = vcvt.s32.f32 %v433_v20  ;;  %v434_v58 = vcvt.s32.f32 %v432_v55 }
 0x1cf   :  { %436 = vmin.xlane.f32.xlu1 %v435_v22 }
 0x240   :  { %v347_v24 = vpop.xlane.xlu1 %346 }
 0x241   :  { %vm348_vm5 = vcmp.eq.f32.partialorder %v345_v48, %v347_v24  ;;  %v353_v60 = vcvt.f32.s32 %v347_v24 }
 0x242   :  { %v349_v27 = vsel %vm348_vm5, %v344_v25, inf }
 0x243   :  { %350 = vmin.xlane.f32.xlu1 %v349_v27  ;;  %v354_v62 = vshll.u32 %v353_v60, 16 }
 0x244   :  { %v332_v28 = vpop.xlane.xlu1 %331 }
 0x245   :  { %vm333_vm6 = vcmp.eq.f32.partialorder %v330_v54, %v332_v28  ;;  %v419_v54 = vcvt.s32.f32 %v417_v50  ;;  %v338_v63 = vcvt.f32.s32 %v332_v28 }
 0x246   :  { %v334_v33 = vsel %vm333_vm6, %v329_v30, inf }
 0x247   :  { %335 = vmin.xlane.f32.xlu1 %v334_v33  ;;  %v339_v6 = vshll.u32 %v338_v63, 16 }
 0x248   :  { %v377_v34 = vpop.xlane.xlu1 %376 }
 0x249   :  { %vm378_vm7 = vcmp.eq.f32.partialorder %v375_v59, %v377_v34  ;;  %v383_v3 = vcvt.f32.s32 %v377_v34 }
 0x24a   :  { %v379_v37 = vsel %vm378_vm7, %v374_v35, inf }
 0x24b   :  { %380 = vmin.xlane.f32.xlu0 %v379_v37  ;;  %v384_v11 = vshll.u32 %v383_v3, 16 }
 0x24c   :  { %v362_v39 = vpop.xlane.xlu1 %361 }
 0x24d   :  { %vm363_vm8 = vcmp.eq.f32.partialorder %v360_v0, %v362_v39  ;;  %v368_v15 = vcvt.f32.s32 %v362_v39 }
 0x24e   :  { %v364_v43 = vsel %vm363_vm8, %v359_v41, inf }
 0x24f   :  { %365 = vmin.xlane.f32.xlu1 %v364_v43  ;;  %v369_v24 = vshll.u32 %v368_v15, 16 }
 0x250   :  { %v407_v44 = vpop.xlane.xlu1 %406 }
 0x251   :  { %vm408_vm9 = vcmp.eq.f32.partialorder %v405_v7, %v407_v44  ;;  %v413_v20 = vcvt.f32.s32 %v407_v44 }
 0x252   :  { %v409_v47 = vsel %vm408_vm9, %v404_v45, inf }
 0x253   :  { %410 = vmin.xlane.f32.xlu1 %v409_v47  ;;  %v414_v30 = vshll.u32 %v413_v20, 16 }
 0x254   :  { %v2543_v48 = vpop.xlane.xlu1 %391 }
 0x255   :  { %vm393_vm10 = vcmp.eq.f32.partialorder %v390_v12, %v2543_v48  ;;  %v398_v34 = vcvt.f32.s32 %v2543_v48 }
 0x256   :  { %v394_v51 = vsel %vm393_vm10, %v389_v49, inf }
 0x257   :  { %395 = vmin.xlane.f32.xlu1 %v394_v51  ;;  %v399_v44 = vshll.u32 %v398_v34, 16 }
 0x258   :  { %v2546_v53 = vpop.xlane.xlu1 %421 }
 0x259   :  { %vm423_vm11 = vcmp.eq.f32.partialorder %v420_v18, %v2546_v53  ;;  %v428_v41 = vcvt.f32.s32 %v2546_v53 }
 0x25a   :  { %v424_v56 = vsel %vm423_vm11, %v419_v54, inf }
 0x25b   :  { %425 = vmin.xlane.f32.xlu1 %v424_v56  ;;  %v429_v49 = vshll.u32 %v428_v41, 16 }
 0x25c   :  { %v2549_v57 = vpop.xlane.xlu1 %436 }
 0x25d   :  { %vm438_vm12 = vcmp.eq.f32.partialorder %v435_v22, %v2549_v57  ;;  %v443_v53 = vcvt.f32.s32 %v2549_v57 }
 0x25e   :  { %v439_v59 = vsel %vm438_vm12, %v434_v58, inf }
 0x25f   :  { %440 = vmin.xlane.f32.xlu1 %v439_v59 }
 0x2d0   :  { %v351_v61 = vpop.xlane.xlu1 %350 }
 0x2d1   :  { %v352_v0 = vcvt.f32.s32 %v351_v61  ;;  %v444_v61 = vshll.u32 %v443_v53, 16 }
 0x2d3   :  { %v355_v1 = vadd.s32 %v354_v62, %v352_v0 }
 0x2d4   :  { %v336_v4 = vpop.xlane.xlu1 %335 }
 0x2d5   :  { %vm447_vm13 = vcmp.eq.s32.totalorder %v2468_v52, %v355_v1  ;;  %v337_v7 = vcvt.f32.s32 %v336_v4 }
 0x2d6   :  { %v2554_v9 = vsel %vm447_vm13, 1.0, %v3600_v8 }
 0x2d7   :  { %vm568_vm14 = vcmp.gt.f32.partialorder %v2554_v9, 0.0  ;;  %v340_v10 = vadd.s32 %v339_v6, %v337_v7 }
 0x2d8   :  { %v2558_v12 = vsel %vm568_vm14, 1e+30, %v2475_v2  ;;  %v381_v14 = vpop.xlane.xlu0 %380 }
 0x2d9   :  { %vm446_vm15 = vcmp.eq.s32.totalorder %v2468_v52, %v340_v10  ;;  %v382_v16 = vcvt.f32.s32 %v381_v14  ;;  %v586_v17 = vsel %vm285_vm3, %v2558_v12, inf  ;;  %2226 = vrsqrt.f32 %v2558_v12 }
 0x2da   :  { %v2564_v18 = vsel %vm446_vm15, 1.0, %v3600_v8  ;;  %587 = vmin.xlane.f32.xlu1 %v586_v17 }
 0x2db   :  { %vm567_vm1 = vcmp.gt.f32.partialorder %v2564_v18, 0.0  ;;  %v385_v19 = vadd.s32 %v384_v11, %v382_v16 }
 0x2dc   :  { %v2568_v22 = vsel %vm567_vm1, 1e+30, %v2479_v5  ;;  %v366_v23 = vpop.xlane.xlu1 %365 }
 0x2dd   :  { %vm449_vm2 = vcmp.eq.s32.totalorder %v2468_v52, %v385_v19  ;;  %v367_v25 = vcvt.f32.s32 %v366_v23  ;;  %v583_v26 = vsel %vm285_vm3, %v2568_v22, inf  ;;  %2228 = vrsqrt.f32 %v2568_v22 }
 0x2de   :  { %v2574_v27 = vsel %vm449_vm2, 1.0, %v3600_v8  ;;  %584 = vmin.xlane.f32.xlu1 %v583_v26 }
 0x2df   :  { %vm570_vm4 = vcmp.gt.f32.partialorder %v2574_v27, 0.0  ;;  %v370_v28 = vadd.s32 %v369_v24, %v367_v25 }
 0x2e0   :  { %v2578_v31 = vsel %vm570_vm4, 1e+30, %v2485_v13  ;;  %v411_v33 = vpop.xlane.xlu1 %410 }
 0x2e1   :  { %vm448_vm5 = vcmp.eq.s32.totalorder %v2468_v52, %v370_v28  ;;  %v412_v35 = vcvt.f32.s32 %v411_v33  ;;  %v592_v36 = vsel %vm285_vm3, %v2578_v31, inf }
 0x2e2   :  { %v2585_v37 = vsel %vm448_vm5, 1.0, %v3600_v8  ;;  %593 = vmin.xlane.f32.xlu1 %v592_v36 }
 0x2e3   :  { %vm569_vm6 = vcmp.gt.f32.partialorder %v2585_v37, 0.0  ;;  %v415_v39 = vadd.s32 %v414_v30, %v412_v35 }
 0x2e4   :  { %v2590_v42 = vsel %vm569_vm6, 1e+30, %v2491_v21  ;;  %v396_v43 = vpop.xlane.xlu1 %395 }
 0x2e5   :  { %vm451_vm7 = vcmp.eq.s32.totalorder %v2468_v52, %v415_v39  ;;  %v397_v45 = vcvt.f32.s32 %v396_v43  ;;  %v589_v46 = vsel %vm285_vm3, %v2590_v42, inf  ;;  %2230 = vrsqrt.f32 %v2590_v42 }
 0x2e6   :  { %v2596_v47 = vsel %vm451_vm7, 1.0, %v3600_v8  ;;  %590 = vmin.xlane.f32.xlu1 %v589_v46  ;;  %2232 = vrsqrt.f32 %v2578_v31 }
 0x2e7   :  { %vm572_vm8 = vcmp.gt.f32.partialorder %v2596_v47, 0.0  ;;  %v400_v48 = vadd.s32 %v399_v44, %v397_v45 }
 0x2e8   :  { %v2600_v50 = vsel %vm572_vm8, 1e+30, %v2498_v29  ;;  %v426_v51 = vpop.xlane.xlu1 %425 }
 0x2e9   :  { %vm450_vm9 = vcmp.eq.s32.totalorder %v2468_v52, %v400_v48  ;;  %v427_v54 = vcvt.f32.s32 %v426_v51  ;;  %v598_v55 = vsel %vm285_vm3, %v2600_v50, inf }
 0x2ea   :  { %v2607_v56 = vsel %vm450_vm9, 1.0, %v3600_v8  ;;  %599 = vmin.xlane.f32.xlu1 %v598_v55 }
 0x2eb   :  { %vm571_vm10 = vcmp.gt.f32.partialorder %v2607_v56, 0.0  ;;  %v430_v58 = vadd.s32 %v429_v49, %v427_v54 }
 0x2ec   :  { %v2611_v59 = vsel %vm571_vm10, 1e+30, %v2504_v32  ;;  %v441_v60 = vpop.xlane.xlu1 %440 }
 0x2ed   :  { %vm452_vm11 = vcmp.eq.s32.totalorder %v2468_v52, %v430_v58  ;;  %v442_v57 = vcvt.f32.s32 %v441_v60  ;;  %v595_v62 = vsel %vm285_vm3, %v2611_v59, inf  ;;  %2234 = vrsqrt.f32 %v2611_v59 }
 0x2ee   :  { %v2617_v63 = vsel %vm452_vm11, 1.0, %v3600_v8  ;;  %596 = vmin.xlane.f32.xlu1 %v595_v62  ;;  %2236 = vrsqrt.f32 %v2600_v50 }
 0x2ef   :  { %vm573_vm12 = vcmp.gt.f32.partialorder %v2617_v63, 0.0  ;;  %v445_v0 = vadd.s32 %v444_v61, %v442_v57 }
 0x2f0   :  { %v2621_v1 = vsel %vm573_vm12, 1e+30, %v2510_v38 }
 0x2f1   :  { %vm453_vm13 = vcmp.eq.s32.totalorder %v2468_v52, %v445_v0  ;;  %v601_v3 = vsel %vm285_vm3, %v2621_v1, inf  ;;  %2238 = vrsqrt.f32 %v2621_v1 }
 0x2f2   :  { %v2627_v4 = vsel %vm453_vm13, 1.0, %v3600_v8  ;;  %602 = vmin.xlane.f32.xlu1 %v601_v3 }
 0x2f3   :  { %vm574_vm14 = vcmp.gt.f32.partialorder %v2627_v4, 0.0 }
 0x2f4   :  { %v2631_v6 = vsel %vm574_vm14, 1e+30, %v2515_v40 }
 0x2f5   :  { %v604_v7 = vsel %vm285_vm3, %v2631_v6, inf  ;;  %2240 = vrsqrt.f32 %v2631_v6 }
 0x2f6   :  { %605 = vmin.xlane.f32.xlu0 %v604_v7 }
 0x367   :  { %v588_v10 = vpop.xlane.xlu1 %587 }
 0x368   :  { %vm608_vm15 = vcmp.eq.f32.partialorder %v2558_v12, %v588_v10 }
 0x369   :  { %v616_v11 = vsel %vm608_vm15, %v2468_v52, 64 }
 0x36a   :  { %v638_v14 = vsel %vm285_vm3, %v616_v11, 2147483647 }
 0x36b   :  { %v585_v15 = vpop.xlane.xlu1 %584  ;;  %v640_v16 = vshra.s32 %v638_v14, 16 }
 0x36c   :  { %vm607_vm1 = vcmp.eq.f32.partialorder %v2568_v22, %v585_v15  ;;  %v639_v15 = vand.u32 65535, %v638_v14 }
 0x36d   :  { %v615_v17 = vsel %vm607_vm1, %v2468_v52, 64  ;;  %v642_v19 = vcvt.s32.f32 %v640_v16 }
 0x36e   :  { %v623_v20 = vsel %vm285_vm3, %v615_v17, 2147483647  ;;  %v641_v17 = vcvt.s32.f32 %v639_v15 }
 0x36f   :  { %643 = vmin.xlane.f32.xlu0 %v642_v19  ;;  %v594_v23 = vpop.xlane.xlu1 %593  ;;  %v625_v24 = vshra.s32 %v623_v20, 16 }
 0x370   :  { %vm610_vm2 = vcmp.eq.f32.partialorder %v2578_v31, %v594_v23  ;;  %v624_v23 = vand.u32 65535, %v623_v20 }
 0x371   :  { %v618_v25 = vsel %vm610_vm2, %v2468_v52, 64  ;;  %v627_v26 = vcvt.s32.f32 %v625_v24  ;;  %vm784_vm2 = vcmp.eq.f32.partialorder %v2558_v12, inf }
 0x372   :  { %v668_v28 = vsel %vm285_vm3, %v618_v25, 2147483647 }
 0x373   :  { %628 = vmin.xlane.f32.xlu1 %v627_v26  ;;  %v591_v30 = vpop.xlane.xlu1 %590  ;;  %v670_v33 = vshra.s32 %v668_v28, 16 }
 0x374   :  { %vm609_vm4 = vcmp.eq.f32.partialorder %v2590_v42, %v591_v30  ;;  %v626_v30 = vcvt.s32.f32 %v624_v23 }
 0x375   :  { %v617_v34 = vsel %vm609_vm4, %v2468_v52, 64  ;;  %v672_v35 = vcvt.s32.f32 %v670_v33  ;;  %v669_v33 = vand.u32 65535, %v668_v28  ;;  %vm786_vm4 = vcmp.eq.f32.partialorder %v2558_v12, 0.0 }
 0x376   :  { %v653_v36 = vsel %vm285_vm3, %v617_v34, 2147483647 }
 0x377   :  { %673 = vmin.xlane.f32.xlu0 %v672_v35  ;;  %v600_v39 = vpop.xlane.xlu1 %599  ;;  %v655_v41 = vshra.s32 %v653_v36, 16 }
 0x378   :  { %vm612_vm5 = vcmp.eq.f32.partialorder %v2600_v50, %v600_v39 }
 0x379   :  { %v620_v43 = vsel %vm612_vm5, %v2468_v52, 64  ;;  %v657_v44 = vcvt.s32.f32 %v655_v41  ;;  %v671_v41 = vcvt.s32.f32 %v669_v33 }
 0x37a   :  { %v698_v45 = vsel %vm285_vm3, %v620_v43, 2147483647  ;;  %v654_v43 = vand.u32 65535, %v653_v36 }
 0x37b   :  { %658 = vmin.xlane.f32.xlu1 %v657_v44  ;;  %v597_v46 = vpop.xlane.xlu1 %596  ;;  %v700_v48 = vshra.s32 %v698_v45, 16 }
 0x37c   :  { %vm611_vm6 = vcmp.eq.f32.partialorder %v2611_v59, %v597_v46  ;;  %v656_v20 = vcvt.s32.f32 %v654_v43 }
 0x37d   :  { %v619_v49 = vsel %vm611_vm6, %v2468_v52, 64  ;;  %v702_v51 = vcvt.s32.f32 %v700_v48  ;;  %vm777_vm6 = vcmp.eq.f32.partialorder %v2568_v22, inf }
 0x37e   :  { %v683_v53 = vsel %vm285_vm3, %v619_v49, 2147483647 }
 0x37f   :  { %703 = vmin.xlane.f32.xlu0 %v702_v51  ;;  %v603_v54 = vpop.xlane.xlu1 %602  ;;  %v685_v55 = vshra.s32 %v683_v53, 16  ;;  %v684_v49 = vand.u32 65535, %v683_v53 }
 0x380   :  { %vm613_vm7 = vcmp.eq.f32.partialorder %v2621_v1, %v603_v54 }
 0x381   :  { %v621_v58 = vsel %vm613_vm7, %v2468_v52, 64  ;;  %v687_v60 = vcvt.s32.f32 %v685_v55  ;;  %vm779_vm7 = vcmp.eq.f32.partialorder %v2568_v22, 0.0 }
 0x382   :  { %v713_v61 = vsel %vm285_vm3, %v621_v58, 2147483647 }
 0x383   :  { %v606_v57 = vpop.xlane.xlu0 %605  ;;  %688 = vmin.xlane.f32.xlu1 %v687_v60  ;;  %v715_v62 = vshra.s32 %v713_v61, 16  ;;  %v714_v55 = vand.u32 65535, %v713_v61 }
 0x384   :  { %vm614_vm8 = vcmp.eq.f32.partialorder %v2631_v6, %v606_v57 }
 0x385   :  { %v622_v0 = vsel %vm614_vm8, %v2468_v52, 64  ;;  %v717_v3 = vcvt.s32.f32 %v715_v62 }
 0x386   :  { %v728_v7 = vsel %vm285_vm3, %v622_v0, 2147483647 }
 0x387   :  { %718 = vmin.xlane.f32.xlu1 %v717_v3  ;;  %v730_v10 = vshra.s32 %v728_v7, 16  ;;  %v729_v57 = vand.u32 65535, %v728_v7 }
 0x389   :  { %v732_v11 = vcvt.s32.f32 %v730_v10 }
 0x38b   :  { %733 = vmin.xlane.f32.xlu0 %v732_v11 }
 0x3fc   :  { %v644_v16 = vpop.xlane.xlu0 %643 }
 0x3fd   :  { %vm645_vm9 = vcmp.eq.f32.partialorder %v642_v19, %v644_v16  ;;  %v699_v19 = vand.u32 65535, %v698_v45  ;;  %v650_v61 = vcvt.f32.s32 %v644_v16  ;;  %v787_v16 = vand.u32 2147483648, %v2558_v12 }
 0x3fe   :  { %v646_v24 = vsel %vm645_vm9, %v641_v17, inf }
 0x3ff   :  { %647 = vmin.xlane.f32.xlu0 %v646_v24  ;;  %v651_v15 = vshll.u32 %v650_v61, 16 }
 0x400   :  { %v629_v25 = vpop.xlane.xlu1 %628 }
 0x401   :  { %vm630_vm10 = vcmp.eq.f32.partialorder %v627_v26, %v629_v25  ;;  %v701_v26 = vcvt.s32.f32 %v699_v19  ;;  %v635_v17 = vcvt.f32.s32 %v629_v25 }
 0x402   :  { %v631_v34 = vsel %vm630_vm10, %v626_v30, inf  ;;  %vm791_vm10 = vcmp.eq.f32.partialorder %v2590_v42, inf }
 0x403   :  { %632 = vmin.xlane.f32.xlu1 %v631_v34  ;;  %v636_v34 = vshll.u32 %v635_v17, 16 }
 0x404   :  { %v2659_v39 = vpop.xlane.xlu0 %673 }
 0x405   :  { %vm675_vm11 = vcmp.eq.f32.partialorder %v672_v35, %v2659_v39  ;;  %v686_v35 = vcvt.s32.f32 %v684_v49 }
 0x406   :  { %v676_v46 = vsel %vm675_vm11, %v671_v41, inf  ;;  %v680_v41 = vcvt.f32.s32 %v2659_v39 }
 0x407   :  { %677 = vmin.xlane.f32.xlu0 %v676_v46  ;;  %v780_v46 = vand.u32 2147483648, %v2568_v22 }
 0x408   :  { %v2662_v14 = vpop.xlane.xlu1 %658 }
 0x409   :  { %vm660_vm12 = vcmp.eq.f32.partialorder %v657_v44, %v2662_v14  ;;  %v716_v44 = vcvt.s32.f32 %v714_v55  ;;  %v665_v39 = vcvt.f32.s32 %v2662_v14  ;;  %v681_v55 = vshll.u32 %v680_v41, 16 }
 0x40a   :  { %v661_v48 = vsel %vm660_vm12, %v656_v20, inf }
 0x40b   :  { %662 = vmin.xlane.f32.xlu1 %v661_v48 }
 0x40c   :  { %v2665_v28 = vpop.xlane.xlu0 %703 }
 0x40d   :  { %vm705_vm13 = vcmp.eq.f32.partialorder %v702_v51, %v2665_v28  ;;  %v731_v51 = vcvt.s32.f32 %v729_v57 }
 0x40e   :  { %v706_v54 = vsel %vm705_vm13, %v701_v26, inf  ;;  %vm793_vm13 = vcmp.eq.f32.partialorder %v2590_v42, 0.0 }
 0x40f   :  { %707 = vmin.xlane.f32.xlu0 %v706_v54 }
 0x410   :  { %v2668_v36 = vpop.xlane.xlu1 %688 }
 0x411   :  { %vm690_vm14 = vcmp.eq.f32.partialorder %v687_v60, %v2668_v36  ;;  %v2227_v60 = vpop.eup %2226 }
 0x412   :  { %v691_v58 = vsel %vm690_vm14, %v686_v35, inf  ;;  %v2229_v7 = vpop.eup %2228 }
 0x413   :  { %692 = vmin.xlane.f32.xlu1 %v691_v58  ;;  %v776_v24 = vmul.f32 %v2229_v7, %v2568_v22  ;;  %v2231_v26 = vpop.eup %2230 }
 0x414   :  { %v2671_v45 = vpop.xlane.xlu1 %718 }
 0x415   :  { %vm720_vm15 = vcmp.eq.f32.partialorder %v717_v3, %v2671_v45  ;;  %v783_v3 = vmul.f32 %v2227_v60, %v2558_v12  ;;  %v778_v19 = vsel %vm777_vm6, %v2568_v22, %v776_v24  ;;  %v710_v60 = vcvt.f32.s32 %v2665_v28 }
 0x416   :  { %v721_v62 = vsel %vm720_vm15, %v716_v44, inf  ;;  %v781_v57 = vsel %vm779_vm7, %v780_v46, %v778_v19  ;;  %v695_v24 = vcvt.f32.s32 %v2668_v36  ;;  %v2233_v46 = vpop.eup %2232  ;;  %vm812_vm7 = vcmp.eq.f32.partialorder %v2600_v50, inf }
 0x417   :  { %722 = vmin.xlane.f32.xlu1 %v721_v62  ;;  %v785_v30 = vsel %vm784_vm2, %v2558_v12, %v783_v3 }
 0x418   :  { %v2674_v53 = vpop.xlane.xlu0 %733  ;;  %v788_v20 = vsel %vm786_vm4, %v787_v16, %v785_v30  ;;  %v794_v16 = vand.u32 2147483648, %v2590_v42  ;;  %vm798_vm4 = vcmp.eq.f32.partialorder %v2578_v31, inf }
 0x419   :  { %vm735_vm1 = vcmp.eq.f32.partialorder %v732_v11, %v2674_v53 }
 0x41a   :  { %v736_v0 = vsel %vm735_vm1, %v731_v51, inf  ;;  %v790_v51 = vmul.f32 %v2231_v26, %v2590_v42  ;;  %v2235_v26 = vpop.eup %2234 }
 0x41b   :  { %737 = vmin.xlane.f32.xlu0 %v736_v0  ;;  %v666_v0 = vshll.u32 %v665_v39, 16  ;;  %v696_v39 = vshll.u32 %v695_v24, 16 }
 0x48c   :  { %v648_v10 = vpop.xlane.xlu0 %647 }
 0x48d   :  { %v649_v23 = vcvt.f32.s32 %v648_v10 }
 0x48f   :  { %v652_v11 = vadd.s32 %v651_v15, %v649_v23 }
 0x490   :  { %v633_v33 = vpop.xlane.xlu1 %632 }
 0x491   :  { %vm744_vm5 = vcmp.eq.s32.totalorder %v2468_v52, %v652_v11  ;;  %v634_v43 = vcvt.f32.s32 %v633_v33 }
 0x492   :  { %v2689_v25 = vsel %vm744_vm5, 1.0, %v3600_v8  ;;  %vm800_vm5 = vcmp.eq.f32.partialorder %v2578_v31, 0.0 }
 0x493   :  { %vm865_vm8 = vcmp.gt.f32.partialorder %v2689_v25, 0.0  ;;  %v637_v48 = vadd.s32 %v636_v34, %v634_v43  ;;  %v832_v49 = vmul.f32 %v2689_v25, %v788_v20  ;;  %v711_v34 = vshll.u32 %v710_v60, 16 }
 0x494   :  { %v2699_v54 = vsel %vm865_vm8, 1e+30, %v2558_v12  ;;  %v678_v35 = vpop.xlane.xlu0 %677 }
 0x495   :  { %vm743_vm9 = vcmp.eq.s32.totalorder %v2468_v52, %v637_v48  ;;  %v679_v58 = vcvt.f32.s32 %v678_v35  ;;  %v883_v44 = vsel %vm285_vm3, %v2699_v54, inf  ;;  %v840_v61 = vsel %vm285_vm3, %v832_v49, 0.0 }
 0x496   :  { %v2708_v14 = vsel %vm743_vm9, 1.0, %v3600_v8  ;;  %884 = vmin.xlane.f32.xlu0 %v883_v44  ;;  %v725_v49 = vcvt.f32.s32 %v2671_v45  ;;  %vm814_vm9 = vcmp.eq.f32.partialorder %v2600_v50, 0.0  ;;  %2242 = vrsqrt.f32 %v2699_v54 }
 0x497   :  { %v831_v12 = vmul.f32 %v2708_v14, %v781_v57  ;;  %vm864_vm11 = vcmp.gt.f32.partialorder %v2708_v14, 0.0  ;;  %v682_v62 = vadd.s32 %v681_v55, %v679_v58 }
 0x498   :  { %v2718_v7 = vsel %vm864_vm11, 1e+30, %v2568_v22  ;;  %v663_v3 = vpop.xlane.xlu1 %662  ;;  %v792_v22 = vsel %vm791_vm10, %v2590_v42, %v790_v51  ;;  %v726_v60 = vshll.u32 %v725_v49, 16  ;;  %vm805_vm10 = vcmp.eq.f32.partialorder %v2611_v59, inf }
 0x499   :  { %v839_v10 = vsel %vm285_vm3, %v831_v12, 0.0  ;;  %vm746_vm12 = vcmp.eq.s32.totalorder %v2468_v52, %v682_v62  ;;  %v664_v15 = vcvt.f32.s32 %v663_v3  ;;  %v880_v17 = vsel %vm285_vm3, %v2718_v7, inf }
 0x49a   :  { %v841_v23 = vadd.f32 %v840_v61, %v839_v10  ;;  %v2725_v11 = vsel %vm746_vm12, 1.0, %v3600_v8  ;;  %881 = vmin.xlane.f32.xlu1 %v880_v17  ;;  %v795_v20 = vsel %vm793_vm13, %v794_v16, %v792_v22  ;;  %v797_v12 = vmul.f32 %v2233_v46, %v2578_v31 }
 0x49b   :  { %vm867_vm14 = vcmp.gt.f32.partialorder %v2725_v11, 0.0  ;;  %v667_v28 = vadd.s32 %v666_v0, %v664_v15  ;;  %v2237_v0 = vpop.eup %2236  ;;  %v804_v3 = vmul.f32 %v2235_v26, %v2611_v59  ;;  %v740_v17 = vcvt.f32.s32 %v2674_v53 }
 0x49c   :  { %v2736_v30 = vsel %vm867_vm14, 1e+30, %v2578_v31  ;;  %v708_v33 = vpop.xlane.xlu0 %707  ;;  %v2239_v15 = vpop.eup %2238  ;;  %v799_v24 = vsel %vm798_vm4, %v2578_v31, %v797_v12  ;;  %v815_v16 = vand.u32 2147483648, %v2600_v50  ;;  %v811_v53 = vmul.f32 %v2237_v0, %v2600_v50 }
 0x49d   :  { %vm745_vm15 = vcmp.eq.s32.totalorder %v2468_v52, %v667_v28  ;;  %v709_v41 = vcvt.f32.s32 %v708_v33  ;;  %v889_v43 = vsel %vm285_vm3, %v2736_v30, inf  ;;  %v2241_v28 = vpop.eup %2240  ;;  %vm807_vm11 = vcmp.eq.f32.partialorder %v2611_v59, 0.0 }
 0x49e   :  { %v2746_v36 = vsel %vm745_vm15, 1.0, %v3600_v8  ;;  %890 = vmin.xlane.f32.xlu0 %v889_v43  ;;  %v808_v43 = vand.u32 2147483648, %v2611_v59  ;;  %vm819_vm14 = vcmp.eq.f32.partialorder %v2621_v1, inf  ;;  %v822_v12 = vand.u32 2147483648, %v2621_v1 }
 0x49f   :  { %v833_v19 = vmul.f32 %v2746_v36, %v795_v20  ;;  %vm866_vm1 = vcmp.gt.f32.partialorder %v2746_v36, 0.0  ;;  %v712_v48 = vadd.s32 %v711_v34, %v709_v41  ;;  %v806_v41 = vsel %vm805_vm10, %v2611_v59, %v804_v3 }
 0x4a0   :  { %v2752_v35 = vsel %vm866_vm1, 1e+30, %v2590_v42  ;;  %v693_v55 = vpop.xlane.xlu1 %692  ;;  %v801_v42 = vand.u32 2147483648, %v2578_v31  ;;  %vm821_vm4 = vcmp.eq.f32.partialorder %v2621_v1, 0.0  ;;  %2244 = vrsqrt.f32 %v2718_v7 }
 0x4a1   :  { %v842_v58 = vsel %vm285_vm3, %v833_v19, 0.0  ;;  %vm748_vm2 = vcmp.eq.s32.totalorder %v2468_v52, %v712_v48  ;;  %v694_v44 = vcvt.f32.s32 %v693_v55  ;;  %v886_v57 = vsel %vm285_vm3, %v2752_v35, inf }
 0x4a2   :  { %v2760_v62 = vadd.f32 %v842_v58, %v841_v23  ;;  %v2763_v45 = vsel %vm748_vm2, 1.0, %v3600_v8  ;;  %887 = vmin.xlane.f32.xlu1 %v886_v57  ;;  %v818_v19 = vmul.f32 %v2239_v15, %v2621_v1  ;;  %v741_v48 = vshll.u32 %v740_v17, 16 }
 0x4a3   :  { %vm869_vm6 = vcmp.gt.f32.partialorder %v2763_v45, 0.0  ;;  %v697_v51 = vadd.s32 %v696_v39, %v694_v44  ;;  %v802_v49 = vsel %vm800_vm5, %v801_v42, %v799_v24  ;;  %v825_v58 = vmul.f32 %v2241_v28, %v2631_v6 }
 0x4a4   :  { %v2770_v61 = vsel %vm869_vm6, 1e+30, %v2600_v50  ;;  %v723_v10 = vpop.xlane.xlu1 %722  ;;  %v813_v44 = vsel %vm812_vm7, %v2600_v50, %v811_v53  ;;  %v834_v31 = vmul.f32 %v2725_v11, %v802_v49  ;;  %v809_v42 = vsel %vm807_vm11, %v808_v43, %v806_v41 }
 0x4a5   :  { %vm747_vm8 = vcmp.eq.s32.totalorder %v2468_v52, %v697_v51  ;;  %v724_v23 = vcvt.f32.s32 %v723_v10  ;;  %v895_v22 = vsel %vm285_vm3, %v2770_v61, inf  ;;  %v820_v0 = vsel %vm819_vm14, %v2621_v1, %v818_v19 }
 0x4a6   :  { %v2784_v33 = vsel %vm747_vm8, 1.0, %v3600_v8  ;;  %896 = vmin.xlane.f32.xlu0 %v895_v22  ;;  %vm826_vm2 = vcmp.eq.f32.partialorder %v2631_v6, inf  ;;  %vm828_vm5 = vcmp.eq.f32.partialorder %v2631_v6, 0.0  ;;  %v816_v15 = vsel %vm814_vm9, %v815_v16, %v813_v44 }
 0x4a7   :  { %vm868_vm12 = vcmp.gt.f32.partialorder %v2784_v33, 0.0  ;;  %v727_v34 = vadd.s32 %v726_v60, %v724_v23  ;;  %v835_v60 = vmul.f32 %v2784_v33, %v809_v42  ;;  %v823_v17 = vsel %vm821_vm4, %v822_v12, %v820_v0 }
 0x4a8   :  { %v2792_v46 = vsel %vm868_vm12, 1e+30, %v2611_v59  ;;  %v738_v20 = vpop.xlane.xlu0 %737  ;;  %v827_v59 = vsel %vm826_vm2, %v2631_v6, %v825_v58  ;;  %v829_v23 = vand.u32 2147483648, %v2631_v6  ;;  %v844_v22 = vsel %vm285_vm3, %v834_v31, 0.0 }
 0x4a9   :  { %vm749_vm13 = vcmp.eq.s32.totalorder %v2468_v52, %v727_v34  ;;  %v739_v26 = vcvt.f32.s32 %v738_v20  ;;  %v892_v39 = vsel %vm285_vm3, %v2792_v46, inf  ;;  %v836_v28 = vmul.f32 %v2763_v45, %v816_v15 }
 0x4aa   :  { %v2801_v55 = vsel %vm749_vm13, 1.0, %v3600_v8  ;;  %893 = vmin.xlane.f32.xlu1 %v892_v39  ;;  %v830_v34 = vsel %vm828_vm5, %v829_v23, %v827_v59  ;;  %v845_v50 = vadd.f32 %v844_v22, %v2760_v62  ;;  %v846_v16 = vsel %vm285_vm3, %v835_v60, 0.0 }
 0x4ab   :  { %vm870_vm15 = vcmp.gt.f32.partialorder %v2801_v55, 0.0  ;;  %v742_v57 = vadd.s32 %v741_v48, %v739_v26  ;;  %v848_v20 = vsel %vm285_vm3, %v836_v28, 0.0  ;;  %2246 = vrsqrt.f32 %v2736_v30 }
 0x4ac   :  { %v2814_v51 = vsel %vm870_vm15, 1e+30, %v2621_v1  ;;  %v837_v1 = vmul.f32 %v2801_v55, %v823_v17  ;;  %v847_v43 = vadd.f32 %v846_v16, %v845_v50  ;;  %2248 = vrsqrt.f32 %v2752_v35 }
 0x4ad   :  { %vm750_vm1 = vcmp.eq.s32.totalorder %v2468_v52, %v742_v57  ;;  %v898_v3 = vsel %vm285_vm3, %v2814_v51, inf  ;;  %2250 = vrsqrt.f32 %v2770_v61 }
 0x4ae   :  { %v2823_v10 = vsel %vm750_vm1, 1.0, %v3600_v8  ;;  %899 = vmin.xlane.f32.xlu1 %v898_v3  ;;  %v850_v19 = vsel %vm285_vm3, %v837_v1, 0.0  ;;  %2252 = vrsqrt.f32 %v2792_v46 }
 0x4af   :  { %vm871_vm6 = vcmp.gt.f32.partialorder %v2823_v10, 0.0  ;;  %v838_v41 = vmul.f32 %v2823_v10, %v830_v34  ;;  %2254 = vrsqrt.f32 %v2814_v51 }
 0x4b0   :  { %v2835_v24 = vsel %vm871_vm6, 1e+30, %v2631_v6  ;;  %v849_v6 = vadd.f32 %v848_v20, %v847_v43 }
 0x4b1   :  { %v901_v53 = vsel %vm285_vm3, %v2835_v24, inf  ;;  %v852_v48 = vsel %vm285_vm3, %v838_v41, 0.0  ;;  %2256 = vrsqrt.f32 %v2835_v24 }
 0x4b2   :  { %902 = vmin.xlane.f32.xlu0 %v901_v53  ;;  %v851_v26 = vadd.f32 %v850_v19, %v849_v6  ;;  %2258 = vrsqrt.f32 %v2479_v5 }
 0x4b3   :  { %2260 = vrsqrt.f32 %v2475_v2 }
 0x4b4   :  { %v2846_v39 = vadd.f32 %v852_v48, %v851_v26  ;;  %2262 = vrsqrt.f32 %v2491_v21 }
 0x4b5   :  { %2264 = vrsqrt.f32 %v2504_v32 }
 0x4b6   :  { %2266 = vrsqrt.f32 %v2485_v13 }
 0x4b7   :  { %2268 = vrsqrt.f32 %v2498_v29 }
 0x4b8   :  { %2270 = vrsqrt.f32 %v2510_v38 }
 0x4b9   :  { %2272 = vrsqrt.f32 %v2515_v40 }
 0x523   :  { %v885_v49 = vpop.xlane.xlu0 %884 }
 0x524   :  { %vm905_vm7 = vcmp.eq.f32.partialorder %v2699_v54, %v885_v49 }
 0x525   :  { %v913_v62 = vsel %vm905_vm7, %v2468_v52, 64 }
 0x526   :  { %v935_v58 = vsel %vm285_vm3, %v913_v62, 2147483647 }
 0x527   :  { %v882_v44 = vpop.xlane.xlu1 %881  ;;  %v937_v57 = vshra.s32 %v935_v58, 16 }
 0x528   :  { %vm904_vm8 = vcmp.eq.f32.partialorder %v2718_v7, %v882_v44 }
 0x529   :  { %v912_v12 = vsel %vm904_vm8, %v2468_v52, 64  ;;  %v939_v31 = vcvt.s32.f32 %v937_v57 }
 0x52a   :  { %v920_v42 = vsel %vm285_vm3, %v912_v12, 2147483647 }
 0x52b   :  { %940 = vmin.xlane.f32.xlu0 %v939_v31  ;;  %v891_v0 = vpop.xlane.xlu0 %890  ;;  %v922_v60 = vshra.s32 %v920_v42, 16 }
 0x52c   :  { %vm907_vm9 = vcmp.eq.f32.partialorder %v2736_v30, %v891_v0 }
 0x52d   :  { %v915_v3 = vsel %vm907_vm9, %v2468_v52, 64  ;;  %v924_v59 = vcvt.s32.f32 %v922_v60  ;;  %vm1081_vm9 = vcmp.eq.f32.partialorder %v2699_v54, inf }
 0x52e   :  { %v965_v15 = vsel %vm285_vm3, %v915_v3, 2147483647 }
 0x52f   :  { %925 = vmin.xlane.f32.xlu1 %v924_v59  ;;  %v888_v17 = vpop.xlane.xlu1 %887  ;;  %v967_v23 = vshra.s32 %v965_v15, 16 }
 0x530   :  { %vm906_vm10 = vcmp.eq.f32.partialorder %v2752_v35, %v888_v17 }
 0x531   :  { %v914_v22 = vsel %vm906_vm10, %v2468_v52, 64  ;;  %v969_v28 = vcvt.s32.f32 %v967_v23  ;;  %vm1083_vm10 = vcmp.eq.f32.partialorder %v2699_v54, 0.0 }
 0x532   :  { %v950_v1 = vsel %vm285_vm3, %v914_v22, 2147483647 }
 0x533   :  { %970 = vmin.xlane.f32.xlu0 %v969_v28  ;;  %v897_v53 = vpop.xlane.xlu0 %896  ;;  %v952_v34 = vshra.s32 %v950_v1, 16 }
 0x534   :  { %vm909_vm11 = vcmp.eq.f32.partialorder %v2770_v61, %v897_v53  ;;  %v936_v53 = vand.u32 65535, %v935_v58 }
 0x535   :  { %v917_v50 = vsel %vm909_vm11, %v2468_v52, 64  ;;  %v954_v16 = vcvt.s32.f32 %v952_v34  ;;  %v921_v34 = vand.u32 65535, %v920_v42  ;;  %vm1074_vm11 = vcmp.eq.f32.partialorder %v2718_v7, inf }
 0x536   :  { %v995_v41 = vsel %vm285_vm3, %v917_v50, 2147483647 }
 0x537   :  { %955 = vmin.xlane.f32.xlu1 %v954_v16  ;;  %v894_v43 = vpop.xlane.xlu1 %893  ;;  %v997_v20 = vshra.s32 %v995_v41, 16 }
 0x538   :  { %vm908_vm12 = vcmp.eq.f32.partialorder %v2792_v46, %v894_v43  ;;  %v938_v43 = vcvt.s32.f32 %v936_v53 }
 0x539   :  { %v916_v19 = vsel %vm908_vm12, %v2468_v52, 64  ;;  %v999_v6 = vcvt.s32.f32 %v997_v20  ;;  %vm1076_vm12 = vcmp.eq.f32.partialorder %v2718_v7, 0.0 }
 0x53a   :  { %v980_v48 = vsel %vm285_vm3, %v916_v19, 2147483647 }
 0x53b   :  { %1000 = vmin.xlane.f32.xlu0 %v999_v6  ;;  %v900_v26 = vpop.xlane.xlu1 %899  ;;  %v982_v49 = vshra.s32 %v980_v48, 16 }
 0x53c   :  { %vm910_vm13 = vcmp.eq.f32.partialorder %v2814_v51, %v900_v26  ;;  %v923_v26 = vcvt.s32.f32 %v921_v34 }
 0x53d   :  { %v918_v62 = vsel %vm910_vm13, %v2468_v52, 64  ;;  %v984_v44 = vcvt.s32.f32 %v982_v49  ;;  %v966_v49 = vand.u32 65535, %v965_v15  ;;  %v981_v15 = vand.u32 65535, %v980_v48 }
 0x53e   :  { %v1010_v57 = vsel %vm285_vm3, %v918_v62, 2147483647  ;;  %vm1095_vm13 = vcmp.eq.f32.partialorder %v2736_v30, inf }
 0x53f   :  { %v1012_v12 = vshra.s32 %v1010_v57, 16  ;;  %v903_v0 = vpop.xlane.xlu0 %902  ;;  %985 = vmin.xlane.f32.xlu1 %v984_v44  ;;  %v968_v58 = vcvt.s32.f32 %v966_v49 }
 0x540   :  { %vm911_vm14 = vcmp.eq.f32.partialorder %v2835_v24, %v903_v0 }
 0x541   :  { %v919_v60 = vsel %vm911_vm14, %v2468_v52, 64  ;;  %v1014_v3 = vcvt.s32.f32 %v1012_v12  ;;  %v951_v12 = vand.u32 65535, %v950_v1  ;;  %vm1097_vm14 = vcmp.eq.f32.partialorder %v2736_v30, 0.0 }
 0x542   :  { %v1025_v17 = vsel %vm285_vm3, %v919_v60, 2147483647 }
 0x543   :  { %1015 = vmin.xlane.f32.xlu1 %v1014_v3  ;;  %v1027_v23 = vshra.s32 %v1025_v17, 16  ;;  %v1026_v49 = vand.u32 65535, %v1025_v17 }
 0x545   :  { %v1029_v22 = vcvt.s32.f32 %v1027_v23  ;;  %v996_v23 = vand.u32 65535, %v995_v41 }
 0x547   :  { %1030 = vmin.xlane.f32.xlu0 %v1029_v22  ;;  %v998_v34 = vcvt.s32.f32 %v996_v23  ;;  %v2911_v23 = vadd.f32 %v2725_v11, %v2574_v27 }
 0x5b8   :  { %v2872_v50 = vpop.xlane.xlu0 %940 }
 0x5b9   :  { %vm942_vm15 = vcmp.eq.f32.partialorder %v939_v31, %v2872_v50  ;;  %v953_v31 = vcvt.s32.f32 %v951_v12  ;;  %v768_v12 = vadd.f32 %v2689_v25, %v2554_v9 }
 0x5ba   :  { %v943_v20 = vsel %vm942_vm15, %v938_v43, inf  ;;  %v1011_v43 = vand.u32 65535, %v1010_v57  ;;  %vm1088_vm15 = vcmp.eq.f32.partialorder %v2752_v35, inf }
 0x5bb   :  { %944 = vmin.xlane.f32.xlu0 %v943_v20  ;;  %v983_v20 = vcvt.s32.f32 %v981_v15 }
 0x5bc   :  { %v2875_v19 = vpop.xlane.xlu1 %925 }
 0x5bd   :  { %vm927_vm1 = vcmp.eq.f32.partialorder %v924_v59, %v2875_v19 }
 0x5be   :  { %v928_v62 = vsel %vm927_vm1, %v923_v26, inf }
 0x5bf   :  { %929 = vmin.xlane.f32.xlu1 %v928_v62 }
 0x5c0   :  { %v2878_v0 = vpop.xlane.xlu0 %970 }
 0x5c1   :  { %vm972_vm2 = vcmp.eq.f32.partialorder %v969_v28, %v2878_v0 }
 0x5c2   :  { %v973_v42 = vsel %vm972_vm2, %v968_v58, inf  ;;  %v947_v58 = vcvt.f32.s32 %v2872_v50 }
 0x5c3   :  { %974 = vmin.xlane.f32.xlu0 %v973_v42  ;;  %v767_v42 = vadd.f32 %v2708_v14, %v2564_v18  ;;  %v1077_v14 = vand.u32 2147483648, %v2718_v7 }
 0x5c4   :  { %v2881_v60 = vpop.xlane.xlu1 %955  ;;  %v948_v15 = vshll.u32 %v947_v58, 16 }
 0x5c5   :  { %vm957_vm4 = vcmp.eq.f32.partialorder %v954_v16, %v2881_v60  ;;  %v1013_v16 = vcvt.s32.f32 %v1011_v43  ;;  %v2924_v43 = vadd.f32 %v2746_v36, %v2585_v37 }
 0x5c6   :  { %v958_v53 = vsel %vm957_vm4, %v953_v31, inf  ;;  %v1084_v31 = vand.u32 2147483648, %v2699_v54  ;;  %vm1090_vm4 = vcmp.eq.f32.partialorder %v2752_v35, 0.0 }
 0x5c7   :  { %959 = vmin.xlane.f32.xlu1 %v958_v53 }
 0x5c8   :  { %v2884_v59 = vpop.xlane.xlu0 %1000 }
 0x5c9   :  { %vm1002_vm5 = vcmp.eq.f32.partialorder %v999_v6, %v2884_v59  ;;  %v1028_v6 = vcvt.s32.f32 %v1026_v49 }
 0x5ca   :  { %v1003_v1 = vsel %vm1002_vm5, %v998_v34, inf  ;;  %v932_v34 = vcvt.f32.s32 %v2875_v19  ;;  %vm1109_vm5 = vcmp.eq.f32.partialorder %v2770_v61, inf }
 0x5cb   :  { %1004 = vmin.xlane.f32.xlu0 %v1003_v1 }
 0x5cc   :  { %v2887_v28 = vpop.xlane.xlu1 %985 }
 0x5cd   :  { %vm987_vm6 = vcmp.eq.f32.partialorder %v984_v44, %v2887_v28  ;;  %v2243_v44 = vpop.eup %2242 }
 0x5ce   :  { %v988_v26 = vsel %vm987_vm6, %v983_v20, inf  ;;  %v2245_v17 = vpop.eup %2244  ;;  %v2928_v20 = vadd.f32 %v2763_v45, %v2596_v47 }
 0x5cf   :  { %989 = vmin.xlane.f32.xlu1 %v988_v26  ;;  %v1073_v53 = vmul.f32 %v2245_v17, %v2718_v7  ;;  %v1098_v26 = vand.u32 2147483648, %v2736_v30 }
 0x5d0   :  { %v2890_v41 = vpop.xlane.xlu1 %1015 }
 0x5d1   :  { %vm1017_vm7 = vcmp.eq.f32.partialorder %v1014_v3, %v2890_v41  ;;  %v2247_v3 = vpop.eup %2246  ;;  %v1075_v19 = vsel %vm1074_vm11, %v2718_v7, %v1073_v53  ;;  %vm1116_vm11 = vcmp.eq.f32.partialorder %v2814_v51, inf }
 0x5d2   :  { %v1018_v48 = vsel %vm1017_vm7, %v1013_v16, inf  ;;  %v1094_v50 = vmul.f32 %v2247_v3, %v2736_v30  ;;  %v2249_v16 = vpop.eup %2248  ;;  %v2948_v3 = vadd.f32 %v2784_v33, %v2607_v56  ;;  %v962_v33 = vcvt.f32.s32 %v2881_v60 }
 0x5d3   :  { %1019 = vmin.xlane.f32.xlu1 %v1018_v48 }
 0x5d4   :  { %v2893_v62 = vpop.xlane.xlu0 %1030  ;;  %v1096_v45 = vsel %vm1095_vm13, %v2736_v30, %v1094_v50 }
 0x5d5   :  { %vm1032_vm8 = vcmp.eq.f32.partialorder %v1029_v22, %v2893_v62  ;;  %v1080_v22 = vmul.f32 %v2243_v44, %v2699_v54  ;;  %v977_v44 = vcvt.f32.s32 %v2878_v0  ;;  %v1112_v0 = vand.u32 2147483648, %v2770_v61 }
 0x5d6   :  { %v1033_v57 = vsel %vm1032_vm8, %v1028_v6, inf  ;;  %v1091_v6 = vand.u32 2147483648, %v2752_v35  ;;  %vm1111_vm8 = vcmp.eq.f32.partialorder %v2770_v61, 0.0 }
 0x5d7   :  { %1034 = vmin.xlane.f32.xlu0 %v1033_v57  ;;  %v1082_v11 = vsel %vm1081_vm9, %v2699_v54, %v1080_v22  ;;  %v933_v57 = vshll.u32 %v932_v34, 16  ;;  %v1078_v22 = vsel %vm1076_vm12, %v1077_v14, %v1075_v19  ;;  %v1099_v14 = vsel %vm1097_vm14, %v1098_v26, %v1096_v45  ;;  %v2251_v34 = vpop.eup %2250 }
 0x5d8   :  { %v1085_v36 = vsel %vm1083_vm10, %v1084_v31, %v1082_v11  ;;  %v1087_v31 = vmul.f32 %v2249_v16, %v2752_v35  ;;  %v978_v11 = vshll.u32 %v977_v44, 16  ;;  %vm1102_vm9 = vcmp.eq.f32.partialorder %v2792_v46, inf }
 0x5d9   :  { %v1007_v45 = vcvt.f32.s32 %v2884_v59  ;;  %vm1104_vm14 = vcmp.eq.f32.partialorder %v2792_v46, 0.0 }
 0x648   :  { %v945_v25 = vpop.xlane.xlu0 %944 }
 0x649   :  { %v946_v1 = vcvt.f32.s32 %v945_v25 }
 0x64b   :  { %v949_v49 = vadd.s32 %v948_v15, %v946_v1 }
 0x64c   :  { %v930_v48 = vpop.xlane.xlu1 %929 }
 0x64d   :  { %vm1041_vm1 = vcmp.eq.s32.totalorder %v2468_v52, %v949_v49  ;;  %v931_v17 = vcvt.f32.s32 %v930_v48 }
 0x64e   :  { %v2015_v58 = vsel %vm1041_vm1, 1.0, %v3600_v8  ;;  %vm1118_vm1 = vcmp.eq.f32.partialorder %v2814_v51, 0.0 }
 0x64f   :  { %v2954_v53 = vadd.f32 %v2015_v58, %v768_v12  ;;  %vm1162_vm2 = vcmp.gt.f32.partialorder %v2015_v58, 0.0  ;;  %v934_v25 = vadd.s32 %v933_v57, %v931_v17  ;;  %v1105_v12 = vand.u32 2147483648, %v2792_v46 }
 0x650   :  { %v2961_v50 = vsel %vm1162_vm2, 1e+30, %v2699_v54  ;;  %v975_v15 = vpop.xlane.xlu0 %974  ;;  %v1129_v1 = vmul.f32 %v2015_v58, %v1085_v36  ;;  %v1089_v54 = vsel %vm1088_vm15, %v2752_v35, %v1087_v31  ;;  %v963_v36 = vshll.u32 %v962_v33, 16  ;;  %v2253_v58 = vpop.eup %2252 }
 0x651   :  { %vm1040_vm6 = vcmp.eq.s32.totalorder %v2468_v52, %v934_v25  ;;  %v976_v16 = vcvt.f32.s32 %v975_v15  ;;  %v1180_v60 = vsel %vm285_vm3, %v2961_v50, inf  ;;  %v1108_v17 = vmul.f32 %v2251_v34, %v2770_v61  ;;  %v2255_v25 = vpop.eup %2254 }
 0x652   :  { %v2014_v49 = vsel %vm1040_vm6, 1.0, %v3600_v8  ;;  %1181 = vmin.xlane.f32.xlu0 %v1180_v60  ;;  %vm1123_vm6 = vcmp.eq.f32.partialorder %v2835_v24, inf  ;;  %2274 = vrsqrt.f32 %v2961_v50 }
 0x653   :  { %v2974_v26 = vadd.f32 %v2014_v49, %v767_v42  ;;  %v1128_v19 = vmul.f32 %v2014_v49, %v1078_v22  ;;  %vm1161_vm7 = vcmp.gt.f32.partialorder %v2014_v49, 0.0  ;;  %v979_v48 = vadd.s32 %v978_v11, %v976_v16 }
 0x654   :  { %v2980_v57 = vsel %vm1161_vm7, 1e+30, %v2718_v7  ;;  %v960_v44 = vpop.xlane.xlu1 %959  ;;  %v1137_v42 = vsel %vm285_vm3, %v1129_v1, 0.0  ;;  %v1119_v11 = vand.u32 2147483648, %v2814_v51  ;;  %v1092_v16 = vsel %vm1090_vm4, %v1091_v6, %v1089_v54 }
 0x655   :  { %v1136_v22 = vsel %vm285_vm3, %v1128_v19, 0.0  ;;  %vm1043_vm10 = vcmp.eq.s32.totalorder %v2468_v52, %v979_v48  ;;  %v961_v31 = vcvt.f32.s32 %v960_v44  ;;  %v1177_v59 = vsel %vm285_vm3, %v2980_v57, inf }
 0x656   :  { %v1138_v15 = vadd.f32 %v1137_v42, %v1136_v22  ;;  %v2017_v33 = vsel %vm1043_vm10, 1.0, %v3600_v8  ;;  %1178 = vmin.xlane.f32.xlu1 %v1177_v59  ;;  %v1110_v49 = vsel %vm1109_vm5, %v2770_v61, %v1108_v17  ;;  %v1101_v19 = vmul.f32 %v2253_v58, %v2792_v46 }
 0x657   :  { %v2991_v7 = vadd.f32 %v2017_v33, %v2911_v23  ;;  %vm1164_vm12 = vcmp.gt.f32.partialorder %v2017_v33, 0.0  ;;  %v964_v34 = vadd.s32 %v963_v36, %v961_v31  ;;  %v1008_v23 = vshll.u32 %v1007_v45, 16 }
 0x658   :  { %v2995_v1 = vsel %vm1164_vm12, 1e+30, %v2736_v30  ;;  %v1005_v60 = vpop.xlane.xlu0 %1004  ;;  %v992_v48 = vcvt.f32.s32 %v2887_v28  ;;  %v1131_v30 = vmul.f32 %v2017_v33, %v1099_v14  ;;  %v1115_v54 = vmul.f32 %v2255_v25, %v2814_v51  ;;  %v2257_v28 = vpop.eup %2256 }
 0x659   :  { %vm1042_vm13 = vcmp.eq.s32.totalorder %v2468_v52, %v964_v34  ;;  %v1006_v36 = vcvt.f32.s32 %v1005_v60  ;;  %v1186_v6 = vsel %vm285_vm3, %v2995_v1, inf  ;;  %v1022_v42 = vcvt.f32.s32 %v2890_v41 }
 0x65a   :  { %v2016_v44 = vsel %vm1042_vm13, 1.0, %v3600_v8  ;;  %1187 = vmin.xlane.f32.xlu0 %v1186_v6  ;;  %v1113_v22 = vsel %vm1111_vm8, %v1112_v0, %v1110_v49  ;;  %v993_v25 = vshll.u32 %v992_v48, 16  ;;  %v1117_v0 = vsel %vm1116_vm11, %v2814_v51, %v1115_v54 }
 0x65b   :  { %v3011_v17 = vadd.f32 %v2016_v44, %v2924_v43  ;;  %v1130_v58 = vmul.f32 %v2016_v44, %v1092_v16  ;;  %vm1163_vm15 = vcmp.gt.f32.partialorder %v2016_v44, 0.0  ;;  %v1009_v45 = vadd.s32 %v1008_v23, %v1006_v36 }
 0x65c   :  { %v3016_v14 = vsel %vm1163_vm15, 1e+30, %v2752_v35  ;;  %v1103_v43 = vsel %vm1102_vm9, %v2792_v46, %v1101_v19  ;;  %v990_v31 = vpop.xlane.xlu1 %989  ;;  %v1141_v16 = vsel %vm285_vm3, %v1131_v30, 0.0  ;;  %v1023_v19 = vshll.u32 %v1022_v42, 16 }
 0x65d   :  { %v1139_v33 = vsel %vm285_vm3, %v1130_v58, 0.0  ;;  %vm1045_vm2 = vcmp.eq.s32.totalorder %v2468_v52, %v1009_v45  ;;  %v991_v59 = vcvt.f32.s32 %v990_v31  ;;  %v1183_v34 = vsel %vm285_vm3, %v3016_v14, inf }
 0x65e   :  { %v1140_v41 = vadd.f32 %v1139_v33, %v1138_v15  ;;  %v2019_v35 = vsel %vm1045_vm2, 1.0, %v3600_v8  ;;  %1184 = vmin.xlane.f32.xlu1 %v1183_v34  ;;  %v1122_v48 = vmul.f32 %v2257_v28, %v2835_v24  ;;  %v1037_v44 = vcvt.f32.s32 %v2893_v62 }
 0x65f   :  { %v3035_v49 = vadd.f32 %v2019_v35, %v2928_v20  ;;  %vm1166_vm4 = vcmp.gt.f32.partialorder %v2019_v35, 0.0  ;;  %v994_v60 = vadd.s32 %v993_v25, %v991_v59  ;;  %v1133_v30 = vmul.f32 %v2019_v35, %v1113_v22 }
 0x660   :  { %v3038_v15 = vsel %vm1166_vm4, 1e+30, %v2770_v61  ;;  %v1020_v23 = vpop.xlane.xlu1 %1019  ;;  %v1142_v36 = vadd.f32 %v1141_v16, %v1140_v41  ;;  %v1106_v54 = vsel %vm1104_vm14, %v1105_v12, %v1103_v43  ;;  %v773_v28 = vadd.f32 %v2801_v55, %v2617_v63 }
 0x661   :  { %vm1044_vm5 = vcmp.eq.s32.totalorder %v2468_v52, %v994_v60  ;;  %v1021_v6 = vcvt.f32.s32 %v1020_v23  ;;  %v1192_v20 = vsel %vm285_vm3, %v3038_v15, inf  ;;  %v1120_v12 = vsel %vm1118_vm1, %v1119_v11, %v1117_v0 }
 0x662   :  { %v2018_v61 = vsel %vm1044_vm5, 1.0, %v3600_v8  ;;  %1193 = vmin.xlane.f32.xlu0 %v1192_v20  ;;  %v1124_v43 = vsel %vm1123_vm6, %v2835_v24, %v1122_v48  ;;  %v1038_v31 = vshll.u32 %v1037_v44, 16  ;;  %v774_v34 = vadd.f32 %v2823_v10, %v2627_v4 }
 0x663   :  { %v3052_v58 = vadd.f32 %v2018_v61, %v2948_v3  ;;  %v1132_v62 = vmul.f32 %v2018_v61, %v1106_v54  ;;  %vm1165_vm7 = vcmp.gt.f32.partialorder %v2018_v61, 0.0  ;;  %v1024_v45 = vadd.s32 %v1023_v19, %v1021_v6 }
 0x664   :  { %v3057_v42 = vsel %vm1165_vm7, 1e+30, %v2792_v46  ;;  %v1035_v22 = vpop.xlane.xlu0 %1034  ;;  %v1145_v46 = vsel %vm285_vm3, %v1133_v30, 0.0  ;;  %v1126_v16 = vand.u32 2147483648, %v2835_v24  ;;  %vm1125_vm11 = vcmp.eq.f32.partialorder %v2835_v24, 0.0 }
 0x665   :  { %v1143_v25 = vsel %vm285_vm3, %v1132_v62, 0.0  ;;  %vm1046_vm8 = vcmp.eq.s32.totalorder %v2468_v52, %v1024_v45  ;;  %v1036_v3 = vcvt.f32.s32 %v1035_v22  ;;  %v1189_v55 = vsel %vm285_vm3, %v3057_v42, inf }
 0x666   :  { %v2020_v33 = vsel %vm1046_vm8, 1.0, %v3600_v8  ;;  %v1144_v59 = vadd.f32 %v1143_v25, %v1142_v36  ;;  %1190 = vmin.xlane.f32.xlu1 %v1189_v55  ;;  %v1127_v36 = vsel %vm1125_vm11, %v1126_v16, %v1124_v43  ;;  %vm487_vm7 = vcmp.eq.f32.partialorder %v2475_v2, inf }
 0x667   :  { %v3068_v41 = vadd.f32 %v2020_v33, %v773_v28  ;;  %v1134_v11 = vmul.f32 %v2020_v33, %v1120_v12  ;;  %vm1167_vm9 = vcmp.gt.f32.partialorder %v2020_v33, 0.0  ;;  %v1039_v35 = vadd.s32 %v1038_v31, %v1036_v3 }
 0x668   :  { %v3073_v0 = vsel %vm1167_vm9, 1e+30, %v2814_v51  ;;  %v1146_v60 = vadd.f32 %v1145_v46, %v1144_v59  ;;  %vm489_vm8 = vcmp.eq.f32.partialorder %v2475_v2, 0.0  ;;  %vm480_vm9 = vcmp.eq.f32.partialorder %v2479_v5, inf }
 0x669   :  { %3606 = vst [vmem:[#allocation6_spill] sm:$0xff] %v3068_v41  ;;  %vm1047_vm10 = vcmp.eq.s32.totalorder %v2468_v52, %v1039_v35  ;;  %v1195_v19 = vsel %vm285_vm3, %v3073_v0, inf  ;;  %v1147_v23 = vsel %vm285_vm3, %v1134_v11, 0.0  ;;  %vm494_vm11 = vcmp.eq.f32.partialorder %v2491_v21, inf }
 0x66a   :  { %v2021_v48 = vsel %vm1047_vm10, 1.0, %v3600_v8  ;;  %v1148_v44 = vadd.f32 %v1147_v23, %v1146_v60  ;;  %1196 = vmin.xlane.f32.xlu1 %v1195_v19  ;;  %vm482_vm10 = vcmp.eq.f32.partialorder %v2479_v5, 0.0  ;;  %v490_v8 = vand.u32 2147483648, %v2475_v2 }
 0x66b   :  { %v3082_v10 = vadd.f32 %v2021_v48, %v774_v34  ;;  %vm1168_vm12 = vcmp.gt.f32.partialorder %v2021_v48, 0.0  ;;  %v1135_v51 = vmul.f32 %v2021_v48, %v1127_v36  ;;  %2276 = vrsqrt.f32 %v2980_v57 }
 0x66c   :  { %v3085_v6 = vsel %vm1168_vm12, 1e+30, %v2835_v24  ;;  %2278 = vrsqrt.f32 %v2995_v1 }
 0x66d   :  { %3607 = vst [vmem:[#allocation7_spill] sm:$0xff] %v3082_v10  ;;  %v1198_v20 = vsel %vm285_vm3, %v3085_v6, inf  ;;  %v1149_v30 = vsel %vm285_vm3, %v1135_v51, 0.0  ;;  %2280 = vrsqrt.f32 %v3016_v14 }
 0x66e   :  { %1199 = vmin.xlane.f32.xlu0 %v1198_v20  ;;  %v3090_v54 = vadd.f32 %v1149_v30, %v1148_v44  ;;  %2282 = vrsqrt.f32 %v3038_v15 }
 0x66f   :  { %2284 = vrsqrt.f32 %v3057_v42 }
 0x670   :  { %2286 = vrsqrt.f32 %v3073_v0 }
 0x671   :  { %2288 = vrsqrt.f32 %v3085_v6 }
 0x6df   :  { %v1182_v61 = vpop.xlane.xlu0 %1181 }
 0x6e0   :  { %vm1202_vm13 = vcmp.eq.f32.partialorder %v2961_v50, %v1182_v61 }
 0x6e1   :  { %v1210_v62 = vsel %vm1202_vm13, %v2468_v52, 64  ;;  %vm496_vm13 = vcmp.eq.f32.partialorder %v2491_v21, 0.0 }
 0x6e2   :  { %v3095_v45 = vsel %vm285_vm3, %v1210_v62, 2147483647 }
 0x6e3   :  { %v1179_v28 = vpop.xlane.xlu1 %1178  ;;  %v1234_v24 = vshra.s32 %v3095_v45, 16 }
 0x6e4   :  { %vm1201_vm14 = vcmp.eq.f32.partialorder %v2980_v57, %v1179_v28 }
 0x6e5   :  { %v1209_v12 = vsel %vm1201_vm14, %v2468_v52, 64  ;;  %v3100_v22 = vcvt.s32.f32 %v1234_v24  ;;  %vm508_vm14 = vcmp.eq.f32.partialorder %v2504_v32, inf }
 0x6e6   :  { %v3103_v43 = vsel %vm285_vm3, %v1209_v12, 2147483647 }
 0x6e7   :  { %v1219_v31 = vshra.s32 %v3103_v43, 16  ;;  %1237 = vmin.xlane.f32.xlu0 %v3100_v22  ;;  %v1188_v25 = vpop.xlane.xlu0 %1187 }
 0x6e8   :  { %vm1204_vm15 = vcmp.eq.f32.partialorder %v2995_v1, %v1188_v25 }
 0x6e9   :  { %v1212_v3 = vsel %vm1204_vm15, %v2468_v52, 64  ;;  %v3109_v33 = vcvt.s32.f32 %v1219_v31 }
 0x6ea   :  { %v3112_v55 = vsel %vm285_vm3, %v1212_v3, 2147483647 }
 0x6eb   :  { %1222 = vmin.xlane.f32.xlu1 %v3109_v33  ;;  %v1185_v59 = vpop.xlane.xlu1 %1184  ;;  %v1264_v46 = vshra.s32 %v3112_v55, 16 }
 0x6ec   :  { %vm1203_vm1 = vcmp.eq.f32.partialorder %v3016_v14, %v1185_v59 }
 0x6ed   :  { %v1211_v11 = vsel %vm1203_vm1, %v2468_v52, 64  ;;  %v3118_v35 = vcvt.s32.f32 %v1264_v46  ;;  %vm501_vm1 = vcmp.eq.f32.partialorder %v2485_v13, inf }
 0x6ee   :  { %v3121_v34 = vsel %vm285_vm3, %v1211_v11, 2147483647 }
 0x6ef   :  { %v1194_v16 = vpop.xlane.xlu0 %1193  ;;  %v1249_v60 = vshra.s32 %v3121_v34, 16  ;;  %1267 = vmin.xlane.f32.xlu0 %v3118_v35 }
 0x6f0   :  { %vm1206_vm2 = vcmp.eq.f32.partialorder %v3038_v15, %v1194_v16 }
 0x6f1   :  { %v1214_v19 = vsel %vm1206_vm2, %v2468_v52, 64  ;;  %v3130_v48 = vcvt.s32.f32 %v1249_v60  ;;  %v2259_v60 = vpop.eup %2258  ;;  %vm510_vm2 = vcmp.eq.f32.partialorder %v2504_v32, 0.0 }
 0x6f2   :  { %v3128_v23 = vsel %vm285_vm3, %v1214_v19, 2147483647  ;;  %v2261_v19 = vpop.eup %2260 }
 0x6f3   :  { %v1294_v36 = vshra.s32 %v3128_v23, 16  ;;  %1252 = vmin.xlane.f32.xlu1 %v3130_v48  ;;  %v1191_v44 = vpop.xlane.xlu1 %1190 }
 0x6f4   :  { %vm1205_vm4 = vcmp.eq.f32.partialorder %v3057_v42, %v1191_v44  ;;  %v479_v44 = vmul.f32 %v2259_v60, %v2479_v5  ;;  %v483_v60 = vand.u32 2147483648, %v2479_v5 }
 0x6f5   :  { %v3135_v51 = vcvt.s32.f32 %v1294_v36  ;;  %v1213_v20 = vsel %vm1205_vm4, %v2468_v52, 64  ;;  %v2263_v36 = vpop.eup %2262  ;;  %vm503_vm4 = vcmp.eq.f32.partialorder %v2485_v13, 0.0 }
 0x6f6   :  { %v3139_v30 = vsel %vm285_vm3, %v1213_v20, 2147483647  ;;  %v1233_v20 = vand.u32 65535, %v3095_v45  ;;  %v1218_v45 = vand.u32 65535, %v3103_v43 }
 0x6f7   :  { %1297 = vmin.xlane.f32.xlu0 %v3135_v51  ;;  %v1279_v61 = vshra.s32 %v3139_v30, 16  ;;  %v1197_v62 = vpop.xlane.xlu1 %1196 }
 0x6f8   :  { %vm1207_vm5 = vcmp.eq.f32.partialorder %v3073_v0, %v1197_v62  ;;  %v493_v62 = vmul.f32 %v2263_v36, %v2491_v21 }
 0x6f9   :  { %v1215_v28 = vsel %vm1207_vm5, %v2468_v52, 64  ;;  %v3145_v24 = vcvt.s32.f32 %v1279_v61  ;;  %v486_v61 = vmul.f32 %v2261_v19, %v2475_v2 }
 0x6fa   :  { %v3148_v12 = vsel %vm285_vm3, %v1215_v28, 2147483647  ;;  %v2265_v28 = vpop.eup %2264  ;;  %v495_v36 = vsel %vm494_vm11, %v2491_v21, %v493_v62  ;;  %v1263_v62 = vand.u32 65535, %v3112_v55  ;;  %vm529_vm11 = vcmp.eq.f32.partialorder %v2515_v40, inf }
 0x6fb   :  { %v1200_v31 = vpop.xlane.xlu0 %1199  ;;  %v1309_v25 = vshra.s32 %v3148_v12, 16  ;;  %1282 = vmin.xlane.f32.xlu1 %v3145_v24  ;;  %v488_v19 = vsel %vm487_vm7, %v2475_v2, %v486_v61  ;;  %v1220_v61 = vcvt.s32.f32 %v1218_v45  ;;  %vm517_vm7 = vcmp.eq.f32.partialorder %v2498_v29, 0.0 }
 0x6fc   :  { %vm1208_vm6 = vcmp.eq.f32.partialorder %v3085_v6, %v1200_v31  ;;  %v481_v31 = vsel %vm480_vm9, %v2479_v5, %v479_v44  ;;  %v507_v44 = vmul.f32 %v2265_v28, %v2504_v32  ;;  %v497_v5 = vand.u32 2147483648, %v2491_v21 }
 0x6fd   :  { %v1216_v3 = vsel %vm1208_vm6, %v2468_v52, 64  ;;  %v3157_v46 = vcvt.s32.f32 %v1309_v25  ;;  %v491_v28 = vsel %vm489_vm8, %v490_v8, %v488_v19  ;;  %v511_v8 = vand.u32 2147483648, %v2504_v32 }
 0x6fe   :  { %v3155_v59 = vsel %vm285_vm3, %v1216_v3, 2147483647  ;;  %v1235_v3 = vcvt.s32.f32 %v1233_v20  ;;  %v484_v20 = vsel %vm482_vm10, %v483_v60, %v481_v31  ;;  %v535_v31 = vmul.f32 %v2554_v9, %v491_v28 }
 0x6ff   :  { %v1324_v11 = vshra.s32 %v3155_v59, 16  ;;  %1312 = vmin.xlane.f32.xlu1 %v3157_v46  ;;  %v534_v10 = vmul.f32 %v2564_v18, %v484_v20  ;;  %v1248_v9 = vand.u32 65535, %v3121_v34  ;;  %v504_v19 = vand.u32 2147483648, %v2485_v13 }
 0x700   :  { %vm515_vm6 = vcmp.eq.f32.partialorder %v2498_v29, inf  ;;  %vm522_vm9 = vcmp.eq.f32.partialorder %v2510_v38, inf }
 0x701   :  { %v3161_v16 = vcvt.s32.f32 %v1324_v11  ;;  %v2267_v11 = vpop.eup %2266  ;;  %v542_v55 = vsel %vm285_vm3, %v534_v10, 0.0 }
 0x703   :  { %1327 = vmin.xlane.f32.xlu0 %v3161_v16 }
 0x774   :  { %v3181_v25 = vpop.xlane.xlu0 %1237 }
 0x775   :  { %vm1239_vm12 = vcmp.eq.f32.partialorder %v3100_v22, %v3181_v25  ;;  %v500_v22 = vmul.f32 %v2267_v11, %v2485_v13  ;;  %v509_v11 = vsel %vm508_vm14, %v2504_v32, %v507_v44  ;;  %v543_v44 = vsel %vm285_vm3, %v535_v31, 0.0 }
 0x776   :  { %v1240_v43 = vsel %vm1239_vm12, %v1235_v3, inf  ;;  %v498_v3 = vsel %vm496_vm13, %v497_v5, %v495_v36  ;;  %v512_v36 = vsel %vm510_vm2, %v511_v8, %v509_v11  ;;  %v544_v34 = vadd.f32 %v543_v44, %v542_v55 }
 0x777   :  { %1241 = vmin.xlane.f32.xlu0 %v1240_v43  ;;  %v536_v18 = vmul.f32 %v2585_v37, %v498_v3  ;;  %v2269_v43 = vpop.eup %2268  ;;  %v1265_v37 = vcvt.s32.f32 %v1263_v62  ;;  %v1293_v3 = vand.u32 65535, %v3128_v23  ;;  %v1250_v31 = vcvt.s32.f32 %v1248_v9 }
 0x778   :  { %v3196_v41 = vpop.xlane.xlu1 %1222  ;;  %v2271_v5 = vpop.eup %2270  ;;  %v514_v10 = vmul.f32 %v2269_v43, %v2498_v29  ;;  %vm524_vm12 = vcmp.eq.f32.partialorder %v2510_v38, 0.0  ;;  %vm531_vm13 = vcmp.eq.f32.partialorder %v2515_v40, 0.0  ;;  %vm1378_vm2 = vcmp.eq.f32.partialorder %v2961_v50, inf }
 0x779   :  { %vm1224_vm15 = vcmp.eq.f32.partialorder %v3109_v33, %v3196_v41  ;;  %v502_v33 = vsel %vm501_vm1, %v2485_v13, %v500_v22  ;;  %v545_v20 = vsel %vm285_vm3, %v536_v18, 0.0  ;;  %v521_v62 = vmul.f32 %v2271_v5, %v2510_v38 }
 0x77a   :  { %v1225_v60 = vsel %vm1224_vm15, %v1220_v61, inf  ;;  %v2273_v61 = vpop.eup %2272  ;;  %v505_v28 = vsel %vm503_vm4, %v504_v19, %v502_v33  ;;  %v546_v8 = vadd.f32 %v545_v20, %v544_v34  ;;  %v516_v18 = vsel %vm515_vm6, %v2498_v29, %v514_v10 }
 0x77b   :  { %1226 = vmin.xlane.f32.xlu1 %v1225_v60  ;;  %v537_v11 = vmul.f32 %v2574_v27, %v505_v28  ;;  %v538_v60 = vmul.f32 %v2607_v56, %v512_v36  ;;  %v528_v27 = vmul.f32 %v2273_v61, %v2515_v40  ;;  %v518_v56 = vand.u32 2147483648, %v2498_v29 }
 0x77c   :  { %v3213_v45 = vpop.xlane.xlu0 %1267  ;;  %v523_v43 = vsel %vm522_vm9, %v2510_v38, %v521_v62  ;;  %v525_v5 = vand.u32 2147483648, %v2510_v38  ;;  %v1295_v33 = vcvt.s32.f32 %v1293_v3  ;;  %v1308_v34 = vand.u32 65535, %v3148_v12 }
 0x77d   :  { %vm1269_vm5 = vcmp.eq.f32.partialorder %v3118_v35, %v3213_v45  ;;  %v547_v9 = vsel %vm285_vm3, %v537_v11, 0.0  ;;  %v519_v19 = vsel %vm517_vm7, %v518_v56, %v516_v18  ;;  %v530_v10 = vsel %vm529_vm11, %v2515_v40, %v528_v27 }
 0x77e   :  { %v1270_v22 = vsel %vm1269_vm5, %v1265_v37, inf  ;;  %v1278_v37 = vand.u32 65535, %v3139_v30  ;;  %v548_v44 = vadd.f32 %v547_v9, %v546_v8  ;;  %v539_v20 = vmul.f32 %v2596_v47, %v519_v19 }
 0x77f   :  { %1271 = vmin.xlane.f32.xlu0 %v1270_v22  ;;  %v526_v22 = vsel %vm524_vm12, %v525_v5, %v523_v43  ;;  %v532_v30 = vand.u32 2147483648, %v2515_v40  ;;  %v1310_v12 = vcvt.s32.f32 %v1308_v34  ;;  %v1244_v5 = vcvt.f32.s32 %v3181_v25 }
 0x780   :  { %v3226_v35 = vpop.xlane.xlu1 %1252  ;;  %v1280_v62 = vcvt.s32.f32 %v1278_v37  ;;  %vm1380_vm4 = vcmp.eq.f32.partialorder %v2961_v50, 0.0  ;;  %v1381_v37 = vand.u32 2147483648, %v2961_v50  ;;  %vm1371_vm5 = vcmp.eq.f32.partialorder %v2980_v57, inf }
 0x781   :  { %vm1254_vm8 = vcmp.eq.f32.partialorder %v3130_v48, %v3226_v35  ;;  %v549_v48 = vsel %vm285_vm3, %v538_v60, 0.0  ;;  %v533_v47 = vsel %vm531_vm13, %v532_v30, %v530_v10  ;;  %v551_v60 = vsel %vm285_vm3, %v539_v20, 0.0 }
 0x782   :  { %v1255_v23 = vsel %vm1254_vm8, %v1250_v31, inf  ;;  %v550_v61 = vadd.f32 %v549_v48, %v548_v44  ;;  %v541_v11 = vmul.f32 %v2627_v4, %v533_v47  ;;  %v1323_v31 = vand.u32 65535, %v3155_v59 }
 0x783   :  { %1256 = vmin.xlane.f32.xlu1 %v1255_v23  ;;  %vm1373_vm6 = vcmp.eq.f32.partialorder %v2980_v57, 0.0  ;;  %v1374_v44 = vand.u32 2147483648, %v2980_v57  ;;  %vm1392_vm8 = vcmp.eq.f32.partialorder %v2995_v1, inf  ;;  %vm1394_vm9 = vcmp.eq.f32.partialorder %v2995_v1, 0.0 }
 0x784   :  { %v3238_v55 = vpop.xlane.xlu0 %1297  ;;  %v1325_v4 = vcvt.s32.f32 %v1323_v31  ;;  %vm1385_vm11 = vcmp.eq.f32.partialorder %v3016_v14, inf  ;;  %vm1387_vm12 = vcmp.eq.f32.partialorder %v3016_v14, 0.0 }
 0x785   :  { %vm1299_vm10 = vcmp.eq.f32.partialorder %v3135_v51, %v3238_v55  ;;  %v540_v51 = vmul.f32 %v2617_v63, %v526_v22  ;;  %v552_v63 = vadd.f32 %v551_v60, %v550_v61  ;;  %v1274_v22 = vcvt.f32.s32 %v3213_v45 }
 0x786   :  { %v1300_v36 = vsel %vm1299_vm10, %v1295_v33, inf  ;;  %v3608_v61 = vmov 0.0   ;;  %v1259_v45 = vcvt.f32.s32 %v3226_v35 }
 0x787   :  { %1301 = vmin.xlane.f32.xlu0 %v1300_v36  ;;  %v553_v18 = vsel %vm285_vm3, %v540_v51, 0.0 }
 0x788   :  { %v3254_v28 = vpop.xlane.xlu1 %1282  ;;  %v554_v56 = vadd.f32 %v553_v18, %v552_v63 }
 0x789   :  { %vm1284_vm14 = vcmp.eq.f32.partialorder %v3145_v24, %v3254_v28  ;;  %v555_v24 = vsel %vm285_vm3, %v541_v11, 0.0 }
 0x78a   :  { %v1285_v3 = vsel %vm1284_vm14, %v1280_v62, inf  ;;  %v556_v43 = vadd.f32 %v555_v24, %v554_v56  ;;  %vm1406_vm14 = vcmp.eq.f32.partialorder %v3038_v15, inf }
 0x78b   :  { %1286 = vmin.xlane.f32.xlu1 %v1285_v3  ;;  %v1395_v3 = vand.u32 2147483648, %v2995_v1 }
 0x78c   :  { %v3262_v8 = vpop.xlane.xlu1 %1312 }
 0x78d   :  { %vm1314_vm15 = vcmp.eq.f32.partialorder %v3157_v46, %v3262_v8  ;;  %v2275_v46 = vpop.eup %2274 }
 0x78e   :  { %v1315_v23 = vsel %vm1314_vm15, %v1310_v12, inf  ;;  %v1377_v33 = vmul.f32 %v2275_v46, %v2961_v50  ;;  %v1275_v12 = vshll.u32 %v1274_v22, 16  ;;  %v1304_v46 = vcvt.f32.s32 %v3238_v55 }
 0x78f   :  { %1316 = vmin.xlane.f32.xlu1 %v1315_v23 }
 0x790   :  { %v3268_v27 = vpop.xlane.xlu0 %1327  ;;  %v1379_v25 = vsel %vm1378_vm2, %v2961_v50, %v1377_v33  ;;  %vm1399_vm2 = vcmp.eq.f32.partialorder %v3057_v42, inf }
 0x791   :  { %vm1329_vm1 = vcmp.eq.f32.partialorder %v3161_v16, %v3268_v27  ;;  %v2277_v16 = vpop.eup %2276  ;;  %v1382_v60 = vsel %vm1380_vm4, %v1381_v37, %v1379_v25  ;;  %v1388_v37 = vand.u32 2147483648, %v3016_v14 }
 0x792   :  { %v1330_v59 = vsel %vm1329_vm1, %v1325_v4, inf  ;;  %v1370_v36 = vmul.f32 %v2277_v16, %v2980_v57  ;;  %vm1408_vm1 = vcmp.eq.f32.partialorder %v3038_v15, 0.0 }
 0x793   :  { %1331 = vmin.xlane.f32.xlu0 %v1330_v59  ;;  %557 = vadd.xlane.f32.xlu1 %v556_v43  ;;  %v1260_v43 = vshll.u32 %v1259_v45, 16  ;;  %v1402_v45 = vand.u32 2147483648, %v3057_v42 }
 0x794   :  { %v1372_v62 = vsel %vm1371_vm5, %v2980_v57, %v1370_v36  ;;  %vm1401_vm5 = vcmp.eq.f32.partialorder %v3057_v42, 0.0 }
 0x795   :  { %v1375_v24 = vsel %vm1373_vm6, %v1374_v44, %v1372_v62  ;;  %vm1413_vm6 = vcmp.eq.f32.partialorder %v3073_v0, inf }
 0x797   :  { %854 = vadd.xlane.f32.xlu0 %v2846_v39  ;;  %1151 = vadd.xlane.f32.xlu1 %v3090_v54  ;;  %v1245_v39 = vshll.u32 %v1244_v5, 16  ;;  %v1229_v54 = vcvt.f32.s32 %v3196_v41  ;;  %v2279_v41 = vpop.eup %2278 }
 0x798   :  { %v2281_v34 = vpop.eup %2280  ;;  %v1391_v31 = vmul.f32 %v2279_v41, %v2995_v1  ;;  %v1289_v41 = vcvt.f32.s32 %v3254_v28 }
 0x799   :  { %v1230_v10 = vshll.u32 %v1229_v54, 16  ;;  %v1384_v4 = vmul.f32 %v2281_v34, %v3016_v14  ;;  %v2283_v35 = vpop.eup %2282 }
 0x79a   :  { %v1393_v57 = vsel %vm1392_vm8, %v2995_v1, %v1391_v31  ;;  %v1405_v54 = vmul.f32 %v2283_v35, %v3038_v15  ;;  %v2285_v44 = vpop.eup %2284  ;;  %v1409_v1 = vand.u32 2147483648, %v3038_v15  ;;  %v1319_v31 = vcvt.f32.s32 %v3262_v8 }
 0x79b   :  { %v1386_v55 = vsel %vm1385_vm11, %v3016_v14, %v1384_v4 }
 0x79c   :  { %v1389_v22 = vsel %vm1387_vm12, %v1388_v37, %v1386_v55 }
 0x804   :  { %v1242_v9 = vpop.xlane.xlu0 %1241 }
 0x805   :  { %v1243_v48 = vcvt.f32.s32 %v1242_v9 }
 0x807   :  { %v1246_v19 = vadd.s32 %v1245_v39, %v1243_v48  ;;  %v1396_v48 = vsel %vm1394_vm9, %v1395_v3, %v1393_v57  ;;  %v1290_v3 = vshll.u32 %v1289_v41, 16  ;;  %v1320_v57 = vshll.u32 %v1319_v31, 16 }
 0x808   :  { %v1227_v20 = vpop.xlane.xlu1 %1226  ;;  %vm1420_vm9 = vcmp.eq.f32.partialorder %v3085_v6, inf }
 0x809   :  { %vm1338_vm7 = vcmp.eq.s32.totalorder %v2468_v52, %v1246_v19  ;;  %v1228_v30 = vcvt.f32.s32 %v1227_v20  ;;  %v1305_v20 = vshll.u32 %v1304_v46, 16 }
 0x80a   :  { %v2023_v51 = vsel %vm1338_vm7, 1.0, %v3608_v61  ;;  %vm1415_vm7 = vcmp.eq.f32.partialorder %v3073_v0, 0.0 }
 0x80b   :  { %v1231_v47 = vadd.s32 %v1230_v10, %v1228_v30  ;;  %v3299_v11 = vadd.f32 %v2023_v51, %v2954_v53  ;;  %v1426_v18 = vmul.f32 %v2023_v51, %v1382_v60  ;;  %v2287_v30 = vpop.eup %2286  ;;  %v1407_v51 = vsel %vm1406_vm14, %v3038_v15, %v1405_v54 }
 0x80c   :  { %v1272_v63 = vpop.xlane.xlu0 %1271  ;;  %v1416_v15 = vand.u32 2147483648, %v3073_v0 }
 0x80d   :  { %vm1337_vm10 = vcmp.eq.s32.totalorder %v2468_v52, %v1231_v47  ;;  %v1273_v23 = vcvt.f32.s32 %v1272_v63  ;;  %v1434_v16 = vsel %vm285_vm3, %v1426_v18, 0.0  ;;  %v1398_v47 = vmul.f32 %v2285_v44, %v3057_v42 }
 0x80e   :  { %v2022_v53 = vsel %vm1337_vm10, 1.0, %v3608_v61  ;;  %vm1422_vm10 = vcmp.eq.f32.partialorder %v3085_v6, 0.0 }
 0x80f   :  { %v1425_v50 = vmul.f32 %v2022_v53, %v1375_v24  ;;  %v1276_v56 = vadd.s32 %v1275_v12, %v1273_v23  ;;  %v3314_v59 = vadd.f32 %v2022_v53, %v2974_v26  ;;  %v2289_v23 = vpop.eup %2288  ;;  %v1412_v53 = vmul.f32 %v2287_v30, %v3073_v0 }
 0x810   :  { %v1257_v5 = vpop.xlane.xlu1 %1256  ;;  %v1400_v8 = vsel %vm1399_vm2, %v3057_v42, %v1398_v47  ;;  %v1423_v42 = vand.u32 2147483648, %v3085_v6 }
 0x811   :  { %v1433_v33 = vsel %vm285_vm3, %v1425_v50, 0.0  ;;  %vm1340_vm13 = vcmp.eq.s32.totalorder %v2468_v52, %v1276_v56  ;;  %v1258_v9 = vcvt.f32.s32 %v1257_v5  ;;  %v1334_v56 = vcvt.f32.s32 %v3268_v27 }
 0x812   :  { %v1435_v39 = vadd.f32 %v1434_v16, %v1433_v33  ;;  %v2025_v26 = vsel %vm1340_vm13, 1.0, %v3608_v61  ;;  %v1419_v5 = vmul.f32 %v2289_v23, %v3085_v6  ;;  %v1403_v16 = vsel %vm1401_vm5, %v1402_v45, %v1400_v8  ;;  %v3610_v23 = vld [vmem:[#allocation7_spill] sm:$0xff] }
 0x813   :  { %v1261_v19 = vadd.s32 %v1260_v43, %v1258_v9  ;;  %v3333_v25 = vadd.f32 %v2025_v26, %v2991_v7  ;;  %v1428_v28 = vmul.f32 %v2025_v26, %v1396_v48  ;;  %v1414_v9 = vsel %vm1413_vm6, %v3073_v0, %v1412_v53 }
 0x814   :  { %v1302_v36 = vpop.xlane.xlu0 %1301  ;;  %v1335_v48 = vshll.u32 %v1334_v56, 16  ;;  %v1421_v44 = vsel %vm1420_vm9, %v3085_v6, %v1419_v5 }
 0x815   :  { %v1303_v10 = vcvt.f32.s32 %v1302_v36  ;;  %vm1339_vm15 = vcmp.eq.s32.totalorder %v2468_v52, %v1261_v19  ;;  %v1438_v35 = vsel %vm285_vm3, %v1428_v28, 0.0 }
 0x816   :  { %v2024_v7 = vsel %vm1339_vm15, 1.0, %v3608_v61 }
 0x817   :  { %v1306_v34 = vadd.s32 %v1305_v20, %v1303_v10  ;;  %v1427_v62 = vmul.f32 %v2024_v7, %v1389_v22  ;;  %v3347_v14 = vadd.f32 %v2024_v7, %v3011_v17  ;;  %v1410_v17 = vsel %vm1408_vm1, %v1409_v1, %v1407_v51 }
 0x818   :  { %v1287_v60 = vpop.xlane.xlu1 %1286 }
 0x819   :  { %vm1342_vm4 = vcmp.eq.s32.totalorder %v2468_v52, %v1306_v34  ;;  %v1436_v63 = vsel %vm285_vm3, %v1427_v62, 0.0  ;;  %v1288_v18 = vcvt.f32.s32 %v1287_v60  ;;  %v3609_v34 = vld [vmem:[#allocation6_spill] sm:$0xff] }
 0x81a   :  { %v2027_v12 = vsel %vm1342_vm4, 1.0, %v3608_v61  ;;  %v1437_v24 = vadd.f32 %v1436_v63, %v1435_v39 }
 0x81b   :  { %v3359_v4 = vadd.f32 %v2027_v12, %v3035_v49  ;;  %v1291_v50 = vadd.s32 %v1290_v3, %v1288_v18  ;;  %v1430_v27 = vmul.f32 %v2027_v12, %v1410_v17  ;;  %v1424_v3 = vsel %vm1422_vm10, %v1423_v42, %v1421_v44 }
 0x81c   :  { %v1317_v43 = vpop.xlane.xlu1 %1316  ;;  %v1439_v46 = vadd.f32 %v1438_v35, %v1437_v24 }
 0x81d   :  { %vm1341_vm8 = vcmp.eq.s32.totalorder %v2468_v52, %v1291_v50  ;;  %v1318_v49 = vcvt.f32.s32 %v1317_v43  ;;  %v1442_v51 = vsel %vm285_vm3, %v1430_v27, 0.0  ;;  %v1668_v27 = vld [vmem:[%s3597_s3 + $0x8] sm:$0xff] }
 0x81e   :  { %v2026_v33 = vsel %vm1341_vm8, 1.0, %v3608_v61 }
 0x81f   :  { %v1429_v39 = vmul.f32 %v2026_v33, %v1403_v16  ;;  %v1321_v26 = vadd.s32 %v1320_v57, %v1318_v49  ;;  %v3377_v54 = vadd.f32 %v2026_v33, %v3052_v58  ;;  %v1417_v58 = vsel %vm1415_vm7, %v1416_v15, %v1414_v9  ;;  %v1667_v9 = vld [vmem:[%s3597_s3] sm:$0xff] }
 0x820   :  { %v1332_v55 = vpop.xlane.xlu0 %1331  ;;  %v558_v19 = vpop.xlane.xlu1 %557 }
 0x821   :  { %v1333_v37 = vcvt.f32.s32 %v1332_v55  ;;  %vm1343_vm11 = vcmp.eq.s32.totalorder %v2468_v52, %v1321_v26  ;;  %v559_v36 = vrot.slane %v558_v19, 4  ;;  %v1440_v20 = vsel %vm285_vm3, %v1429_v39, 0.0  ;;  %v1669_v39 = vld [vmem:[%s3597_s3 + $0x10] sm:$0xff] }
 0x822   :  { %v2028_v41 = vsel %vm1343_vm11, 1.0, %v3608_v61  ;;  %v1441_v22 = vadd.f32 %v1440_v20, %v1439_v46  ;;  %v2190_v55 = vpack.c.bf16 %v1668_v27, %v1667_v9  ;;  %v1672_v20 = vld [vmem:[%s3596_s2 + $0x8] sm:$0xff] }
 0x823   :  { %v1336_v10 = vadd.s32 %v1335_v48, %v1333_v37  ;;  %v560_v1 = vadd.f32 %v559_v36, %v558_v19  ;;  %v1431_v7 = vmul.f32 %v2028_v41, %v1417_v58  ;;  %v3389_v28 = vadd.f32 %v2028_v41, %v3609_v34  ;;  %v1670_v48 = vld [vmem:[%s3597_s3 + $0x18] sm:$0xff]  ;;  %v1671_v37 = vld [vmem:[%s3596_s2] sm:$0xff] }
 0x824   :  { %v855_v30 = vpop.xlane.xlu0 %854  ;;  %v1152_v47 = vpop.xlane.xlu1 %1151  ;;  %v1443_v45 = vadd.f32 %v1442_v51, %v1441_v22  ;;  %v2194_v19 = vpack.c.bf16 %v1670_v48, %v1669_v39  ;;  %2126 = vmatprep.mubr.msk.f32.mxu1 %vm28_vm0, %v1671_v37  ;;  %2191 = vmatprep.subr.bf16.mxu1 %v2190_v55  ;;  %v1674_v58 = vld [vmem:[%s3596_s2 + $0x18] sm:$0xff]  ;;  %v1675_v22 = vld [vmem:[%s3596_s2 + $0x20] sm:$0xff] }
 0x825   :  { %vm1344_vm12 = vcmp.eq.s32.totalorder %v2468_v52, %v1336_v10  ;;  %v856_v62 = vrot.slane %v855_v30, 4  ;;  %v561_v60 = vrot.slane %v560_v1, 2  ;;  %v1153_v0 = vrot.slane %v1152_v47, 4  ;;  %2193 = vmatpush3.bf16.msra.mxu1 %v2190_v55  ;;  %v1673_v10 = vld [vmem:[%s3596_s2 + $0x10] sm:$0xff]  ;;  %v3611_v34 = vld [vmem:[#allocation5_spill] sm:$0xff] }
 0x826   :  { %v2029_v31 = vsel %vm1344_vm12, 1.0, %v3608_v61  ;;  %v1444_v63 = vsel %vm285_vm3, %v1431_v7, 0.0  ;;  %2195 = vmatprep.subr.bf16.mxu1 %v2194_v19  ;;  %v1678_v7 = vld [vmem:[%s3596_s2 + $0x38] sm:$0xff] }
 0x827   :  { %v857_v12 = vadd.f32 %v856_v62, %v855_v30  ;;  %v1432_v18 = vmul.f32 %v2029_v31, %v1424_v3  ;;  %v3397_v24 = vadd.f32 %v2029_v31, %v3610_v23  ;;  %v1154_v17 = vadd.f32 %v1153_v0, %v1152_v47  ;;  %v1677_v30 = vld [vmem:[%s3596_s2 + $0x30] sm:$0xff] }
 0x828   :  { %v1445_v53 = vadd.f32 %v1444_v63, %v1443_v45  ;;  %v562_v52 = vadd.f32 %v561_v60, %v560_v1  ;;  %v1676_v1 = vld [vmem:[%s3596_s2 + $0x28] sm:$0xff]  ;;  %v1462_v62 = vsub.f32 0.0, %v3611_v34  ;;  %v1463_v47 = vsub.f32 0.0, %v2475_v2 }
 0x829   :  { %v858_v35 = vrot.slane %v857_v12, 2  ;;  %v1446_v8 = vsel %vm285_vm3, %v1432_v18, 0.0  ;;  %v1155_v6 = vrot.slane %v1154_v17, 2  ;;  %2197 = vmatpush3.bf16.msra.mxu1 %v2194_v19  ;;  %v1464_v0 = vsub.f32 0.0, %v2491_v21 }
 0x82a   :  { %v1447_v50 = vadd.f32 %v1446_v8, %v1445_v53  ;;  %v563_v56 = vrot.slane %v562_v52, 1  ;;  %v1465_v18 = vsub.f32 0.0, %v2485_v13  ;;  %v1466_v53 = vsub.f32 0.0, %v2504_v32 }
 0x82b   :  { %v859_v43 = vadd.f32 %v858_v35, %v857_v12  ;;  %v1156_v61 = vadd.f32 %v1155_v6, %v1154_v17  ;;  %v1467_v2 = vsub.f32 0.0, %v2498_v29 }
 0x82c   :  { %1448 = vadd.xlane.f32.xlu0 %v1447_v50  ;;  %v564_v15 = vadd.f32 %v563_v56, %v562_v52  ;;  %2127 = vmatmul.mubr.msk.f32.vlgmr.msra.gmra.mrb[0].mxu1 %vm28_vm0, %v1672_v20 }
 0x82d   :  { %v860_v46 = vrot.slane %v859_v43, 1  ;;  %v1157_v57 = vrot.slane %v1156_v61, 1  ;;  %2129 = vmatprep.mubr.msk.f32.mxu1 %vm28_vm0, %v1673_v10 }
 0x82e   :  { %2214 = vpush %v564_v15 }
 0x82f   :  { %v861_v49 = vadd.f32 %v860_v46, %v859_v43  ;;  %v1158_v5 = vadd.f32 %v1157_v57, %v1156_v61  ;;  %v1468_v43 = vsub.f32 0.0, %v2510_v38  ;;  %v1469_v46 = vsub.f32 0.0, %v2515_v40 }
 0x830   :  { %2130 = vmatmul.mubr.msk.f32.gmra.mrb[2].mxu1 %vm28_vm0, %v1674_v58 }
 0x831   :  { %2216 = vpush %v861_v49  ;;  %2132 = vmatprep.mubr.msk.f32.mxu1 %vm28_vm0, %v1675_v22 }
 0x832   :  { %2218 = vpush %v1158_v5 }
 0x834   :  { %2133 = vmatmul.mubr.msk.f32.gmra.mrb[4].mxu1 %vm28_vm0, %v1676_v1 }
 0x835   :  { %2135 = vmatprep.mubr.msk.f32.mxu1 %vm28_vm0, %v1677_v30 }
 0x838   :  { %2136 = vmatmul.mubr.msk.f32.gmra.mrb[6].mxu1 %vm28_vm0, %v1678_v7 }
 0x85f   :  { %s2215_s6 = spop %2214 }
 0x862   :  { %s2217_s7 = spop %2216 }
 0x863   :  { %s863_s8 = sadd.f32 %s2217_s7, %s2215_s6  ;;  %s2219_s0 = spop %2218 }
 0x865   :  { %s1160_s9 = sadd.f32 %s2219_s0, %s863_s8 }
 0x8b9   :  { %v1449_v16 = vpop.xlane.xlu0 %1448 }
 0x8ba   :  { %v1450_v33 = vrot.slane %v1449_v16, 4 }
 0x8bc   :  { %v1451_v26 = vadd.f32 %v1450_v33, %v1449_v16 }
 0x8be   :  { %v1452_v42 = vrot.slane %v1451_v26, 2 }
 0x8c0   :  { %v1453_v36 = vadd.f32 %v1452_v42, %v1451_v26 }
 0x8c2   :  { %v1454_v44 = vrot.slane %v1453_v36, 1 }
 0x8c4   :  { %v1455_v41 = vadd.f32 %v1454_v44, %v1453_v36 }
 0x8c6   :  { %2220 = vpush %v1455_v41 }
 0x8f7   :  { %s2221_s10 = spop %2220 }
 0x8f8   :  { %s1457_s11 = sadd.f32 %s2221_s10, %s1160_s9 }
 0x8fa   :  { %s1460_s12 = smul.f32 0.00390625, %s1457_s11 }
 0x8fc   :  { %s1461_s13 = sadd.f32 1e-12, %s1460_s12 }
 0x8fe   :  { %s1470_s14 = smul.f32 2.0, %s1461_s13 }
 0x900   :  { %s1471_s15 = smul.f32 %s1470_s14, %s1461_s13 }
 0x902   :  { %v1472_v51 = vstv %s1471_s15 }
 0x903   :  { %2290 = vrcp.f32 %v1472_v51 }
 0x90d   :  { %v2291_v3 = vpop.eup %2290 }
 0x90e   :  { %v1474_v45 = vmul.f32 %v2291_v3, %v1462_v62  ;;  %v1475_v60 = vmul.f32 %v2291_v3, %v1463_v47  ;;  %v1476_v12 = vmul.f32 %v2291_v3, %v1464_v0  ;;  %v1477_v17 = vmul.f32 %v2291_v3, %v1465_v18 }
 0x90f   :  { %v1478_v35 = vmul.f32 %v2291_v3, %v1466_v53  ;;  %v1479_v21 = vmul.f32 %v2291_v3, %v1467_v2  ;;  %v1480_v15 = vmul.f32 %v2291_v3, %v1468_v43  ;;  %v1481_v57 = vmul.f32 %v2291_v3, %v1469_v46 }
 0x910   :  { %v1482_v31 = vmul.f32 1.442695, %v1474_v45  ;;  %v1484_v63 = vmul.f32 1.442695, %v1475_v60  ;;  %v1486_v23 = vmul.f32 1.442695, %v1476_v12 }
 0x911   :  { %v1488_v52 = vmul.f32 1.442695, %v1477_v17  ;;  %v1490_v6 = vmul.f32 1.442695, %v1478_v35  ;;  %v1492_v13 = vmul.f32 1.442695, %v1479_v21 }
 0x912   :  { %2292 = vpow2.f32 %v1482_v31  ;;  %v1494_v29 = vmul.f32 1.442695, %v1480_v15 }
 0x913   :  { %2294 = vpow2.f32 %v1484_v63 }
 0x914   :  { %2296 = vpow2.f32 %v1486_v23 }
 0x915   :  { %2298 = vpow2.f32 %v1488_v52 }
 0x916   :  { %2300 = vpow2.f32 %v1490_v6 }
 0x917   :  { %2302 = vpow2.f32 %v1492_v13 }
 0x918   :  { %2304 = vpow2.f32 %v1494_v29 }
 0x91c   :  { %v2293_v8 = vpop.eup %2292 }
 0x91d   :  { %v1498_v50 = vmul.f32 %v2293_v8, %v3314_v59  ;;  %v2295_v56 = vpop.eup %2294  ;;  %v1496_v59 = vmul.f32 1.442695, %v1481_v57  ;;  %v2128_v8 = vpop.f32.mrb[0].mxu1 }
 0x91e   :  { %v1499_v32 = vmul.f32 %v2295_v56, %v3299_v11  ;;  %v2297_v61 = vpop.eup %2296  ;;  %v1769_v6 = vpop.f32.mrb[1].mxu1 }
 0x91f   :  { %1506 = vxpose.xlu1.b32.start [1/8] (short) (narrow) %v1498_v50, 64  ;;  %v1500_v49 = vmul.f32 %v2297_v61, %v3347_v14  ;;  %v2299_v5 = vpop.eup %2298  ;;  %2306 = vpow2.f32 %v1496_v59  ;;  %v2198_v21 = vpack.c.bf16 %v2128_v8, %v1769_v6 }
 0x920   :  { %v1501_v38 = vmul.f32 %v2299_v5, %v3333_v25  ;;  %v2301_v16 = vpop.eup %2300 }
 0x921   :  { %v1502_v11 = vmul.f32 %v2301_v16, %v3377_v54  ;;  %v2303_v33 = vpop.eup %2302  ;;  %2199 = vmatprep.subr.bf16.mxu1 %v2198_v21 }
 0x922   :  { %v1503_v40 = vmul.f32 %v2303_v33, %v3359_v4  ;;  %v2305_v9 = vpop.eup %2304  ;;  %2201 = vmatpush3.bf16.msra.mxu1 %v2198_v21 }
 0x923   :  { %1507 = vxpose.xlu1.b32.cont [2/8] (short) (narrow) %v1499_v32, 64  ;;  %v1504_v27 = vmul.f32 %v2305_v9, %v3389_v28 }
 0x927   :  { %1508 = vxpose.xlu1.b32.cont [3/8] (short) (narrow) %v1500_v49, 64 }
 0x929   :  { %v2307_v14 = vpop.eup %2306 }
 0x92a   :  { %v1505_v39 = vmul.f32 %v2307_v14, %v3397_v24 }
 0x92b   :  { %1509 = vxpose.xlu1.b32.cont [4/8] (short) (narrow) %v1501_v38, 64 }
 0x92f   :  { %1510 = vxpose.xlu1.b32.cont [5/8] (short) (narrow) %v1502_v11, 64 }
 0x933   :  { %1511 = vxpose.xlu1.b32.cont [6/8] (short) (narrow) %v1503_v40, 64 }
 0x937   :  { %1512 = vxpose.xlu1.b32.cont [7/8] (short) (narrow) %v1504_v27, 64 }
 0x93b   :  { %1513 = vxpose.xlu1.b32.end [8/8] (short) (narrow) %v1505_v39, 64 }
 0x99f   :  { %v1522_v26 = vpop.trf.xlu1 }
 0x9a0   :  { %v1538_v25 = vadd.f32 %v1522_v26, %v1498_v50  ;;  %v2131_v50 = vpop.f32.mrb[2].mxu1 }
 0x9a1   :  { %v1779_v56 = vpop.f32.mrb[3].mxu1 }
 0x9a2   :  { %v3460_v55 = vmul.f32 0.5, %v1538_v25  ;;  %v2202_v43 = vpack.c.bf16 %v2131_v50, %v1779_v56  ;;  %v2134_v13 = vpop.f32.mrb[4].mxu1  ;;  %v1631_v50 = vld [vmem:[%s3595_s1 + $0x20] sm:$0xff] }
 0x9a3   :  { %v1523_v48 = vpop.trf.xlu1  ;;  %v1789_v15 = vpop.f32.mrb[5].mxu1 }
 0x9a4   :  { %v1539_v37 = vadd.f32 %v1523_v48, %v1499_v32  ;;  %v1554_v54 = vsel %vm285_vm3, %v3460_v55, 0.0  ;;  %2203 = vmatprep.subr.bf16.mxu1 %v2202_v43  ;;  %v2206_v32 = vpack.c.bf16 %v2134_v13, %v1789_v15  ;;  %v2137_v61 = vpop.f32.mrb[6].mxu1  ;;  %v1627_v48 = vld [vmem:[%s3595_s1] sm:$0xff] }
 0x9a5   :  { %1555 = vadd.xlane.f32.xlu0 %v1554_v54  ;;  %2205 = vmatpush3.bf16.msra.mxu1 %v2202_v43  ;;  %v1799_v46 = vpop.f32.mrb[7].mxu1 }
 0x9a6   :  { %v3464_v4 = vmul.f32 0.5, %v1539_v37  ;;  %2207 = vmatprep.subr.bf16.mxu1 %v2206_v32  ;;  %v2210_v29 = vpack.c.bf16 %v2137_v61, %v1799_v46  ;;  %v1639_v61 = vmul.f32 0.5, %v1631_v50  ;;  %v1632_v46 = vld [vmem:[%s3595_s1 + $0x28] sm:$0xff] }
 0x9a7   :  { %v1524_v19 = vpop.trf.xlu1 }
 0x9a8   :  { %v1540_v42 = vadd.f32 %v1524_v19, %v1500_v49  ;;  %v1557_v28 = vsel %vm285_vm3, %v3464_v4, 0.0 }
 0x9a9   :  { %1558 = vadd.xlane.f32.xlu0 %v1557_v28  ;;  %v1578_v24 = vadd.f32 %v1557_v28, %v1554_v54  ;;  %2209 = vmatpush3.bf16.msra.mxu1 %v2206_v32  ;;  %v1635_v28 = vmul.f32 0.5, %v1627_v48 }
 0x9aa   :  { %v3468_v36 = vmul.f32 0.5, %v1540_v42  ;;  %2211 = vmatprep.subr.bf16.mxu1 %v2210_v29 }
 0x9ab   :  { %v1525_v44 = vpop.trf.xlu1 }
 0x9ac   :  { %v1541_v20 = vadd.f32 %v1525_v44, %v1501_v38  ;;  %v1560_v41 = vsel %vm285_vm3, %v3468_v36, 0.0  ;;  %v1628_v44 = vld [vmem:[%s3595_s1 + $0x8] sm:$0xff] }
 0x9ad   :  { %1561 = vadd.xlane.f32.xlu0 %v1560_v41  ;;  %v1579_v10 = vadd.f32 %v1578_v24, %v1560_v41  ;;  %2213 = vmatpush3.bf16.msra.mxu1 %v2210_v29 }
 0x9ae   :  { %v3472_v58 = vmul.f32 0.5, %v1541_v20 }
 0x9af   :  { %v1526_v22 = vpop.trf.xlu1 }
 0x9b0   :  { %v1542_v1 = vadd.f32 %v1526_v22, %v1502_v11  ;;  %v1563_v30 = vsel %vm285_vm3, %v3472_v58, 0.0 }
 0x9b1   :  { %1564 = vadd.xlane.f32.xlu0 %v1563_v30  ;;  %v1580_v7 = vadd.f32 %v1579_v10, %v1563_v30  ;;  %v1636_v30 = vmul.f32 0.5, %v1628_v44 }
 0x9b2   :  { %v3476_v51 = vmul.f32 0.5, %v1542_v1 }
 0x9b3   :  { %v1527_v34 = vpop.trf.xlu1 }
 0x9b4   :  { %v1543_v62 = vadd.f32 %v1527_v34, %v1503_v40  ;;  %v1566_v47 = vsel %vm285_vm3, %v3476_v51, 0.0 }
 0x9b5   :  { %1567 = vadd.xlane.f32.xlu0 %v1566_v47  ;;  %v1581_v3 = vadd.f32 %v1580_v7, %v1566_v47 }
 0x9b6   :  { %v3480_v45 = vmul.f32 0.5, %v1543_v62  ;;  %v1629_v62 = vld [vmem:[%s3595_s1 + $0x10] sm:$0xff] }
 0x9b7   :  { %v1528_v60 = vpop.trf.xlu1 }
 0x9b8   :  { %v1544_v0 = vadd.f32 %v1528_v60, %v1504_v27  ;;  %v1569_v31 = vsel %vm285_vm3, %v3480_v45, 0.0 }
 0x9b9   :  { %1570 = vadd.xlane.f32.xlu0 %v1569_v31  ;;  %v1582_v63 = vadd.f32 %v1581_v3, %v1569_v31 }
 0x9ba   :  { %v3484_v12 = vmul.f32 0.5, %v1544_v0 }
 0x9bb   :  { %v1529_v18 = vpop.trf.xlu1 }
 0x9bc   :  { %v1545_v23 = vadd.f32 %v1529_v18, %v1505_v39  ;;  %v1572_v17 = vsel %vm285_vm3, %v3484_v12, 0.0 }
 0x9bd   :  { %1573 = vadd.xlane.f32.xlu0 %v1572_v17  ;;  %v1583_v53 = vadd.f32 %v1582_v63, %v1572_v17  ;;  %v1637_v63 = vmul.f32 0.5, %v1629_v62 }
 0x9be   :  { %v3488_v52 = vmul.f32 0.5, %v1545_v23  ;;  %v1630_v23 = vld [vmem:[%s3595_s1 + $0x18] sm:$0xff] }
 0x9bf   :  { %v1638_v6 = vmul.f32 0.5, %v1630_v23 }
 0x9c0   :  { %v1575_v35 = vsel %vm285_vm3, %v3488_v52, 0.0 }
 0x9c1   :  { %1576 = vadd.xlane.f32.xlu0 %v1575_v35  ;;  %v1584_v2 = vadd.f32 %v1583_v53, %v1575_v35 }
 0x9c3   :  { %v1585_v57 = vrot.slane %v1584_v2, 4 }
 0x9c5   :  { %v1586_v49 = vadd.f32 %v1585_v57, %v1584_v2 }
 0x9c7   :  { %v1587_v5 = vrot.slane %v1586_v49, 2 }
 0x9c9   :  { %v1588_v59 = vadd.f32 %v1587_v5, %v1586_v49 }
 0x9cb   :  { %v1589_v38 = vrot.slane %v1588_v59, 1 }
 0x9cd   :  { %v1590_v16 = vadd.f32 %v1589_v38, %v1588_v59  ;;  %v1633_v38 = vld [vmem:[%s3595_s1 + $0x30] sm:$0xff] }
 0x9cf   :  { %v1624_v11 = vmax.f32 %v1590_v16, 1e-30  ;;  %vm1623_vm13 = vcmp.gt.f32.partialorder %v1590_v16, 0.0 }
 0x9d1   :  { %2308 = vrsqrt.f32 %v1624_v11 }
 0x9db   :  { %v2309_v26 = vpop.eup %2308 }
 0x9dc   :  { %v3496_v24 = vsel %vm1623_vm13, %v2309_v26, 0.0 }
 0xa32   :  { %v1556_v33 = vpop.xlane.xlu0 %1555 }
 0xa33   :  { %v1599_v40 = vmax.f32 %v1556_v33, 1e-30  ;;  %vm1591_vm0 = vcmp.gt.f32.partialorder %v1556_v33, 0.0 }
 0xa35   :  { %2310 = vrsqrt.f32 %v1599_v40 }
 0xa36   :  { %v1559_v9 = vpop.xlane.xlu0 %1558 }
 0xa37   :  { %v1600_v27 = vmax.f32 %v1559_v9, 1e-30  ;;  %vm1592_vm14 = vcmp.gt.f32.partialorder %v1559_v9, 0.0 }
 0xa39   :  { %2312 = vrsqrt.f32 %v1600_v27  ;;  %v1641_v27 = vmul.f32 0.5, %v1633_v38 }
 0xa3a   :  { %v1562_v14 = vpop.xlane.xlu0 %1561 }
 0xa3b   :  { %v1601_v39 = vmax.f32 %v1562_v14, 1e-30  ;;  %vm1593_vm15 = vcmp.gt.f32.partialorder %v1562_v14, 0.0 }
 0xa3d   :  { %2314 = vrsqrt.f32 %v1601_v39 }
 0xa3e   :  { %v1565_v25 = vpop.xlane.xlu0 %1564 }
 0xa3f   :  { %v2311_v37 = vpop.eup %2310  ;;  %v1602_v54 = vmax.f32 %v1565_v25, 1e-30  ;;  %vm1594_vm1 = vcmp.gt.f32.partialorder %v1565_v25, 0.0 }
 0xa40   :  { %v1615_v19 = vsel %vm1591_vm0, %v2311_v37, 0.0 }
 0xa41   :  { %v1643_v42 = vmul.f32 %v1615_v19, %v3460_v55  ;;  %2316 = vrsqrt.f32 %v1602_v54 }
 0xa42   :  { %v1568_v20 = vpop.xlane.xlu0 %1567 }
 0xa43   :  { %v2313_v41 = vpop.eup %2312  ;;  %v1651_v10 = vmul.f32 %v1643_v42, %v3496_v24  ;;  %v1603_v22 = vmax.f32 %v1568_v20, 1e-30  ;;  %vm1595_vm2 = vcmp.gt.f32.partialorder %v1568_v20, 0.0 }
 0xa44   :  { %v1616_v1 = vsel %vm1592_vm14, %v2313_v41, 0.0 }
 0xa45   :  { %v1644_v7 = vmul.f32 %v1616_v1, %v3464_v4  ;;  %2318 = vrsqrt.f32 %v1603_v22  ;;  %v1659_v55 = vadd.f32 %v1651_v10, %v1635_v28 }
 0xa46   :  { %v1571_v34 = vpop.xlane.xlu0 %1570 }
 0xa47   :  { %v2315_v47 = vpop.eup %2314  ;;  %v1652_v3 = vmul.f32 %v1644_v7, %v3496_v24  ;;  %v1604_v60 = vmax.f32 %v1571_v34, 1e-30  ;;  %2154 = vmatprep.mubr.msk.f32.mxu1 %vm285_vm3, %v1659_v55  ;;  %1954 = vst.msk [vmem:[#allocation2] sm:$0xff] %vm285_vm3, %v1659_v55  ;;  %vm1596_vm4 = vcmp.gt.f32.partialorder %v1571_v34, 0.0 }
 0xa48   :  { %v1617_v0 = vsel %vm1593_vm15, %v2315_v47, 0.0 }
 0xa49   :  { %v1660_v31 = vadd.f32 %v1652_v3, %v1636_v30  ;;  %v1645_v4 = vmul.f32 %v1617_v0, %v3468_v36  ;;  %2320 = vrsqrt.f32 %v1604_v60 }
 0xa4a   :  { %v1574_v18 = vpop.xlane.xlu0 %1573 }
 0xa4b   :  { %v2317_v17 = vpop.eup %2316  ;;  %1955 = vst.msk [vmem:[#allocation2 + $0x8] sm:$0xff] %vm285_vm3, %v1660_v31  ;;  %v1653_v53 = vmul.f32 %v1645_v4, %v3496_v24  ;;  %v1605_v35 = vmax.f32 %v1574_v18, 1e-30  ;;  %2155 = vmatmul.mubr.msk.f32.vlgmr.msra.gmra.mrb[8].mxu1 %vm285_vm3, %v1660_v31  ;;  %vm1597_vm5 = vcmp.gt.f32.partialorder %v1574_v18, 0.0 }
 0xa4c   :  { %v1618_v2 = vsel %vm1594_vm1, %v2317_v17, 0.0 }
 0xa4d   :  { %v1646_v8 = vmul.f32 %v1618_v2, %v3472_v58  ;;  %2322 = vrsqrt.f32 %v1605_v35  ;;  %v1661_v36 = vadd.f32 %v1653_v53, %v1637_v63 }
 0xa4e   :  { %v1577_v21 = vpop.xlane.xlu0 %1576 }
 0xa4f   :  { %v2319_v56 = vpop.eup %2318  ;;  %v1654_v43 = vmul.f32 %v1646_v8, %v3496_v24  ;;  %v1606_v13 = vmax.f32 %v1577_v21, 1e-30  ;;  %2157 = vmatprep.mubr.msk.f32.mxu1 %vm285_vm3, %v1661_v36  ;;  %1956 = vst.msk [vmem:[#allocation2 + $0x10] sm:$0xff] %vm285_vm3, %v1661_v36  ;;  %vm1598_vm6 = vcmp.gt.f32.partialorder %v1577_v21, 0.0 }
 0xa50   :  { %v1619_v15 = vsel %vm1595_vm2, %v2319_v56, 0.0 }
 0xa51   :  { %v1647_v58 = vmul.f32 %v1619_v15, %v3476_v51  ;;  %2324 = vrsqrt.f32 %v1606_v13  ;;  %v1662_v32 = vadd.f32 %v1654_v43, %v1638_v6  ;;  %v1640_v51 = vmul.f32 0.5, %v1632_v46 }
 0xa53   :  { %v2321_v29 = vpop.eup %2320  ;;  %v1655_v57 = vmul.f32 %v1647_v58, %v3496_v24  ;;  %2158 = vmatmul.mubr.msk.f32.gmra.mrb[10].mxu1 %vm285_vm3, %v1662_v32  ;;  %1957 = vst.msk [vmem:[#allocation2 + $0x18] sm:$0xff] %vm285_vm3, %v1662_v32 }
 0xa54   :  { %v1620_v49 = vsel %vm1596_vm4, %v2321_v29, 0.0 }
 0xa55   :  { %v1648_v5 = vmul.f32 %v1620_v49, %v3480_v45  ;;  %v1663_v59 = vadd.f32 %v1655_v57, %v1639_v61  ;;  %v1634_v45 = vld [vmem:[%s3595_s1 + $0x38] sm:$0xff]  ;;  %s2367_s1 = smov [#allocation2]  }
 0xa56   :  { %v1642_v25 = vmul.f32 0.5, %v1634_v45  ;;  %s1969_s30 = sshll.u32 %s2367_s1, 4  ;;  %s1970_s30 = int_to_ptr.vmem [resolvable:$true] %s1969_s30 }
 0xa57   :  { %v2323_v16 = vpop.eup %2322  ;;  %v1656_v11 = vmul.f32 %v1648_v5, %v3496_v24  ;;  %2160 = vmatprep.mubr.msk.f32.mxu1 %vm285_vm3, %v1663_v59  ;;  %1958 = vst.msk [vmem:[#allocation2 + $0x20] sm:$0xff] %vm285_vm3, %v1663_v59  ;;  %s2342_s6 = scalar_lea.vmem %s1970_s30, 1024  ;;  %p2347_p1 = scmp.lt.s32.totalorder %s1970_s30, %s1970_s30 }
 0xa58   :  { %v1621_v33 = vsel %vm1597_vm5, %v2323_v16, 0.0  ;;  %p2343_p0 = scmp.ne.s32.totalorder %s1970_s30, %s2342_s6  ;;  %p2348_p2 = scmp.lt.s32.totalorder %s2342_s6, %s2342_s6 }
 0xa59   :  { %v1649_v40 = vmul.f32 %v1621_v33, %v3484_v12  ;;  %v1664_v9 = vadd.f32 %v1656_v11, %v1640_v51 }
 0xa5a   :  { %p2349_p3 = por %p2348_p2, %p2347_p1 }
 0xa5b   :  { %v2325_v14 = vpop.eup %2324  ;;  %v1657_v39 = vmul.f32 %v1649_v40, %v3496_v24  ;;  %2161 = vmatmul.mubr.msk.f32.gmra.mrb[12].mxu1 %vm285_vm3, %v1664_v9  ;;  %1959 = vst.msk [vmem:[#allocation2 + $0x28] sm:$0xff] %vm285_vm3, %v1664_v9 }
 0xa5c   :  { %v1622_v26 = vsel %vm1598_vm6, %v2325_v14, 0.0  ;;  %p2350_p4 = pnand %p2349_p3, %p2343_p0 }
 0xa5d   :  { %v1650_v48 = vmul.f32 %v1622_v26, %v3488_v52  ;;  %v1665_v37 = vadd.f32 %v1657_v39, %v1641_v27 }
 0xa5f   :  { %v1658_v12 = vmul.f32 %v1650_v48, %v3496_v24  ;;  %2163 = vmatprep.mubr.msk.f32.mxu1 %vm285_vm3, %v1665_v37  ;;  %1960 = vst.msk [vmem:[#allocation2 + $0x30] sm:$0xff] %vm285_vm3, %v1665_v37 }
 0xa61   :  { %v1666_v54 = vadd.f32 %v1658_v12, %v1642_v25 }
 0xa63   :  { %1961 = vst.msk [vmem:[#allocation2 + $0x38] sm:$0xff] %vm285_vm3, %v1666_v54  ;;  %2164 = vmatmul.mubr.msk.f32.gmra.mrb[14].mxu1 %vm285_vm3, %v1666_v54 }
 0xa64   :  { %2353 = shalt.err (!%p2350_p4)
}
 0xa65   :  { %s2354_s0 = scalar_lea.hbm %s3599_s5, 1024 }
 0xa66   :  { %p2355_p5 = scmp.ne.s32.totalorder %s3599_s5, %s2354_s0  ;;  %p2358_p6 = scmp.lt.u32.totalorder %s2354_s0, %s3599_s5 }
 0xa68   :  { %p2360_p7 = pnand %p2358_p6, %p2355_p5 }
 0xa6a   :  { %2363 = shalt.err (!%p2360_p7)
}
 0xa6b   :  { %s2368_s13 = smov 128   ;;  %s2369_s14 = smov 8   ;;  %vm1945_vm3 = vcmask 130048  }
 0xa6c   :  { %1975 = dma.vmem_to_hbm [thread:$0]  %s1970_s30, 1024, %s3599_s5, [#allocation3], %s2368_s13, %s2368_s13, %s2369_s14  }
 0xb1e   :  { %v2156_v52 = vpop.f32.mrb[8].mxu1 }
 0xb1f   :  { %2326 = vtanh.f32 %v2156_v52  ;;  %v1898_v19 = vpop.f32.mrb[9].mxu1 }
 0xb20   :  { %2328 = vtanh.f32 %v1898_v19 }
 0xb26   :  { %v2159_v42 = vpop.f32.mrb[10].mxu1 }
 0xb27   :  { %2330 = vtanh.f32 %v2159_v42  ;;  %v1908_v28 = vpop.f32.mrb[11].mxu1 }
 0xb28   :  { %2332 = vtanh.f32 %v1908_v28 }
 0xb29   :  { %v2327_v24 = vpop.eup %2326 }
 0xb2a   :  { %v2329_v44 = vpop.eup %2328  ;;  %1947 = vst.msk [vmem:[%s3598_s4 + $0x8] sm:$0xff] %vm1945_vm3, %v2327_v24 }
 0xb2b   :  { %1946 = vst.msk [vmem:[%s3598_s4] sm:$0xff] %vm1945_vm3, %v2329_v44 }
 0xb2e   :  { %v2162_v20 = vpop.f32.mrb[12].mxu1 }
 0xb2f   :  { %2334 = vtanh.f32 %v2162_v20  ;;  %v1918_v41 = vpop.f32.mrb[13].mxu1 }
 0xb30   :  { %2336 = vtanh.f32 %v1918_v41 }
 0xb31   :  { %v2331_v10 = vpop.eup %2330 }
 0xb32   :  { %v2333_v22 = vpop.eup %2332  ;;  %1949 = vst.msk [vmem:[%s3598_s4 + $0x18] sm:$0xff] %vm1945_vm3, %v2331_v10 }
 0xb33   :  { %1948 = vst.msk [vmem:[%s3598_s4 + $0x10] sm:$0xff] %vm1945_vm3, %v2333_v22 }
 0xb36   :  { %v2165_v1 = vpop.f32.mrb[14].mxu1 }
 0xb37   :  { %2338 = vtanh.f32 %v2165_v1  ;;  %v1928_v30 = vpop.f32.mrb[15].mxu1 }
 0xb38   :  { %2340 = vtanh.f32 %v1928_v30 }
 0xb39   :  { %v2335_v7 = vpop.eup %2334 }
 0xb3a   :  { %v2337_v55 = vpop.eup %2336  ;;  %1951 = vst.msk [vmem:[%s3598_s4 + $0x28] sm:$0xff] %vm1945_vm3, %v2335_v7 }
 0xb3b   :  { %1950 = vst.msk [vmem:[%s3598_s4 + $0x20] sm:$0xff] %vm1945_vm3, %v2337_v55 }
 0xb41   :  { %v2339_v34 = vpop.eup %2338 }
 0xb42   :  { %v2341_v62 = vpop.eup %2340  ;;  %1953 = vst.msk [vmem:[%s3598_s4 + $0x38] sm:$0xff] %vm1945_vm3, %v2339_v34 }
 0xb43   :  { %1952 = vst.msk [vmem:[%s3598_s4 + $0x30] sm:$0xff] %vm1945_vm3, %v2341_v62 }
 0xb44   :  { %2364 = dma.done.wait [#allocation3], 1024  }
 0xb45   :  { %2365 = vsyncadd [#allocation3], 4294966272 }
 0xb46   :  { %1981 = vsyncpa [#allocation3], 1 }

// kernel: graphstar_forward.4
= control target key start
LH: loop header
LB: loop body
LE: loop exit
PB: predicated region body
PF: predicated region fallthrough
CT: control target
= control target key end

     0   :  { %vm28_vm0 = vcmask 130048   ;;  %s3587_s0 = inlined_call_operand.vmem [shape: f32[64,16], index: 0, kind: input, shape index: {}]   ;;  %s3588_s1 = inlined_call_operand.vmem [shape: f32[64,64], index: 1, kind: input, shape index: {}]   ;;  %s3589_s2 = inlined_call_operand.vmem [shape: f32[64,16], index: 2, kind: input, shape index: {}]   ;;  %s3590_s3 = inlined_call_operand.vmem [shape: f32[16,16], index: 3, kind: input, shape index: {}]   ;;  %s3591_s4 = inlined_call_operand.vmem [shape: f32[64,16], index: 4, kind: output, shape index: {0}]   ;;  %s3592_s5 = inlined_call_operand.hbm [shape: f32[64,64], index: 5, kind: output, shape index: {1}]  }
   0x1   :  { %v20_v0 = vld [vmem:[%s3587_s0] sm:$0xff]  ;;  %v21_v1 = vld [vmem:[%s3587_s0 + $0x8] sm:$0xff]  ;;  %v22_v2 = vld [vmem:[%s3587_s0 + $0x10] sm:$0xff] }
   0x2   :  { %v158_v3 = vmul.f32 %v20_v0, %v20_v0  ;;  %v159_v4 = vmul.f32 %v21_v1, %v21_v1  ;;  %v160_v5 = vmul.f32 %v22_v2, %v22_v2  ;;  %v23_v6 = vld [vmem:[%s3587_s0 + $0x18] sm:$0xff]  ;;  %v2185_v7 = vpack.c.bf16 %v21_v1, %v20_v0  ;;  %vm2413_vm1 = vmpackc.low %vm28_vm0, %vm28_vm0  ;;  %2129 = vmatprep.mubr.msk.f32.mxu0 %vm28_vm0, %v20_v0  ;;  %v24_v11 = vld [vmem:[%s3587_s0 + $0x20] sm:$0xff] }
   0x3   :  { %v161_v9 = vmul.f32 %v23_v6, %v23_v6  ;;  %v2191_v10 = vpack.c.bf16 %v23_v6, %v22_v2  ;;  %v25_v12 = vld [vmem:[%s3587_s0 + $0x28] sm:$0xff] }
   0x4   :  { %v166_v13 = vsel %vm28_vm0, %v158_v3, 0.0  ;;  %v172_v14 = vsel %vm28_vm0, %v160_v5, 0.0  ;;  %2187 = vmatprep.subr.msk.bf16.mxu0 %vm2413_vm1, %v2185_v7 }
   0x5   :  { %11 = vsyncpa [#allocation3], 0  ;;  %167 = vadd.xlane.f32.xlu0 %v166_v13  ;;  %173 = vadd.xlane.f32.xlu1 %v172_v14  ;;  %v169_v15 = vsel %vm28_vm0, %v159_v4, 0.0  ;;  %v175_v16 = vsel %vm28_vm0, %v161_v9, 0.0  ;;  %v162_v17 = vmul.f32 %v24_v11, %v24_v11  ;;  %v163_v18 = vmul.f32 %v25_v12, %v25_v12  ;;  %v26_v19 = vld [vmem:[%s3587_s0 + $0x30] sm:$0xff]  ;;  %v27_v20 = vld [vmem:[%s3587_s0 + $0x38] sm:$0xff] }
   0x6   :  { %2190 = vmatpush3.bf16.xpose.msk.msra.mxu0 %vm2413_vm1, %v2185_v7  ;;  %v164_v23 = vmul.f32 %v26_v19, %v26_v19  ;;  %v165_v24 = vmul.f32 %v27_v20, %v27_v20  ;;  %v2197_v25 = vpack.c.bf16 %v25_v12, %v24_v11  ;;  %v2203_v28 = vpack.c.bf16 %v27_v20, %v26_v19 }
   0x7   :  { %2193 = vmatprep.subr.msk.bf16.mxu0 %vm2413_vm1, %v2191_v10  ;;  %v178_v21 = vsel %vm28_vm0, %v162_v17, 0.0  ;;  %v181_v22 = vsel %vm28_vm0, %v163_v18, 0.0  ;;  %v190_v45 = vlaneseq  ;;  %vm285_vm3 = vcmask 523264  }
   0x8   :  { %v184_v26 = vsel %vm28_vm0, %v164_v23, 0.0  ;;  %v187_v27 = vsel %vm28_vm0, %v165_v24, 0.0 }
   0x9   :  { %170 = vadd.xlane.f32.xlu0 %v169_v15  ;;  %176 = vadd.xlane.f32.xlu1 %v175_v16  ;;  %v2464_v46 = vshrl.u32 %v190_v45, 7  ;;  %v2467_v52 = vand.u32 127, %v190_v45 }
   0xb   :  { %v235_v47 = vsub.s32 0, %v2464_v46  ;;  %v192_v53 = vadd.s32 8, %v2464_v46  ;;  %vm269_vm4 = vcmp.eq.s32.totalorder %v2464_v46, %v2467_v52  ;;  %v193_v9 = vadd.s32 16, %v2464_v46 }
   0xc   :  { %v196_v16 = vadd.s32 40, %v2464_v46  ;;  %v195_v23 = vadd.s32 32, %v2464_v46 }
   0xd   :  { %179 = vadd.xlane.f32.xlu0 %v178_v21  ;;  %182 = vadd.xlane.f32.xlu1 %v181_v22  ;;  %vm270_vm2 = vcmp.eq.s32.totalorder %v192_v53, %v2467_v52  ;;  %vm271_vm6 = vcmp.eq.s32.totalorder %v193_v9, %v2467_v52 }
   0xe   :  { %2196 = vmatpush3.bf16.xpose.msk.msra.mxu0 %vm2413_vm1, %v2191_v10  ;;  %vm274_vm7 = vcmp.eq.s32.totalorder %v196_v16, %v2467_v52  ;;  %vm273_vm8 = vcmp.eq.s32.totalorder %v195_v23, %v2467_v52 }
   0xf   :  { %2199 = vmatprep.subr.msk.bf16.mxu0 %vm2413_vm1, %v2197_v25 }
  0x11   :  { %185 = vadd.xlane.f32.xlu0 %v184_v26  ;;  %188 = vadd.xlane.f32.xlu1 %v187_v27 }
  0x16   :  { %2202 = vmatpush3.bf16.xpose.msk.msra.mxu0 %vm2413_vm1, %v2197_v25 }
  0x17   :  { %2205 = vmatprep.subr.msk.bf16.mxu0 %vm2413_vm1, %v2203_v28 }
  0x1e   :  { %2208 = vmatpush3.bf16.xpose.msk.msra.mxu0 %vm2413_vm1, %v2203_v28 }
  0x25   :  { %2130 = vmatmul.mubr.msk.f32.vlgmr.msra.gmra.mrb[0].mxu0 %vm28_vm0, %v21_v1  ;;  %v194_v1 = vadd.s32 24, %v2464_v46 }
  0x26   :  { %2132 = vmatprep.mubr.msk.f32.mxu0 %vm28_vm0, %v22_v2 }
  0x27   :  { %vm272_vm5 = vcmp.eq.s32.totalorder %v194_v1, %v2467_v52 }
  0x29   :  { %2133 = vmatmul.mubr.msk.f32.gmra.mrb[2].mxu0 %vm28_vm0, %v23_v6 }
  0x2a   :  { %2135 = vmatprep.mubr.msk.f32.mxu0 %vm28_vm0, %v24_v11 }
  0x2d   :  { %2136 = vmatmul.mubr.msk.f32.gmra.mrb[4].mxu0 %vm28_vm0, %v25_v12 }
  0x2e   :  { %2138 = vmatprep.mubr.msk.f32.mxu0 %vm28_vm0, %v26_v19 }
  0x31   :  { %2139 = vmatmul.mubr.msk.f32.gmra.mrb[6].mxu0 %vm28_vm0, %v27_v20 }
  0x92   :  { %v168_v29 = vpop.xlane.xlu0 %167  ;;  %v174_v31 = vpop.xlane.xlu1 %173 }
  0x93   :  { %201 = vxpose.xlu0.b32.start [1/8] (short) (narrow) %v168_v29, 8 }
  0x96   :  { %v171_v30 = vpop.xlane.xlu0 %170  ;;  %v177_v32 = vpop.xlane.xlu1 %176 }
  0x97   :  { %202 = vxpose.xlu0.b32.cont [2/8] (short) (narrow) %v171_v30, 8 }
  0x9a   :  { %v180_v33 = vpop.xlane.xlu0 %179  ;;  %v183_v34 = vpop.xlane.xlu1 %182 }
  0x9b   :  { %203 = vxpose.xlu0.b32.cont [3/8] (short) (narrow) %v174_v31, 8 }
  0x9e   :  { %v186_v35 = vpop.xlane.xlu0 %185  ;;  %v2461_v36 = vpop.xlane.xlu1 %188 }
  0x9f   :  { %204 = vxpose.xlu0.b32.cont [4/8] (short) (narrow) %v177_v32, 8 }
  0xa3   :  { %205 = vxpose.xlu0.b32.cont [5/8] (short) (narrow) %v180_v33, 8 }
  0xa7   :  { %206 = vxpose.xlu0.b32.cont [6/8] (short) (narrow) %v183_v34, 8 }
  0xab   :  { %207 = vxpose.xlu0.b32.cont [7/8] (short) (narrow) %v186_v35, 8 }
  0xaf   :  { %208 = vxpose.xlu0.b32.end [8/8] (short) (narrow) %v2461_v36, 8 }
  0xf8   :  { %v2131_v37 = vpop.f32.mrb[0].mxu0 }
  0xf9   :  { %v119_v38 = vpop.f32.mrb[1].mxu0  ;;  %v246_v49 = vmul.f32 2.0, %v2131_v37 }
  0xfa   :  { %v245_v51 = vmul.f32 2.0, %v119_v38 }
  0xfc   :  { %v2134_v39 = vpop.f32.mrb[2].mxu0 }
  0xfd   :  { %v129_v40 = vpop.f32.mrb[3].mxu0  ;;  %v248_v55 = vmul.f32 2.0, %v2134_v39 }
  0xfe   :  { %v247_v61 = vmul.f32 2.0, %v129_v40 }
 0x100   :  { %v2137_v41 = vpop.f32.mrb[4].mxu0 }
 0x101   :  { %v139_v42 = vpop.f32.mrb[5].mxu0  ;;  %v250_v3 = vmul.f32 2.0, %v2137_v41 }
 0x102   :  { %v249_v10 = vmul.f32 2.0, %v139_v42 }
 0x104   :  { %v2140_v43 = vpop.f32.mrb[6].mxu0 }
 0x105   :  { %v149_v44 = vpop.f32.mrb[7].mxu0  ;;  %v252_v24 = vmul.f32 2.0, %v2140_v43 }
 0x106   :  { %v251_v17 = vmul.f32 2.0, %v149_v44 }
 0x113   :  { %v217_v48 = vpop.trf.xlu0 }
 0x114   :  { %v236_v50 = vrot.slane %v217_v48, %v235_v47 }
 0x116   :  { %v238_v54 = vadd.f32 %v236_v50, %v171_v30  ;;  %v237_v56 = vadd.f32 %v236_v50, %v168_v29  ;;  %v240_v57 = vadd.f32 %v236_v50, %v177_v32  ;;  %v239_v0 = vadd.f32 %v236_v50, %v174_v31 }
 0x117   :  { %v242_v8 = vadd.f32 %v236_v50, %v183_v34  ;;  %v241_v12 = vadd.f32 %v236_v50, %v180_v33  ;;  %v243_v20 = vadd.f32 %v236_v50, %v186_v35  ;;  %v244_v27 = vadd.f32 %v236_v50, %v2461_v36 }
 0x118   :  { %v254_v58 = vsub.f32 %v238_v54, %v246_v49  ;;  %v253_v59 = vsub.f32 %v237_v56, %v245_v51  ;;  %v256_v63 = vsub.f32 %v240_v57, %v248_v55  ;;  %v255_v7 = vsub.f32 %v239_v0, %v247_v61 }
 0x119   :  { %v258_v15 = vsub.f32 %v242_v8, %v250_v3  ;;  %v257_v19 = vsub.f32 %v241_v12, %v249_v10  ;;  %v259_v28 = vsub.f32 %v243_v20, %v251_v17  ;;  %v197_v30 = vadd.s32 48, %v2464_v46 }
 0x11a   :  { %v262_v60 = vmax.f32 %v254_v58, 0.0  ;;  %v261_v62 = vmax.f32 %v253_v59, 0.0  ;;  %v264_v6 = vmax.f32 %v256_v63, 0.0  ;;  %v263_v14 = vmax.f32 %v255_v7, 0.0 }
 0x11b   :  { %v266_v22 = vmax.f32 %v258_v15, 0.0  ;;  %v265_v26 = vmax.f32 %v257_v19, 0.0  ;;  %v260_v33 = vsub.f32 %v244_v27, %v252_v24  ;;  %v267_v34 = vmax.f32 %v259_v28, 0.0 }
 0x11c   :  { %v2474_v2 = vsel %vm270_vm2, 1e+30, %v262_v60  ;;  %v2478_v5 = vsel %vm269_vm4, 1e+30, %v261_v62  ;;  %v2484_v13 = vsel %vm272_vm5, 1e+30, %v264_v6  ;;  %vm275_vm9 = vcmp.eq.s32.totalorder %v197_v30, %v2467_v52 }
 0x11d   :  { %v289_v4 = vsel %vm285_vm3, %v2474_v2, inf  ;;  %3598 = vst [vmem:[#allocation5_spill] sm:$0xff] %v2478_v5  ;;  %v286_v11 = vsel %vm285_vm3, %v2478_v5, inf  ;;  %v295_v18 = vsel %vm285_vm3, %v2484_v13, inf  ;;  %v2490_v21 = vsel %vm271_vm6, 1e+30, %v263_v14 }
 0x11e   :  { %290 = vmin.xlane.f32.xlu1 %v289_v4  ;;  %v292_v25 = vsel %vm285_vm3, %v2490_v21, inf  ;;  %v2497_v29 = vsel %vm274_vm7, 1e+30, %v266_v22  ;;  %v2503_v32 = vsel %vm273_vm8, 1e+30, %v265_v26  ;;  %v198_v35 = vadd.s32 56, %v2464_v46 }
 0x11f   :  { %v301_v31 = vsel %vm285_vm3, %v2497_v29, inf  ;;  %v298_v36 = vsel %vm285_vm3, %v2503_v32, inf  ;;  %v268_v37 = vmax.f32 %v260_v33, 0.0  ;;  %v2509_v38 = vsel %vm275_vm9, 1e+30, %v267_v34 }
 0x120   :  { %vm276_vm10 = vcmp.eq.s32.totalorder %v198_v35, %v2467_v52  ;;  %v304_v39 = vsel %vm285_vm3, %v2509_v38, inf }
 0x121   :  { %v2514_v40 = vsel %vm276_vm10, 1e+30, %v268_v37 }
 0x122   :  { %287 = vmin.xlane.f32.xlu1 %v286_v11  ;;  %v307_v41 = vsel %vm285_vm3, %v2514_v40, inf }
 0x126   :  { %296 = vmin.xlane.f32.xlu1 %v295_v18 }
 0x12a   :  { %293 = vmin.xlane.f32.xlu1 %v292_v25 }
 0x12e   :  { %302 = vmin.xlane.f32.xlu1 %v301_v31 }
 0x132   :  { %299 = vmin.xlane.f32.xlu1 %v298_v36 }
 0x136   :  { %305 = vmin.xlane.f32.xlu1 %v304_v39 }
 0x13a   :  { %308 = vmin.xlane.f32.xlu1 %v307_v41 }
 0x1ab   :  { %v291_v42 = vpop.xlane.xlu1 %290 }
 0x1ac   :  { %vm311_vm11 = vcmp.eq.f32.partialorder %v2474_v2, %v291_v42 }
 0x1ad   :  { %v319_v43 = vsel %vm311_vm11, %v2467_v52, 64 }
 0x1ae   :  { %v341_v44 = vsel %vm285_vm3, %v319_v43, 2147483647 }
 0x1af   :  { %v288_v45 = vpop.xlane.xlu1 %287  ;;  %v343_v46 = vshra.s32 %v341_v44, 16  ;;  %v342_v23 = vand.u32 65535, %v341_v44 }
 0x1b0   :  { %vm310_vm12 = vcmp.eq.f32.partialorder %v2478_v5, %v288_v45 }
 0x1b1   :  { %v318_v47 = vsel %vm310_vm12, %v2467_v52, 64  ;;  %v345_v48 = vcvt.s32.f32 %v343_v46  ;;  %v344_v25 = vcvt.s32.f32 %v342_v23 }
 0x1b2   :  { %v326_v49 = vsel %vm285_vm3, %v318_v47, 2147483647 }
 0x1b3   :  { %v297_v50 = vpop.xlane.xlu1 %296  ;;  %346 = vmin.xlane.f32.xlu1 %v345_v48  ;;  %v328_v51 = vshra.s32 %v326_v49, 16  ;;  %v327_v26 = vand.u32 65535, %v326_v49 }
 0x1b4   :  { %vm313_vm13 = vcmp.eq.f32.partialorder %v2484_v13, %v297_v50 }
 0x1b5   :  { %v321_v53 = vsel %vm313_vm13, %v2467_v52, 64  ;;  %v330_v54 = vcvt.s32.f32 %v328_v51  ;;  %v329_v30 = vcvt.s32.f32 %v327_v26 }
 0x1b6   :  { %v371_v55 = vsel %vm285_vm3, %v321_v53, 2147483647 }
 0x1b7   :  { %v294_v56 = vpop.xlane.xlu1 %293  ;;  %331 = vmin.xlane.f32.xlu1 %v330_v54  ;;  %v373_v57 = vshra.s32 %v371_v55, 16  ;;  %v372_v31 = vand.u32 65535, %v371_v55 }
 0x1b8   :  { %vm312_vm14 = vcmp.eq.f32.partialorder %v2490_v21, %v294_v56 }
 0x1b9   :  { %v320_v58 = vsel %vm312_vm14, %v2467_v52, 64  ;;  %v375_v59 = vcvt.s32.f32 %v373_v57  ;;  %v374_v35 = vcvt.s32.f32 %v372_v31 }
 0x1ba   :  { %v356_v60 = vsel %vm285_vm3, %v320_v58, 2147483647 }
 0x1bb   :  { %v303_v61 = vpop.xlane.xlu1 %302  ;;  %376 = vmin.xlane.f32.xlu1 %v375_v59  ;;  %v358_v62 = vshra.s32 %v356_v60, 16  ;;  %v357_v36 = vand.u32 65535, %v356_v60 }
 0x1bc   :  { %vm315_vm15 = vcmp.eq.f32.partialorder %v2497_v29, %v303_v61 }
 0x1bd   :  { %v323_v63 = vsel %vm315_vm15, %v2467_v52, 64  ;;  %v360_v0 = vcvt.s32.f32 %v358_v62  ;;  %v359_v41 = vcvt.s32.f32 %v357_v36 }
 0x1be   :  { %v401_v1 = vsel %vm285_vm3, %v323_v63, 2147483647 }
 0x1bf   :  { %v300_v3 = vpop.xlane.xlu1 %299  ;;  %361 = vmin.xlane.f32.xlu1 %v360_v0  ;;  %v403_v4 = vshra.s32 %v401_v1, 16  ;;  %v402_v42 = vand.u32 65535, %v401_v1 }
 0x1c0   :  { %vm314_vm1 = vcmp.eq.f32.partialorder %v2503_v32, %v300_v3 }
 0x1c1   :  { %v322_v6 = vsel %vm314_vm1, %v2467_v52, 64  ;;  %v405_v7 = vcvt.s32.f32 %v403_v4  ;;  %v404_v45 = vcvt.s32.f32 %v402_v42 }
 0x1c2   :  { %v386_v8 = vsel %vm285_vm3, %v322_v6, 2147483647 }
 0x1c3   :  { %406 = vmin.xlane.f32.xlu1 %v405_v7  ;;  %v306_v9 = vpop.xlane.xlu1 %305  ;;  %v388_v10 = vshra.s32 %v386_v8, 16  ;;  %v387_v46 = vand.u32 65535, %v386_v8  ;;  %v3593_v8 = vmov 0.0  }
 0x1c4   :  { %vm316_vm2 = vcmp.eq.f32.partialorder %v2509_v38, %v306_v9 }
 0x1c5   :  { %v324_v11 = vsel %vm316_vm2, %v2467_v52, 64  ;;  %v390_v12 = vcvt.s32.f32 %v388_v10  ;;  %v389_v49 = vcvt.s32.f32 %v387_v46 }
 0x1c6   :  { %v416_v14 = vsel %vm285_vm3, %v324_v11, 2147483647 }
 0x1c7   :  { %391 = vmin.xlane.f32.xlu1 %v390_v12  ;;  %v309_v15 = vpop.xlane.xlu1 %308  ;;  %v418_v16 = vshra.s32 %v416_v14, 16  ;;  %v417_v50 = vand.u32 65535, %v416_v14 }
 0x1c8   :  { %vm317_vm4 = vcmp.eq.f32.partialorder %v2514_v40, %v309_v15 }
 0x1c9   :  { %v325_v17 = vsel %vm317_vm4, %v2467_v52, 64  ;;  %v420_v18 = vcvt.s32.f32 %v418_v16 }
 0x1ca   :  { %v431_v19 = vsel %vm285_vm3, %v325_v17, 2147483647 }
 0x1cb   :  { %421 = vmin.xlane.f32.xlu1 %v420_v18  ;;  %v433_v20 = vshra.s32 %v431_v19, 16  ;;  %v432_v55 = vand.u32 65535, %v431_v19 }
 0x1cd   :  { %v435_v22 = vcvt.s32.f32 %v433_v20  ;;  %v434_v58 = vcvt.s32.f32 %v432_v55 }
 0x1cf   :  { %436 = vmin.xlane.f32.xlu1 %v435_v22 }
 0x240   :  { %v347_v24 = vpop.xlane.xlu1 %346 }
 0x241   :  { %vm348_vm5 = vcmp.eq.f32.partialorder %v345_v48, %v347_v24  ;;  %v353_v60 = vcvt.f32.s32 %v347_v24 }
 0x242   :  { %v349_v27 = vsel %vm348_vm5, %v344_v25, inf }
 0x243   :  { %350 = vmin.xlane.f32.xlu1 %v349_v27  ;;  %v354_v62 = vshll.u32 %v353_v60, 16 }
 0x244   :  { %v332_v28 = vpop.xlane.xlu1 %331 }
 0x245   :  { %vm333_vm6 = vcmp.eq.f32.partialorder %v330_v54, %v332_v28  ;;  %v419_v54 = vcvt.s32.f32 %v417_v50  ;;  %v338_v63 = vcvt.f32.s32 %v332_v28 }
 0x246   :  { %v334_v33 = vsel %vm333_vm6, %v329_v30, inf }
 0x247   :  { %335 = vmin.xlane.f32.xlu1 %v334_v33  ;;  %v339_v6 = vshll.u32 %v338_v63, 16 }
 0x248   :  { %v377_v34 = vpop.xlane.xlu1 %376 }
 0x249   :  { %vm378_vm7 = vcmp.eq.f32.partialorder %v375_v59, %v377_v34  ;;  %v383_v3 = vcvt.f32.s32 %v377_v34 }
 0x24a   :  { %v379_v37 = vsel %vm378_vm7, %v374_v35, inf }
 0x24b   :  { %380 = vmin.xlane.f32.xlu0 %v379_v37  ;;  %v384_v11 = vshll.u32 %v383_v3, 16 }
 0x24c   :  { %v362_v39 = vpop.xlane.xlu1 %361 }
 0x24d   :  { %vm363_vm8 = vcmp.eq.f32.partialorder %v360_v0, %v362_v39  ;;  %v368_v15 = vcvt.f32.s32 %v362_v39 }
 0x24e   :  { %v364_v43 = vsel %vm363_vm8, %v359_v41, inf }
 0x24f   :  { %365 = vmin.xlane.f32.xlu1 %v364_v43  ;;  %v369_v24 = vshll.u32 %v368_v15, 16 }
 0x250   :  { %v407_v44 = vpop.xlane.xlu1 %406 }
 0x251   :  { %vm408_vm9 = vcmp.eq.f32.partialorder %v405_v7, %v407_v44  ;;  %v413_v20 = vcvt.f32.s32 %v407_v44 }
 0x252   :  { %v409_v47 = vsel %vm408_vm9, %v404_v45, inf }
 0x253   :  { %410 = vmin.xlane.f32.xlu1 %v409_v47  ;;  %v414_v30 = vshll.u32 %v413_v20, 16 }
 0x254   :  { %v2542_v48 = vpop.xlane.xlu1 %391 }
 0x255   :  { %vm393_vm10 = vcmp.eq.f32.partialorder %v390_v12, %v2542_v48  ;;  %v398_v34 = vcvt.f32.s32 %v2542_v48 }
 0x256   :  { %v394_v51 = vsel %vm393_vm10, %v389_v49, inf }
 0x257   :  { %395 = vmin.xlane.f32.xlu1 %v394_v51  ;;  %v399_v44 = vshll.u32 %v398_v34, 16 }
 0x258   :  { %v2545_v53 = vpop.xlane.xlu1 %421 }
 0x259   :  { %vm423_vm11 = vcmp.eq.f32.partialorder %v420_v18, %v2545_v53  ;;  %v428_v41 = vcvt.f32.s32 %v2545_v53 }
 0x25a   :  { %v424_v56 = vsel %vm423_vm11, %v419_v54, inf }
 0x25b   :  { %425 = vmin.xlane.f32.xlu1 %v424_v56  ;;  %v429_v49 = vshll.u32 %v428_v41, 16 }
 0x25c   :  { %v2548_v57 = vpop.xlane.xlu1 %436 }
 0x25d   :  { %vm438_vm12 = vcmp.eq.f32.partialorder %v435_v22, %v2548_v57  ;;  %v443_v53 = vcvt.f32.s32 %v2548_v57 }
 0x25e   :  { %v439_v59 = vsel %vm438_vm12, %v434_v58, inf }
 0x25f   :  { %440 = vmin.xlane.f32.xlu1 %v439_v59 }
 0x2d0   :  { %v351_v61 = vpop.xlane.xlu1 %350 }
 0x2d1   :  { %v352_v0 = vcvt.f32.s32 %v351_v61  ;;  %v444_v61 = vshll.u32 %v443_v53, 16 }
 0x2d3   :  { %v355_v1 = vadd.s32 %v354_v62, %v352_v0 }
 0x2d4   :  { %v336_v4 = vpop.xlane.xlu1 %335 }
 0x2d5   :  { %vm447_vm13 = vcmp.eq.s32.totalorder %v2467_v52, %v355_v1  ;;  %v337_v7 = vcvt.f32.s32 %v336_v4 }
 0x2d6   :  { %v2553_v9 = vsel %vm447_vm13, 1.0, %v3593_v8 }
 0x2d7   :  { %vm568_vm14 = vcmp.gt.f32.partialorder %v2553_v9, 0.0  ;;  %v340_v10 = vadd.s32 %v339_v6, %v337_v7 }
 0x2d8   :  { %v2557_v12 = vsel %vm568_vm14, 1e+30, %v2474_v2  ;;  %v381_v14 = vpop.xlane.xlu0 %380 }
 0x2d9   :  { %vm446_vm15 = vcmp.eq.s32.totalorder %v2467_v52, %v340_v10  ;;  %v382_v16 = vcvt.f32.s32 %v381_v14  ;;  %v586_v17 = vsel %vm285_vm3, %v2557_v12, inf  ;;  %2241 = vrsqrt.f32 %v2557_v12 }
 0x2da   :  { %v2563_v18 = vsel %vm446_vm15, 1.0, %v3593_v8  ;;  %587 = vmin.xlane.f32.xlu1 %v586_v17 }
 0x2db   :  { %vm567_vm1 = vcmp.gt.f32.partialorder %v2563_v18, 0.0  ;;  %v385_v19 = vadd.s32 %v384_v11, %v382_v16 }
 0x2dc   :  { %v2567_v22 = vsel %vm567_vm1, 1e+30, %v2478_v5  ;;  %v366_v23 = vpop.xlane.xlu1 %365 }
 0x2dd   :  { %vm449_vm2 = vcmp.eq.s32.totalorder %v2467_v52, %v385_v19  ;;  %v367_v25 = vcvt.f32.s32 %v366_v23  ;;  %v583_v26 = vsel %vm285_vm3, %v2567_v22, inf  ;;  %2243 = vrsqrt.f32 %v2567_v22 }
 0x2de   :  { %v2573_v27 = vsel %vm449_vm2, 1.0, %v3593_v8  ;;  %584 = vmin.xlane.f32.xlu1 %v583_v26 }
 0x2df   :  { %vm570_vm4 = vcmp.gt.f32.partialorder %v2573_v27, 0.0  ;;  %v370_v28 = vadd.s32 %v369_v24, %v367_v25 }
 0x2e0   :  { %v2577_v31 = vsel %vm570_vm4, 1e+30, %v2484_v13  ;;  %v411_v33 = vpop.xlane.xlu1 %410 }
 0x2e1   :  { %vm448_vm5 = vcmp.eq.s32.totalorder %v2467_v52, %v370_v28  ;;  %v412_v35 = vcvt.f32.s32 %v411_v33  ;;  %v592_v36 = vsel %vm285_vm3, %v2577_v31, inf }
 0x2e2   :  { %v2584_v37 = vsel %vm448_vm5, 1.0, %v3593_v8  ;;  %593 = vmin.xlane.f32.xlu1 %v592_v36 }
 0x2e3   :  { %vm569_vm6 = vcmp.gt.f32.partialorder %v2584_v37, 0.0  ;;  %v415_v39 = vadd.s32 %v414_v30, %v412_v35 }
 0x2e4   :  { %v2589_v42 = vsel %vm569_vm6, 1e+30, %v2490_v21  ;;  %v396_v43 = vpop.xlane.xlu1 %395 }
 0x2e5   :  { %vm451_vm7 = vcmp.eq.s32.totalorder %v2467_v52, %v415_v39  ;;  %v397_v45 = vcvt.f32.s32 %v396_v43  ;;  %v589_v46 = vsel %vm285_vm3, %v2589_v42, inf  ;;  %2245 = vrsqrt.f32 %v2589_v42 }
 0x2e6   :  { %v2595_v47 = vsel %vm451_vm7, 1.0, %v3593_v8  ;;  %590 = vmin.xlane.f32.xlu1 %v589_v46  ;;  %2247 = vrsqrt.f32 %v2577_v31 }
 0x2e7   :  { %vm572_vm8 = vcmp.gt.f32.partialorder %v2595_v47, 0.0  ;;  %v400_v48 = vadd.s32 %v399_v44, %v397_v45 }
 0x2e8   :  { %v2599_v50 = vsel %vm572_vm8, 1e+30, %v2497_v29  ;;  %v426_v51 = vpop.xlane.xlu1 %425 }
 0x2e9   :  { %vm450_vm9 = vcmp.eq.s32.totalorder %v2467_v52, %v400_v48  ;;  %v427_v54 = vcvt.f32.s32 %v426_v51  ;;  %v598_v55 = vsel %vm285_vm3, %v2599_v50, inf }
 0x2ea   :  { %v2606_v56 = vsel %vm450_vm9, 1.0, %v3593_v8  ;;  %599 = vmin.xlane.f32.xlu1 %v598_v55 }
 0x2eb   :  { %vm571_vm10 = vcmp.gt.f32.partialorder %v2606_v56, 0.0  ;;  %v430_v58 = vadd.s32 %v429_v49, %v427_v54 }
 0x2ec   :  { %v2610_v59 = vsel %vm571_vm10, 1e+30, %v2503_v32  ;;  %v441_v60 = vpop.xlane.xlu1 %440 }
 0x2ed   :  { %vm452_vm11 = vcmp.eq.s32.totalorder %v2467_v52, %v430_v58  ;;  %v442_v57 = vcvt.f32.s32 %v441_v60  ;;  %v595_v62 = vsel %vm285_vm3, %v2610_v59, inf  ;;  %2249 = vrsqrt.f32 %v2610_v59 }
 0x2ee   :  { %v2616_v63 = vsel %vm452_vm11, 1.0, %v3593_v8  ;;  %596 = vmin.xlane.f32.xlu1 %v595_v62  ;;  %2251 = vrsqrt.f32 %v2599_v50 }
 0x2ef   :  { %vm573_vm12 = vcmp.gt.f32.partialorder %v2616_v63, 0.0  ;;  %v445_v0 = vadd.s32 %v444_v61, %v442_v57 }
 0x2f0   :  { %v2620_v1 = vsel %vm573_vm12, 1e+30, %v2509_v38 }
 0x2f1   :  { %vm453_vm13 = vcmp.eq.s32.totalorder %v2467_v52, %v445_v0  ;;  %v601_v3 = vsel %vm285_vm3, %v2620_v1, inf  ;;  %2253 = vrsqrt.f32 %v2620_v1 }
 0x2f2   :  { %v2626_v4 = vsel %vm453_vm13, 1.0, %v3593_v8  ;;  %602 = vmin.xlane.f32.xlu1 %v601_v3 }
 0x2f3   :  { %vm574_vm14 = vcmp.gt.f32.partialorder %v2626_v4, 0.0 }
 0x2f4   :  { %v2630_v6 = vsel %vm574_vm14, 1e+30, %v2514_v40 }
 0x2f5   :  { %v604_v7 = vsel %vm285_vm3, %v2630_v6, inf  ;;  %2255 = vrsqrt.f32 %v2630_v6 }
 0x2f6   :  { %605 = vmin.xlane.f32.xlu0 %v604_v7 }
 0x367   :  { %v588_v10 = vpop.xlane.xlu1 %587 }
 0x368   :  { %vm608_vm15 = vcmp.eq.f32.partialorder %v2557_v12, %v588_v10 }
 0x369   :  { %v616_v11 = vsel %vm608_vm15, %v2467_v52, 64 }
 0x36a   :  { %v638_v14 = vsel %vm285_vm3, %v616_v11, 2147483647 }
 0x36b   :  { %v585_v15 = vpop.xlane.xlu1 %584  ;;  %v640_v16 = vshra.s32 %v638_v14, 16 }
 0x36c   :  { %vm607_vm1 = vcmp.eq.f32.partialorder %v2567_v22, %v585_v15  ;;  %v639_v15 = vand.u32 65535, %v638_v14 }
 0x36d   :  { %v615_v17 = vsel %vm607_vm1, %v2467_v52, 64  ;;  %v642_v19 = vcvt.s32.f32 %v640_v16 }
 0x36e   :  { %v623_v20 = vsel %vm285_vm3, %v615_v17, 2147483647  ;;  %v641_v17 = vcvt.s32.f32 %v639_v15 }
 0x36f   :  { %643 = vmin.xlane.f32.xlu0 %v642_v19  ;;  %v594_v23 = vpop.xlane.xlu1 %593  ;;  %v625_v24 = vshra.s32 %v623_v20, 16 }
 0x370   :  { %vm610_vm2 = vcmp.eq.f32.partialorder %v2577_v31, %v594_v23  ;;  %v624_v23 = vand.u32 65535, %v623_v20 }
 0x371   :  { %v618_v25 = vsel %vm610_vm2, %v2467_v52, 64  ;;  %v627_v26 = vcvt.s32.f32 %v625_v24  ;;  %vm784_vm2 = vcmp.eq.f32.partialorder %v2557_v12, inf }
 0x372   :  { %v668_v28 = vsel %vm285_vm3, %v618_v25, 2147483647 }
 0x373   :  { %628 = vmin.xlane.f32.xlu1 %v627_v26  ;;  %v591_v30 = vpop.xlane.xlu1 %590  ;;  %v670_v33 = vshra.s32 %v668_v28, 16 }
 0x374   :  { %vm609_vm4 = vcmp.eq.f32.partialorder %v2589_v42, %v591_v30  ;;  %v626_v30 = vcvt.s32.f32 %v624_v23 }
 0x375   :  { %v617_v34 = vsel %vm609_vm4, %v2467_v52, 64  ;;  %v672_v35 = vcvt.s32.f32 %v670_v33  ;;  %v669_v33 = vand.u32 65535, %v668_v28  ;;  %vm786_vm4 = vcmp.eq.f32.partialorder %v2557_v12, 0.0 }
 0x376   :  { %v653_v36 = vsel %vm285_vm3, %v617_v34, 2147483647 }
 0x377   :  { %673 = vmin.xlane.f32.xlu0 %v672_v35  ;;  %v600_v39 = vpop.xlane.xlu1 %599  ;;  %v655_v41 = vshra.s32 %v653_v36, 16 }
 0x378   :  { %vm612_vm5 = vcmp.eq.f32.partialorder %v2599_v50, %v600_v39 }
 0x379   :  { %v620_v43 = vsel %vm612_vm5, %v2467_v52, 64  ;;  %v657_v44 = vcvt.s32.f32 %v655_v41  ;;  %v671_v41 = vcvt.s32.f32 %v669_v33 }
 0x37a   :  { %v698_v45 = vsel %vm285_vm3, %v620_v43, 2147483647  ;;  %v654_v43 = vand.u32 65535, %v653_v36 }
 0x37b   :  { %658 = vmin.xlane.f32.xlu1 %v657_v44  ;;  %v597_v46 = vpop.xlane.xlu1 %596  ;;  %v700_v48 = vshra.s32 %v698_v45, 16 }
 0x37c   :  { %vm611_vm6 = vcmp.eq.f32.partialorder %v2610_v59, %v597_v46  ;;  %v656_v20 = vcvt.s32.f32 %v654_v43 }
 0x37d   :  { %v619_v49 = vsel %vm611_vm6, %v2467_v52, 64  ;;  %v702_v51 = vcvt.s32.f32 %v700_v48  ;;  %vm777_vm6 = vcmp.eq.f32.partialorder %v2567_v22, inf }
 0x37e   :  { %v683_v53 = vsel %vm285_vm3, %v619_v49, 2147483647 }
 0x37f   :  { %703 = vmin.xlane.f32.xlu0 %v702_v51  ;;  %v603_v54 = vpop.xlane.xlu1 %602  ;;  %v685_v55 = vshra.s32 %v683_v53, 16  ;;  %v684_v49 = vand.u32 65535, %v683_v53 }
 0x380   :  { %vm613_vm7 = vcmp.eq.f32.partialorder %v2620_v1, %v603_v54 }
 0x381   :  { %v621_v58 = vsel %vm613_vm7, %v2467_v52, 64  ;;  %v687_v60 = vcvt.s32.f32 %v685_v55  ;;  %vm779_vm7 = vcmp.eq.f32.partialorder %v2567_v22, 0.0 }
 0x382   :  { %v713_v61 = vsel %vm285_vm3, %v621_v58, 2147483647 }
 0x383   :  { %v606_v57 = vpop.xlane.xlu0 %605  ;;  %688 = vmin.xlane.f32.xlu1 %v687_v60  ;;  %v715_v62 = vshra.s32 %v713_v61, 16  ;;  %v714_v55 = vand.u32 65535, %v713_v61 }
 0x384   :  { %vm614_vm8 = vcmp.eq.f32.partialorder %v2630_v6, %v606_v57 }
 0x385   :  { %v622_v0 = vsel %vm614_vm8, %v2467_v52, 64  ;;  %v717_v3 = vcvt.s32.f32 %v715_v62 }
 0x386   :  { %v728_v7 = vsel %vm285_vm3, %v622_v0, 2147483647 }
 0x387   :  { %718 = vmin.xlane.f32.xlu1 %v717_v3  ;;  %v730_v10 = vshra.s32 %v728_v7, 16  ;;  %v729_v57 = vand.u32 65535, %v728_v7 }
 0x389   :  { %v732_v11 = vcvt.s32.f32 %v730_v10 }
 0x38b   :  { %733 = vmin.xlane.f32.xlu0 %v732_v11 }
 0x3fc   :  { %v644_v16 = vpop.xlane.xlu0 %643 }
 0x3fd   :  { %vm645_vm9 = vcmp.eq.f32.partialorder %v642_v19, %v644_v16  ;;  %v699_v19 = vand.u32 65535, %v698_v45  ;;  %v650_v61 = vcvt.f32.s32 %v644_v16  ;;  %v787_v16 = vand.u32 2147483648, %v2557_v12 }
 0x3fe   :  { %v646_v24 = vsel %vm645_vm9, %v641_v17, inf }
 0x3ff   :  { %647 = vmin.xlane.f32.xlu0 %v646_v24  ;;  %v651_v15 = vshll.u32 %v650_v61, 16 }
 0x400   :  { %v629_v25 = vpop.xlane.xlu1 %628 }
 0x401   :  { %vm630_vm10 = vcmp.eq.f32.partialorder %v627_v26, %v629_v25  ;;  %v701_v26 = vcvt.s32.f32 %v699_v19  ;;  %v635_v17 = vcvt.f32.s32 %v629_v25 }
 0x402   :  { %v631_v34 = vsel %vm630_vm10, %v626_v30, inf  ;;  %vm791_vm10 = vcmp.eq.f32.partialorder %v2589_v42, inf }
 0x403   :  { %632 = vmin.xlane.f32.xlu1 %v631_v34  ;;  %v636_v34 = vshll.u32 %v635_v17, 16 }
 0x404   :  { %v2658_v39 = vpop.xlane.xlu0 %673 }
 0x405   :  { %vm675_vm11 = vcmp.eq.f32.partialorder %v672_v35, %v2658_v39  ;;  %v686_v35 = vcvt.s32.f32 %v684_v49 }
 0x406   :  { %v676_v46 = vsel %vm675_vm11, %v671_v41, inf  ;;  %v680_v41 = vcvt.f32.s32 %v2658_v39 }
 0x407   :  { %677 = vmin.xlane.f32.xlu0 %v676_v46  ;;  %v780_v46 = vand.u32 2147483648, %v2567_v22 }
 0x408   :  { %v2661_v14 = vpop.xlane.xlu1 %658 }
 0x409   :  { %vm660_vm12 = vcmp.eq.f32.partialorder %v657_v44, %v2661_v14  ;;  %v716_v44 = vcvt.s32.f32 %v714_v55  ;;  %v665_v39 = vcvt.f32.s32 %v2661_v14  ;;  %v681_v55 = vshll.u32 %v680_v41, 16 }
 0x40a   :  { %v661_v48 = vsel %vm660_vm12, %v656_v20, inf }
 0x40b   :  { %662 = vmin.xlane.f32.xlu1 %v661_v48 }
 0x40c   :  { %v2664_v28 = vpop.xlane.xlu0 %703 }
 0x40d   :  { %vm705_vm13 = vcmp.eq.f32.partialorder %v702_v51, %v2664_v28  ;;  %v731_v51 = vcvt.s32.f32 %v729_v57 }
 0x40e   :  { %v706_v54 = vsel %vm705_vm13, %v701_v26, inf  ;;  %vm793_vm13 = vcmp.eq.f32.partialorder %v2589_v42, 0.0 }
 0x40f   :  { %707 = vmin.xlane.f32.xlu0 %v706_v54 }
 0x410   :  { %v2667_v36 = vpop.xlane.xlu1 %688 }
 0x411   :  { %vm690_vm14 = vcmp.eq.f32.partialorder %v687_v60, %v2667_v36  ;;  %v2242_v60 = vpop.eup %2241 }
 0x412   :  { %v691_v58 = vsel %vm690_vm14, %v686_v35, inf  ;;  %v2244_v7 = vpop.eup %2243 }
 0x413   :  { %692 = vmin.xlane.f32.xlu1 %v691_v58  ;;  %v776_v24 = vmul.f32 %v2244_v7, %v2567_v22  ;;  %v2246_v26 = vpop.eup %2245 }
 0x414   :  { %v2670_v45 = vpop.xlane.xlu1 %718 }
 0x415   :  { %vm720_vm15 = vcmp.eq.f32.partialorder %v717_v3, %v2670_v45  ;;  %v783_v3 = vmul.f32 %v2242_v60, %v2557_v12  ;;  %v778_v19 = vsel %vm777_vm6, %v2567_v22, %v776_v24  ;;  %v710_v60 = vcvt.f32.s32 %v2664_v28 }
 0x416   :  { %v721_v62 = vsel %vm720_vm15, %v716_v44, inf  ;;  %v781_v57 = vsel %vm779_vm7, %v780_v46, %v778_v19  ;;  %v695_v24 = vcvt.f32.s32 %v2667_v36  ;;  %v2248_v46 = vpop.eup %2247  ;;  %vm812_vm7 = vcmp.eq.f32.partialorder %v2599_v50, inf }
 0x417   :  { %722 = vmin.xlane.f32.xlu1 %v721_v62  ;;  %v785_v30 = vsel %vm784_vm2, %v2557_v12, %v783_v3 }
 0x418   :  { %v2673_v53 = vpop.xlane.xlu0 %733  ;;  %v788_v20 = vsel %vm786_vm4, %v787_v16, %v785_v30  ;;  %v794_v16 = vand.u32 2147483648, %v2589_v42  ;;  %vm798_vm4 = vcmp.eq.f32.partialorder %v2577_v31, inf }
 0x419   :  { %vm735_vm1 = vcmp.eq.f32.partialorder %v732_v11, %v2673_v53 }
 0x41a   :  { %v736_v0 = vsel %vm735_vm1, %v731_v51, inf  ;;  %v790_v51 = vmul.f32 %v2246_v26, %v2589_v42  ;;  %v2250_v26 = vpop.eup %2249 }
 0x41b   :  { %737 = vmin.xlane.f32.xlu0 %v736_v0  ;;  %v666_v0 = vshll.u32 %v665_v39, 16  ;;  %v696_v39 = vshll.u32 %v695_v24, 16  ;;  %v815_v24 = vand.u32 2147483648, %v2599_v50 }
 0x48c   :  { %v648_v10 = vpop.xlane.xlu0 %647 }
 0x48d   :  { %v649_v23 = vcvt.f32.s32 %v648_v10 }
 0x48f   :  { %v652_v11 = vadd.s32 %v651_v15, %v649_v23 }
 0x490   :  { %v633_v33 = vpop.xlane.xlu1 %632 }
 0x491   :  { %vm744_vm5 = vcmp.eq.s32.totalorder %v2467_v52, %v652_v11  ;;  %v634_v43 = vcvt.f32.s32 %v633_v33 }
 0x492   :  { %v2688_v25 = vsel %vm744_vm5, 1.0, %v3593_v8  ;;  %vm800_vm5 = vcmp.eq.f32.partialorder %v2577_v31, 0.0 }
 0x493   :  { %vm865_vm8 = vcmp.gt.f32.partialorder %v2688_v25, 0.0  ;;  %v637_v48 = vadd.s32 %v636_v34, %v634_v43  ;;  %v832_v49 = vmul.f32 %v2688_v25, %v788_v20  ;;  %v711_v34 = vshll.u32 %v710_v60, 16 }
 0x494   :  { %v2698_v54 = vsel %vm865_vm8, 1e+30, %v2557_v12  ;;  %v678_v35 = vpop.xlane.xlu0 %677 }
 0x495   :  { %vm743_vm9 = vcmp.eq.s32.totalorder %v2467_v52, %v637_v48  ;;  %v679_v58 = vcvt.f32.s32 %v678_v35  ;;  %v883_v44 = vsel %vm285_vm3, %v2698_v54, inf  ;;  %v840_v61 = vsel %vm285_vm3, %v832_v49, 0.0 }
 0x496   :  { %v2707_v14 = vsel %vm743_vm9, 1.0, %v3593_v8  ;;  %884 = vmin.xlane.f32.xlu0 %v883_v44  ;;  %v725_v49 = vcvt.f32.s32 %v2670_v45  ;;  %vm814_vm9 = vcmp.eq.f32.partialorder %v2599_v50, 0.0  ;;  %2257 = vrsqrt.f32 %v2698_v54 }
 0x497   :  { %v831_v12 = vmul.f32 %v2707_v14, %v781_v57  ;;  %vm864_vm11 = vcmp.gt.f32.partialorder %v2707_v14, 0.0  ;;  %v682_v62 = vadd.s32 %v681_v55, %v679_v58 }
 0x498   :  { %v2717_v7 = vsel %vm864_vm11, 1e+30, %v2567_v22  ;;  %v663_v3 = vpop.xlane.xlu1 %662  ;;  %v792_v22 = vsel %vm791_vm10, %v2589_v42, %v790_v51  ;;  %v726_v60 = vshll.u32 %v725_v49, 16  ;;  %vm805_vm10 = vcmp.eq.f32.partialorder %v2610_v59, inf }
 0x499   :  { %v839_v10 = vsel %vm285_vm3, %v831_v12, 0.0  ;;  %vm746_vm12 = vcmp.eq.s32.totalorder %v2467_v52, %v682_v62  ;;  %v664_v15 = vcvt.f32.s32 %v663_v3  ;;  %v880_v17 = vsel %vm285_vm3, %v2717_v7, inf }
 0x49a   :  { %v841_v23 = vadd.f32 %v840_v61, %v839_v10  ;;  %v2724_v11 = vsel %vm746_vm12, 1.0, %v3593_v8  ;;  %881 = vmin.xlane.f32.xlu1 %v880_v17  ;;  %v795_v20 = vsel %vm793_vm13, %v794_v16, %v792_v22  ;;  %v801_v62 = vand.u32 2147483648, %v2577_v31 }
 0x49b   :  { %vm867_vm14 = vcmp.gt.f32.partialorder %v2724_v11, 0.0  ;;  %v667_v28 = vadd.s32 %v666_v0, %v664_v15  ;;  %v2252_v0 = vpop.eup %2251  ;;  %v804_v3 = vmul.f32 %v2250_v26, %v2610_v59  ;;  %v740_v17 = vcvt.f32.s32 %v2673_v53 }
 0x49c   :  { %v2735_v30 = vsel %vm867_vm14, 1e+30, %v2577_v31  ;;  %v708_v33 = vpop.xlane.xlu0 %707  ;;  %v2254_v15 = vpop.eup %2253  ;;  %vm807_vm11 = vcmp.eq.f32.partialorder %v2610_v59, 0.0  ;;  %vm819_vm14 = vcmp.eq.f32.partialorder %v2620_v1, inf  ;;  %2259 = vrsqrt.f32 %v2717_v7 }
 0x49d   :  { %vm745_vm15 = vcmp.eq.s32.totalorder %v2467_v52, %v667_v28  ;;  %v709_v41 = vcvt.f32.s32 %v708_v33  ;;  %v889_v43 = vsel %vm285_vm3, %v2735_v30, inf  ;;  %v2256_v28 = vpop.eup %2255  ;;  %v811_v33 = vmul.f32 %v2252_v0, %v2599_v50 }
 0x49e   :  { %v2745_v36 = vsel %vm745_vm15, 1.0, %v3593_v8  ;;  %890 = vmin.xlane.f32.xlu0 %v889_v43  ;;  %v808_v43 = vand.u32 2147483648, %v2610_v59  ;;  %2261 = vrsqrt.f32 %v2735_v30 }
 0x49f   :  { %v833_v19 = vmul.f32 %v2745_v36, %v795_v20  ;;  %vm866_vm1 = vcmp.gt.f32.partialorder %v2745_v36, 0.0  ;;  %v712_v48 = vadd.s32 %v711_v34, %v709_v41  ;;  %v806_v41 = vsel %vm805_vm10, %v2610_v59, %v804_v3 }
 0x4a0   :  { %v2751_v35 = vsel %vm866_vm1, 1e+30, %v2589_v42  ;;  %v693_v55 = vpop.xlane.xlu1 %692  ;;  %v797_v42 = vmul.f32 %v2248_v46, %v2577_v31 }
 0x4a1   :  { %v842_v58 = vsel %vm285_vm3, %v833_v19, 0.0  ;;  %vm748_vm2 = vcmp.eq.s32.totalorder %v2467_v52, %v712_v48  ;;  %v694_v44 = vcvt.f32.s32 %v693_v55  ;;  %v886_v57 = vsel %vm285_vm3, %v2751_v35, inf }
 0x4a2   :  { %v2759_v12 = vadd.f32 %v842_v58, %v841_v23  ;;  %v2762_v45 = vsel %vm748_vm2, 1.0, %v3593_v8  ;;  %887 = vmin.xlane.f32.xlu1 %v886_v57  ;;  %v799_v53 = vsel %vm798_vm4, %v2577_v31, %v797_v42  ;;  %v818_v19 = vmul.f32 %v2254_v15, %v2620_v1 }
 0x4a3   :  { %vm869_vm6 = vcmp.gt.f32.partialorder %v2762_v45, 0.0  ;;  %v697_v51 = vadd.s32 %v696_v39, %v694_v44  ;;  %v741_v48 = vshll.u32 %v740_v17, 16  ;;  %v802_v49 = vsel %vm800_vm5, %v801_v62, %v799_v53 }
 0x4a4   :  { %v2769_v61 = vsel %vm869_vm6, 1e+30, %v2599_v50  ;;  %v723_v10 = vpop.xlane.xlu1 %722  ;;  %v825_v58 = vmul.f32 %v2256_v28, %v2630_v6  ;;  %v813_v44 = vsel %vm812_vm7, %v2599_v50, %v811_v33  ;;  %v822_v42 = vand.u32 2147483648, %v2620_v1 }
 0x4a5   :  { %vm747_vm8 = vcmp.eq.s32.totalorder %v2467_v52, %v697_v51  ;;  %v724_v23 = vcvt.f32.s32 %v723_v10  ;;  %v895_v22 = vsel %vm285_vm3, %v2769_v61, inf  ;;  %v834_v31 = vmul.f32 %v2724_v11, %v802_v49 }
 0x4a6   :  { %v2781_v16 = vsel %vm747_vm8, 1.0, %v3593_v8  ;;  %896 = vmin.xlane.f32.xlu0 %v895_v22  ;;  %v809_v62 = vsel %vm807_vm11, %v808_v43, %v806_v41  ;;  %v820_v0 = vsel %vm819_vm14, %v2620_v1, %v818_v19  ;;  %vm826_vm2 = vcmp.eq.f32.partialorder %v2630_v6, inf }
 0x4a7   :  { %vm868_vm12 = vcmp.gt.f32.partialorder %v2781_v16, 0.0  ;;  %v727_v34 = vadd.s32 %v726_v60, %v724_v23  ;;  %v835_v60 = vmul.f32 %v2781_v16, %v809_v62  ;;  %vm821_vm4 = vcmp.eq.f32.partialorder %v2620_v1, 0.0 }
 0x4a8   :  { %v2791_v46 = vsel %vm868_vm12, 1e+30, %v2610_v59  ;;  %v738_v20 = vpop.xlane.xlu0 %737  ;;  %v827_v59 = vsel %vm826_vm2, %v2630_v6, %v825_v58  ;;  %vm828_vm5 = vcmp.eq.f32.partialorder %v2630_v6, 0.0  ;;  %v816_v15 = vsel %vm814_vm9, %v815_v24, %v813_v44 }
 0x4a9   :  { %vm749_vm13 = vcmp.eq.s32.totalorder %v2467_v52, %v727_v34  ;;  %v739_v26 = vcvt.f32.s32 %v738_v20  ;;  %v892_v39 = vsel %vm285_vm3, %v2791_v46, inf  ;;  %v823_v17 = vsel %vm821_vm4, %v822_v42, %v820_v0 }
 0x4aa   :  { %v2800_v55 = vsel %vm749_vm13, 1.0, %v3593_v8  ;;  %893 = vmin.xlane.f32.xlu1 %v892_v39  ;;  %v829_v23 = vand.u32 2147483648, %v2630_v6  ;;  %v844_v22 = vsel %vm285_vm3, %v834_v31, 0.0  ;;  %v836_v28 = vmul.f32 %v2762_v45, %v816_v15 }
 0x4ab   :  { %vm870_vm15 = vcmp.gt.f32.partialorder %v2800_v55, 0.0  ;;  %v742_v57 = vadd.s32 %v741_v48, %v739_v26  ;;  %v845_v50 = vadd.f32 %v844_v22, %v2759_v12  ;;  %v846_v24 = vsel %vm285_vm3, %v835_v60, 0.0 }
 0x4ac   :  { %v2813_v51 = vsel %vm870_vm15, 1e+30, %v2620_v1  ;;  %v837_v1 = vmul.f32 %v2800_v55, %v823_v17  ;;  %v830_v34 = vsel %vm828_vm5, %v829_v23, %v827_v59  ;;  %v848_v20 = vsel %vm285_vm3, %v836_v28, 0.0 }
 0x4ad   :  { %vm750_vm1 = vcmp.eq.s32.totalorder %v2467_v52, %v742_v57  ;;  %v898_v3 = vsel %vm285_vm3, %v2813_v51, inf  ;;  %v847_v43 = vadd.f32 %v846_v24, %v845_v50  ;;  %2263 = vrsqrt.f32 %v2751_v35 }
 0x4ae   :  { %v2822_v10 = vsel %vm750_vm1, 1.0, %v3593_v8  ;;  %899 = vmin.xlane.f32.xlu1 %v898_v3  ;;  %v850_v19 = vsel %vm285_vm3, %v837_v1, 0.0  ;;  %2265 = vrsqrt.f32 %v2769_v61 }
 0x4af   :  { %vm871_vm6 = vcmp.gt.f32.partialorder %v2822_v10, 0.0  ;;  %v838_v41 = vmul.f32 %v2822_v10, %v830_v34  ;;  %2267 = vrsqrt.f32 %v2791_v46 }
 0x4b0   :  { %v2834_v53 = vsel %vm871_vm6, 1e+30, %v2630_v6  ;;  %v849_v6 = vadd.f32 %v848_v20, %v847_v43  ;;  %2269 = vrsqrt.f32 %v2813_v51 }
 0x4b1   :  { %v901_v33 = vsel %vm285_vm3, %v2834_v53, inf  ;;  %v852_v48 = vsel %vm285_vm3, %v838_v41, 0.0  ;;  %2271 = vrsqrt.f32 %v2834_v53 }
 0x4b2   :  { %902 = vmin.xlane.f32.xlu0 %v901_v33  ;;  %v851_v26 = vadd.f32 %v850_v19, %v849_v6  ;;  %2273 = vrsqrt.f32 %v2478_v5 }
 0x4b3   :  { %2275 = vrsqrt.f32 %v2474_v2 }
 0x4b4   :  { %v2845_v39 = vadd.f32 %v852_v48, %v851_v26  ;;  %2277 = vrsqrt.f32 %v2490_v21 }
 0x4b5   :  { %2279 = vrsqrt.f32 %v2503_v32 }
 0x4b6   :  { %2281 = vrsqrt.f32 %v2484_v13 }
 0x4b7   :  { %2283 = vrsqrt.f32 %v2497_v29 }
 0x4b8   :  { %2285 = vrsqrt.f32 %v2509_v38 }
 0x4b9   :  { %2287 = vrsqrt.f32 %v2514_v40 }
 0x523   :  { %v885_v49 = vpop.xlane.xlu0 %884 }
 0x524   :  { %vm905_vm7 = vcmp.eq.f32.partialorder %v2698_v54, %v885_v49 }
 0x525   :  { %v913_v12 = vsel %vm905_vm7, %v2467_v52, 64 }
 0x526   :  { %v935_v58 = vsel %vm285_vm3, %v913_v12, 2147483647 }
 0x527   :  { %v882_v44 = vpop.xlane.xlu1 %881  ;;  %v937_v57 = vshra.s32 %v935_v58, 16 }
 0x528   :  { %vm904_vm8 = vcmp.eq.f32.partialorder %v2717_v7, %v882_v44 }
 0x529   :  { %v912_v42 = vsel %vm904_vm8, %v2467_v52, 64  ;;  %v939_v31 = vcvt.s32.f32 %v937_v57 }
 0x52a   :  { %v920_v62 = vsel %vm285_vm3, %v912_v42, 2147483647 }
 0x52b   :  { %940 = vmin.xlane.f32.xlu0 %v939_v31  ;;  %v891_v0 = vpop.xlane.xlu0 %890  ;;  %v922_v60 = vshra.s32 %v920_v62, 16 }
 0x52c   :  { %vm907_vm9 = vcmp.eq.f32.partialorder %v2735_v30, %v891_v0 }
 0x52d   :  { %v915_v3 = vsel %vm907_vm9, %v2467_v52, 64  ;;  %v924_v59 = vcvt.s32.f32 %v922_v60  ;;  %vm1081_vm9 = vcmp.eq.f32.partialorder %v2698_v54, inf }
 0x52e   :  { %v965_v15 = vsel %vm285_vm3, %v915_v3, 2147483647 }
 0x52f   :  { %925 = vmin.xlane.f32.xlu1 %v924_v59  ;;  %v888_v17 = vpop.xlane.xlu1 %887  ;;  %v967_v23 = vshra.s32 %v965_v15, 16 }
 0x530   :  { %vm906_vm10 = vcmp.eq.f32.partialorder %v2751_v35, %v888_v17 }
 0x531   :  { %v914_v22 = vsel %vm906_vm10, %v2467_v52, 64  ;;  %v969_v28 = vcvt.s32.f32 %v967_v23  ;;  %vm1083_vm10 = vcmp.eq.f32.partialorder %v2698_v54, 0.0 }
 0x532   :  { %v950_v1 = vsel %vm285_vm3, %v914_v22, 2147483647 }
 0x533   :  { %970 = vmin.xlane.f32.xlu0 %v969_v28  ;;  %v897_v33 = vpop.xlane.xlu0 %896  ;;  %v952_v34 = vshra.s32 %v950_v1, 16 }
 0x534   :  { %vm909_vm11 = vcmp.eq.f32.partialorder %v2769_v61, %v897_v33  ;;  %v936_v33 = vand.u32 65535, %v935_v58 }
 0x535   :  { %v917_v50 = vsel %vm909_vm11, %v2467_v52, 64  ;;  %v954_v24 = vcvt.s32.f32 %v952_v34  ;;  %v921_v34 = vand.u32 65535, %v920_v62  ;;  %vm1074_vm11 = vcmp.eq.f32.partialorder %v2717_v7, inf }
 0x536   :  { %v995_v41 = vsel %vm285_vm3, %v917_v50, 2147483647 }
 0x537   :  { %955 = vmin.xlane.f32.xlu1 %v954_v24  ;;  %v894_v43 = vpop.xlane.xlu1 %893  ;;  %v997_v20 = vshra.s32 %v995_v41, 16 }
 0x538   :  { %vm908_vm12 = vcmp.eq.f32.partialorder %v2791_v46, %v894_v43  ;;  %v938_v43 = vcvt.s32.f32 %v936_v33 }
 0x539   :  { %v916_v19 = vsel %vm908_vm12, %v2467_v52, 64  ;;  %v999_v6 = vcvt.s32.f32 %v997_v20  ;;  %vm1076_vm12 = vcmp.eq.f32.partialorder %v2717_v7, 0.0 }
 0x53a   :  { %v980_v48 = vsel %vm285_vm3, %v916_v19, 2147483647 }
 0x53b   :  { %1000 = vmin.xlane.f32.xlu0 %v999_v6  ;;  %v900_v26 = vpop.xlane.xlu1 %899  ;;  %v982_v49 = vshra.s32 %v980_v48, 16 }
 0x53c   :  { %vm910_vm13 = vcmp.eq.f32.partialorder %v2813_v51, %v900_v26  ;;  %v923_v26 = vcvt.s32.f32 %v921_v34 }
 0x53d   :  { %v918_v12 = vsel %vm910_vm13, %v2467_v52, 64  ;;  %v984_v44 = vcvt.s32.f32 %v982_v49  ;;  %v966_v49 = vand.u32 65535, %v965_v15  ;;  %v981_v15 = vand.u32 65535, %v980_v48 }
 0x53e   :  { %v1010_v57 = vsel %vm285_vm3, %v918_v12, 2147483647  ;;  %vm1095_vm13 = vcmp.eq.f32.partialorder %v2735_v30, inf }
 0x53f   :  { %v1012_v42 = vshra.s32 %v1010_v57, 16  ;;  %v903_v0 = vpop.xlane.xlu0 %902  ;;  %985 = vmin.xlane.f32.xlu1 %v984_v44  ;;  %v968_v58 = vcvt.s32.f32 %v966_v49 }
 0x540   :  { %vm911_vm14 = vcmp.eq.f32.partialorder %v2834_v53, %v903_v0 }
 0x541   :  { %v919_v60 = vsel %vm911_vm14, %v2467_v52, 64  ;;  %v1014_v3 = vcvt.s32.f32 %v1012_v42  ;;  %v951_v42 = vand.u32 65535, %v950_v1  ;;  %vm1097_vm14 = vcmp.eq.f32.partialorder %v2735_v30, 0.0 }
 0x542   :  { %v1025_v17 = vsel %vm285_vm3, %v919_v60, 2147483647 }
 0x543   :  { %1015 = vmin.xlane.f32.xlu1 %v1014_v3  ;;  %v1027_v23 = vshra.s32 %v1025_v17, 16  ;;  %v1026_v49 = vand.u32 65535, %v1025_v17 }
 0x545   :  { %v1029_v22 = vcvt.s32.f32 %v1027_v23  ;;  %v996_v23 = vand.u32 65535, %v995_v41 }
 0x547   :  { %1030 = vmin.xlane.f32.xlu0 %v1029_v22  ;;  %v998_v34 = vcvt.s32.f32 %v996_v23  ;;  %v2910_v23 = vadd.f32 %v2724_v11, %v2573_v27 }
 0x5b8   :  { %v2871_v50 = vpop.xlane.xlu0 %940 }
 0x5b9   :  { %vm942_vm15 = vcmp.eq.f32.partialorder %v939_v31, %v2871_v50  ;;  %v953_v31 = vcvt.s32.f32 %v951_v42  ;;  %v768_v42 = vadd.f32 %v2688_v25, %v2553_v9 }
 0x5ba   :  { %v943_v20 = vsel %vm942_vm15, %v938_v43, inf  ;;  %v1011_v43 = vand.u32 65535, %v1010_v57  ;;  %vm1088_vm15 = vcmp.eq.f32.partialorder %v2751_v35, inf }
 0x5bb   :  { %944 = vmin.xlane.f32.xlu0 %v943_v20  ;;  %v983_v20 = vcvt.s32.f32 %v981_v15 }
 0x5bc   :  { %v2874_v19 = vpop.xlane.xlu1 %925 }
 0x5bd   :  { %vm927_vm1 = vcmp.eq.f32.partialorder %v924_v59, %v2874_v19 }
 0x5be   :  { %v928_v12 = vsel %vm927_vm1, %v923_v26, inf }
 0x5bf   :  { %929 = vmin.xlane.f32.xlu1 %v928_v12 }
 0x5c0   :  { %v2877_v0 = vpop.xlane.xlu0 %970 }
 0x5c1   :  { %vm972_vm2 = vcmp.eq.f32.partialorder %v969_v28, %v2877_v0 }
 0x5c2   :  { %v973_v62 = vsel %vm972_vm2, %v968_v58, inf  ;;  %v947_v58 = vcvt.f32.s32 %v2871_v50 }
 0x5c3   :  { %974 = vmin.xlane.f32.xlu0 %v973_v62  ;;  %v767_v62 = vadd.f32 %v2707_v14, %v2563_v18  ;;  %v1077_v14 = vand.u32 2147483648, %v2717_v7 }
 0x5c4   :  { %v2880_v60 = vpop.xlane.xlu1 %955  ;;  %v948_v15 = vshll.u32 %v947_v58, 16 }
 0x5c5   :  { %vm957_vm4 = vcmp.eq.f32.partialorder %v954_v24, %v2880_v60  ;;  %v1013_v24 = vcvt.s32.f32 %v1011_v43  ;;  %v2923_v43 = vadd.f32 %v2745_v36, %v2584_v37 }
 0x5c6   :  { %v958_v33 = vsel %vm957_vm4, %v953_v31, inf  ;;  %v1084_v31 = vand.u32 2147483648, %v2698_v54  ;;  %vm1090_vm4 = vcmp.eq.f32.partialorder %v2751_v35, 0.0 }
 0x5c7   :  { %959 = vmin.xlane.f32.xlu1 %v958_v33 }
 0x5c8   :  { %v2883_v59 = vpop.xlane.xlu0 %1000 }
 0x5c9   :  { %vm1002_vm5 = vcmp.eq.f32.partialorder %v999_v6, %v2883_v59  ;;  %v1028_v6 = vcvt.s32.f32 %v1026_v49 }
 0x5ca   :  { %v1003_v1 = vsel %vm1002_vm5, %v998_v34, inf  ;;  %v932_v34 = vcvt.f32.s32 %v2874_v19  ;;  %vm1109_vm5 = vcmp.eq.f32.partialorder %v2769_v61, inf }
 0x5cb   :  { %1004 = vmin.xlane.f32.xlu0 %v1003_v1 }
 0x5cc   :  { %v2886_v28 = vpop.xlane.xlu1 %985 }
 0x5cd   :  { %vm987_vm6 = vcmp.eq.f32.partialorder %v984_v44, %v2886_v28  ;;  %v2258_v44 = vpop.eup %2257 }
 0x5ce   :  { %v988_v26 = vsel %vm987_vm6, %v983_v20, inf  ;;  %v2260_v17 = vpop.eup %2259  ;;  %v2927_v20 = vadd.f32 %v2762_v45, %v2595_v47 }
 0x5cf   :  { %989 = vmin.xlane.f32.xlu1 %v988_v26  ;;  %v1073_v33 = vmul.f32 %v2260_v17, %v2717_v7  ;;  %v1098_v26 = vand.u32 2147483648, %v2735_v30 }
 0x5d0   :  { %v2889_v41 = vpop.xlane.xlu1 %1015 }
 0x5d1   :  { %vm1017_vm7 = vcmp.eq.f32.partialorder %v1014_v3, %v2889_v41  ;;  %v2262_v3 = vpop.eup %2261  ;;  %v1075_v19 = vsel %vm1074_vm11, %v2717_v7, %v1073_v33  ;;  %vm1116_vm11 = vcmp.eq.f32.partialorder %v2813_v51, inf }
 0x5d2   :  { %v1018_v48 = vsel %vm1017_vm7, %v1013_v24, inf  ;;  %v1094_v50 = vmul.f32 %v2262_v3, %v2735_v30  ;;  %v2264_v24 = vpop.eup %2263  ;;  %v2947_v3 = vadd.f32 %v2781_v16, %v2606_v56  ;;  %v962_v16 = vcvt.f32.s32 %v2880_v60 }
 0x5d3   :  { %1019 = vmin.xlane.f32.xlu1 %v1018_v48 }
 0x5d4   :  { %v2892_v12 = vpop.xlane.xlu0 %1030  ;;  %v1096_v45 = vsel %vm1095_vm13, %v2735_v30, %v1094_v50 }
 0x5d5   :  { %vm1032_vm8 = vcmp.eq.f32.partialorder %v1029_v22, %v2892_v12  ;;  %v1080_v22 = vmul.f32 %v2258_v44, %v2698_v54  ;;  %v977_v44 = vcvt.f32.s32 %v2877_v0  ;;  %v1112_v0 = vand.u32 2147483648, %v2769_v61 }
 0x5d6   :  { %v1033_v57 = vsel %vm1032_vm8, %v1028_v6, inf  ;;  %v1091_v6 = vand.u32 2147483648, %v2751_v35  ;;  %vm1111_vm8 = vcmp.eq.f32.partialorder %v2769_v61, 0.0 }
 0x5d7   :  { %1034 = vmin.xlane.f32.xlu0 %v1033_v57  ;;  %v1082_v11 = vsel %vm1081_vm9, %v2698_v54, %v1080_v22  ;;  %v933_v57 = vshll.u32 %v932_v34, 16  ;;  %v1078_v22 = vsel %vm1076_vm12, %v1077_v14, %v1075_v19  ;;  %v1099_v14 = vsel %vm1097_vm14, %v1098_v26, %v1096_v45  ;;  %v2266_v34 = vpop.eup %2265 }
 0x5d8   :  { %v1085_v36 = vsel %vm1083_vm10, %v1084_v31, %v1082_v11  ;;  %v1087_v31 = vmul.f32 %v2264_v24, %v2751_v35  ;;  %v978_v11 = vshll.u32 %v977_v44, 16  ;;  %vm1102_vm9 = vcmp.eq.f32.partialorder %v2791_v46, inf }
 0x5d9   :  { %v1007_v45 = vcvt.f32.s32 %v2883_v59  ;;  %vm1104_vm14 = vcmp.eq.f32.partialorder %v2791_v46, 0.0 }
 0x648   :  { %v945_v25 = vpop.xlane.xlu0 %944 }
 0x649   :  { %v946_v1 = vcvt.f32.s32 %v945_v25 }
 0x64b   :  { %v949_v49 = vadd.s32 %v948_v15, %v946_v1 }
 0x64c   :  { %v930_v48 = vpop.xlane.xlu1 %929 }
 0x64d   :  { %vm1041_vm1 = vcmp.eq.s32.totalorder %v2467_v52, %v949_v49  ;;  %v931_v17 = vcvt.f32.s32 %v930_v48 }
 0x64e   :  { %v2040_v58 = vsel %vm1041_vm1, 1.0, %v3593_v8  ;;  %vm1118_vm1 = vcmp.eq.f32.partialorder %v2813_v51, 0.0 }
 0x64f   :  { %v2953_v33 = vadd.f32 %v2040_v58, %v768_v42  ;;  %vm1162_vm2 = vcmp.gt.f32.partialorder %v2040_v58, 0.0  ;;  %v934_v25 = vadd.s32 %v933_v57, %v931_v17  ;;  %v1105_v42 = vand.u32 2147483648, %v2791_v46 }
 0x650   :  { %v2960_v50 = vsel %vm1162_vm2, 1e+30, %v2698_v54  ;;  %v975_v15 = vpop.xlane.xlu0 %974  ;;  %v1129_v1 = vmul.f32 %v2040_v58, %v1085_v36  ;;  %v1089_v54 = vsel %vm1088_vm15, %v2751_v35, %v1087_v31  ;;  %v963_v36 = vshll.u32 %v962_v16, 16  ;;  %v2268_v58 = vpop.eup %2267 }
 0x651   :  { %vm1040_vm6 = vcmp.eq.s32.totalorder %v2467_v52, %v934_v25  ;;  %v976_v24 = vcvt.f32.s32 %v975_v15  ;;  %v1180_v60 = vsel %vm285_vm3, %v2960_v50, inf  ;;  %v1108_v17 = vmul.f32 %v2266_v34, %v2769_v61  ;;  %v2270_v25 = vpop.eup %2269 }
 0x652   :  { %v2039_v49 = vsel %vm1040_vm6, 1.0, %v3593_v8  ;;  %1181 = vmin.xlane.f32.xlu0 %v1180_v60  ;;  %vm1123_vm6 = vcmp.eq.f32.partialorder %v2834_v53, inf  ;;  %2289 = vrsqrt.f32 %v2960_v50 }
 0x653   :  { %v2973_v26 = vadd.f32 %v2039_v49, %v767_v62  ;;  %v1128_v19 = vmul.f32 %v2039_v49, %v1078_v22  ;;  %vm1161_vm7 = vcmp.gt.f32.partialorder %v2039_v49, 0.0  ;;  %v979_v48 = vadd.s32 %v978_v11, %v976_v24 }
 0x654   :  { %v2979_v57 = vsel %vm1161_vm7, 1e+30, %v2717_v7  ;;  %v960_v44 = vpop.xlane.xlu1 %959  ;;  %v1137_v62 = vsel %vm285_vm3, %v1129_v1, 0.0  ;;  %v1119_v11 = vand.u32 2147483648, %v2813_v51  ;;  %v1092_v24 = vsel %vm1090_vm4, %v1091_v6, %v1089_v54 }
 0x655   :  { %v1136_v22 = vsel %vm285_vm3, %v1128_v19, 0.0  ;;  %vm1043_vm10 = vcmp.eq.s32.totalorder %v2467_v52, %v979_v48  ;;  %v961_v31 = vcvt.f32.s32 %v960_v44  ;;  %v1177_v59 = vsel %vm285_vm3, %v2979_v57, inf }
 0x656   :  { %v1138_v15 = vadd.f32 %v1137_v62, %v1136_v22  ;;  %v2042_v16 = vsel %vm1043_vm10, 1.0, %v3593_v8  ;;  %1178 = vmin.xlane.f32.xlu1 %v1177_v59  ;;  %v1110_v49 = vsel %vm1109_vm5, %v2769_v61, %v1108_v17  ;;  %v1101_v19 = vmul.f32 %v2268_v58, %v2791_v46 }
 0x657   :  { %v2990_v7 = vadd.f32 %v2042_v16, %v2910_v23  ;;  %vm1164_vm12 = vcmp.gt.f32.partialorder %v2042_v16, 0.0  ;;  %v964_v34 = vadd.s32 %v963_v36, %v961_v31  ;;  %v1008_v23 = vshll.u32 %v1007_v45, 16 }
 0x658   :  { %v2994_v1 = vsel %vm1164_vm12, 1e+30, %v2735_v30  ;;  %v1005_v60 = vpop.xlane.xlu0 %1004  ;;  %v992_v48 = vcvt.f32.s32 %v2886_v28  ;;  %v1131_v30 = vmul.f32 %v2042_v16, %v1099_v14  ;;  %v1115_v54 = vmul.f32 %v2270_v25, %v2813_v51  ;;  %v2272_v28 = vpop.eup %2271 }
 0x659   :  { %vm1042_vm13 = vcmp.eq.s32.totalorder %v2467_v52, %v964_v34  ;;  %v1006_v36 = vcvt.f32.s32 %v1005_v60  ;;  %v1186_v6 = vsel %vm285_vm3, %v2994_v1, inf  ;;  %v1022_v62 = vcvt.f32.s32 %v2889_v41 }
 0x65a   :  { %v2041_v44 = vsel %vm1042_vm13, 1.0, %v3593_v8  ;;  %1187 = vmin.xlane.f32.xlu0 %v1186_v6  ;;  %v1113_v22 = vsel %vm1111_vm8, %v1112_v0, %v1110_v49  ;;  %v993_v25 = vshll.u32 %v992_v48, 16  ;;  %v1117_v0 = vsel %vm1116_vm11, %v2813_v51, %v1115_v54 }
 0x65b   :  { %v3010_v17 = vadd.f32 %v2041_v44, %v2923_v43  ;;  %v1130_v58 = vmul.f32 %v2041_v44, %v1092_v24  ;;  %vm1163_vm15 = vcmp.gt.f32.partialorder %v2041_v44, 0.0  ;;  %v1009_v45 = vadd.s32 %v1008_v23, %v1006_v36 }
 0x65c   :  { %v3015_v14 = vsel %vm1163_vm15, 1e+30, %v2751_v35  ;;  %v1103_v43 = vsel %vm1102_vm9, %v2791_v46, %v1101_v19  ;;  %v990_v31 = vpop.xlane.xlu1 %989  ;;  %v1141_v24 = vsel %vm285_vm3, %v1131_v30, 0.0  ;;  %v1023_v19 = vshll.u32 %v1022_v62, 16 }
 0x65d   :  { %v1139_v16 = vsel %vm285_vm3, %v1130_v58, 0.0  ;;  %vm1045_vm2 = vcmp.eq.s32.totalorder %v2467_v52, %v1009_v45  ;;  %v991_v59 = vcvt.f32.s32 %v990_v31  ;;  %v1183_v34 = vsel %vm285_vm3, %v3015_v14, inf }
 0x65e   :  { %v1140_v41 = vadd.f32 %v1139_v16, %v1138_v15  ;;  %v2044_v35 = vsel %vm1045_vm2, 1.0, %v3593_v8  ;;  %1184 = vmin.xlane.f32.xlu1 %v1183_v34  ;;  %v1122_v48 = vmul.f32 %v2272_v28, %v2834_v53  ;;  %v1037_v44 = vcvt.f32.s32 %v2892_v12 }
 0x65f   :  { %v3034_v49 = vadd.f32 %v2044_v35, %v2927_v20  ;;  %vm1166_vm4 = vcmp.gt.f32.partialorder %v2044_v35, 0.0  ;;  %v994_v60 = vadd.s32 %v993_v25, %v991_v59  ;;  %v1133_v30 = vmul.f32 %v2044_v35, %v1113_v22 }
 0x660   :  { %v3037_v15 = vsel %vm1166_vm4, 1e+30, %v2769_v61  ;;  %v1020_v23 = vpop.xlane.xlu1 %1019  ;;  %v1142_v36 = vadd.f32 %v1141_v24, %v1140_v41  ;;  %v1106_v54 = vsel %vm1104_vm14, %v1105_v42, %v1103_v43  ;;  %v773_v28 = vadd.f32 %v2800_v55, %v2616_v63 }
 0x661   :  { %vm1044_vm5 = vcmp.eq.s32.totalorder %v2467_v52, %v994_v60  ;;  %v1021_v6 = vcvt.f32.s32 %v1020_v23  ;;  %v1192_v20 = vsel %vm285_vm3, %v3037_v15, inf  ;;  %v1120_v42 = vsel %vm1118_vm1, %v1119_v11, %v1117_v0 }
 0x662   :  { %v2043_v61 = vsel %vm1044_vm5, 1.0, %v3593_v8  ;;  %1193 = vmin.xlane.f32.xlu0 %v1192_v20  ;;  %v1124_v43 = vsel %vm1123_vm6, %v2834_v53, %v1122_v48  ;;  %v1038_v31 = vshll.u32 %v1037_v44, 16  ;;  %v774_v34 = vadd.f32 %v2822_v10, %v2626_v4 }
 0x663   :  { %v3051_v58 = vadd.f32 %v2043_v61, %v2947_v3  ;;  %v1132_v12 = vmul.f32 %v2043_v61, %v1106_v54  ;;  %vm1165_vm7 = vcmp.gt.f32.partialorder %v2043_v61, 0.0  ;;  %v1024_v45 = vadd.s32 %v1023_v19, %v1021_v6 }
 0x664   :  { %v3056_v62 = vsel %vm1165_vm7, 1e+30, %v2791_v46  ;;  %v1035_v22 = vpop.xlane.xlu0 %1034  ;;  %v1145_v46 = vsel %vm285_vm3, %v1133_v30, 0.0  ;;  %v1126_v24 = vand.u32 2147483648, %v2834_v53  ;;  %vm1125_vm11 = vcmp.eq.f32.partialorder %v2834_v53, 0.0 }
 0x665   :  { %v1143_v25 = vsel %vm285_vm3, %v1132_v12, 0.0  ;;  %vm1046_vm8 = vcmp.eq.s32.totalorder %v2467_v52, %v1024_v45  ;;  %v1036_v3 = vcvt.f32.s32 %v1035_v22  ;;  %v1189_v55 = vsel %vm285_vm3, %v3056_v62, inf }
 0x666   :  { %v2045_v16 = vsel %vm1046_vm8, 1.0, %v3593_v8  ;;  %v1144_v59 = vadd.f32 %v1143_v25, %v1142_v36  ;;  %1190 = vmin.xlane.f32.xlu1 %v1189_v55  ;;  %v1127_v36 = vsel %vm1125_vm11, %v1126_v24, %v1124_v43  ;;  %vm487_vm7 = vcmp.eq.f32.partialorder %v2474_v2, inf }
 0x667   :  { %v3067_v41 = vadd.f32 %v2045_v16, %v773_v28  ;;  %v1134_v11 = vmul.f32 %v2045_v16, %v1120_v42  ;;  %vm1167_vm9 = vcmp.gt.f32.partialorder %v2045_v16, 0.0  ;;  %v1039_v35 = vadd.s32 %v1038_v31, %v1036_v3 }
 0x668   :  { %v3072_v0 = vsel %vm1167_vm9, 1e+30, %v2813_v51  ;;  %v1146_v60 = vadd.f32 %v1145_v46, %v1144_v59  ;;  %vm489_vm8 = vcmp.eq.f32.partialorder %v2474_v2, 0.0  ;;  %vm480_vm9 = vcmp.eq.f32.partialorder %v2478_v5, inf }
 0x669   :  { %3599 = vst [vmem:[#allocation6_spill] sm:$0xff] %v3067_v41  ;;  %vm1047_vm10 = vcmp.eq.s32.totalorder %v2467_v52, %v1039_v35  ;;  %v1195_v19 = vsel %vm285_vm3, %v3072_v0, inf  ;;  %v1147_v23 = vsel %vm285_vm3, %v1134_v11, 0.0  ;;  %vm494_vm11 = vcmp.eq.f32.partialorder %v2490_v21, inf }
 0x66a   :  { %v2046_v48 = vsel %vm1047_vm10, 1.0, %v3593_v8  ;;  %v1148_v44 = vadd.f32 %v1147_v23, %v1146_v60  ;;  %1196 = vmin.xlane.f32.xlu1 %v1195_v19  ;;  %vm482_vm10 = vcmp.eq.f32.partialorder %v2478_v5, 0.0  ;;  %v490_v8 = vand.u32 2147483648, %v2474_v2 }
 0x66b   :  { %v3081_v10 = vadd.f32 %v2046_v48, %v774_v34  ;;  %vm1168_vm12 = vcmp.gt.f32.partialorder %v2046_v48, 0.0  ;;  %v1135_v51 = vmul.f32 %v2046_v48, %v1127_v36  ;;  %2291 = vrsqrt.f32 %v2979_v57 }
 0x66c   :  { %v3084_v6 = vsel %vm1168_vm12, 1e+30, %v2834_v53  ;;  %2293 = vrsqrt.f32 %v2994_v1 }
 0x66d   :  { %3600 = vst [vmem:[#allocation7_spill] sm:$0xff] %v3081_v10  ;;  %v1198_v20 = vsel %vm285_vm3, %v3084_v6, inf  ;;  %v1149_v30 = vsel %vm285_vm3, %v1135_v51, 0.0  ;;  %2295 = vrsqrt.f32 %v3015_v14 }
 0x66e   :  { %1199 = vmin.xlane.f32.xlu0 %v1198_v20  ;;  %v3089_v54 = vadd.f32 %v1149_v30, %v1148_v44  ;;  %2297 = vrsqrt.f32 %v3037_v15 }
 0x66f   :  { %2299 = vrsqrt.f32 %v3056_v62 }
 0x670   :  { %2301 = vrsqrt.f32 %v3072_v0 }
 0x671   :  { %2303 = vrsqrt.f32 %v3084_v6 }
 0x6df   :  { %v1182_v61 = vpop.xlane.xlu0 %1181 }
 0x6e0   :  { %vm1202_vm13 = vcmp.eq.f32.partialorder %v2960_v50, %v1182_v61 }
 0x6e1   :  { %v1210_v12 = vsel %vm1202_vm13, %v2467_v52, 64  ;;  %vm496_vm13 = vcmp.eq.f32.partialorder %v2490_v21, 0.0 }
 0x6e2   :  { %v3094_v45 = vsel %vm285_vm3, %v1210_v12, 2147483647 }
 0x6e3   :  { %v1179_v28 = vpop.xlane.xlu1 %1178  ;;  %v1234_v53 = vshra.s32 %v3094_v45, 16 }
 0x6e4   :  { %vm1201_vm14 = vcmp.eq.f32.partialorder %v2979_v57, %v1179_v28 }
 0x6e5   :  { %v1209_v42 = vsel %vm1201_vm14, %v2467_v52, 64  ;;  %v3099_v22 = vcvt.s32.f32 %v1234_v53  ;;  %vm508_vm14 = vcmp.eq.f32.partialorder %v2503_v32, inf }
 0x6e6   :  { %v3102_v43 = vsel %vm285_vm3, %v1209_v42, 2147483647 }
 0x6e7   :  { %v1219_v31 = vshra.s32 %v3102_v43, 16  ;;  %1237 = vmin.xlane.f32.xlu0 %v3099_v22  ;;  %v1188_v25 = vpop.xlane.xlu0 %1187 }
 0x6e8   :  { %vm1204_vm15 = vcmp.eq.f32.partialorder %v2994_v1, %v1188_v25 }
 0x6e9   :  { %v1212_v3 = vsel %vm1204_vm15, %v2467_v52, 64  ;;  %v3108_v16 = vcvt.s32.f32 %v1219_v31 }
 0x6ea   :  { %v3111_v55 = vsel %vm285_vm3, %v1212_v3, 2147483647 }
 0x6eb   :  { %1222 = vmin.xlane.f32.xlu1 %v3108_v16  ;;  %v1185_v59 = vpop.xlane.xlu1 %1184  ;;  %v1264_v46 = vshra.s32 %v3111_v55, 16 }
 0x6ec   :  { %vm1203_vm1 = vcmp.eq.f32.partialorder %v3015_v14, %v1185_v59 }
 0x6ed   :  { %v1211_v11 = vsel %vm1203_vm1, %v2467_v52, 64  ;;  %v3117_v35 = vcvt.s32.f32 %v1264_v46  ;;  %vm501_vm1 = vcmp.eq.f32.partialorder %v2484_v13, inf }
 0x6ee   :  { %v3120_v34 = vsel %vm285_vm3, %v1211_v11, 2147483647 }
 0x6ef   :  { %v1194_v24 = vpop.xlane.xlu0 %1193  ;;  %v1249_v60 = vshra.s32 %v3120_v34, 16  ;;  %1267 = vmin.xlane.f32.xlu0 %v3117_v35 }
 0x6f0   :  { %vm1206_vm2 = vcmp.eq.f32.partialorder %v3037_v15, %v1194_v24 }
 0x6f1   :  { %v1214_v19 = vsel %vm1206_vm2, %v2467_v52, 64  ;;  %v3129_v48 = vcvt.s32.f32 %v1249_v60  ;;  %v2274_v60 = vpop.eup %2273  ;;  %vm510_vm2 = vcmp.eq.f32.partialorder %v2503_v32, 0.0 }
 0x6f2   :  { %v3127_v23 = vsel %vm285_vm3, %v1214_v19, 2147483647  ;;  %v2276_v19 = vpop.eup %2275 }
 0x6f3   :  { %v1294_v36 = vshra.s32 %v3127_v23, 16  ;;  %1252 = vmin.xlane.f32.xlu1 %v3129_v48  ;;  %v1191_v44 = vpop.xlane.xlu1 %1190 }
 0x6f4   :  { %vm1205_vm4 = vcmp.eq.f32.partialorder %v3056_v62, %v1191_v44  ;;  %v479_v44 = vmul.f32 %v2274_v60, %v2478_v5  ;;  %v483_v60 = vand.u32 2147483648, %v2478_v5 }
 0x6f5   :  { %v3134_v51 = vcvt.s32.f32 %v1294_v36  ;;  %v1213_v20 = vsel %vm1205_vm4, %v2467_v52, 64  ;;  %v2278_v36 = vpop.eup %2277  ;;  %vm503_vm4 = vcmp.eq.f32.partialorder %v2484_v13, 0.0 }
 0x6f6   :  { %v3138_v30 = vsel %vm285_vm3, %v1213_v20, 2147483647  ;;  %v1233_v20 = vand.u32 65535, %v3094_v45  ;;  %v1218_v45 = vand.u32 65535, %v3102_v43 }
 0x6f7   :  { %1297 = vmin.xlane.f32.xlu0 %v3134_v51  ;;  %v1279_v61 = vshra.s32 %v3138_v30, 16  ;;  %v1197_v12 = vpop.xlane.xlu1 %1196 }
 0x6f8   :  { %vm1207_vm5 = vcmp.eq.f32.partialorder %v3072_v0, %v1197_v12  ;;  %v493_v12 = vmul.f32 %v2278_v36, %v2490_v21 }
 0x6f9   :  { %v1215_v28 = vsel %vm1207_vm5, %v2467_v52, 64  ;;  %v3144_v53 = vcvt.s32.f32 %v1279_v61  ;;  %v486_v61 = vmul.f32 %v2276_v19, %v2474_v2 }
 0x6fa   :  { %v3147_v42 = vsel %vm285_vm3, %v1215_v28, 2147483647  ;;  %v2280_v28 = vpop.eup %2279  ;;  %v495_v36 = vsel %vm494_vm11, %v2490_v21, %v493_v12  ;;  %v1263_v12 = vand.u32 65535, %v3111_v55  ;;  %vm529_vm11 = vcmp.eq.f32.partialorder %v2514_v40, inf }
 0x6fb   :  { %v1200_v31 = vpop.xlane.xlu0 %1199  ;;  %v1309_v25 = vshra.s32 %v3147_v42, 16  ;;  %1282 = vmin.xlane.f32.xlu1 %v3144_v53  ;;  %v488_v19 = vsel %vm487_vm7, %v2474_v2, %v486_v61  ;;  %v1220_v61 = vcvt.s32.f32 %v1218_v45  ;;  %vm517_vm7 = vcmp.eq.f32.partialorder %v2497_v29, 0.0 }
 0x6fc   :  { %vm1208_vm6 = vcmp.eq.f32.partialorder %v3084_v6, %v1200_v31  ;;  %v481_v31 = vsel %vm480_vm9, %v2478_v5, %v479_v44  ;;  %v507_v44 = vmul.f32 %v2280_v28, %v2503_v32  ;;  %v497_v5 = vand.u32 2147483648, %v2490_v21 }
 0x6fd   :  { %v1216_v3 = vsel %vm1208_vm6, %v2467_v52, 64  ;;  %v3156_v46 = vcvt.s32.f32 %v1309_v25  ;;  %v491_v28 = vsel %vm489_vm8, %v490_v8, %v488_v19  ;;  %v511_v8 = vand.u32 2147483648, %v2503_v32 }
 0x6fe   :  { %v3154_v59 = vsel %vm285_vm3, %v1216_v3, 2147483647  ;;  %v1235_v3 = vcvt.s32.f32 %v1233_v20  ;;  %v484_v20 = vsel %vm482_vm10, %v483_v60, %v481_v31  ;;  %v535_v31 = vmul.f32 %v2553_v9, %v491_v28 }
 0x6ff   :  { %v1324_v11 = vshra.s32 %v3154_v59, 16  ;;  %1312 = vmin.xlane.f32.xlu1 %v3156_v46  ;;  %v534_v10 = vmul.f32 %v2563_v18, %v484_v20  ;;  %v1248_v9 = vand.u32 65535, %v3120_v34  ;;  %v504_v19 = vand.u32 2147483648, %v2484_v13 }
 0x700   :  { %vm515_vm6 = vcmp.eq.f32.partialorder %v2497_v29, inf  ;;  %vm522_vm9 = vcmp.eq.f32.partialorder %v2509_v38, inf }
 0x701   :  { %v3160_v24 = vcvt.s32.f32 %v1324_v11  ;;  %v2282_v11 = vpop.eup %2281  ;;  %v542_v55 = vsel %vm285_vm3, %v534_v10, 0.0 }
 0x703   :  { %1327 = vmin.xlane.f32.xlu0 %v3160_v24 }
 0x774   :  { %v3180_v25 = vpop.xlane.xlu0 %1237 }
 0x775   :  { %vm1239_vm12 = vcmp.eq.f32.partialorder %v3099_v22, %v3180_v25  ;;  %v500_v22 = vmul.f32 %v2282_v11, %v2484_v13  ;;  %v509_v11 = vsel %vm508_vm14, %v2503_v32, %v507_v44  ;;  %v543_v44 = vsel %vm285_vm3, %v535_v31, 0.0 }
 0x776   :  { %v1240_v43 = vsel %vm1239_vm12, %v1235_v3, inf  ;;  %v498_v3 = vsel %vm496_vm13, %v497_v5, %v495_v36  ;;  %v512_v36 = vsel %vm510_vm2, %v511_v8, %v509_v11  ;;  %v544_v34 = vadd.f32 %v543_v44, %v542_v55 }
 0x777   :  { %1241 = vmin.xlane.f32.xlu0 %v1240_v43  ;;  %v536_v18 = vmul.f32 %v2584_v37, %v498_v3  ;;  %v2284_v43 = vpop.eup %2283  ;;  %v1265_v37 = vcvt.s32.f32 %v1263_v12  ;;  %v1293_v12 = vand.u32 65535, %v3127_v23  ;;  %v1250_v31 = vcvt.s32.f32 %v1248_v9 }
 0x778   :  { %v3195_v41 = vpop.xlane.xlu1 %1222  ;;  %v2286_v5 = vpop.eup %2285  ;;  %v514_v10 = vmul.f32 %v2284_v43, %v2497_v29  ;;  %vm524_vm12 = vcmp.eq.f32.partialorder %v2509_v38, 0.0  ;;  %vm531_vm13 = vcmp.eq.f32.partialorder %v2514_v40, 0.0  ;;  %vm1378_vm2 = vcmp.eq.f32.partialorder %v2960_v50, inf }
 0x779   :  { %vm1224_vm15 = vcmp.eq.f32.partialorder %v3108_v16, %v3195_v41  ;;  %v502_v16 = vsel %vm501_vm1, %v2484_v13, %v500_v22  ;;  %v545_v20 = vsel %vm285_vm3, %v536_v18, 0.0  ;;  %v521_v3 = vmul.f32 %v2286_v5, %v2509_v38 }
 0x77a   :  { %v1225_v60 = vsel %vm1224_vm15, %v1220_v61, inf  ;;  %v2288_v61 = vpop.eup %2287  ;;  %v505_v28 = vsel %vm503_vm4, %v504_v19, %v502_v16  ;;  %v546_v8 = vadd.f32 %v545_v20, %v544_v34  ;;  %v516_v18 = vsel %vm515_vm6, %v2497_v29, %v514_v10 }
 0x77b   :  { %1226 = vmin.xlane.f32.xlu1 %v1225_v60  ;;  %v537_v11 = vmul.f32 %v2573_v27, %v505_v28  ;;  %v538_v60 = vmul.f32 %v2606_v56, %v512_v36  ;;  %v528_v27 = vmul.f32 %v2288_v61, %v2514_v40  ;;  %v518_v56 = vand.u32 2147483648, %v2497_v29 }
 0x77c   :  { %v3212_v45 = vpop.xlane.xlu0 %1267  ;;  %v1295_v5 = vcvt.s32.f32 %v1293_v12  ;;  %v523_v55 = vsel %vm522_vm9, %v2509_v38, %v521_v3  ;;  %v525_v16 = vand.u32 2147483648, %v2509_v38  ;;  %v1308_v61 = vand.u32 65535, %v3147_v42 }
 0x77d   :  { %vm1269_vm5 = vcmp.eq.f32.partialorder %v3117_v35, %v3212_v45  ;;  %v547_v9 = vsel %vm285_vm3, %v537_v11, 0.0  ;;  %v519_v19 = vsel %vm517_vm7, %v518_v56, %v516_v18  ;;  %v530_v10 = vsel %vm529_vm11, %v2514_v40, %v528_v27 }
 0x77e   :  { %v1270_v22 = vsel %vm1269_vm5, %v1265_v37, inf  ;;  %v549_v37 = vsel %vm285_vm3, %v538_v60, 0.0  ;;  %v548_v44 = vadd.f32 %v547_v9, %v546_v8  ;;  %v539_v20 = vmul.f32 %v2595_v47, %v519_v19 }
 0x77f   :  { %1271 = vmin.xlane.f32.xlu0 %v1270_v22  ;;  %v532_v22 = vand.u32 2147483648, %v2514_v40  ;;  %v1310_v18 = vcvt.s32.f32 %v1308_v61  ;;  %vm1380_vm4 = vcmp.eq.f32.partialorder %v2960_v50, 0.0  ;;  %vm1371_vm5 = vcmp.eq.f32.partialorder %v2979_v57, inf }
 0x780   :  { %v3225_v35 = vpop.xlane.xlu1 %1252  ;;  %v551_v60 = vsel %vm285_vm3, %v539_v20, 0.0  ;;  %vm1373_vm6 = vcmp.eq.f32.partialorder %v2979_v57, 0.0  ;;  %vm1394_vm9 = vcmp.eq.f32.partialorder %v2994_v1, 0.0  ;;  %vm1385_vm11 = vcmp.eq.f32.partialorder %v3015_v14, inf }
 0x781   :  { %vm1254_vm8 = vcmp.eq.f32.partialorder %v3129_v48, %v3225_v35  ;;  %v1278_v48 = vand.u32 65535, %v3138_v30  ;;  %v526_v30 = vsel %vm524_vm12, %v525_v16, %v523_v55  ;;  %v533_v47 = vsel %vm531_vm13, %v532_v22, %v530_v10 }
 0x782   :  { %v1255_v23 = vsel %vm1254_vm8, %v1250_v31, inf  ;;  %v540_v12 = vmul.f32 %v2616_v63, %v526_v30  ;;  %v541_v11 = vmul.f32 %v2626_v4, %v533_v47  ;;  %v1323_v31 = vand.u32 65535, %v3154_v59 }
 0x783   :  { %1256 = vmin.xlane.f32.xlu1 %v1255_v23  ;;  %v1280_v28 = vcvt.s32.f32 %v1278_v48  ;;  %v1244_v55 = vcvt.f32.s32 %v3180_v25  ;;  %v1274_v30 = vcvt.f32.s32 %v3212_v45  ;;  %vm1392_vm8 = vcmp.eq.f32.partialorder %v2994_v1, inf }
 0x784   :  { %v3235_v43 = vpop.xlane.xlu0 %1297  ;;  %v553_v23 = vsel %vm285_vm3, %v540_v12, 0.0  ;;  %v1325_v4 = vcvt.s32.f32 %v1323_v31  ;;  %v1395_v45 = vand.u32 2147483648, %v2994_v1  ;;  %vm1387_vm12 = vcmp.eq.f32.partialorder %v3015_v14, 0.0 }
 0x785   :  { %vm1299_vm10 = vcmp.eq.f32.partialorder %v3134_v51, %v3235_v43  ;;  %v550_v51 = vadd.f32 %v549_v37, %v548_v44  ;;  %v1381_v37 = vand.u32 2147483648, %v2960_v50  ;;  %v1374_v44 = vand.u32 2147483648, %v2979_v57 }
 0x786   :  { %v1300_v36 = vsel %vm1299_vm10, %v1295_v5, inf }
 0x787   :  { %1301 = vmin.xlane.f32.xlu0 %v1300_v36  ;;  %v552_v42 = vadd.f32 %v551_v60, %v550_v51  ;;  %v3601_v51 = vmov 0.0  }
 0x788   :  { %v3252_v34 = vpop.xlane.xlu1 %1282 }
 0x789   :  { %vm1284_vm14 = vcmp.eq.f32.partialorder %v3144_v53, %v3252_v34  ;;  %v555_v53 = vsel %vm285_vm3, %v541_v11, 0.0  ;;  %v554_v56 = vadd.f32 %v553_v23, %v552_v42  ;;  %v1259_v11 = vcvt.f32.s32 %v3225_v35 }
 0x78a   :  { %v1285_v3 = vsel %vm1284_vm14, %v1280_v28, inf  ;;  %vm1406_vm14 = vcmp.eq.f32.partialorder %v3037_v15, inf }
 0x78b   :  { %1286 = vmin.xlane.f32.xlu1 %v1285_v3  ;;  %v556_v5 = vadd.f32 %v555_v53, %v554_v56 }
 0x78c   :  { %v3261_v8 = vpop.xlane.xlu1 %1312 }
 0x78d   :  { %vm1314_vm15 = vcmp.eq.f32.partialorder %v3156_v46, %v3261_v8  ;;  %v2290_v46 = vpop.eup %2289 }
 0x78e   :  { %v1315_v63 = vsel %vm1314_vm15, %v1310_v18, inf  ;;  %v1377_v16 = vmul.f32 %v2290_v46, %v2960_v50  ;;  %v1275_v18 = vshll.u32 %v1274_v30, 16  ;;  %v1304_v46 = vcvt.f32.s32 %v3235_v43 }
 0x78f   :  { %1316 = vmin.xlane.f32.xlu1 %v1315_v63 }
 0x790   :  { %v3267_v27 = vpop.xlane.xlu0 %1327  ;;  %v1379_v25 = vsel %vm1378_vm2, %v2960_v50, %v1377_v16  ;;  %vm1399_vm2 = vcmp.eq.f32.partialorder %v3056_v62, inf }
 0x791   :  { %vm1329_vm1 = vcmp.eq.f32.partialorder %v3160_v24, %v3267_v27  ;;  %v2292_v24 = vpop.eup %2291  ;;  %v1382_v60 = vsel %vm1380_vm4, %v1381_v37, %v1379_v25 }
 0x792   :  { %v1330_v59 = vsel %vm1329_vm1, %v1325_v4, inf  ;;  %v1370_v36 = vmul.f32 %v2292_v24, %v2979_v57  ;;  %vm1408_vm1 = vcmp.eq.f32.partialorder %v3037_v15, 0.0 }
 0x793   :  { %1331 = vmin.xlane.f32.xlu0 %v1330_v59  ;;  %557 = vadd.xlane.f32.xlu1 %v556_v5  ;;  %v1260_v5 = vshll.u32 %v1259_v11, 16  ;;  %v1402_v11 = vand.u32 2147483648, %v3056_v62 }
 0x794   :  { %v1372_v47 = vsel %vm1371_vm5, %v2979_v57, %v1370_v36  ;;  %vm1401_vm5 = vcmp.eq.f32.partialorder %v3056_v62, 0.0 }
 0x795   :  { %v1375_v63 = vsel %vm1373_vm6, %v1374_v44, %v1372_v47  ;;  %vm1413_vm6 = vcmp.eq.f32.partialorder %v3072_v0, inf }
 0x797   :  { %854 = vadd.xlane.f32.xlu0 %v2845_v39  ;;  %1151 = vadd.xlane.f32.xlu1 %v3089_v54  ;;  %v1245_v39 = vshll.u32 %v1244_v55, 16  ;;  %v1229_v54 = vcvt.f32.s32 %v3195_v41  ;;  %v2294_v41 = vpop.eup %2293 }
 0x798   :  { %v2296_v28 = vpop.eup %2295  ;;  %v1391_v31 = vmul.f32 %v2294_v41, %v2994_v1  ;;  %v1289_v41 = vcvt.f32.s32 %v3252_v34 }
 0x799   :  { %v1230_v10 = vshll.u32 %v1229_v54, 16  ;;  %v1384_v4 = vmul.f32 %v2296_v28, %v3015_v14  ;;  %v2298_v35 = vpop.eup %2297 }
 0x79a   :  { %v1393_v57 = vsel %vm1392_vm8, %v2994_v1, %v1391_v31  ;;  %v1405_v54 = vmul.f32 %v2298_v35, %v3037_v15  ;;  %v2300_v44 = vpop.eup %2299  ;;  %v1319_v31 = vcvt.f32.s32 %v3261_v8 }
 0x79b   :  { %v1386_v43 = vsel %vm1385_vm11, %v3015_v14, %v1384_v4  ;;  %v2302_v1 = vpop.eup %2301 }
 0x79c   :  { %v1412_v4 = vmul.f32 %v2302_v1, %v3072_v0 }
 0x804   :  { %v1242_v9 = vpop.xlane.xlu0 %1241 }
 0x805   :  { %v1243_v48 = vcvt.f32.s32 %v1242_v9 }
 0x807   :  { %v1246_v19 = vadd.s32 %v1245_v39, %v1243_v48  ;;  %v1396_v48 = vsel %vm1394_vm9, %v1395_v45, %v1393_v57  ;;  %v1290_v45 = vshll.u32 %v1289_v41, 16  ;;  %vm1420_vm9 = vcmp.eq.f32.partialorder %v3084_v6, inf }
 0x808   :  { %v1227_v20 = vpop.xlane.xlu1 %1226 }
 0x809   :  { %vm1338_vm7 = vcmp.eq.s32.totalorder %v2467_v52, %v1246_v19  ;;  %v1228_v22 = vcvt.f32.s32 %v1227_v20  ;;  %v1388_v19 = vand.u32 2147483648, %v3015_v14  ;;  %v1305_v20 = vshll.u32 %v1304_v46, 16 }
 0x80a   :  { %v2048_v61 = vsel %vm1338_vm7, 1.0, %v3601_v51  ;;  %vm1415_vm7 = vcmp.eq.f32.partialorder %v3072_v0, 0.0  ;;  %v1320_v46 = vshll.u32 %v1319_v31, 16 }
 0x80b   :  { %v3296_v12 = vadd.f32 %v2048_v61, %v2953_v33  ;;  %v1231_v3 = vadd.s32 %v1230_v10, %v1228_v22  ;;  %v1426_v23 = vmul.f32 %v2048_v61, %v1382_v60  ;;  %v1389_v30 = vsel %vm1387_vm12, %v1388_v19, %v1386_v43 }
 0x80c   :  { %v1272_v42 = vpop.xlane.xlu0 %1271  ;;  %v1407_v61 = vsel %vm1406_vm14, %v3037_v15, %v1405_v54 }
 0x80d   :  { %vm1337_vm10 = vcmp.eq.s32.totalorder %v2467_v52, %v1231_v3  ;;  %v1273_v33 = vcvt.f32.s32 %v1272_v42  ;;  %v1434_v24 = vsel %vm285_vm3, %v1426_v23, 0.0  ;;  %v1398_v3 = vmul.f32 %v2300_v44, %v3056_v62 }
 0x80e   :  { %v2047_v53 = vsel %vm1337_vm10, 1.0, %v3601_v51  ;;  %vm1422_vm10 = vcmp.eq.f32.partialorder %v3084_v6, 0.0 }
 0x80f   :  { %v1425_v50 = vmul.f32 %v2047_v53, %v1375_v63  ;;  %v1276_v56 = vadd.s32 %v1275_v18, %v1273_v33  ;;  %v3313_v59 = vadd.f32 %v2047_v53, %v2973_v26  ;;  %v1400_v8 = vsel %vm1399_vm2, %v3056_v62, %v1398_v3 }
 0x810   :  { %v1257_v55 = vpop.xlane.xlu1 %1256  ;;  %v1423_v62 = vand.u32 2147483648, %v3084_v6 }
 0x811   :  { %v1433_v16 = vsel %vm285_vm3, %v1425_v50, 0.0  ;;  %vm1340_vm13 = vcmp.eq.s32.totalorder %v2467_v52, %v1276_v56  ;;  %v1258_v9 = vcvt.f32.s32 %v1257_v55  ;;  %v1334_v56 = vcvt.f32.s32 %v3267_v27 }
 0x812   :  { %v1435_v39 = vadd.f32 %v1434_v24, %v1433_v16  ;;  %v2050_v26 = vsel %vm1340_vm13, 1.0, %v3601_v51  ;;  %v1403_v24 = vsel %vm1401_vm5, %v1402_v11, %v1400_v8 }
 0x813   :  { %v3331_v37 = vadd.f32 %v2050_v26, %v2990_v7  ;;  %v1261_v36 = vadd.s32 %v1260_v5, %v1258_v9  ;;  %v1409_v7 = vand.u32 2147483648, %v3037_v15  ;;  %v1428_v34 = vmul.f32 %v2050_v26, %v1396_v48 }
 0x814   :  { %v1302_v25 = vpop.xlane.xlu0 %1301  ;;  %v1416_v15 = vand.u32 2147483648, %v3072_v0  ;;  %v1414_v9 = vsel %vm1413_vm6, %v3072_v0, %v1412_v4  ;;  %v1335_v48 = vshll.u32 %v1334_v56, 16 }
 0x815   :  { %v1303_v10 = vcvt.f32.s32 %v1302_v25  ;;  %vm1339_vm15 = vcmp.eq.s32.totalorder %v2467_v52, %v1261_v36  ;;  %v1410_v63 = vsel %vm1408_vm1, %v1409_v7, %v1407_v61  ;;  %v1438_v35 = vsel %vm285_vm3, %v1428_v34, 0.0  ;;  %v3602_v7 = vld [vmem:[#allocation6_spill] sm:$0xff] }
 0x816   :  { %v2049_v22 = vsel %vm1339_vm15, 1.0, %v3601_v51 }
 0x817   :  { %v1306_v28 = vadd.s32 %v1305_v20, %v1303_v10  ;;  %v3345_v47 = vadd.f32 %v2049_v22, %v3010_v17  ;;  %v1427_v14 = vmul.f32 %v2049_v22, %v1389_v30  ;;  %v2304_v17 = vpop.eup %2303  ;;  %v1417_v10 = vsel %vm1415_vm7, %v1416_v15, %v1414_v9 }
 0x818   :  { %v1287_v60 = vpop.xlane.xlu1 %1286  ;;  %v1419_v55 = vmul.f32 %v2304_v17, %v3084_v6 }
 0x819   :  { %vm1342_vm4 = vcmp.eq.s32.totalorder %v2467_v52, %v1306_v28  ;;  %v1436_v42 = vsel %vm285_vm3, %v1427_v14, 0.0  ;;  %v1288_v23 = vcvt.f32.s32 %v1287_v60 }
 0x81a   :  { %v2052_v18 = vsel %vm1342_vm4, 1.0, %v3601_v51  ;;  %v1437_v33 = vadd.f32 %v1436_v42, %v1435_v39  ;;  %v1421_v44 = vsel %vm1420_vm9, %v3084_v6, %v1419_v55 }
 0x81b   :  { %v3357_v53 = vadd.f32 %v2052_v18, %v3034_v49  ;;  %v1291_v50 = vadd.s32 %v1290_v45, %v1288_v23  ;;  %v1430_v27 = vmul.f32 %v2052_v18, %v1410_v63  ;;  %v1424_v45 = vsel %vm1422_vm10, %v1423_v62, %v1421_v44  ;;  %v3603_v23 = vld [vmem:[#allocation7_spill] sm:$0xff] }
 0x81c   :  { %v1317_v5 = vpop.xlane.xlu1 %1316  ;;  %v1439_v49 = vadd.f32 %v1438_v35, %v1437_v33 }
 0x81d   :  { %vm1341_vm8 = vcmp.eq.s32.totalorder %v2467_v52, %v1291_v50  ;;  %v1318_v57 = vcvt.f32.s32 %v1317_v5  ;;  %v1442_v34 = vsel %vm285_vm3, %v1430_v27, 0.0 }
 0x81e   :  { %v2051_v16 = vsel %vm1341_vm8, 1.0, %v3601_v51 }
 0x81f   :  { %v3376_v39 = vadd.f32 %v2051_v16, %v3051_v58  ;;  %v1429_v26 = vmul.f32 %v2051_v16, %v1403_v24  ;;  %v1321_v43 = vadd.s32 %v1320_v46, %v1318_v57  ;;  %v1667_v24 = vld [vmem:[%s3590_s3] sm:$0xff]  ;;  %v1668_v16 = vld [vmem:[%s3590_s3 + $0x8] sm:$0xff] }
 0x820   :  { %v1332_v54 = vpop.xlane.xlu0 %1331  ;;  %v558_v36 = vpop.xlane.xlu1 %557  ;;  %1669 = vxpose.xlu1.b32.start [1/2] (short) (narrow) %v1667_v24, 16 }
 0x821   :  { %v1333_v19 = vcvt.f32.s32 %v1332_v54  ;;  %vm1343_vm11 = vcmp.eq.s32.totalorder %v2467_v52, %v1321_v43  ;;  %v559_v25 = vrot.slane %v558_v36, 4  ;;  %v1440_v20 = vsel %vm285_vm3, %v1429_v26, 0.0  ;;  %v1705_v26 = vld [vmem:[%s3589_s2] sm:$0xff] }
 0x822   :  { %v2053_v58 = vsel %vm1343_vm11, 1.0, %v3601_v51  ;;  %v1441_v30 = vadd.f32 %v1440_v20, %v1439_v49  ;;  %2145 = vmatprep.mubr.msk.f32.mxu1 %vm28_vm0, %v1705_v26 }
 0x823   :  { %v1336_v41 = vadd.s32 %v1335_v48, %v1333_v19  ;;  %v3387_v1 = vadd.f32 %v2053_v58, %v3602_v7  ;;  %v560_v22 = vadd.f32 %v559_v25, %v558_v36  ;;  %v1431_v28 = vmul.f32 %v2053_v58, %v1417_v10  ;;  %v1707_v7 = vld [vmem:[%s3589_s2 + $0x10] sm:$0xff] }
 0x824   :  { %v855_v61 = vpop.xlane.xlu0 %854  ;;  %v1152_v3 = vpop.xlane.xlu1 %1151  ;;  %v1443_v11 = vadd.f32 %v1442_v34, %v1441_v30  ;;  %1670 = vxpose.xlu1.b32.end [2/2] (short) (narrow) %v1668_v16, 16  ;;  %v1706_v30 = vld [vmem:[%s3589_s2 + $0x8] sm:$0xff]  ;;  %v1711_v34 = vld [vmem:[%s3589_s2 + $0x30] sm:$0xff] }
 0x825   :  { %vm1344_vm12 = vcmp.eq.s32.totalorder %v2467_v52, %v1336_v41  ;;  %v856_v14 = vrot.slane %v855_v61, 4  ;;  %v561_v60 = vrot.slane %v560_v22, 2  ;;  %v1153_v0 = vrot.slane %v1152_v3, 4 }
 0x826   :  { %v2054_v31 = vsel %vm1344_vm12, 1.0, %v3601_v51  ;;  %v1444_v42 = vsel %vm285_vm3, %v1431_v28, 0.0  ;;  %v1710_v28 = vld [vmem:[%s3589_s2 + $0x28] sm:$0xff] }
 0x827   :  { %v857_v18 = vadd.f32 %v856_v14, %v855_v61  ;;  %v3396_v17 = vadd.f32 %v2054_v31, %v3603_v23  ;;  %v1432_v33 = vmul.f32 %v2054_v31, %v1424_v45  ;;  %v1154_v63 = vadd.f32 %v1153_v0, %v1152_v3  ;;  %v1709_v61 = vld [vmem:[%s3589_s2 + $0x20] sm:$0xff]  ;;  %v1712_v14 = vld [vmem:[%s3589_s2 + $0x38] sm:$0xff] }
 0x828   :  { %v1445_v4 = vadd.f32 %v1444_v42, %v1443_v11  ;;  %v562_v52 = vadd.f32 %v561_v60, %v560_v22  ;;  %v1708_v22 = vld [vmem:[%s3589_s2 + $0x18] sm:$0xff]  ;;  %v3604_v45 = vld [vmem:[#allocation5_spill] sm:$0xff]  ;;  %v1463_v60 = vsub.f32 0.0, %v2474_v2  ;;  %v1467_v2 = vsub.f32 0.0, %v2497_v29 }
 0x829   :  { %v858_v35 = vrot.slane %v857_v18, 2  ;;  %v1446_v8 = vsel %vm285_vm3, %v1432_v33, 0.0  ;;  %v1155_v6 = vrot.slane %v1154_v63, 2  ;;  %v1462_v11 = vsub.f32 0.0, %v3604_v45 }
 0x82a   :  { %v1447_v50 = vadd.f32 %v1446_v8, %v1445_v4  ;;  %v563_v56 = vrot.slane %v562_v52, 1  ;;  %v1465_v4 = vsub.f32 0.0, %v2484_v13  ;;  %v1466_v8 = vsub.f32 0.0, %v2503_v32 }
 0x82b   :  { %v859_v5 = vadd.f32 %v858_v35, %v857_v18  ;;  %v1156_v51 = vadd.f32 %v1155_v6, %v1154_v63  ;;  %v1464_v18 = vsub.f32 0.0, %v2490_v21 }
 0x82c   :  { %1448 = vadd.xlane.f32.xlu0 %v1447_v50  ;;  %v564_v15 = vadd.f32 %v563_v56, %v562_v52 }
 0x82d   :  { %v860_v49 = vrot.slane %v859_v5, 1  ;;  %v1157_v46 = vrot.slane %v1156_v51, 1 }
 0x82e   :  { %2229 = vpush %v564_v15 }
 0x82f   :  { %v861_v57 = vadd.f32 %v860_v49, %v859_v5  ;;  %v1158_v55 = vadd.f32 %v1157_v46, %v1156_v51  ;;  %v1468_v49 = vsub.f32 0.0, %v2509_v38 }
 0x831   :  { %2231 = vpush %v861_v57 }
 0x832   :  { %2233 = vpush %v1158_v55  ;;  %v1469_v55 = vsub.f32 0.0, %v2514_v40 }
 0x85f   :  { %s2230_s27 = spop %2229 }
 0x862   :  { %s2232_s28 = spop %2231 }
 0x863   :  { %s863_s29 = sadd.f32 %s2232_s28, %s2230_s27  ;;  %s2234_s30 = spop %2233 }
 0x865   :  { %s1160_s6 = sadd.f32 %s2234_s30, %s863_s29 }
 0x8a0   :  { %v1685_v62 = vpop.trf.xlu1 }
 0x8a1   :  { %v1701_v25 = vadd.f32 %v1685_v62, %v1667_v24 }
 0x8a3   :  { %v1703_v20 = vmul.f32 0.5, %v1701_v25 }
 0x8a4   :  { %v1686_v44 = vpop.trf.xlu1 }
 0x8a5   :  { %v1702_v58 = vadd.f32 %v1686_v44, %v1668_v16 }
 0x8a7   :  { %v1704_v41 = vmul.f32 0.5, %v1702_v58 }
 0x8a9   :  { %v2209_v10 = vpack.c.bf16 %v1704_v41, %v1703_v20 }
 0x8ab   :  { %2210 = vmatprep.subr.bf16.mxu1 %v2209_v10 }
 0x8ac   :  { %2212 = vmatpush3.bf16.msra.mxu1 %v2209_v10 }
 0x8af   :  { %2146 = vmatmul.mubr.msk.f32.vlgmr.msra.gmra.mrb[0].mxu1 %vm28_vm0, %v1706_v30 }
 0x8b0   :  { %2148 = vmatprep.mubr.msk.f32.mxu1 %vm28_vm0, %v1707_v7 }
 0x8b3   :  { %2149 = vmatmul.mubr.msk.f32.gmra.mrb[2].mxu1 %vm28_vm0, %v1708_v22 }
 0x8b4   :  { %2151 = vmatprep.mubr.msk.f32.mxu1 %vm28_vm0, %v1709_v61 }
 0x8b7   :  { %2152 = vmatmul.mubr.msk.f32.gmra.mrb[4].mxu1 %vm28_vm0, %v1710_v28 }
 0x8b8   :  { %2154 = vmatprep.mubr.msk.f32.mxu1 %vm28_vm0, %v1711_v34 }
 0x8b9   :  { %v1449_v9 = vpop.xlane.xlu0 %1448 }
 0x8ba   :  { %v1450_v27 = vrot.slane %v1449_v9, 4 }
 0x8bb   :  { %2155 = vmatmul.mubr.msk.f32.gmra.mrb[6].mxu1 %vm28_vm0, %v1712_v14 }
 0x8bc   :  { %v1451_v43 = vadd.f32 %v1450_v27, %v1449_v9 }
 0x8be   :  { %v1452_v54 = vrot.slane %v1451_v43, 2 }
 0x8c0   :  { %v1453_v48 = vadd.f32 %v1452_v54, %v1451_v43 }
 0x8c2   :  { %v1454_v19 = vrot.slane %v1453_v48, 1 }
 0x8c4   :  { %v1455_v36 = vadd.f32 %v1454_v19, %v1453_v48 }
 0x8c6   :  { %2235 = vpush %v1455_v36 }
 0x8f7   :  { %s2236_s7 = spop %2235 }
 0x8f8   :  { %s1457_s8 = sadd.f32 %s2236_s7, %s1160_s6 }
 0x8fa   :  { %s1460_s0 = smul.f32 0.00390625, %s1457_s8 }
 0x8fc   :  { %s1461_s9 = sadd.f32 1e-12, %s1460_s0 }
 0x8fe   :  { %s1470_s10 = smul.f32 2.0, %s1461_s9 }
 0x900   :  { %s1471_s11 = smul.f32 %s1470_s10, %s1461_s9 }
 0x902   :  { %v1472_v3 = vstv %s1471_s11 }
 0x903   :  { %2305 = vrcp.f32 %v1472_v3 }
 0x90d   :  { %v2306_v0 = vpop.eup %2305 }
 0x90e   :  { %v1474_v31 = vmul.f32 %v2306_v0, %v1462_v11  ;;  %v1475_v42 = vmul.f32 %v2306_v0, %v1463_v60  ;;  %v1476_v63 = vmul.f32 %v2306_v0, %v1464_v18  ;;  %v1477_v35 = vmul.f32 %v2306_v0, %v1465_v4 }
 0x90f   :  { %v1478_v50 = vmul.f32 %v2306_v0, %v1466_v8  ;;  %v1479_v21 = vmul.f32 %v2306_v0, %v1467_v2  ;;  %v1480_v46 = vmul.f32 %v2306_v0, %v1468_v49  ;;  %v1481_v24 = vmul.f32 %v2306_v0, %v1469_v55 }
 0x910   :  { %v1482_v23 = vmul.f32 1.442695, %v1474_v31  ;;  %v1484_v33 = vmul.f32 1.442695, %v1475_v42  ;;  %v1486_v52 = vmul.f32 1.442695, %v1476_v63 }
 0x911   :  { %v1488_v6 = vmul.f32 1.442695, %v1477_v35  ;;  %v1490_v5 = vmul.f32 1.442695, %v1478_v50  ;;  %v1492_v13 = vmul.f32 1.442695, %v1479_v21 }
 0x912   :  { %2307 = vpow2.f32 %v1482_v23  ;;  %v1494_v29 = vmul.f32 1.442695, %v1480_v46 }
 0x913   :  { %2309 = vpow2.f32 %v1484_v33 }
 0x914   :  { %2311 = vpow2.f32 %v1486_v52 }
 0x915   :  { %2313 = vpow2.f32 %v1488_v6 }
 0x916   :  { %2315 = vpow2.f32 %v1490_v5 }
 0x917   :  { %2317 = vpow2.f32 %v1492_v13 }
 0x918   :  { %2319 = vpow2.f32 %v1494_v29 }
 0x91c   :  { %v2308_v56 = vpop.eup %2307 }
 0x91d   :  { %v1498_v15 = vmul.f32 %v2308_v56, %v3313_v59  ;;  %v2310_v51 = vpop.eup %2309  ;;  %v1496_v59 = vmul.f32 1.442695, %v1481_v24 }
 0x91e   :  { %v1499_v32 = vmul.f32 %v2310_v51, %v3296_v12  ;;  %v2312_v57 = vpop.eup %2311 }
 0x91f   :  { %1506 = vxpose.xlu0.b32.start [1/8] (short) (narrow) %v1498_v15, 64  ;;  %v1500_v16 = vmul.f32 %v2312_v57, %v3345_v47  ;;  %v2314_v9 = vpop.eup %2313  ;;  %2321 = vpow2.f32 %v1496_v59 }
 0x920   :  { %v1501_v38 = vmul.f32 %v2314_v9, %v3331_v37  ;;  %v2316_v27 = vpop.eup %2315 }
 0x921   :  { %v1502_v12 = vmul.f32 %v2316_v27, %v3376_v39  ;;  %v2318_v26 = vpop.eup %2317 }
 0x922   :  { %v1503_v40 = vmul.f32 %v2318_v26, %v3357_v53  ;;  %v2320_v43 = vpop.eup %2319 }
 0x923   :  { %1507 = vxpose.xlu0.b32.cont [2/8] (short) (narrow) %v1499_v32, 64  ;;  %v1504_v54 = vmul.f32 %v2320_v43, %v3387_v1 }
 0x927   :  { %1508 = vxpose.xlu0.b32.cont [3/8] (short) (narrow) %v1500_v16, 64 }
 0x929   :  { %v2322_v47 = vpop.eup %2321 }
 0x92a   :  { %v1505_v48 = vmul.f32 %v2322_v47, %v3396_v17 }
 0x92b   :  { %1509 = vxpose.xlu0.b32.cont [4/8] (short) (narrow) %v1501_v38, 64 }
 0x92f   :  { %1510 = vxpose.xlu0.b32.cont [5/8] (short) (narrow) %v1502_v12, 64 }
 0x933   :  { %1511 = vxpose.xlu0.b32.cont [6/8] (short) (narrow) %v1503_v40, 64 }
 0x937   :  { %1512 = vxpose.xlu0.b32.cont [7/8] (short) (narrow) %v1504_v54, 64 }
 0x93b   :  { %1513 = vxpose.xlu0.b32.end [8/8] (short) (narrow) %v1505_v48, 64 }
 0x982   :  { %v2147_v56 = vpop.f32.mrb[0].mxu1 }
 0x983   :  { %v1803_v5 = vpop.f32.mrb[1].mxu1 }
 0x984   :  { %v2213_v21 = vpack.c.bf16 %v2147_v56, %v1803_v5 }
 0x986   :  { %2214 = vmatprep.subr.bf16.mxu1 %v2213_v21 }
 0x987   :  { %2216 = vmatpush3.bf16.msra.mxu1 %v2213_v21 }
 0x99f   :  { %v1522_v19 = vpop.trf.xlu0 }
 0x9a0   :  { %v1538_v37 = vadd.f32 %v1522_v19, %v1498_v15  ;;  %v2150_v15 = vpop.f32.mrb[2].mxu1 }
 0x9a1   :  { %v1813_v51 = vpop.f32.mrb[3].mxu1 }
 0x9a2   :  { %v3453_v36 = vmul.f32 0.5, %v1538_v37  ;;  %v2217_v49 = vpack.c.bf16 %v2150_v15, %v1813_v51  ;;  %v2153_v13 = vpop.f32.mrb[4].mxu1  ;;  %v1631_v15 = vld [vmem:[%s3588_s1 + $0x20] sm:$0xff] }
 0x9a3   :  { %v1523_v62 = vpop.trf.xlu0  ;;  %v1823_v46 = vpop.f32.mrb[5].mxu1 }
 0x9a4   :  { %v1539_v25 = vadd.f32 %v1523_v62, %v1499_v32  ;;  %v1554_v39 = vsel %vm285_vm3, %v3453_v36, 0.0  ;;  %2218 = vmatprep.subr.bf16.mxu1 %v2217_v49  ;;  %v2221_v32 = vpack.c.bf16 %v2153_v13, %v1823_v46  ;;  %v2156_v57 = vpop.f32.mrb[6].mxu1  ;;  %v1627_v62 = vld [vmem:[%s3588_s1] sm:$0xff] }
 0x9a5   :  { %1555 = vadd.xlane.f32.xlu1 %v1554_v39  ;;  %2220 = vmatpush3.bf16.msra.mxu1 %v2217_v49  ;;  %v1833_v55 = vpop.f32.mrb[7].mxu1 }
 0x9a6   :  { %v3457_v53 = vmul.f32 0.5, %v1539_v25  ;;  %2222 = vmatprep.subr.bf16.mxu1 %v2221_v32  ;;  %v2225_v29 = vpack.c.bf16 %v2156_v57, %v1833_v55  ;;  %v1639_v57 = vmul.f32 0.5, %v1631_v15  ;;  %v1632_v55 = vld [vmem:[%s3588_s1 + $0x28] sm:$0xff] }
 0x9a7   :  { %v1524_v44 = vpop.trf.xlu0 }
 0x9a8   :  { %v1540_v20 = vadd.f32 %v1524_v44, %v1500_v16  ;;  %v1557_v1 = vsel %vm285_vm3, %v3457_v53, 0.0 }
 0x9a9   :  { %1558 = vadd.xlane.f32.xlu0 %v1557_v1  ;;  %v1578_v17 = vadd.f32 %v1557_v1, %v1554_v39  ;;  %2224 = vmatpush3.bf16.msra.mxu1 %v2221_v32  ;;  %v1635_v1 = vmul.f32 0.5, %v1627_v62 }
 0x9aa   :  { %v3461_v58 = vmul.f32 0.5, %v1540_v20  ;;  %2226 = vmatprep.subr.bf16.mxu1 %v2225_v29 }
 0x9ab   :  { %v1525_v41 = vpop.trf.xlu0 }
 0x9ac   :  { %v1541_v10 = vadd.f32 %v1525_v41, %v1501_v38  ;;  %v1560_v30 = vsel %vm285_vm3, %v3461_v58, 0.0  ;;  %v1628_v41 = vld [vmem:[%s3588_s1 + $0x8] sm:$0xff] }
 0x9ad   :  { %1561 = vadd.xlane.f32.xlu1 %v1560_v30  ;;  %v1579_v7 = vadd.f32 %v1578_v17, %v1560_v30  ;;  %2228 = vmatpush3.bf16.msra.mxu1 %v2225_v29 }
 0x9ae   :  { %v3465_v22 = vmul.f32 0.5, %v1541_v10 }
 0x9af   :  { %v1526_v61 = vpop.trf.xlu0 }
 0x9b0   :  { %v1542_v28 = vadd.f32 %v1526_v61, %v1502_v12  ;;  %v1563_v34 = vsel %vm285_vm3, %v3465_v22, 0.0 }
 0x9b1   :  { %1564 = vadd.xlane.f32.xlu1 %v1563_v34  ;;  %v1580_v14 = vadd.f32 %v1579_v7, %v1563_v34  ;;  %v1636_v34 = vmul.f32 0.5, %v1628_v41 }
 0x9b2   :  { %v3469_v3 = vmul.f32 0.5, %v1542_v28 }
 0x9b3   :  { %v1527_v45 = vpop.trf.xlu0 }
 0x9b4   :  { %v1543_v11 = vadd.f32 %v1527_v45, %v1503_v40  ;;  %v1566_v60 = vsel %vm285_vm3, %v3469_v3, 0.0 }
 0x9b5   :  { %1567 = vadd.xlane.f32.xlu1 %v1566_v60  ;;  %v1581_v0 = vadd.f32 %v1580_v14, %v1566_v60 }
 0x9b6   :  { %v3473_v31 = vmul.f32 0.5, %v1543_v11  ;;  %v1629_v11 = vld [vmem:[%s3588_s1 + $0x10] sm:$0xff] }
 0x9b7   :  { %v1528_v42 = vpop.trf.xlu0 }
 0x9b8   :  { %v1544_v18 = vadd.f32 %v1528_v42, %v1504_v54  ;;  %v1569_v23 = vsel %vm285_vm3, %v3473_v31, 0.0 }
 0x9b9   :  { %1570 = vadd.xlane.f32.xlu1 %v1569_v23  ;;  %v1582_v33 = vadd.f32 %v1581_v0, %v1569_v23 }
 0x9ba   :  { %v3477_v63 = vmul.f32 0.5, %v1544_v18 }
 0x9bb   :  { %v1529_v4 = vpop.trf.xlu0 }
 0x9bc   :  { %v1545_v52 = vadd.f32 %v1529_v4, %v1505_v48  ;;  %v1572_v35 = vsel %vm285_vm3, %v3477_v63, 0.0 }
 0x9bd   :  { %1573 = vadd.xlane.f32.xlu1 %v1572_v35  ;;  %v1583_v8 = vadd.f32 %v1582_v33, %v1572_v35  ;;  %v1637_v33 = vmul.f32 0.5, %v1629_v11 }
 0x9be   :  { %v3481_v6 = vmul.f32 0.5, %v1545_v52  ;;  %v1630_v52 = vld [vmem:[%s3588_s1 + $0x18] sm:$0xff] }
 0x9bf   :  { %v1638_v5 = vmul.f32 0.5, %v1630_v52 }
 0x9c0   :  { %v1575_v50 = vsel %vm285_vm3, %v3481_v6, 0.0 }
 0x9c1   :  { %1576 = vadd.xlane.f32.xlu1 %v1575_v50  ;;  %v1584_v2 = vadd.f32 %v1583_v8, %v1575_v50 }
 0x9c3   :  { %v1585_v24 = vrot.slane %v1584_v2, 4 }
 0x9c5   :  { %v1586_v16 = vadd.f32 %v1585_v24, %v1584_v2 }
 0x9c7   :  { %v1587_v9 = vrot.slane %v1586_v16, 2 }
 0x9c9   :  { %v1588_v59 = vadd.f32 %v1587_v9, %v1586_v16 }
 0x9cb   :  { %v1589_v38 = vrot.slane %v1588_v59, 1 }
 0x9cd   :  { %v1590_v27 = vadd.f32 %v1589_v38, %v1588_v59  ;;  %v1633_v38 = vld [vmem:[%s3588_s1 + $0x30] sm:$0xff] }
 0x9cf   :  { %v1624_v12 = vmax.f32 %v1590_v27, 1e-30  ;;  %vm1623_vm14 = vcmp.gt.f32.partialorder %v1590_v27, 0.0 }
 0x9d1   :  { %2323 = vrsqrt.f32 %v1624_v12 }
 0x9db   :  { %v2324_v19 = vpop.eup %2323 }
 0x9dc   :  { %v3489_v17 = vsel %vm1623_vm14, %v2324_v19, 0.0 }
 0xa32   :  { %v1556_v26 = vpop.xlane.xlu1 %1555 }
 0xa33   :  { %v1599_v40 = vmax.f32 %v1556_v26, 1e-30  ;;  %vm1591_vm13 = vcmp.gt.f32.partialorder %v1556_v26, 0.0 }
 0xa35   :  { %2325 = vrsqrt.f32 %v1599_v40 }
 0xa36   :  { %v1559_v43 = vpop.xlane.xlu0 %1558 }
 0xa37   :  { %v1600_v54 = vmax.f32 %v1559_v43, 1e-30  ;;  %vm1592_vm15 = vcmp.gt.f32.partialorder %v1559_v43, 0.0 }
 0xa39   :  { %2327 = vrsqrt.f32 %v1600_v54  ;;  %v1641_v54 = vmul.f32 0.5, %v1633_v38 }
 0xa3a   :  { %v1562_v47 = vpop.xlane.xlu1 %1561 }
 0xa3b   :  { %v1601_v48 = vmax.f32 %v1562_v47, 1e-30  ;;  %vm1593_vm1 = vcmp.gt.f32.partialorder %v1562_v47, 0.0 }
 0xa3d   :  { %2329 = vrsqrt.f32 %v1601_v48 }
 0xa3e   :  { %v1565_v37 = vpop.xlane.xlu1 %1564 }
 0xa3f   :  { %v2326_v25 = vpop.eup %2325  ;;  %v1602_v39 = vmax.f32 %v1565_v37, 1e-30  ;;  %vm1594_vm2 = vcmp.gt.f32.partialorder %v1565_v37, 0.0 }
 0xa40   :  { %v1615_v44 = vsel %vm1591_vm13, %v2326_v25, 0.0 }
 0xa41   :  { %v1643_v20 = vmul.f32 %v1615_v44, %v3453_v36  ;;  %2331 = vrsqrt.f32 %v1602_v39 }
 0xa42   :  { %v1568_v10 = vpop.xlane.xlu1 %1567 }
 0xa43   :  { %v2328_v30 = vpop.eup %2327  ;;  %v1651_v7 = vmul.f32 %v1643_v20, %v3489_v17  ;;  %v1603_v61 = vmax.f32 %v1568_v10, 1e-30  ;;  %vm1595_vm4 = vcmp.gt.f32.partialorder %v1568_v10, 0.0 }
 0xa44   :  { %v1616_v28 = vsel %vm1592_vm15, %v2328_v30, 0.0 }
 0xa45   :  { %v1644_v14 = vmul.f32 %v1616_v28, %v3457_v53  ;;  %2333 = vrsqrt.f32 %v1603_v61  ;;  %v1659_v36 = vadd.f32 %v1651_v7, %v1635_v1 }
 0xa46   :  { %v1571_v45 = vpop.xlane.xlu1 %1570 }
 0xa47   :  { %v2330_v60 = vpop.eup %2329  ;;  %v1652_v0 = vmul.f32 %v1644_v14, %v3489_v17  ;;  %v1604_v42 = vmax.f32 %v1571_v45, 1e-30  ;;  %2173 = vmatprep.mubr.msk.f32.mxu1 %vm285_vm3, %v1659_v36  ;;  %1979 = vst.msk [vmem:[#allocation2] sm:$0xff] %vm285_vm3, %v1659_v36  ;;  %vm1596_vm5 = vcmp.gt.f32.partialorder %v1571_v45, 0.0 }
 0xa48   :  { %v1617_v18 = vsel %vm1593_vm1, %v2330_v60, 0.0 }
 0xa49   :  { %v1660_v23 = vadd.f32 %v1652_v0, %v1636_v34  ;;  %v1645_v53 = vmul.f32 %v1617_v18, %v3461_v58  ;;  %2335 = vrsqrt.f32 %v1604_v42 }
 0xa4a   :  { %v1574_v4 = vpop.xlane.xlu1 %1573 }
 0xa4b   :  { %v2332_v35 = vpop.eup %2331  ;;  %1980 = vst.msk [vmem:[#allocation2 + $0x8] sm:$0xff] %vm285_vm3, %v1660_v23  ;;  %v1653_v8 = vmul.f32 %v1645_v53, %v3489_v17  ;;  %v1605_v50 = vmax.f32 %v1574_v4, 1e-30  ;;  %2174 = vmatmul.mubr.msk.f32.vlgmr.msra.gmra.mrb[8].mxu1 %vm285_vm3, %v1660_v23  ;;  %vm1597_vm6 = vcmp.gt.f32.partialorder %v1574_v4, 0.0 }
 0xa4c   :  { %v1618_v2 = vsel %vm1594_vm2, %v2332_v35, 0.0 }
 0xa4d   :  { %v1646_v56 = vmul.f32 %v1618_v2, %v3465_v22  ;;  %2337 = vrsqrt.f32 %v1605_v50  ;;  %v1661_v58 = vadd.f32 %v1653_v8, %v1637_v33 }
 0xa4e   :  { %v1577_v21 = vpop.xlane.xlu1 %1576 }
 0xa4f   :  { %v2334_v51 = vpop.eup %2333  ;;  %v1654_v49 = vmul.f32 %v1646_v56, %v3489_v17  ;;  %v1606_v13 = vmax.f32 %v1577_v21, 1e-30  ;;  %2176 = vmatprep.mubr.msk.f32.mxu1 %vm285_vm3, %v1661_v58  ;;  %1981 = vst.msk [vmem:[#allocation2 + $0x10] sm:$0xff] %vm285_vm3, %v1661_v58  ;;  %vm1598_vm7 = vcmp.gt.f32.partialorder %v1577_v21, 0.0 }
 0xa50   :  { %v1619_v46 = vsel %vm1595_vm4, %v2334_v51, 0.0 }
 0xa51   :  { %v1647_v22 = vmul.f32 %v1619_v46, %v3469_v3  ;;  %2339 = vrsqrt.f32 %v1606_v13  ;;  %v1662_v32 = vadd.f32 %v1654_v49, %v1638_v5  ;;  %v1640_v3 = vmul.f32 0.5, %v1632_v55 }
 0xa53   :  { %v2336_v29 = vpop.eup %2335  ;;  %v1655_v24 = vmul.f32 %v1647_v22, %v3489_v17  ;;  %2177 = vmatmul.mubr.msk.f32.gmra.mrb[10].mxu1 %vm285_vm3, %v1662_v32  ;;  %1982 = vst.msk [vmem:[#allocation2 + $0x18] sm:$0xff] %vm285_vm3, %v1662_v32 }
 0xa54   :  { %v1620_v16 = vsel %vm1596_vm5, %v2336_v29, 0.0 }
 0xa55   :  { %v1648_v9 = vmul.f32 %v1620_v16, %v3473_v31  ;;  %v1663_v59 = vadd.f32 %v1655_v24, %v1639_v57  ;;  %v1634_v31 = vld [vmem:[%s3588_s1 + $0x38] sm:$0xff]  ;;  %s2366_s1 = smov [#allocation2]  }
 0xa56   :  { %v1642_v37 = vmul.f32 0.5, %v1634_v31  ;;  %s1994_s26 = sshll.u32 %s2366_s1, 4  ;;  %s1995_s26 = int_to_ptr.vmem [resolvable:$true] %s1994_s26 }
 0xa57   :  { %v2338_v27 = vpop.eup %2337  ;;  %v1656_v12 = vmul.f32 %v1648_v9, %v3489_v17  ;;  %2179 = vmatprep.mubr.msk.f32.mxu1 %vm285_vm3, %v1663_v59  ;;  %1983 = vst.msk [vmem:[#allocation2 + $0x20] sm:$0xff] %vm285_vm3, %v1663_v59  ;;  %s2341_s27 = scalar_lea.vmem %s1995_s26, 1024  ;;  %p2346_p1 = scmp.lt.s32.totalorder %s1995_s26, %s1995_s26 }
 0xa58   :  { %v1621_v26 = vsel %vm1597_vm6, %v2338_v27, 0.0  ;;  %p2342_p0 = scmp.ne.s32.totalorder %s1995_s26, %s2341_s27  ;;  %p2347_p2 = scmp.lt.s32.totalorder %s2341_s27, %s2341_s27 }
 0xa59   :  { %v1649_v40 = vmul.f32 %v1621_v26, %v3477_v63  ;;  %v1664_v43 = vadd.f32 %v1656_v12, %v1640_v3 }
 0xa5a   :  { %p2348_p3 = por %p2347_p2, %p2346_p1 }
 0xa5b   :  { %v2340_v47 = vpop.eup %2339  ;;  %v1657_v48 = vmul.f32 %v1649_v40, %v3489_v17  ;;  %2180 = vmatmul.mubr.msk.f32.gmra.mrb[12].mxu1 %vm285_vm3, %v1664_v43  ;;  %1984 = vst.msk [vmem:[#allocation2 + $0x28] sm:$0xff] %vm285_vm3, %v1664_v43 }
 0xa5c   :  { %v1622_v19 = vsel %vm1598_vm7, %v2340_v47, 0.0  ;;  %p2349_p4 = pnand %p2348_p3, %p2342_p0 }
 0xa5d   :  { %v1650_v62 = vmul.f32 %v1622_v19, %v3481_v6  ;;  %v1665_v25 = vadd.f32 %v1657_v48, %v1641_v54 }
 0xa5f   :  { %v1658_v63 = vmul.f32 %v1650_v62, %v3489_v17  ;;  %2182 = vmatprep.mubr.msk.f32.mxu1 %vm285_vm3, %v1665_v25  ;;  %1985 = vst.msk [vmem:[#allocation2 + $0x30] sm:$0xff] %vm285_vm3, %v1665_v25 }
 0xa61   :  { %v1666_v39 = vadd.f32 %v1658_v63, %v1642_v37 }
 0xa63   :  { %1986 = vst.msk [vmem:[#allocation2 + $0x38] sm:$0xff] %vm285_vm3, %v1666_v39  ;;  %2183 = vmatmul.mubr.msk.f32.gmra.mrb[14].mxu1 %vm285_vm3, %v1666_v39 }
 0xa64   :  { %2352 = shalt.err (!%p2349_p4)
}
 0xa65   :  { %s2353_s30 = scalar_lea.hbm %s3592_s5, 1024 }
 0xa66   :  { %p2354_p5 = scmp.ne.s32.totalorder %s3592_s5, %s2353_s30  ;;  %p2357_p6 = scmp.lt.u32.totalorder %s2353_s30, %s3592_s5 }
 0xa68   :  { %p2359_p7 = pnand %p2357_p6, %p2354_p5 }
 0xa6a   :  { %2362 = shalt.err (!%p2359_p7)
}
 0xa6b   :  { %s2367_s9 = smov 128   ;;  %s2368_s10 = smov 8  }
 0xa6c   :  { %2000 = dma.vmem_to_hbm [thread:$0]  %s1995_s26, 1024, %s3592_s5, [#allocation3], %s2367_s9, %s2367_s9, %s2368_s10  }
 0xb1e   :  { %v2175_v6 = vpop.f32.mrb[8].mxu1 }
 0xb1f   :  { %1972 = vst.msk [vmem:[%s3591_s4 + $0x8] sm:$0xff] %vm28_vm0, %v2175_v6  ;;  %v1932_v44 = vpop.f32.mrb[9].mxu1 }
 0xb20   :  { %1971 = vst.msk [vmem:[%s3591_s4] sm:$0xff] %vm28_vm0, %v1932_v44 }
 0xb26   :  { %v2178_v20 = vpop.f32.mrb[10].mxu1 }
 0xb27   :  { %1974 = vst.msk [vmem:[%s3591_s4 + $0x18] sm:$0xff] %vm28_vm0, %v2178_v20  ;;  %v1942_v1 = vpop.f32.mrb[11].mxu1 }
 0xb28   :  { %1973 = vst.msk [vmem:[%s3591_s4 + $0x10] sm:$0xff] %vm28_vm0, %v1942_v1 }
 0xb2e   :  { %v2181_v17 = vpop.f32.mrb[12].mxu1 }
 0xb2f   :  { %1976 = vst.msk [vmem:[%s3591_s4 + $0x28] sm:$0xff] %vm28_vm0, %v2181_v17  ;;  %v1952_v41 = vpop.f32.mrb[13].mxu1 }
 0xb30   :  { %1975 = vst.msk [vmem:[%s3591_s4 + $0x20] sm:$0xff] %vm28_vm0, %v1952_v41 }
 0xb36   :  { %v2184_v10 = vpop.f32.mrb[14].mxu1 }
 0xb37   :  { %1978 = vst.msk [vmem:[%s3591_s4 + $0x38] sm:$0xff] %vm28_vm0, %v2184_v10  ;;  %v1962_v30 = vpop.f32.mrb[15].mxu1 }
 0xb38   :  { %1977 = vst.msk [vmem:[%s3591_s4 + $0x30] sm:$0xff] %vm28_vm0, %v1962_v30 }
 0xb39   :  { %2363 = dma.done.wait [#allocation3], 1024  }
 0xb3a   :  { %2364 = vsyncadd [#allocation3], 4294966272 }
 0xb3b   :  { %2006 = vsyncpa [#allocation3], 1 }

</bundles_post_ra>
